<compile_context>
chip_gen: v7x
topology: tpu7x:2x2x1
jax: 0.10.0
libtpu: 0.0.40
codegen_flags: <defaults>
</compile_context>

<pallas_src>
import math

import jax
import jax.numpy as jnp
from jax.experimental import pallas as pl
from jax.experimental.pallas import tpu as pltpu

BN_EPS = 1e-5
LN_EPS = 1e-5
HI = jax.lax.Precision.HIGHEST


def _round_up(v, m):
    return ((v + m - 1) // m) * m


def _gelu_tanh(v):
    c = math.sqrt(2.0 / math.pi)
    return 0.5 * v * (1.0 + jnp.tanh(c * (v + 0.044715 * (v * v * v))))


def _layer_norm(v, g, b):
    mu = jnp.mean(v, axis=-1, keepdims=True)
    vc = v - mu
    var = jnp.mean(vc * vc, axis=-1, keepdims=True)
    return vc * jax.lax.rsqrt(var + LN_EPS) * g + b


# ------------------------------- Pallas kernel ------------------------------ #

def _make_kernel(*, Fdim, D, dff, T, Bb, H, hd, L, cast_bf16):
    """One grid step = Bb batch elements: tokenizer + projection + L post-norm
    transformer encoder layers (eval mode)."""
    inv_sqrt_hd = 1.0 / math.sqrt(hd)
    D3 = 3 * D

    def mm(a, b):                       # a @ b on the MXU, f32 accumulate
        if cast_bf16:
            a = a.astype(jnp.bfloat16)
            b = b.astype(jnp.bfloat16)
        return jnp.dot(a, b, preferred_element_type=jnp.float32)

    def mm_t(a, b):                     # a @ b.T (contract last dims)
        if cast_bf16:
            a = a.astype(jnp.bfloat16)
            b = b.astype(jnp.bfloat16)
        return jax.lax.dot_general(a, b, (((1,), (1,)), ((), ())),
                                   preferred_element_type=jnp.float32)

    def kernel(xcol_ref, wconv_ref, pmat_ref, wptb_ref,
               wqkv_ref, wo_ref, w1_ref, w2_ref, vec_ref, o_ref):
        # ---- tokenizer: conv1 o conv2 o BN folded into one big-K matmul -----
        # xcol has a trailing ones-row so the folded bias/BN shift is in wconv.
        y = mm(wconv_ref[...], xcol_ref[0])                 # (F, Bb*L1p)
        # block-diagonal AvgPool over time -> stacked, time-major (Bb*T, F)
        pooled = mm_t(pmat_ref[...], y)                     # (Bb*T, F)
        wptb = wptb_ref[...]                                # (F+1, D): [wp^T ; bp]
        tokens = mm(pooled, wptb[:Fdim]) + wptb[Fdim:Fdim + 1]   # (M, D)

        # ---- transformer encoder layers (post-norm; dropout = identity) -----
        for li in range(L):
            vrow = vec_ref[li]                              # (8, MW) packed vectors
            bqkv = vrow[0:1, :D3]
            b1 = vrow[1:2, :dff]
            bo = vrow[2:3, :D]
            ln1g = vrow[3:4, :D]
            ln1b = vrow[4:5, :D]
            b2 = vrow[5:6, :D]
            ln2g = vrow[6:7, :D]
            ln2b = vrow[7:8, :D]

            # fused QKV projection: one (M,D)@(D,3D) matmul
            qkv = mm(tokens, wqkv_ref[li]) + bqkv           # (M, 3D)

            # per-(batch, head) attention on value slices of qkv
            ctx_rows = []
            for b in range(Bb):
                r0 = b * T
                heads = []
                for h in range(H):
                    c0 = h * hd
                    q = qkv[r0:r0 + T, c0:c0 + hd]
                    k = qkv[r0:r0 + T, D + c0:D + c0 + hd]
                    v = qkv[r0:r0 + T, 2 * D + c0:2 * D + c0 + hd]
                    s = mm_t(q, k) * inv_sqrt_hd            # (T, T)
                    s = s - jnp.max(s, axis=-1, keepdims=True)
                    e = jnp.exp(s)
                    inv = pl.reciprocal(jnp.sum(e, axis=-1, keepdims=True),
                                        approx=True)
                    heads.append(mm(e * inv, v))            # (T, hd)
                ctx_rows.append(jnp.concatenate(heads, axis=-1))   # (T, D)
            ctx = jnp.concatenate(ctx_rows, axis=0)         # (M, D)

            # fused output projection: one (M,D)@(D,D) matmul
            attn = mm(ctx, wo_ref[li]) + bo
            tokens = _layer_norm(tokens + attn, ln1g, ln1b)

            hmid = _gelu_tanh(mm(tokens, w1_ref[li]) + b1)
            ffn = mm(hmid, w2_ref[li]) + b2
            tokens = _layer_norm(tokens + ffn, ln2g, ln2b)

        o_ref[0] = tokens                                   # (Bb*T, D)

    return kernel


# ------------------------------ forward wrapper ----------------------------- #

def eeg_conformer_encoder_forward(x, params, *, K1, Pool, stride_pool, nheads,
                                  grid_steps=2, cast_bf16=False):
    """x: (B, Chans, Samples) float32  ->  (B, d_model, T) float32."""
    B, Chans, S = x.shape
    Fdim = params["w1"].shape[0]
    D = params["wp"].shape[0]
    L = params["wq"].shape[0]
    dff = params["lin1_w"].shape[-1]
    assert D % nheads == 0
    hd = D // nheads
    L1 = S - K1 + 1
    T = (L1 - Pool) // stride_pool + 1
    # Review guard: every pooling window must end inside the valid conv range so the
    # zero-padded time columns [L1, L1p) are never read with nonzero pooling weight.
    assert (T - 1) * stride_pool + Pool <= L1
    L1p = _round_up(L1, 128)
    Kc = K1 * Chans
    f32 = jnp.float32

    # batch blocking: 2 "parallel" grid steps keep both v7x TCs busy; one big block
    # per step maximizes matmul M and amortizes per-step pipeline overhead.
    if grid_steps < 1 or B % grid_steps != 0:
        grid_steps = 1
    G = grid_steps
    Bb = B // G
    M = Bb * T
    BbL = Bb * L1p

    # -- fold conv1 o conv2 o BatchNorm(eval) into one (F, Kc) weight + shift column
    scale = params["bn_gamma"] * jax.lax.rsqrt(params["bn_var"] + BN_EPS)
    wcomb = jnp.einsum("gfc,fk->gck", params["w2"], params["w1"], precision=HI)
    bcomb = jnp.einsum("gfc,f->g", params["w2"], params["b1"], precision=HI) + params["b2"]
    wfold = wcomb * scale[:, None, None]                              # (F, Chans, K1)
    wconv = jnp.transpose(wfold, (0, 2, 1)).reshape(Fdim, Kc)         # im2col row order (k, c)
    shift = ((bcomb - params["bn_mean"]) * scale + params["bn_beta"]).reshape(Fdim, 1)
    wconv_aug = jnp.concatenate([wconv, shift], axis=1)               # (F, Kc+1)

    # -- wrapper-side im2col (k-major, channel-minor rows) + ones row for the shift
    xf = x.astype(f32)
    xcol = jnp.concatenate([xf[:, :, kk:kk + L1] for kk in range(K1)], axis=1)  # (B, Kc, L1)
    xcol = jnp.pad(xcol, ((0, 0), (0, 0), (0, L1p - L1)))
    xcol = jnp.concatenate([xcol, jnp.ones((B, 1, L1p), f32)], axis=1)          # (B, Kc+1, L1p)
    # group Bb batch elements along lanes: (G, Kc+1, Bb*L1p)
    xcol_g = xcol.reshape(G, Bb, Kc + 1, L1p).transpose(0, 2, 1, 3).reshape(G, Kc + 1, BbL)

    # -- block-diagonal AvgPool2d((1,Pool), stride) matrix (Bb*T, Bb*L1p)
    ridx = jnp.arange(M)
    cidx = jnp.arange(BbL)
    b_r, j_r = ridx // T, ridx % T
    b_c, l_c = cidx // L1p, cidx % L1p
    start = (j_r * stride_pool)[:, None]
    pmat = ((b_r[:, None] == b_c[None, :])
            & (l_c[None, :] >= start)
            & (l_c[None, :] < start + Pool)).astype(f32) / Pool

    # -- 1x1-conv projection weight^T with bias stacked underneath: (F+1, D)
    wptb = jnp.concatenate([jnp.transpose(params["wp"]), params["bp"][None, :]], axis=0)

    # -- fused QKV weights and packed per-layer vectors
    wqkv = jnp.concatenate([params["wq"], params["wk"], params["wv"]], axis=2)  # (L, D, 3D)
    bqkv = jnp.concatenate([params["bq"], params["bk"], params["bv"]], axis=1)  # (L, 3D)
    MW = max(3 * D, dff, D)
    padw = lambda a: jnp.pad(a, ((0, 0), (0, MW - a.shape[-1])))
    vecs = jnp.stack([padw(bqkv), padw(params["lin1_b"]), padw(params["bo"]),
                      padw(params["ln1_g"]), padw(params["ln1_b"]),
                      padw(params["lin2_b"]), padw(params["ln2_g"]),
                      padw(params["ln2_b"])], axis=1)                 # (L, 8, MW)

    kernel = _make_kernel(Fdim=Fdim, D=D, dff=dff, T=T, Bb=Bb, H=nheads, hd=hd,
                          L=L, cast_bf16=cast_bf16)
    c2 = lambda g: (0, 0)
    c3 = lambda g: (0, 0, 0)

    out = pl.pallas_call(
        kernel,
        out_shape=jax.ShapeDtypeStruct((G, M, D), f32),
        grid_spec=pltpu.PrefetchScalarGridSpec(
            num_scalar_prefetch=0,
            grid=(G,),
            in_specs=[
                pl.BlockSpec((1, Kc + 1, BbL), lambda g: (g, 0, 0)),   # im2col slab
                pl.BlockSpec((Fdim, Kc + 1), c2),                      # folded conv+BN weight
                pl.BlockSpec((M, BbL), c2),                            # block-diag pooling
                pl.BlockSpec((Fdim + 1, D), c2),                       # projection w^T ; bias
                pl.BlockSpec((L, D, 3 * D), c3),                       # fused Wqkv
                pl.BlockSpec((L, D, D), c3),                           # Wo
                pl.BlockSpec((L, D, dff), c3),                         # FFN W1
                pl.BlockSpec((L, dff, D), c3),                         # FFN W2
                pl.BlockSpec((L, 8, MW), c3),                          # packed bias/LN vectors
            ],
            out_specs=pl.BlockSpec((1, M, D), lambda g: (g, 0, 0)),
        ),
        compiler_params=pltpu.CompilerParams(
            dimension_semantics=("parallel",),
            vmem_limit_bytes=32 * 1024 * 1024,
        ),
    )(xcol_g, wconv_aug, pmat, wptb, wqkv, params["wo"],
      params["lin1_w"], params["lin2_w"], vecs)

    # (G, Bb*T, D) -> (B, T, D) -> module's final permute (B, d_model, T)
    out = out.reshape(B, T, D)
    return jnp.transpose(out, (0, 2, 1))


# ------------------------- pure-JAX reference (check) ----------------------- #

def ref_forward(x, p, *, K1, Pool, stride_pool, nheads):
    B, Chans, S = x.shape
    D = p["wp"].shape[0]
    L = p["wq"].shape[0]
    hd = D // nheads

    # tokenizer
    x4 = x[:, None, :, :]                                            # (B,1,Chans,S)
    k1 = p["w1"][:, None, None, :]                                   # (F,1,1,K1)
    y = jax.lax.conv_general_dilated(x4, k1, (1, 1), "VALID",
                                     dimension_numbers=("NCHW", "OIHW", "NCHW"),
                                     precision=HI)
    y = y + p["b1"][None, :, None, None]
    k2 = p["w2"][:, :, :, None]                                      # (F,F,Chans,1)
    y = jax.lax.conv_general_dilated(y, k2, (1, 1), "VALID",
                                     dimension_numbers=("NCHW", "OIHW", "NCHW"),
                                     precision=HI)
    y = y + p["b2"][None, :, None, None]                             # (B,F,1,L1)
    inv = jax.lax.rsqrt(p["bn_var"] + BN_EPS)
    y = ((y - p["bn_mean"][None, :, None, None])
         * (inv * p["bn_gamma"])[None, :, None, None]
         + p["bn_beta"][None, :, None, None])
    y = jax.lax.reduce_window(y, 0.0, jax.lax.add,
                              (1, 1, 1, Pool), (1, 1, 1, stride_pool), "VALID") / Pool
    y = jnp.einsum("df,bfot->bdot", p["wp"], y, precision=HI) + p["bp"][None, :, None, None]
    tok = jnp.transpose(y[:, :, 0, :], (0, 2, 1))                    # (B, T, D)

    def one_layer(tk, li):
        T_ = tk.shape[0]
        q = jnp.matmul(tk, p["wq"][li], precision=HI) + p["bq"][li]
        k = jnp.matmul(tk, p["wk"][li], precision=HI) + p["bk"][li]
        v = jnp.matmul(tk, p["wv"][li], precision=HI) + p["bv"][li]
        qh = jnp.transpose(q.reshape(T_, nheads, hd), (1, 0, 2))
        kh = jnp.transpose(k.reshape(T_, nheads, hd), (1, 0, 2))
        vh = jnp.transpose(v.reshape(T_, nheads, hd), (1, 0, 2))
        s = jnp.einsum("htd,hsd->hts", qh, kh, precision=HI) / math.sqrt(hd)
        a = jax.nn.softmax(s, axis=-1)
        ctx = jnp.einsum("hts,hsd->htd", a, vh, precision=HI)
        ctx = jnp.transpose(ctx, (1, 0, 2)).reshape(T_, D)
        attn = jnp.matmul(ctx, p["wo"][li], precision=HI) + p["bo"][li]
        tk = _layer_norm(tk + attn, p["ln1_g"][li], p["ln1_b"][li])
        hmid = _gelu_tanh(jnp.matmul(tk, p["lin1_w"][li], precision=HI) + p["lin1_b"][li])
        ff = jnp.matmul(hmid, p["lin2_w"][li], precision=HI) + p["lin2_b"][li]
        return _layer_norm(tk + ff, p["ln2_g"][li], p["ln2_b"][li])

    outs = []
    for b in range(B):
        tk = tok[b]
        for li in range(L):
            tk = one_layer(tk, li)
        outs.append(jnp.transpose(tk))
    return jnp.stack(outs, axis=0)                                   # (B, D, T)


# ------------------------------- param init --------------------------------- #

def init_params(key, *, Chans, F, K1, D, L, dff):
    ks = iter(jax.random.split(key, 40))
    nrm = lambda shape, s: s * jax.random.normal(next(ks), shape, jnp.float32)
    p = {}
    p["w1"] = nrm((F, K1), 1.0 / math.sqrt(K1))
    p["b1"] = nrm((F,), 0.1)
    p["w2"] = nrm((F, F, Chans), 1.0 / math.sqrt(F * Chans))
    p["b2"] = nrm((F,), 0.1)
    p["bn_gamma"] = 1.0 + nrm((F,), 0.1)
    p["bn_beta"] = nrm((F,), 0.1)
    p["bn_mean"] = nrm((F,), 0.1)
    p["bn_var"] = 0.5 + jax.random.uniform(next(ks), (F,), jnp.float32)
    p["wp"] = nrm((D, F), 1.0 / math.sqrt(F))
    p["bp"] = nrm((D,), 0.1)
    for name in ("wq", "wk", "wv", "wo"):
        p[name] = nrm((L, D, D), 1.0 / math.sqrt(D))
    for name in ("bq", "bk", "bv", "bo"):
        p[name] = nrm((L, D), 0.1)
    p["lin1_w"] = nrm((L, D, dff), 1.0 / math.sqrt(D))
    p["lin1_b"] = nrm((L, dff), 0.1)
    p["lin2_w"] = nrm((L, dff, D), 1.0 / math.sqrt(dff))
    p["lin2_b"] = nrm((L, D), 0.1)
    p["ln1_g"] = 1.0 + nrm((L, D), 0.1)
    p["ln1_b"] = nrm((L, D), 0.1)
    p["ln2_g"] = 1.0 + nrm((L, D), 0.1)
    p["ln2_b"] = nrm((L, D), 0.1)
    return p


if __name__ == "__main__":
    # Small EEGConformerEncoder configuration (defaults except nlayers=2 and
    # nheads=5, chosen so head_dim = d_model/nheads = 8 is TPU-friendly).
    B, Chans, Samples = 4, 8, 512
    F_, K1, Pool, stride_pool = 40, 25, 75, 15
    d_model, nlayers, nheads, dff = 40, 2, 5, 160

    key = jax.random.PRNGKey(0)
    kx, kp = jax.random.split(key)
    x = jax.random.normal(kx, (B, Chans, Samples), jnp.float32)
    params = init_params(kp, Chans=Chans, F=F_, K1=K1, D=d_model, L=nlayers, dff=dff)

    out = eeg_conformer_encoder_forward(x, params, K1=K1, Pool=Pool,
                                        stride_pool=stride_pool, nheads=nheads,
                                        grid_steps=2, cast_bf16=False)
    out = jax.block_until_ready(out)

    ref = jax.block_until_ready(ref_forward(x, params, K1=K1, Pool=Pool,
                                            stride_pool=stride_pool, nheads=nheads))
    L1 = Samples - K1 + 1
    T = (L1 - Pool) // stride_pool + 1
    assert out.shape == ref.shape == (B, d_model, T), (out.shape, ref.shape)
    assert bool(jnp.all(jnp.isfinite(out))), "non-finite values in kernel output"
    max_err = float(jnp.max(jnp.abs(out - ref)))
    if not bool(jnp.allclose(out, ref, atol=2e-2, rtol=2e-2)):
        raise AssertionError(f"Pallas output mismatch vs reference, max abs err = {max_err}")
    print("KERNEL_OK")
</pallas_src>

<mosaic_0001>
module attributes {stable_mosaic.version = 11 : i64} {
  func.func @kernel(%arg0: i32, %arg1: memref<1x201x1024xf32, #tpu.memory_space<vmem>>, %arg2: memref<40x201xf32, #tpu.memory_space<vmem>>, %arg3: memref<56x1024xf32, #tpu.memory_space<vmem>>, %arg4: memref<41x40xf32, #tpu.memory_space<vmem>>, %arg5: memref<2x40x120xf32, #tpu.memory_space<vmem>>, %arg6: memref<2x40x40xf32, #tpu.memory_space<vmem>>, %arg7: memref<2x40x160xf32, #tpu.memory_space<vmem>>, %arg8: memref<2x160x40xf32, #tpu.memory_space<vmem>>, %arg9: memref<2x8x160xf32, #tpu.memory_space<vmem>>, %arg10: memref<1x56x40xf32, #tpu.memory_space<vmem>>) attributes {dimension_semantics = [#tpu.dimension_semantics<parallel>], iteration_bounds = array<i64: 2>, scalar_prefetch = 0 : i64, scratch_operands = 0 : i64, tpu.core_type = #tpu.core_type<tc>, window_params = [{transform_indices = @transform_0, window_bounds = array<i64: 1, 201, 1024>}, {pipeline_mode = #tpu.pipeline_mode<synchronous>, transform_indices = @transform_1, window_bounds = array<i64: 40, 201>}, {pipeline_mode = #tpu.pipeline_mode<synchronous>, transform_indices = @transform_2, window_bounds = array<i64: 56, 1024>}, {pipeline_mode = #tpu.pipeline_mode<synchronous>, transform_indices = @transform_3, window_bounds = array<i64: 41, 40>}, {pipeline_mode = #tpu.pipeline_mode<synchronous>, transform_indices = @transform_4, window_bounds = array<i64: 2, 40, 120>}, {pipeline_mode = #tpu.pipeline_mode<synchronous>, transform_indices = @transform_5, window_bounds = array<i64: 2, 40, 40>}, {pipeline_mode = #tpu.pipeline_mode<synchronous>, transform_indices = @transform_6, window_bounds = array<i64: 2, 40, 160>}, {pipeline_mode = #tpu.pipeline_mode<synchronous>, transform_indices = @transform_7, window_bounds = array<i64: 2, 160, 40>}, {pipeline_mode = #tpu.pipeline_mode<synchronous>, transform_indices = @transform_8, window_bounds = array<i64: 2, 8, 160>}, {transform_indices = @transform_9, window_bounds = array<i64: 1, 56, 40>}]} {
    %c0 = arith.constant 0 : index
    %c0_0 = arith.constant 0 : index
    %0 = vector.load %arg2[%c0, %c0_0] : memref<40x201xf32, #tpu.memory_space<vmem>>, vector<40x201xf32>
    %c0_1 = arith.constant 0 : index
    %c0_2 = arith.constant 0 : index
    %c0_3 = arith.constant 0 : index
    %1 = vector.load %arg1[%c0_1, %c0_2, %c0_3] : memref<1x201x1024xf32, #tpu.memory_space<vmem>>, vector<1x201x1024xf32>
    %2 = vector.shape_cast %1 : vector<1x201x1024xf32> to vector<201x1024xf32>
    %cst = arith.constant dense<0.000000e+00> : vector<40x1024xf32>
    %3 = tpu.matmul %0, %2, %cst {dimension_numbers = #tpu.dot_dimension_numbers<[1], [0], [0], [1], [0, 0, 1, 1], [], []>} : vector<40x201xf32>, vector<201x1024xf32>, vector<40x1024xf32> -> vector<40x1024xf32>
    %c0_4 = arith.constant 0 : index
    %c0_5 = arith.constant 0 : index
    %4 = vector.load %arg3[%c0_4, %c0_5] : memref<56x1024xf32, #tpu.memory_space<vmem>>, vector<56x1024xf32>
    %cst_6 = arith.constant dense<0.000000e+00> : vector<56x40xf32>
    %5 = tpu.matmul %4, %3, %cst_6 {dimension_numbers = #tpu.dot_dimension_numbers<[1], [1], [0], [0], [0, 0, 1, 0], [], []>} : vector<56x1024xf32>, vector<40x1024xf32>, vector<56x40xf32> -> vector<56x40xf32>
    %c0_7 = arith.constant 0 : index
    %c0_8 = arith.constant 0 : index
    %6 = vector.load %arg4[%c0_7, %c0_8] : memref<41x40xf32, #tpu.memory_space<vmem>>, vector<41x40xf32>
    %7 = vector.extract_strided_slice %6 {offsets = [0, 0], sizes = [40, 40], strides = [1, 1]} : vector<41x40xf32> to vector<40x40xf32>
    %cst_9 = arith.constant dense<0.000000e+00> : vector<56x40xf32>
    %8 = tpu.matmul %5, %7, %cst_9 {dimension_numbers = #tpu.dot_dimension_numbers<[1], [0], [0], [1], [0, 0, 1, 1], [], []>} : vector<56x40xf32>, vector<40x40xf32>, vector<56x40xf32> -> vector<56x40xf32>
    %9 = vector.extract_strided_slice %6 {offsets = [40, 0], sizes = [1, 40], strides = [1, 1]} : vector<41x40xf32> to vector<1x40xf32>
    %10 = vector.broadcast %9 : vector<1x40xf32> to vector<56x40xf32>
    %11 = arith.addf %8, %10 : vector<56x40xf32>
    %c0_10 = arith.constant 0 : index
    %c0_11 = arith.constant 0 : index
    %c0_12 = arith.constant 0 : index
    %12 = vector.load %arg9[%c0_10, %c0_11, %c0_12] : memref<2x8x160xf32, #tpu.memory_space<vmem>>, vector<1x8x160xf32>
    %13 = vector.shape_cast %12 : vector<1x8x160xf32> to vector<8x160xf32>
    %14 = vector.extract_strided_slice %13 {offsets = [0, 0], sizes = [1, 120], strides = [1, 1]} : vector<8x160xf32> to vector<1x120xf32>
    %15 = vector.extract_strided_slice %13 {offsets = [1, 0], sizes = [1, 160], strides = [1, 1]} : vector<8x160xf32> to vector<1x160xf32>
    %16 = vector.extract_strided_slice %13 {offsets = [2, 0], sizes = [1, 40], strides = [1, 1]} : vector<8x160xf32> to vector<1x40xf32>
    %17 = vector.extract_strided_slice %13 {offsets = [3, 0], sizes = [1, 40], strides = [1, 1]} : vector<8x160xf32> to vector<1x40xf32>
    %18 = vector.extract_strided_slice %13 {offsets = [4, 0], sizes = [1, 40], strides = [1, 1]} : vector<8x160xf32> to vector<1x40xf32>
    %19 = vector.extract_strided_slice %13 {offsets = [5, 0], sizes = [1, 40], strides = [1, 1]} : vector<8x160xf32> to vector<1x40xf32>
    %20 = vector.extract_strided_slice %13 {offsets = [6, 0], sizes = [1, 40], strides = [1, 1]} : vector<8x160xf32> to vector<1x40xf32>
    %21 = vector.extract_strided_slice %13 {offsets = [7, 0], sizes = [1, 40], strides = [1, 1]} : vector<8x160xf32> to vector<1x40xf32>
    %c0_13 = arith.constant 0 : index
    %c0_14 = arith.constant 0 : index
    %c0_15 = arith.constant 0 : index
    %22 = vector.load %arg5[%c0_13, %c0_14, %c0_15] : memref<2x40x120xf32, #tpu.memory_space<vmem>>, vector<1x40x120xf32>
    %23 = vector.shape_cast %22 : vector<1x40x120xf32> to vector<40x120xf32>
    %cst_16 = arith.constant dense<0.000000e+00> : vector<56x120xf32>
    %24 = tpu.matmul %11, %23, %cst_16 {dimension_numbers = #tpu.dot_dimension_numbers<[1], [0], [0], [1], [0, 0, 1, 1], [], []>} : vector<56x40xf32>, vector<40x120xf32>, vector<56x120xf32> -> vector<56x120xf32>
    %25 = vector.broadcast %14 : vector<1x120xf32> to vector<56x120xf32>
    %26 = arith.addf %24, %25 : vector<56x120xf32>
    %27 = vector.extract_strided_slice %26 {offsets = [0, 0], sizes = [28, 8], strides = [1, 1]} : vector<56x120xf32> to vector<28x8xf32>
    %28 = vector.extract_strided_slice %26 {offsets = [0, 40], sizes = [28, 8], strides = [1, 1]} : vector<56x120xf32> to vector<28x8xf32>
    %29 = vector.extract_strided_slice %26 {offsets = [0, 80], sizes = [28, 8], strides = [1, 1]} : vector<56x120xf32> to vector<28x8xf32>
    %cst_17 = arith.constant dense<0.000000e+00> : vector<28x28xf32>
    %30 = tpu.matmul %27, %28, %cst_17 {dimension_numbers = #tpu.dot_dimension_numbers<[1], [1], [0], [0], [0, 0, 1, 0], [], []>} : vector<28x8xf32>, vector<28x8xf32>, vector<28x28xf32> -> vector<28x28xf32>
    %cst_18 = arith.constant 0.353553385 : f32
    %31 = vector.broadcast %cst_18 : f32 to vector<28x28xf32>
    %32 = arith.mulf %30, %31 : vector<28x28xf32>
    %cst_19 = arith.constant dense<0xFF800000> : vector<28xf32>
    %33 = vector.multi_reduction <maximumf>, %32, %cst_19 [1] : vector<28x28xf32> to vector<28xf32>
    %34 = vector.shape_cast %33 : vector<28xf32> to vector<28x1xf32>
    %35 = vector.broadcast %34 : vector<28x1xf32> to vector<28x28xf32>
    %36 = arith.subf %32, %35 : vector<28x28xf32>
    %37 = math.exp %36 : vector<28x28xf32>
    %cst_20 = arith.constant dense<0.000000e+00> : vector<28xf32>
    %38 = vector.multi_reduction <add>, %37, %cst_20 [1] : vector<28x28xf32> to vector<28xf32>
    %39 = vector.shape_cast %38 : vector<28xf32> to vector<28x1xf32>
    %40 = tpu.reciprocal %39 {approx = true} : vector<28x1xf32> -> vector<28x1xf32>
    %41 = vector.broadcast %40 : vector<28x1xf32> to vector<28x28xf32>
    %42 = arith.mulf %37, %41 : vector<28x28xf32>
    %cst_21 = arith.constant dense<0.000000e+00> : vector<28x8xf32>
    %43 = tpu.matmul %42, %29, %cst_21 {dimension_numbers = #tpu.dot_dimension_numbers<[1], [0], [0], [1], [0, 0, 1, 1], [], []>} : vector<28x28xf32>, vector<28x8xf32>, vector<28x8xf32> -> vector<28x8xf32>
    %44 = vector.extract_strided_slice %26 {offsets = [0, 8], sizes = [28, 8], strides = [1, 1]} : vector<56x120xf32> to vector<28x8xf32>
    %45 = vector.extract_strided_slice %26 {offsets = [0, 48], sizes = [28, 8], strides = [1, 1]} : vector<56x120xf32> to vector<28x8xf32>
    %46 = vector.extract_strided_slice %26 {offsets = [0, 88], sizes = [28, 8], strides = [1, 1]} : vector<56x120xf32> to vector<28x8xf32>
    %cst_22 = arith.constant dense<0.000000e+00> : vector<28x28xf32>
    %47 = tpu.matmul %44, %45, %cst_22 {dimension_numbers = #tpu.dot_dimension_numbers<[1], [1], [0], [0], [0, 0, 1, 0], [], []>} : vector<28x8xf32>, vector<28x8xf32>, vector<28x28xf32> -> vector<28x28xf32>
    %cst_23 = arith.constant 0.353553385 : f32
    %48 = vector.broadcast %cst_23 : f32 to vector<28x28xf32>
    %49 = arith.mulf %47, %48 : vector<28x28xf32>
    %cst_24 = arith.constant dense<0xFF800000> : vector<28xf32>
    %50 = vector.multi_reduction <maximumf>, %49, %cst_24 [1] : vector<28x28xf32> to vector<28xf32>
    %51 = vector.shape_cast %50 : vector<28xf32> to vector<28x1xf32>
    %52 = vector.broadcast %51 : vector<28x1xf32> to vector<28x28xf32>
    %53 = arith.subf %49, %52 : vector<28x28xf32>
    %54 = math.exp %53 : vector<28x28xf32>
    %cst_25 = arith.constant dense<0.000000e+00> : vector<28xf32>
    %55 = vector.multi_reduction <add>, %54, %cst_25 [1] : vector<28x28xf32> to vector<28xf32>
    %56 = vector.shape_cast %55 : vector<28xf32> to vector<28x1xf32>
    %57 = tpu.reciprocal %56 {approx = true} : vector<28x1xf32> -> vector<28x1xf32>
    %58 = vector.broadcast %57 : vector<28x1xf32> to vector<28x28xf32>
    %59 = arith.mulf %54, %58 : vector<28x28xf32>
    %cst_26 = arith.constant dense<0.000000e+00> : vector<28x8xf32>
    %60 = tpu.matmul %59, %46, %cst_26 {dimension_numbers = #tpu.dot_dimension_numbers<[1], [0], [0], [1], [0, 0, 1, 1], [], []>} : vector<28x28xf32>, vector<28x8xf32>, vector<28x8xf32> -> vector<28x8xf32>
    %61 = vector.extract_strided_slice %26 {offsets = [0, 16], sizes = [28, 8], strides = [1, 1]} : vector<56x120xf32> to vector<28x8xf32>
    %62 = vector.extract_strided_slice %26 {offsets = [0, 56], sizes = [28, 8], strides = [1, 1]} : vector<56x120xf32> to vector<28x8xf32>
    %63 = vector.extract_strided_slice %26 {offsets = [0, 96], sizes = [28, 8], strides = [1, 1]} : vector<56x120xf32> to vector<28x8xf32>
    %cst_27 = arith.constant dense<0.000000e+00> : vector<28x28xf32>
    %64 = tpu.matmul %61, %62, %cst_27 {dimension_numbers = #tpu.dot_dimension_numbers<[1], [1], [0], [0], [0, 0, 1, 0], [], []>} : vector<28x8xf32>, vector<28x8xf32>, vector<28x28xf32> -> vector<28x28xf32>
    %cst_28 = arith.constant 0.353553385 : f32
    %65 = vector.broadcast %cst_28 : f32 to vector<28x28xf32>
    %66 = arith.mulf %64, %65 : vector<28x28xf32>
    %cst_29 = arith.constant dense<0xFF800000> : vector<28xf32>
    %67 = vector.multi_reduction <maximumf>, %66, %cst_29 [1] : vector<28x28xf32> to vector<28xf32>
    %68 = vector.shape_cast %67 : vector<28xf32> to vector<28x1xf32>
    %69 = vector.broadcast %68 : vector<28x1xf32> to vector<28x28xf32>
    %70 = arith.subf %66, %69 : vector<28x28xf32>
    %71 = math.exp %70 : vector<28x28xf32>
    %cst_30 = arith.constant dense<0.000000e+00> : vector<28xf32>
    %72 = vector.multi_reduction <add>, %71, %cst_30 [1] : vector<28x28xf32> to vector<28xf32>
    %73 = vector.shape_cast %72 : vector<28xf32> to vector<28x1xf32>
    %74 = tpu.reciprocal %73 {approx = true} : vector<28x1xf32> -> vector<28x1xf32>
    %75 = vector.broadcast %74 : vector<28x1xf32> to vector<28x28xf32>
    %76 = arith.mulf %71, %75 : vector<28x28xf32>
    %cst_31 = arith.constant dense<0.000000e+00> : vector<28x8xf32>
    %77 = tpu.matmul %76, %63, %cst_31 {dimension_numbers = #tpu.dot_dimension_numbers<[1], [0], [0], [1], [0, 0, 1, 1], [], []>} : vector<28x28xf32>, vector<28x8xf32>, vector<28x8xf32> -> vector<28x8xf32>
    %78 = vector.extract_strided_slice %26 {offsets = [0, 24], sizes = [28, 8], strides = [1, 1]} : vector<56x120xf32> to vector<28x8xf32>
    %79 = vector.extract_strided_slice %26 {offsets = [0, 64], sizes = [28, 8], strides = [1, 1]} : vector<56x120xf32> to vector<28x8xf32>
    %80 = vector.extract_strided_slice %26 {offsets = [0, 104], sizes = [28, 8], strides = [1, 1]} : vector<56x120xf32> to vector<28x8xf32>
    %cst_32 = arith.constant dense<0.000000e+00> : vector<28x28xf32>
    %81 = tpu.matmul %78, %79, %cst_32 {dimension_numbers = #tpu.dot_dimension_numbers<[1], [1], [0], [0], [0, 0, 1, 0], [], []>} : vector<28x8xf32>, vector<28x8xf32>, vector<28x28xf32> -> vector<28x28xf32>
    %cst_33 = arith.constant 0.353553385 : f32
    %82 = vector.broadcast %cst_33 : f32 to vector<28x28xf32>
    %83 = arith.mulf %81, %82 : vector<28x28xf32>
    %cst_34 = arith.constant dense<0xFF800000> : vector<28xf32>
    %84 = vector.multi_reduction <maximumf>, %83, %cst_34 [1] : vector<28x28xf32> to vector<28xf32>
    %85 = vector.shape_cast %84 : vector<28xf32> to vector<28x1xf32>
    %86 = vector.broadcast %85 : vector<28x1xf32> to vector<28x28xf32>
    %87 = arith.subf %83, %86 : vector<28x28xf32>
    %88 = math.exp %87 : vector<28x28xf32>
    %cst_35 = arith.constant dense<0.000000e+00> : vector<28xf32>
    %89 = vector.multi_reduction <add>, %88, %cst_35 [1] : vector<28x28xf32> to vector<28xf32>
    %90 = vector.shape_cast %89 : vector<28xf32> to vector<28x1xf32>
    %91 = tpu.reciprocal %90 {approx = true} : vector<28x1xf32> -> vector<28x1xf32>
    %92 = vector.broadcast %91 : vector<28x1xf32> to vector<28x28xf32>
    %93 = arith.mulf %88, %92 : vector<28x28xf32>
    %cst_36 = arith.constant dense<0.000000e+00> : vector<28x8xf32>
    %94 = tpu.matmul %93, %80, %cst_36 {dimension_numbers = #tpu.dot_dimension_numbers<[1], [0], [0], [1], [0, 0, 1, 1], [], []>} : vector<28x28xf32>, vector<28x8xf32>, vector<28x8xf32> -> vector<28x8xf32>
    %95 = vector.extract_strided_slice %26 {offsets = [0, 32], sizes = [28, 8], strides = [1, 1]} : vector<56x120xf32> to vector<28x8xf32>
    %96 = vector.extract_strided_slice %26 {offsets = [0, 72], sizes = [28, 8], strides = [1, 1]} : vector<56x120xf32> to vector<28x8xf32>
    %97 = vector.extract_strided_slice %26 {offsets = [0, 112], sizes = [28, 8], strides = [1, 1]} : vector<56x120xf32> to vector<28x8xf32>
    %cst_37 = arith.constant dense<0.000000e+00> : vector<28x28xf32>
    %98 = tpu.matmul %95, %96, %cst_37 {dimension_numbers = #tpu.dot_dimension_numbers<[1], [1], [0], [0], [0, 0, 1, 0], [], []>} : vector<28x8xf32>, vector<28x8xf32>, vector<28x28xf32> -> vector<28x28xf32>
    %cst_38 = arith.constant 0.353553385 : f32
    %99 = vector.broadcast %cst_38 : f32 to vector<28x28xf32>
    %100 = arith.mulf %98, %99 : vector<28x28xf32>
    %cst_39 = arith.constant dense<0xFF800000> : vector<28xf32>
    %101 = vector.multi_reduction <maximumf>, %100, %cst_39 [1] : vector<28x28xf32> to vector<28xf32>
    %102 = vector.shape_cast %101 : vector<28xf32> to vector<28x1xf32>
    %103 = vector.broadcast %102 : vector<28x1xf32> to vector<28x28xf32>
    %104 = arith.subf %100, %103 : vector<28x28xf32>
    %105 = math.exp %104 : vector<28x28xf32>
    %cst_40 = arith.constant dense<0.000000e+00> : vector<28xf32>
    %106 = vector.multi_reduction <add>, %105, %cst_40 [1] : vector<28x28xf32> to vector<28xf32>
    %107 = vector.shape_cast %106 : vector<28xf32> to vector<28x1xf32>
    %108 = tpu.reciprocal %107 {approx = true} : vector<28x1xf32> -> vector<28x1xf32>
    %109 = vector.broadcast %108 : vector<28x1xf32> to vector<28x28xf32>
    %110 = arith.mulf %105, %109 : vector<28x28xf32>
    %cst_41 = arith.constant dense<0.000000e+00> : vector<28x8xf32>
    %111 = tpu.matmul %110, %97, %cst_41 {dimension_numbers = #tpu.dot_dimension_numbers<[1], [0], [0], [1], [0, 0, 1, 1], [], []>} : vector<28x28xf32>, vector<28x8xf32>, vector<28x8xf32> -> vector<28x8xf32>
    %112 = tpu.concatenate %43, %60, %77, %94, %111 in 1 : vector<28x8xf32>, vector<28x8xf32>, vector<28x8xf32>, vector<28x8xf32>, vector<28x8xf32> -> vector<28x40xf32>
    %113 = vector.extract_strided_slice %26 {offsets = [28, 0], sizes = [28, 8], strides = [1, 1]} : vector<56x120xf32> to vector<28x8xf32>
    %114 = vector.extract_strided_slice %26 {offsets = [28, 40], sizes = [28, 8], strides = [1, 1]} : vector<56x120xf32> to vector<28x8xf32>
    %115 = vector.extract_strided_slice %26 {offsets = [28, 80], sizes = [28, 8], strides = [1, 1]} : vector<56x120xf32> to vector<28x8xf32>
    %cst_42 = arith.constant dense<0.000000e+00> : vector<28x28xf32>
    %116 = tpu.matmul %113, %114, %cst_42 {dimension_numbers = #tpu.dot_dimension_numbers<[1], [1], [0], [0], [0, 0, 1, 0], [], []>} : vector<28x8xf32>, vector<28x8xf32>, vector<28x28xf32> -> vector<28x28xf32>
    %cst_43 = arith.constant 0.353553385 : f32
    %117 = vector.broadcast %cst_43 : f32 to vector<28x28xf32>
    %118 = arith.mulf %116, %117 : vector<28x28xf32>
    %cst_44 = arith.constant dense<0xFF800000> : vector<28xf32>
    %119 = vector.multi_reduction <maximumf>, %118, %cst_44 [1] : vector<28x28xf32> to vector<28xf32>
    %120 = vector.shape_cast %119 : vector<28xf32> to vector<28x1xf32>
    %121 = vector.broadcast %120 : vector<28x1xf32> to vector<28x28xf32>
    %122 = arith.subf %118, %121 : vector<28x28xf32>
    %123 = math.exp %122 : vector<28x28xf32>
    %cst_45 = arith.constant dense<0.000000e+00> : vector<28xf32>
    %124 = vector.multi_reduction <add>, %123, %cst_45 [1] : vector<28x28xf32> to vector<28xf32>
    %125 = vector.shape_cast %124 : vector<28xf32> to vector<28x1xf32>
    %126 = tpu.reciprocal %125 {approx = true} : vector<28x1xf32> -> vector<28x1xf32>
    %127 = vector.broadcast %126 : vector<28x1xf32> to vector<28x28xf32>
    %128 = arith.mulf %123, %127 : vector<28x28xf32>
    %cst_46 = arith.constant dense<0.000000e+00> : vector<28x8xf32>
    %129 = tpu.matmul %128, %115, %cst_46 {dimension_numbers = #tpu.dot_dimension_numbers<[1], [0], [0], [1], [0, 0, 1, 1], [], []>} : vector<28x28xf32>, vector<28x8xf32>, vector<28x8xf32> -> vector<28x8xf32>
    %130 = vector.extract_strided_slice %26 {offsets = [28, 8], sizes = [28, 8], strides = [1, 1]} : vector<56x120xf32> to vector<28x8xf32>
    %131 = vector.extract_strided_slice %26 {offsets = [28, 48], sizes = [28, 8], strides = [1, 1]} : vector<56x120xf32> to vector<28x8xf32>
    %132 = vector.extract_strided_slice %26 {offsets = [28, 88], sizes = [28, 8], strides = [1, 1]} : vector<56x120xf32> to vector<28x8xf32>
    %cst_47 = arith.constant dense<0.000000e+00> : vector<28x28xf32>
    %133 = tpu.matmul %130, %131, %cst_47 {dimension_numbers = #tpu.dot_dimension_numbers<[1], [1], [0], [0], [0, 0, 1, 0], [], []>} : vector<28x8xf32>, vector<28x8xf32>, vector<28x28xf32> -> vector<28x28xf32>
    %cst_48 = arith.constant 0.353553385 : f32
    %134 = vector.broadcast %cst_48 : f32 to vector<28x28xf32>
    %135 = arith.mulf %133, %134 : vector<28x28xf32>
    %cst_49 = arith.constant dense<0xFF800000> : vector<28xf32>
    %136 = vector.multi_reduction <maximumf>, %135, %cst_49 [1] : vector<28x28xf32> to vector<28xf32>
    %137 = vector.shape_cast %136 : vector<28xf32> to vector<28x1xf32>
    %138 = vector.broadcast %137 : vector<28x1xf32> to vector<28x28xf32>
    %139 = arith.subf %135, %138 : vector<28x28xf32>
    %140 = math.exp %139 : vector<28x28xf32>
    %cst_50 = arith.constant dense<0.000000e+00> : vector<28xf32>
    %141 = vector.multi_reduction <add>, %140, %cst_50 [1] : vector<28x28xf32> to vector<28xf32>
    %142 = vector.shape_cast %141 : vector<28xf32> to vector<28x1xf32>
    %143 = tpu.reciprocal %142 {approx = true} : vector<28x1xf32> -> vector<28x1xf32>
    %144 = vector.broadcast %143 : vector<28x1xf32> to vector<28x28xf32>
    %145 = arith.mulf %140, %144 : vector<28x28xf32>
    %cst_51 = arith.constant dense<0.000000e+00> : vector<28x8xf32>
    %146 = tpu.matmul %145, %132, %cst_51 {dimension_numbers = #tpu.dot_dimension_numbers<[1], [0], [0], [1], [0, 0, 1, 1], [], []>} : vector<28x28xf32>, vector<28x8xf32>, vector<28x8xf32> -> vector<28x8xf32>
    %147 = vector.extract_strided_slice %26 {offsets = [28, 16], sizes = [28, 8], strides = [1, 1]} : vector<56x120xf32> to vector<28x8xf32>
    %148 = vector.extract_strided_slice %26 {offsets = [28, 56], sizes = [28, 8], strides = [1, 1]} : vector<56x120xf32> to vector<28x8xf32>
    %149 = vector.extract_strided_slice %26 {offsets = [28, 96], sizes = [28, 8], strides = [1, 1]} : vector<56x120xf32> to vector<28x8xf32>
    %cst_52 = arith.constant dense<0.000000e+00> : vector<28x28xf32>
    %150 = tpu.matmul %147, %148, %cst_52 {dimension_numbers = #tpu.dot_dimension_numbers<[1], [1], [0], [0], [0, 0, 1, 0], [], []>} : vector<28x8xf32>, vector<28x8xf32>, vector<28x28xf32> -> vector<28x28xf32>
    %cst_53 = arith.constant 0.353553385 : f32
    %151 = vector.broadcast %cst_53 : f32 to vector<28x28xf32>
    %152 = arith.mulf %150, %151 : vector<28x28xf32>
    %cst_54 = arith.constant dense<0xFF800000> : vector<28xf32>
    %153 = vector.multi_reduction <maximumf>, %152, %cst_54 [1] : vector<28x28xf32> to vector<28xf32>
    %154 = vector.shape_cast %153 : vector<28xf32> to vector<28x1xf32>
    %155 = vector.broadcast %154 : vector<28x1xf32> to vector<28x28xf32>
    %156 = arith.subf %152, %155 : vector<28x28xf32>
    %157 = math.exp %156 : vector<28x28xf32>
    %cst_55 = arith.constant dense<0.000000e+00> : vector<28xf32>
    %158 = vector.multi_reduction <add>, %157, %cst_55 [1] : vector<28x28xf32> to vector<28xf32>
    %159 = vector.shape_cast %158 : vector<28xf32> to vector<28x1xf32>
    %160 = tpu.reciprocal %159 {approx = true} : vector<28x1xf32> -> vector<28x1xf32>
    %161 = vector.broadcast %160 : vector<28x1xf32> to vector<28x28xf32>
    %162 = arith.mulf %157, %161 : vector<28x28xf32>
    %cst_56 = arith.constant dense<0.000000e+00> : vector<28x8xf32>
    %163 = tpu.matmul %162, %149, %cst_56 {dimension_numbers = #tpu.dot_dimension_numbers<[1], [0], [0], [1], [0, 0, 1, 1], [], []>} : vector<28x28xf32>, vector<28x8xf32>, vector<28x8xf32> -> vector<28x8xf32>
    %164 = vector.extract_strided_slice %26 {offsets = [28, 24], sizes = [28, 8], strides = [1, 1]} : vector<56x120xf32> to vector<28x8xf32>
    %165 = vector.extract_strided_slice %26 {offsets = [28, 64], sizes = [28, 8], strides = [1, 1]} : vector<56x120xf32> to vector<28x8xf32>
    %166 = vector.extract_strided_slice %26 {offsets = [28, 104], sizes = [28, 8], strides = [1, 1]} : vector<56x120xf32> to vector<28x8xf32>
    %cst_57 = arith.constant dense<0.000000e+00> : vector<28x28xf32>
    %167 = tpu.matmul %164, %165, %cst_57 {dimension_numbers = #tpu.dot_dimension_numbers<[1], [1], [0], [0], [0, 0, 1, 0], [], []>} : vector<28x8xf32>, vector<28x8xf32>, vector<28x28xf32> -> vector<28x28xf32>
    %cst_58 = arith.constant 0.353553385 : f32
    %168 = vector.broadcast %cst_58 : f32 to vector<28x28xf32>
    %169 = arith.mulf %167, %168 : vector<28x28xf32>
    %cst_59 = arith.constant dense<0xFF800000> : vector<28xf32>
    %170 = vector.multi_reduction <maximumf>, %169, %cst_59 [1] : vector<28x28xf32> to vector<28xf32>
    %171 = vector.shape_cast %170 : vector<28xf32> to vector<28x1xf32>
    %172 = vector.broadcast %171 : vector<28x1xf32> to vector<28x28xf32>
    %173 = arith.subf %169, %172 : vector<28x28xf32>
    %174 = math.exp %173 : vector<28x28xf32>
    %cst_60 = arith.constant dense<0.000000e+00> : vector<28xf32>
    %175 = vector.multi_reduction <add>, %174, %cst_60 [1] : vector<28x28xf32> to vector<28xf32>
    %176 = vector.shape_cast %175 : vector<28xf32> to vector<28x1xf32>
    %177 = tpu.reciprocal %176 {approx = true} : vector<28x1xf32> -> vector<28x1xf32>
    %178 = vector.broadcast %177 : vector<28x1xf32> to vector<28x28xf32>
    %179 = arith.mulf %174, %178 : vector<28x28xf32>
    %cst_61 = arith.constant dense<0.000000e+00> : vector<28x8xf32>
    %180 = tpu.matmul %179, %166, %cst_61 {dimension_numbers = #tpu.dot_dimension_numbers<[1], [0], [0], [1], [0, 0, 1, 1], [], []>} : vector<28x28xf32>, vector<28x8xf32>, vector<28x8xf32> -> vector<28x8xf32>
    %181 = vector.extract_strided_slice %26 {offsets = [28, 32], sizes = [28, 8], strides = [1, 1]} : vector<56x120xf32> to vector<28x8xf32>
    %182 = vector.extract_strided_slice %26 {offsets = [28, 72], sizes = [28, 8], strides = [1, 1]} : vector<56x120xf32> to vector<28x8xf32>
    %183 = vector.extract_strided_slice %26 {offsets = [28, 112], sizes = [28, 8], strides = [1, 1]} : vector<56x120xf32> to vector<28x8xf32>
    %cst_62 = arith.constant dense<0.000000e+00> : vector<28x28xf32>
    %184 = tpu.matmul %181, %182, %cst_62 {dimension_numbers = #tpu.dot_dimension_numbers<[1], [1], [0], [0], [0, 0, 1, 0], [], []>} : vector<28x8xf32>, vector<28x8xf32>, vector<28x28xf32> -> vector<28x28xf32>
    %cst_63 = arith.constant 0.353553385 : f32
    %185 = vector.broadcast %cst_63 : f32 to vector<28x28xf32>
    %186 = arith.mulf %184, %185 : vector<28x28xf32>
    %cst_64 = arith.constant dense<0xFF800000> : vector<28xf32>
    %187 = vector.multi_reduction <maximumf>, %186, %cst_64 [1] : vector<28x28xf32> to vector<28xf32>
    %188 = vector.shape_cast %187 : vector<28xf32> to vector<28x1xf32>
    %189 = vector.broadcast %188 : vector<28x1xf32> to vector<28x28xf32>
    %190 = arith.subf %186, %189 : vector<28x28xf32>
    %191 = math.exp %190 : vector<28x28xf32>
    %cst_65 = arith.constant dense<0.000000e+00> : vector<28xf32>
    %192 = vector.multi_reduction <add>, %191, %cst_65 [1] : vector<28x28xf32> to vector<28xf32>
    %193 = vector.shape_cast %192 : vector<28xf32> to vector<28x1xf32>
    %194 = tpu.reciprocal %193 {approx = true} : vector<28x1xf32> -> vector<28x1xf32>
    %195 = vector.broadcast %194 : vector<28x1xf32> to vector<28x28xf32>
    %196 = arith.mulf %191, %195 : vector<28x28xf32>
    %cst_66 = arith.constant dense<0.000000e+00> : vector<28x8xf32>
    %197 = tpu.matmul %196, %183, %cst_66 {dimension_numbers = #tpu.dot_dimension_numbers<[1], [0], [0], [1], [0, 0, 1, 1], [], []>} : vector<28x28xf32>, vector<28x8xf32>, vector<28x8xf32> -> vector<28x8xf32>
    %198 = tpu.concatenate %129, %146, %163, %180, %197 in 1 : vector<28x8xf32>, vector<28x8xf32>, vector<28x8xf32>, vector<28x8xf32>, vector<28x8xf32> -> vector<28x40xf32>
    %199 = tpu.concatenate %112, %198 in 0 : vector<28x40xf32>, vector<28x40xf32> -> vector<56x40xf32>
    %c0_67 = arith.constant 0 : index
    %c0_68 = arith.constant 0 : index
    %c0_69 = arith.constant 0 : index
    %200 = vector.load %arg6[%c0_67, %c0_68, %c0_69] : memref<2x40x40xf32, #tpu.memory_space<vmem>>, vector<1x40x40xf32>
    %201 = vector.shape_cast %200 : vector<1x40x40xf32> to vector<40x40xf32>
    %cst_70 = arith.constant dense<0.000000e+00> : vector<56x40xf32>
    %202 = tpu.matmul %199, %201, %cst_70 {dimension_numbers = #tpu.dot_dimension_numbers<[1], [0], [0], [1], [0, 0, 1, 1], [], []>} : vector<56x40xf32>, vector<40x40xf32>, vector<56x40xf32> -> vector<56x40xf32>
    %203 = vector.broadcast %16 : vector<1x40xf32> to vector<56x40xf32>
    %204 = arith.addf %202, %203 : vector<56x40xf32>
    %205 = arith.addf %11, %204 : vector<56x40xf32>
    %cst_71 = arith.constant dense<0.000000e+00> : vector<56xf32>
    %206 = vector.multi_reduction <add>, %205, %cst_71 [1] : vector<56x40xf32> to vector<56xf32>
    %207 = vector.shape_cast %206 : vector<56xf32> to vector<56x1xf32>
    %cst_72 = arith.constant 4.000000e+01 : f32
    %208 = vector.broadcast %cst_72 : f32 to vector<56x1xf32>
    %209 = arith.divf %207, %208 : vector<56x1xf32>
    %210 = vector.broadcast %209 : vector<56x1xf32> to vector<56x40xf32>
    %211 = arith.subf %205, %210 : vector<56x40xf32>
    %212 = arith.mulf %211, %211 : vector<56x40xf32>
    %cst_73 = arith.constant dense<0.000000e+00> : vector<56xf32>
    %213 = vector.multi_reduction <add>, %212, %cst_73 [1] : vector<56x40xf32> to vector<56xf32>
    %214 = vector.shape_cast %213 : vector<56xf32> to vector<56x1xf32>
    %cst_74 = arith.constant 4.000000e+01 : f32
    %215 = vector.broadcast %cst_74 : f32 to vector<56x1xf32>
    %216 = arith.divf %214, %215 : vector<56x1xf32>
    %cst_75 = arith.constant 9.99999974E-6 : f32
    %217 = vector.broadcast %cst_75 : f32 to vector<56x1xf32>
    %218 = arith.addf %216, %217 : vector<56x1xf32>
    %219 = math.rsqrt %218 : vector<56x1xf32>
    %220 = vector.broadcast %219 : vector<56x1xf32> to vector<56x40xf32>
    %221 = arith.mulf %211, %220 : vector<56x40xf32>
    %222 = vector.broadcast %17 : vector<1x40xf32> to vector<56x40xf32>
    %223 = arith.mulf %221, %222 : vector<56x40xf32>
    %224 = vector.broadcast %18 : vector<1x40xf32> to vector<56x40xf32>
    %225 = arith.addf %223, %224 : vector<56x40xf32>
    %c0_76 = arith.constant 0 : index
    %c0_77 = arith.constant 0 : index
    %c0_78 = arith.constant 0 : index
    %226 = vector.load %arg7[%c0_76, %c0_77, %c0_78] : memref<2x40x160xf32, #tpu.memory_space<vmem>>, vector<1x40x160xf32>
    %227 = vector.shape_cast %226 : vector<1x40x160xf32> to vector<40x160xf32>
    %cst_79 = arith.constant dense<0.000000e+00> : vector<56x160xf32>
    %228 = tpu.matmul %225, %227, %cst_79 {dimension_numbers = #tpu.dot_dimension_numbers<[1], [0], [0], [1], [0, 0, 1, 1], [], []>} : vector<56x40xf32>, vector<40x160xf32>, vector<56x160xf32> -> vector<56x160xf32>
    %229 = vector.broadcast %15 : vector<1x160xf32> to vector<56x160xf32>
    %230 = arith.addf %228, %229 : vector<56x160xf32>
    %cst_80 = arith.constant 5.000000e-01 : f32
    %231 = vector.broadcast %cst_80 : f32 to vector<56x160xf32>
    %232 = arith.mulf %231, %230 : vector<56x160xf32>
    %233 = arith.mulf %230, %230 : vector<56x160xf32>
    %234 = arith.mulf %233, %230 : vector<56x160xf32>
    %cst_81 = arith.constant 4.471500e-02 : f32
    %235 = vector.broadcast %cst_81 : f32 to vector<56x160xf32>
    %236 = arith.mulf %235, %234 : vector<56x160xf32>
    %237 = arith.addf %230, %236 : vector<56x160xf32>
    %cst_82 = arith.constant 0.797884583 : f32
    %238 = vector.broadcast %cst_82 : f32 to vector<56x160xf32>
    %239 = arith.mulf %238, %237 : vector<56x160xf32>
    %240 = math.tanh %239 : vector<56x160xf32>
    %cst_83 = arith.constant 1.000000e+00 : f32
    %241 = vector.broadcast %cst_83 : f32 to vector<56x160xf32>
    %242 = arith.addf %241, %240 : vector<56x160xf32>
    %243 = arith.mulf %232, %242 : vector<56x160xf32>
    %c0_84 = arith.constant 0 : index
    %c0_85 = arith.constant 0 : index
    %c0_86 = arith.constant 0 : index
    %244 = vector.load %arg8[%c0_84, %c0_85, %c0_86] : memref<2x160x40xf32, #tpu.memory_space<vmem>>, vector<1x160x40xf32>
    %245 = vector.shape_cast %244 : vector<1x160x40xf32> to vector<160x40xf32>
    %cst_87 = arith.constant dense<0.000000e+00> : vector<56x40xf32>
    %246 = tpu.matmul %243, %245, %cst_87 {dimension_numbers = #tpu.dot_dimension_numbers<[1], [0], [0], [1], [0, 0, 1, 1], [], []>} : vector<56x160xf32>, vector<160x40xf32>, vector<56x40xf32> -> vector<56x40xf32>
    %247 = vector.broadcast %19 : vector<1x40xf32> to vector<56x40xf32>
    %248 = arith.addf %246, %247 : vector<56x40xf32>
    %249 = arith.addf %225, %248 : vector<56x40xf32>
    %cst_88 = arith.constant dense<0.000000e+00> : vector<56xf32>
    %250 = vector.multi_reduction <add>, %249, %cst_88 [1] : vector<56x40xf32> to vector<56xf32>
    %251 = vector.shape_cast %250 : vector<56xf32> to vector<56x1xf32>
    %cst_89 = arith.constant 4.000000e+01 : f32
    %252 = vector.broadcast %cst_89 : f32 to vector<56x1xf32>
    %253 = arith.divf %251, %252 : vector<56x1xf32>
    %254 = vector.broadcast %253 : vector<56x1xf32> to vector<56x40xf32>
    %255 = arith.subf %249, %254 : vector<56x40xf32>
    %256 = arith.mulf %255, %255 : vector<56x40xf32>
    %cst_90 = arith.constant dense<0.000000e+00> : vector<56xf32>
    %257 = vector.multi_reduction <add>, %256, %cst_90 [1] : vector<56x40xf32> to vector<56xf32>
    %258 = vector.shape_cast %257 : vector<56xf32> to vector<56x1xf32>
    %cst_91 = arith.constant 4.000000e+01 : f32
    %259 = vector.broadcast %cst_91 : f32 to vector<56x1xf32>
    %260 = arith.divf %258, %259 : vector<56x1xf32>
    %cst_92 = arith.constant 9.99999974E-6 : f32
    %261 = vector.broadcast %cst_92 : f32 to vector<56x1xf32>
    %262 = arith.addf %260, %261 : vector<56x1xf32>
    %263 = math.rsqrt %262 : vector<56x1xf32>
    %264 = vector.broadcast %263 : vector<56x1xf32> to vector<56x40xf32>
    %265 = arith.mulf %255, %264 : vector<56x40xf32>
    %266 = vector.broadcast %20 : vector<1x40xf32> to vector<56x40xf32>
    %267 = arith.mulf %265, %266 : vector<56x40xf32>
    %268 = vector.broadcast %21 : vector<1x40xf32> to vector<56x40xf32>
    %269 = arith.addf %267, %268 : vector<56x40xf32>
    %c1 = arith.constant 1 : index
    %c0_93 = arith.constant 0 : index
    %c0_94 = arith.constant 0 : index
    %270 = vector.load %arg9[%c1, %c0_93, %c0_94] : memref<2x8x160xf32, #tpu.memory_space<vmem>>, vector<1x8x160xf32>
    %271 = vector.shape_cast %270 : vector<1x8x160xf32> to vector<8x160xf32>
    %272 = vector.extract_strided_slice %271 {offsets = [0, 0], sizes = [1, 120], strides = [1, 1]} : vector<8x160xf32> to vector<1x120xf32>
    %273 = vector.extract_strided_slice %271 {offsets = [1, 0], sizes = [1, 160], strides = [1, 1]} : vector<8x160xf32> to vector<1x160xf32>
    %274 = vector.extract_strided_slice %271 {offsets = [2, 0], sizes = [1, 40], strides = [1, 1]} : vector<8x160xf32> to vector<1x40xf32>
    %275 = vector.extract_strided_slice %271 {offsets = [3, 0], sizes = [1, 40], strides = [1, 1]} : vector<8x160xf32> to vector<1x40xf32>
    %276 = vector.extract_strided_slice %271 {offsets = [4, 0], sizes = [1, 40], strides = [1, 1]} : vector<8x160xf32> to vector<1x40xf32>
    %277 = vector.extract_strided_slice %271 {offsets = [5, 0], sizes = [1, 40], strides = [1, 1]} : vector<8x160xf32> to vector<1x40xf32>
    %278 = vector.extract_strided_slice %271 {offsets = [6, 0], sizes = [1, 40], strides = [1, 1]} : vector<8x160xf32> to vector<1x40xf32>
    %279 = vector.extract_strided_slice %271 {offsets = [7, 0], sizes = [1, 40], strides = [1, 1]} : vector<8x160xf32> to vector<1x40xf32>
    %c1_95 = arith.constant 1 : index
    %c0_96 = arith.constant 0 : index
    %c0_97 = arith.constant 0 : index
    %280 = vector.load %arg5[%c1_95, %c0_96, %c0_97] : memref<2x40x120xf32, #tpu.memory_space<vmem>>, vector<1x40x120xf32>
    %281 = vector.shape_cast %280 : vector<1x40x120xf32> to vector<40x120xf32>
    %cst_98 = arith.constant dense<0.000000e+00> : vector<56x120xf32>
    %282 = tpu.matmul %269, %281, %cst_98 {dimension_numbers = #tpu.dot_dimension_numbers<[1], [0], [0], [1], [0, 0, 1, 1], [], []>} : vector<56x40xf32>, vector<40x120xf32>, vector<56x120xf32> -> vector<56x120xf32>
    %283 = vector.broadcast %272 : vector<1x120xf32> to vector<56x120xf32>
    %284 = arith.addf %282, %283 : vector<56x120xf32>
    %285 = vector.extract_strided_slice %284 {offsets = [0, 0], sizes = [28, 8], strides = [1, 1]} : vector<56x120xf32> to vector<28x8xf32>
    %286 = vector.extract_strided_slice %284 {offsets = [0, 40], sizes = [28, 8], strides = [1, 1]} : vector<56x120xf32> to vector<28x8xf32>
    %287 = vector.extract_strided_slice %284 {offsets = [0, 80], sizes = [28, 8], strides = [1, 1]} : vector<56x120xf32> to vector<28x8xf32>
    %cst_99 = arith.constant dense<0.000000e+00> : vector<28x28xf32>
    %288 = tpu.matmul %285, %286, %cst_99 {dimension_numbers = #tpu.dot_dimension_numbers<[1], [1], [0], [0], [0, 0, 1, 0], [], []>} : vector<28x8xf32>, vector<28x8xf32>, vector<28x28xf32> -> vector<28x28xf32>
    %cst_100 = arith.constant 0.353553385 : f32
    %289 = vector.broadcast %cst_100 : f32 to vector<28x28xf32>
    %290 = arith.mulf %288, %289 : vector<28x28xf32>
    %cst_101 = arith.constant dense<0xFF800000> : vector<28xf32>
    %291 = vector.multi_reduction <maximumf>, %290, %cst_101 [1] : vector<28x28xf32> to vector<28xf32>
    %292 = vector.shape_cast %291 : vector<28xf32> to vector<28x1xf32>
    %293 = vector.broadcast %292 : vector<28x1xf32> to vector<28x28xf32>
    %294 = arith.subf %290, %293 : vector<28x28xf32>
    %295 = math.exp %294 : vector<28x28xf32>
    %cst_102 = arith.constant dense<0.000000e+00> : vector<28xf32>
    %296 = vector.multi_reduction <add>, %295, %cst_102 [1] : vector<28x28xf32> to vector<28xf32>
    %297 = vector.shape_cast %296 : vector<28xf32> to vector<28x1xf32>
    %298 = tpu.reciprocal %297 {approx = true} : vector<28x1xf32> -> vector<28x1xf32>
    %299 = vector.broadcast %298 : vector<28x1xf32> to vector<28x28xf32>
    %300 = arith.mulf %295, %299 : vector<28x28xf32>
    %cst_103 = arith.constant dense<0.000000e+00> : vector<28x8xf32>
    %301 = tpu.matmul %300, %287, %cst_103 {dimension_numbers = #tpu.dot_dimension_numbers<[1], [0], [0], [1], [0, 0, 1, 1], [], []>} : vector<28x28xf32>, vector<28x8xf32>, vector<28x8xf32> -> vector<28x8xf32>
    %302 = vector.extract_strided_slice %284 {offsets = [0, 8], sizes = [28, 8], strides = [1, 1]} : vector<56x120xf32> to vector<28x8xf32>
    %303 = vector.extract_strided_slice %284 {offsets = [0, 48], sizes = [28, 8], strides = [1, 1]} : vector<56x120xf32> to vector<28x8xf32>
    %304 = vector.extract_strided_slice %284 {offsets = [0, 88], sizes = [28, 8], strides = [1, 1]} : vector<56x120xf32> to vector<28x8xf32>
    %cst_104 = arith.constant dense<0.000000e+00> : vector<28x28xf32>
    %305 = tpu.matmul %302, %303, %cst_104 {dimension_numbers = #tpu.dot_dimension_numbers<[1], [1], [0], [0], [0, 0, 1, 0], [], []>} : vector<28x8xf32>, vector<28x8xf32>, vector<28x28xf32> -> vector<28x28xf32>
    %cst_105 = arith.constant 0.353553385 : f32
    %306 = vector.broadcast %cst_105 : f32 to vector<28x28xf32>
    %307 = arith.mulf %305, %306 : vector<28x28xf32>
    %cst_106 = arith.constant dense<0xFF800000> : vector<28xf32>
    %308 = vector.multi_reduction <maximumf>, %307, %cst_106 [1] : vector<28x28xf32> to vector<28xf32>
    %309 = vector.shape_cast %308 : vector<28xf32> to vector<28x1xf32>
    %310 = vector.broadcast %309 : vector<28x1xf32> to vector<28x28xf32>
    %311 = arith.subf %307, %310 : vector<28x28xf32>
    %312 = math.exp %311 : vector<28x28xf32>
    %cst_107 = arith.constant dense<0.000000e+00> : vector<28xf32>
    %313 = vector.multi_reduction <add>, %312, %cst_107 [1] : vector<28x28xf32> to vector<28xf32>
    %314 = vector.shape_cast %313 : vector<28xf32> to vector<28x1xf32>
    %315 = tpu.reciprocal %314 {approx = true} : vector<28x1xf32> -> vector<28x1xf32>
    %316 = vector.broadcast %315 : vector<28x1xf32> to vector<28x28xf32>
    %317 = arith.mulf %312, %316 : vector<28x28xf32>
    %cst_108 = arith.constant dense<0.000000e+00> : vector<28x8xf32>
    %318 = tpu.matmul %317, %304, %cst_108 {dimension_numbers = #tpu.dot_dimension_numbers<[1], [0], [0], [1], [0, 0, 1, 1], [], []>} : vector<28x28xf32>, vector<28x8xf32>, vector<28x8xf32> -> vector<28x8xf32>
    %319 = vector.extract_strided_slice %284 {offsets = [0, 16], sizes = [28, 8], strides = [1, 1]} : vector<56x120xf32> to vector<28x8xf32>
    %320 = vector.extract_strided_slice %284 {offsets = [0, 56], sizes = [28, 8], strides = [1, 1]} : vector<56x120xf32> to vector<28x8xf32>
    %321 = vector.extract_strided_slice %284 {offsets = [0, 96], sizes = [28, 8], strides = [1, 1]} : vector<56x120xf32> to vector<28x8xf32>
    %cst_109 = arith.constant dense<0.000000e+00> : vector<28x28xf32>
    %322 = tpu.matmul %319, %320, %cst_109 {dimension_numbers = #tpu.dot_dimension_numbers<[1], [1], [0], [0], [0, 0, 1, 0], [], []>} : vector<28x8xf32>, vector<28x8xf32>, vector<28x28xf32> -> vector<28x28xf32>
    %cst_110 = arith.constant 0.353553385 : f32
    %323 = vector.broadcast %cst_110 : f32 to vector<28x28xf32>
    %324 = arith.mulf %322, %323 : vector<28x28xf32>
    %cst_111 = arith.constant dense<0xFF800000> : vector<28xf32>
    %325 = vector.multi_reduction <maximumf>, %324, %cst_111 [1] : vector<28x28xf32> to vector<28xf32>
    %326 = vector.shape_cast %325 : vector<28xf32> to vector<28x1xf32>
    %327 = vector.broadcast %326 : vector<28x1xf32> to vector<28x28xf32>
    %328 = arith.subf %324, %327 : vector<28x28xf32>
    %329 = math.exp %328 : vector<28x28xf32>
    %cst_112 = arith.constant dense<0.000000e+00> : vector<28xf32>
    %330 = vector.multi_reduction <add>, %329, %cst_112 [1] : vector<28x28xf32> to vector<28xf32>
    %331 = vector.shape_cast %330 : vector<28xf32> to vector<28x1xf32>
    %332 = tpu.reciprocal %331 {approx = true} : vector<28x1xf32> -> vector<28x1xf32>
    %333 = vector.broadcast %332 : vector<28x1xf32> to vector<28x28xf32>
    %334 = arith.mulf %329, %333 : vector<28x28xf32>
    %cst_113 = arith.constant dense<0.000000e+00> : vector<28x8xf32>
    %335 = tpu.matmul %334, %321, %cst_113 {dimension_numbers = #tpu.dot_dimension_numbers<[1], [0], [0], [1], [0, 0, 1, 1], [], []>} : vector<28x28xf32>, vector<28x8xf32>, vector<28x8xf32> -> vector<28x8xf32>
    %336 = vector.extract_strided_slice %284 {offsets = [0, 24], sizes = [28, 8], strides = [1, 1]} : vector<56x120xf32> to vector<28x8xf32>
    %337 = vector.extract_strided_slice %284 {offsets = [0, 64], sizes = [28, 8], strides = [1, 1]} : vector<56x120xf32> to vector<28x8xf32>
    %338 = vector.extract_strided_slice %284 {offsets = [0, 104], sizes = [28, 8], strides = [1, 1]} : vector<56x120xf32> to vector<28x8xf32>
    %cst_114 = arith.constant dense<0.000000e+00> : vector<28x28xf32>
    %339 = tpu.matmul %336, %337, %cst_114 {dimension_numbers = #tpu.dot_dimension_numbers<[1], [1], [0], [0], [0, 0, 1, 0], [], []>} : vector<28x8xf32>, vector<28x8xf32>, vector<28x28xf32> -> vector<28x28xf32>
    %cst_115 = arith.constant 0.353553385 : f32
    %340 = vector.broadcast %cst_115 : f32 to vector<28x28xf32>
    %341 = arith.mulf %339, %340 : vector<28x28xf32>
    %cst_116 = arith.constant dense<0xFF800000> : vector<28xf32>
    %342 = vector.multi_reduction <maximumf>, %341, %cst_116 [1] : vector<28x28xf32> to vector<28xf32>
    %343 = vector.shape_cast %342 : vector<28xf32> to vector<28x1xf32>
    %344 = vector.broadcast %343 : vector<28x1xf32> to vector<28x28xf32>
    %345 = arith.subf %341, %344 : vector<28x28xf32>
    %346 = math.exp %345 : vector<28x28xf32>
    %cst_117 = arith.constant dense<0.000000e+00> : vector<28xf32>
    %347 = vector.multi_reduction <add>, %346, %cst_117 [1] : vector<28x28xf32> to vector<28xf32>
    %348 = vector.shape_cast %347 : vector<28xf32> to vector<28x1xf32>
    %349 = tpu.reciprocal %348 {approx = true} : vector<28x1xf32> -> vector<28x1xf32>
    %350 = vector.broadcast %349 : vector<28x1xf32> to vector<28x28xf32>
    %351 = arith.mulf %346, %350 : vector<28x28xf32>
    %cst_118 = arith.constant dense<0.000000e+00> : vector<28x8xf32>
    %352 = tpu.matmul %351, %338, %cst_118 {dimension_numbers = #tpu.dot_dimension_numbers<[1], [0], [0], [1], [0, 0, 1, 1], [], []>} : vector<28x28xf32>, vector<28x8xf32>, vector<28x8xf32> -> vector<28x8xf32>
    %353 = vector.extract_strided_slice %284 {offsets = [0, 32], sizes = [28, 8], strides = [1, 1]} : vector<56x120xf32> to vector<28x8xf32>
    %354 = vector.extract_strided_slice %284 {offsets = [0, 72], sizes = [28, 8], strides = [1, 1]} : vector<56x120xf32> to vector<28x8xf32>
    %355 = vector.extract_strided_slice %284 {offsets = [0, 112], sizes = [28, 8], strides = [1, 1]} : vector<56x120xf32> to vector<28x8xf32>
    %cst_119 = arith.constant dense<0.000000e+00> : vector<28x28xf32>
    %356 = tpu.matmul %353, %354, %cst_119 {dimension_numbers = #tpu.dot_dimension_numbers<[1], [1], [0], [0], [0, 0, 1, 0], [], []>} : vector<28x8xf32>, vector<28x8xf32>, vector<28x28xf32> -> vector<28x28xf32>
    %cst_120 = arith.constant 0.353553385 : f32
    %357 = vector.broadcast %cst_120 : f32 to vector<28x28xf32>
    %358 = arith.mulf %356, %357 : vector<28x28xf32>
    %cst_121 = arith.constant dense<0xFF800000> : vector<28xf32>
    %359 = vector.multi_reduction <maximumf>, %358, %cst_121 [1] : vector<28x28xf32> to vector<28xf32>
    %360 = vector.shape_cast %359 : vector<28xf32> to vector<28x1xf32>
    %361 = vector.broadcast %360 : vector<28x1xf32> to vector<28x28xf32>
    %362 = arith.subf %358, %361 : vector<28x28xf32>
    %363 = math.exp %362 : vector<28x28xf32>
    %cst_122 = arith.constant dense<0.000000e+00> : vector<28xf32>
    %364 = vector.multi_reduction <add>, %363, %cst_122 [1] : vector<28x28xf32> to vector<28xf32>
    %365 = vector.shape_cast %364 : vector<28xf32> to vector<28x1xf32>
    %366 = tpu.reciprocal %365 {approx = true} : vector<28x1xf32> -> vector<28x1xf32>
    %367 = vector.broadcast %366 : vector<28x1xf32> to vector<28x28xf32>
    %368 = arith.mulf %363, %367 : vector<28x28xf32>
    %cst_123 = arith.constant dense<0.000000e+00> : vector<28x8xf32>
    %369 = tpu.matmul %368, %355, %cst_123 {dimension_numbers = #tpu.dot_dimension_numbers<[1], [0], [0], [1], [0, 0, 1, 1], [], []>} : vector<28x28xf32>, vector<28x8xf32>, vector<28x8xf32> -> vector<28x8xf32>
    %370 = tpu.concatenate %301, %318, %335, %352, %369 in 1 : vector<28x8xf32>, vector<28x8xf32>, vector<28x8xf32>, vector<28x8xf32>, vector<28x8xf32> -> vector<28x40xf32>
    %371 = vector.extract_strided_slice %284 {offsets = [28, 0], sizes = [28, 8], strides = [1, 1]} : vector<56x120xf32> to vector<28x8xf32>
    %372 = vector.extract_strided_slice %284 {offsets = [28, 40], sizes = [28, 8], strides = [1, 1]} : vector<56x120xf32> to vector<28x8xf32>
    %373 = vector.extract_strided_slice %284 {offsets = [28, 80], sizes = [28, 8], strides = [1, 1]} : vector<56x120xf32> to vector<28x8xf32>
    %cst_124 = arith.constant dense<0.000000e+00> : vector<28x28xf32>
    %374 = tpu.matmul %371, %372, %cst_124 {dimension_numbers = #tpu.dot_dimension_numbers<[1], [1], [0], [0], [0, 0, 1, 0], [], []>} : vector<28x8xf32>, vector<28x8xf32>, vector<28x28xf32> -> vector<28x28xf32>
    %cst_125 = arith.constant 0.353553385 : f32
    %375 = vector.broadcast %cst_125 : f32 to vector<28x28xf32>
    %376 = arith.mulf %374, %375 : vector<28x28xf32>
    %cst_126 = arith.constant dense<0xFF800000> : vector<28xf32>
    %377 = vector.multi_reduction <maximumf>, %376, %cst_126 [1] : vector<28x28xf32> to vector<28xf32>
    %378 = vector.shape_cast %377 : vector<28xf32> to vector<28x1xf32>
    %379 = vector.broadcast %378 : vector<28x1xf32> to vector<28x28xf32>
    %380 = arith.subf %376, %379 : vector<28x28xf32>
    %381 = math.exp %380 : vector<28x28xf32>
    %cst_127 = arith.constant dense<0.000000e+00> : vector<28xf32>
    %382 = vector.multi_reduction <add>, %381, %cst_127 [1] : vector<28x28xf32> to vector<28xf32>
    %383 = vector.shape_cast %382 : vector<28xf32> to vector<28x1xf32>
    %384 = tpu.reciprocal %383 {approx = true} : vector<28x1xf32> -> vector<28x1xf32>
    %385 = vector.broadcast %384 : vector<28x1xf32> to vector<28x28xf32>
    %386 = arith.mulf %381, %385 : vector<28x28xf32>
    %cst_128 = arith.constant dense<0.000000e+00> : vector<28x8xf32>
    %387 = tpu.matmul %386, %373, %cst_128 {dimension_numbers = #tpu.dot_dimension_numbers<[1], [0], [0], [1], [0, 0, 1, 1], [], []>} : vector<28x28xf32>, vector<28x8xf32>, vector<28x8xf32> -> vector<28x8xf32>
    %388 = vector.extract_strided_slice %284 {offsets = [28, 8], sizes = [28, 8], strides = [1, 1]} : vector<56x120xf32> to vector<28x8xf32>
    %389 = vector.extract_strided_slice %284 {offsets = [28, 48], sizes = [28, 8], strides = [1, 1]} : vector<56x120xf32> to vector<28x8xf32>
    %390 = vector.extract_strided_slice %284 {offsets = [28, 88], sizes = [28, 8], strides = [1, 1]} : vector<56x120xf32> to vector<28x8xf32>
    %cst_129 = arith.constant dense<0.000000e+00> : vector<28x28xf32>
    %391 = tpu.matmul %388, %389, %cst_129 {dimension_numbers = #tpu.dot_dimension_numbers<[1], [1], [0], [0], [0, 0, 1, 0], [], []>} : vector<28x8xf32>, vector<28x8xf32>, vector<28x28xf32> -> vector<28x28xf32>
    %cst_130 = arith.constant 0.353553385 : f32
    %392 = vector.broadcast %cst_130 : f32 to vector<28x28xf32>
    %393 = arith.mulf %391, %392 : vector<28x28xf32>
    %cst_131 = arith.constant dense<0xFF800000> : vector<28xf32>
    %394 = vector.multi_reduction <maximumf>, %393, %cst_131 [1] : vector<28x28xf32> to vector<28xf32>
    %395 = vector.shape_cast %394 : vector<28xf32> to vector<28x1xf32>
    %396 = vector.broadcast %395 : vector<28x1xf32> to vector<28x28xf32>
    %397 = arith.subf %393, %396 : vector<28x28xf32>
    %398 = math.exp %397 : vector<28x28xf32>
    %cst_132 = arith.constant dense<0.000000e+00> : vector<28xf32>
    %399 = vector.multi_reduction <add>, %398, %cst_132 [1] : vector<28x28xf32> to vector<28xf32>
    %400 = vector.shape_cast %399 : vector<28xf32> to vector<28x1xf32>
    %401 = tpu.reciprocal %400 {approx = true} : vector<28x1xf32> -> vector<28x1xf32>
    %402 = vector.broadcast %401 : vector<28x1xf32> to vector<28x28xf32>
    %403 = arith.mulf %398, %402 : vector<28x28xf32>
    %cst_133 = arith.constant dense<0.000000e+00> : vector<28x8xf32>
    %404 = tpu.matmul %403, %390, %cst_133 {dimension_numbers = #tpu.dot_dimension_numbers<[1], [0], [0], [1], [0, 0, 1, 1], [], []>} : vector<28x28xf32>, vector<28x8xf32>, vector<28x8xf32> -> vector<28x8xf32>
    %405 = vector.extract_strided_slice %284 {offsets = [28, 16], sizes = [28, 8], strides = [1, 1]} : vector<56x120xf32> to vector<28x8xf32>
    %406 = vector.extract_strided_slice %284 {offsets = [28, 56], sizes = [28, 8], strides = [1, 1]} : vector<56x120xf32> to vector<28x8xf32>
    %407 = vector.extract_strided_slice %284 {offsets = [28, 96], sizes = [28, 8], strides = [1, 1]} : vector<56x120xf32> to vector<28x8xf32>
    %cst_134 = arith.constant dense<0.000000e+00> : vector<28x28xf32>
    %408 = tpu.matmul %405, %406, %cst_134 {dimension_numbers = #tpu.dot_dimension_numbers<[1], [1], [0], [0], [0, 0, 1, 0], [], []>} : vector<28x8xf32>, vector<28x8xf32>, vector<28x28xf32> -> vector<28x28xf32>
    %cst_135 = arith.constant 0.353553385 : f32
    %409 = vector.broadcast %cst_135 : f32 to vector<28x28xf32>
    %410 = arith.mulf %408, %409 : vector<28x28xf32>
    %cst_136 = arith.constant dense<0xFF800000> : vector<28xf32>
    %411 = vector.multi_reduction <maximumf>, %410, %cst_136 [1] : vector<28x28xf32> to vector<28xf32>
    %412 = vector.shape_cast %411 : vector<28xf32> to vector<28x1xf32>
    %413 = vector.broadcast %412 : vector<28x1xf32> to vector<28x28xf32>
    %414 = arith.subf %410, %413 : vector<28x28xf32>
    %415 = math.exp %414 : vector<28x28xf32>
    %cst_137 = arith.constant dense<0.000000e+00> : vector<28xf32>
    %416 = vector.multi_reduction <add>, %415, %cst_137 [1] : vector<28x28xf32> to vector<28xf32>
    %417 = vector.shape_cast %416 : vector<28xf32> to vector<28x1xf32>
    %418 = tpu.reciprocal %417 {approx = true} : vector<28x1xf32> -> vector<28x1xf32>
    %419 = vector.broadcast %418 : vector<28x1xf32> to vector<28x28xf32>
    %420 = arith.mulf %415, %419 : vector<28x28xf32>
    %cst_138 = arith.constant dense<0.000000e+00> : vector<28x8xf32>
    %421 = tpu.matmul %420, %407, %cst_138 {dimension_numbers = #tpu.dot_dimension_numbers<[1], [0], [0], [1], [0, 0, 1, 1], [], []>} : vector<28x28xf32>, vector<28x8xf32>, vector<28x8xf32> -> vector<28x8xf32>
    %422 = vector.extract_strided_slice %284 {offsets = [28, 24], sizes = [28, 8], strides = [1, 1]} : vector<56x120xf32> to vector<28x8xf32>
    %423 = vector.extract_strided_slice %284 {offsets = [28, 64], sizes = [28, 8], strides = [1, 1]} : vector<56x120xf32> to vector<28x8xf32>
    %424 = vector.extract_strided_slice %284 {offsets = [28, 104], sizes = [28, 8], strides = [1, 1]} : vector<56x120xf32> to vector<28x8xf32>
    %cst_139 = arith.constant dense<0.000000e+00> : vector<28x28xf32>
    %425 = tpu.matmul %422, %423, %cst_139 {dimension_numbers = #tpu.dot_dimension_numbers<[1], [1], [0], [0], [0, 0, 1, 0], [], []>} : vector<28x8xf32>, vector<28x8xf32>, vector<28x28xf32> -> vector<28x28xf32>
    %cst_140 = arith.constant 0.353553385 : f32
    %426 = vector.broadcast %cst_140 : f32 to vector<28x28xf32>
    %427 = arith.mulf %425, %426 : vector<28x28xf32>
    %cst_141 = arith.constant dense<0xFF800000> : vector<28xf32>
    %428 = vector.multi_reduction <maximumf>, %427, %cst_141 [1] : vector<28x28xf32> to vector<28xf32>
    %429 = vector.shape_cast %428 : vector<28xf32> to vector<28x1xf32>
    %430 = vector.broadcast %429 : vector<28x1xf32> to vector<28x28xf32>
    %431 = arith.subf %427, %430 : vector<28x28xf32>
    %432 = math.exp %431 : vector<28x28xf32>
    %cst_142 = arith.constant dense<0.000000e+00> : vector<28xf32>
    %433 = vector.multi_reduction <add>, %432, %cst_142 [1] : vector<28x28xf32> to vector<28xf32>
    %434 = vector.shape_cast %433 : vector<28xf32> to vector<28x1xf32>
    %435 = tpu.reciprocal %434 {approx = true} : vector<28x1xf32> -> vector<28x1xf32>
    %436 = vector.broadcast %435 : vector<28x1xf32> to vector<28x28xf32>
    %437 = arith.mulf %432, %436 : vector<28x28xf32>
    %cst_143 = arith.constant dense<0.000000e+00> : vector<28x8xf32>
    %438 = tpu.matmul %437, %424, %cst_143 {dimension_numbers = #tpu.dot_dimension_numbers<[1], [0], [0], [1], [0, 0, 1, 1], [], []>} : vector<28x28xf32>, vector<28x8xf32>, vector<28x8xf32> -> vector<28x8xf32>
    %439 = vector.extract_strided_slice %284 {offsets = [28, 32], sizes = [28, 8], strides = [1, 1]} : vector<56x120xf32> to vector<28x8xf32>
    %440 = vector.extract_strided_slice %284 {offsets = [28, 72], sizes = [28, 8], strides = [1, 1]} : vector<56x120xf32> to vector<28x8xf32>
    %441 = vector.extract_strided_slice %284 {offsets = [28, 112], sizes = [28, 8], strides = [1, 1]} : vector<56x120xf32> to vector<28x8xf32>
    %cst_144 = arith.constant dense<0.000000e+00> : vector<28x28xf32>
    %442 = tpu.matmul %439, %440, %cst_144 {dimension_numbers = #tpu.dot_dimension_numbers<[1], [1], [0], [0], [0, 0, 1, 0], [], []>} : vector<28x8xf32>, vector<28x8xf32>, vector<28x28xf32> -> vector<28x28xf32>
    %cst_145 = arith.constant 0.353553385 : f32
    %443 = vector.broadcast %cst_145 : f32 to vector<28x28xf32>
    %444 = arith.mulf %442, %443 : vector<28x28xf32>
    %cst_146 = arith.constant dense<0xFF800000> : vector<28xf32>
    %445 = vector.multi_reduction <maximumf>, %444, %cst_146 [1] : vector<28x28xf32> to vector<28xf32>
    %446 = vector.shape_cast %445 : vector<28xf32> to vector<28x1xf32>
    %447 = vector.broadcast %446 : vector<28x1xf32> to vector<28x28xf32>
    %448 = arith.subf %444, %447 : vector<28x28xf32>
    %449 = math.exp %448 : vector<28x28xf32>
    %cst_147 = arith.constant dense<0.000000e+00> : vector<28xf32>
    %450 = vector.multi_reduction <add>, %449, %cst_147 [1] : vector<28x28xf32> to vector<28xf32>
    %451 = vector.shape_cast %450 : vector<28xf32> to vector<28x1xf32>
    %452 = tpu.reciprocal %451 {approx = true} : vector<28x1xf32> -> vector<28x1xf32>
    %453 = vector.broadcast %452 : vector<28x1xf32> to vector<28x28xf32>
    %454 = arith.mulf %449, %453 : vector<28x28xf32>
    %cst_148 = arith.constant dense<0.000000e+00> : vector<28x8xf32>
    %455 = tpu.matmul %454, %441, %cst_148 {dimension_numbers = #tpu.dot_dimension_numbers<[1], [0], [0], [1], [0, 0, 1, 1], [], []>} : vector<28x28xf32>, vector<28x8xf32>, vector<28x8xf32> -> vector<28x8xf32>
    %456 = tpu.concatenate %387, %404, %421, %438, %455 in 1 : vector<28x8xf32>, vector<28x8xf32>, vector<28x8xf32>, vector<28x8xf32>, vector<28x8xf32> -> vector<28x40xf32>
    %457 = tpu.concatenate %370, %456 in 0 : vector<28x40xf32>, vector<28x40xf32> -> vector<56x40xf32>
    %c1_149 = arith.constant 1 : index
    %c0_150 = arith.constant 0 : index
    %c0_151 = arith.constant 0 : index
    %458 = vector.load %arg6[%c1_149, %c0_150, %c0_151] : memref<2x40x40xf32, #tpu.memory_space<vmem>>, vector<1x40x40xf32>
    %459 = vector.shape_cast %458 : vector<1x40x40xf32> to vector<40x40xf32>
    %cst_152 = arith.constant dense<0.000000e+00> : vector<56x40xf32>
    %460 = tpu.matmul %457, %459, %cst_152 {dimension_numbers = #tpu.dot_dimension_numbers<[1], [0], [0], [1], [0, 0, 1, 1], [], []>} : vector<56x40xf32>, vector<40x40xf32>, vector<56x40xf32> -> vector<56x40xf32>
    %461 = vector.broadcast %274 : vector<1x40xf32> to vector<56x40xf32>
    %462 = arith.addf %460, %461 : vector<56x40xf32>
    %463 = arith.addf %269, %462 : vector<56x40xf32>
    %cst_153 = arith.constant dense<0.000000e+00> : vector<56xf32>
    %464 = vector.multi_reduction <add>, %463, %cst_153 [1] : vector<56x40xf32> to vector<56xf32>
    %465 = vector.shape_cast %464 : vector<56xf32> to vector<56x1xf32>
    %cst_154 = arith.constant 4.000000e+01 : f32
    %466 = vector.broadcast %cst_154 : f32 to vector<56x1xf32>
    %467 = arith.divf %465, %466 : vector<56x1xf32>
    %468 = vector.broadcast %467 : vector<56x1xf32> to vector<56x40xf32>
    %469 = arith.subf %463, %468 : vector<56x40xf32>
    %470 = arith.mulf %469, %469 : vector<56x40xf32>
    %cst_155 = arith.constant dense<0.000000e+00> : vector<56xf32>
    %471 = vector.multi_reduction <add>, %470, %cst_155 [1] : vector<56x40xf32> to vector<56xf32>
    %472 = vector.shape_cast %471 : vector<56xf32> to vector<56x1xf32>
    %cst_156 = arith.constant 4.000000e+01 : f32
    %473 = vector.broadcast %cst_156 : f32 to vector<56x1xf32>
    %474 = arith.divf %472, %473 : vector<56x1xf32>
    %cst_157 = arith.constant 9.99999974E-6 : f32
    %475 = vector.broadcast %cst_157 : f32 to vector<56x1xf32>
    %476 = arith.addf %474, %475 : vector<56x1xf32>
    %477 = math.rsqrt %476 : vector<56x1xf32>
    %478 = vector.broadcast %477 : vector<56x1xf32> to vector<56x40xf32>
    %479 = arith.mulf %469, %478 : vector<56x40xf32>
    %480 = vector.broadcast %275 : vector<1x40xf32> to vector<56x40xf32>
    %481 = arith.mulf %479, %480 : vector<56x40xf32>
    %482 = vector.broadcast %276 : vector<1x40xf32> to vector<56x40xf32>
    %483 = arith.addf %481, %482 : vector<56x40xf32>
    %c1_158 = arith.constant 1 : index
    %c0_159 = arith.constant 0 : index
    %c0_160 = arith.constant 0 : index
    %484 = vector.load %arg7[%c1_158, %c0_159, %c0_160] : memref<2x40x160xf32, #tpu.memory_space<vmem>>, vector<1x40x160xf32>
    %485 = vector.shape_cast %484 : vector<1x40x160xf32> to vector<40x160xf32>
    %cst_161 = arith.constant dense<0.000000e+00> : vector<56x160xf32>
    %486 = tpu.matmul %483, %485, %cst_161 {dimension_numbers = #tpu.dot_dimension_numbers<[1], [0], [0], [1], [0, 0, 1, 1], [], []>} : vector<56x40xf32>, vector<40x160xf32>, vector<56x160xf32> -> vector<56x160xf32>
    %487 = vector.broadcast %273 : vector<1x160xf32> to vector<56x160xf32>
    %488 = arith.addf %486, %487 : vector<56x160xf32>
    %cst_162 = arith.constant 5.000000e-01 : f32
    %489 = vector.broadcast %cst_162 : f32 to vector<56x160xf32>
    %490 = arith.mulf %489, %488 : vector<56x160xf32>
    %491 = arith.mulf %488, %488 : vector<56x160xf32>
    %492 = arith.mulf %491, %488 : vector<56x160xf32>
    %cst_163 = arith.constant 4.471500e-02 : f32
    %493 = vector.broadcast %cst_163 : f32 to vector<56x160xf32>
    %494 = arith.mulf %493, %492 : vector<56x160xf32>
    %495 = arith.addf %488, %494 : vector<56x160xf32>
    %cst_164 = arith.constant 0.797884583 : f32
    %496 = vector.broadcast %cst_164 : f32 to vector<56x160xf32>
    %497 = arith.mulf %496, %495 : vector<56x160xf32>
    %498 = math.tanh %497 : vector<56x160xf32>
    %cst_165 = arith.constant 1.000000e+00 : f32
    %499 = vector.broadcast %cst_165 : f32 to vector<56x160xf32>
    %500 = arith.addf %499, %498 : vector<56x160xf32>
    %501 = arith.mulf %490, %500 : vector<56x160xf32>
    %c1_166 = arith.constant 1 : index
    %c0_167 = arith.constant 0 : index
    %c0_168 = arith.constant 0 : index
    %502 = vector.load %arg8[%c1_166, %c0_167, %c0_168] : memref<2x160x40xf32, #tpu.memory_space<vmem>>, vector<1x160x40xf32>
    %503 = vector.shape_cast %502 : vector<1x160x40xf32> to vector<160x40xf32>
    %cst_169 = arith.constant dense<0.000000e+00> : vector<56x40xf32>
    %504 = tpu.matmul %501, %503, %cst_169 {dimension_numbers = #tpu.dot_dimension_numbers<[1], [0], [0], [1], [0, 0, 1, 1], [], []>} : vector<56x160xf32>, vector<160x40xf32>, vector<56x40xf32> -> vector<56x40xf32>
    %505 = vector.broadcast %277 : vector<1x40xf32> to vector<56x40xf32>
    %506 = arith.addf %504, %505 : vector<56x40xf32>
    %507 = arith.addf %483, %506 : vector<56x40xf32>
    %cst_170 = arith.constant dense<0.000000e+00> : vector<56xf32>
    %508 = vector.multi_reduction <add>, %507, %cst_170 [1] : vector<56x40xf32> to vector<56xf32>
    %509 = vector.shape_cast %508 : vector<56xf32> to vector<56x1xf32>
    %cst_171 = arith.constant 4.000000e+01 : f32
    %510 = vector.broadcast %cst_171 : f32 to vector<56x1xf32>
    %511 = arith.divf %509, %510 : vector<56x1xf32>
    %512 = vector.broadcast %511 : vector<56x1xf32> to vector<56x40xf32>
    %513 = arith.subf %507, %512 : vector<56x40xf32>
    %514 = arith.mulf %513, %513 : vector<56x40xf32>
    %cst_172 = arith.constant dense<0.000000e+00> : vector<56xf32>
    %515 = vector.multi_reduction <add>, %514, %cst_172 [1] : vector<56x40xf32> to vector<56xf32>
    %516 = vector.shape_cast %515 : vector<56xf32> to vector<56x1xf32>
    %cst_173 = arith.constant 4.000000e+01 : f32
    %517 = vector.broadcast %cst_173 : f32 to vector<56x1xf32>
    %518 = arith.divf %516, %517 : vector<56x1xf32>
    %cst_174 = arith.constant 9.99999974E-6 : f32
    %519 = vector.broadcast %cst_174 : f32 to vector<56x1xf32>
    %520 = arith.addf %518, %519 : vector<56x1xf32>
    %521 = math.rsqrt %520 : vector<56x1xf32>
    %522 = vector.broadcast %521 : vector<56x1xf32> to vector<56x40xf32>
    %523 = arith.mulf %513, %522 : vector<56x40xf32>
    %524 = vector.broadcast %278 : vector<1x40xf32> to vector<56x40xf32>
    %525 = arith.mulf %523, %524 : vector<56x40xf32>
    %526 = vector.broadcast %279 : vector<1x40xf32> to vector<56x40xf32>
    %527 = arith.addf %525, %526 : vector<56x40xf32>
    %c0_175 = arith.constant 0 : index
    %c0_176 = arith.constant 0 : index
    %c0_177 = arith.constant 0 : index
    %528 = vector.load %arg10[%c0_175, %c0_176, %c0_177] : memref<1x56x40xf32, #tpu.memory_space<vmem>>, vector<1x56x40xf32>
    %529 = vector.shape_cast %528 : vector<1x56x40xf32> to vector<56x40xf32>
    %530 = vector.shape_cast %527 : vector<56x40xf32> to vector<1x56x40xf32>
    tpu.vector_store %arg10[%c0_175, %c0_176, %c0_177], %530 {strides = array<i32>} : memref<1x56x40xf32, #tpu.memory_space<vmem>>, vector<1x56x40xf32>,
    return
  }
  func.func @transform_0(%arg0: i32) -> (i32, i32, i32) {
    %c0_i32 = arith.constant 0 : i32
    %c0_i32_0 = arith.constant 0 : i32
    %c0_i32_1 = arith.constant 0 : i32
    return %arg0, %c0_i32, %c0_i32_0 : i32, i32, i32
  }
  func.func @transform_1(%arg0: i32) -> (i32, i32) {
    %c0_i32 = arith.constant 0 : i32
    %c0_i32_0 = arith.constant 0 : i32
    %c0_i32_1 = arith.constant 0 : i32
    return %c0_i32, %c0_i32_0 : i32, i32
  }
  func.func @transform_2(%arg0: i32) -> (i32, i32) {
    %c0_i32 = arith.constant 0 : i32
    %c0_i32_0 = arith.constant 0 : i32
    %c0_i32_1 = arith.constant 0 : i32
    return %c0_i32, %c0_i32_0 : i32, i32
  }
  func.func @transform_3(%arg0: i32) -> (i32, i32) {
    %c0_i32 = arith.constant 0 : i32
    %c0_i32_0 = arith.constant 0 : i32
    %c0_i32_1 = arith.constant 0 : i32
    return %c0_i32, %c0_i32_0 : i32, i32
  }
  func.func @transform_4(%arg0: i32) -> (i32, i32, i32) {
    %c0_i32 = arith.constant 0 : i32
    %c0_i32_0 = arith.constant 0 : i32
    %c0_i32_1 = arith.constant 0 : i32
    %c0_i32_2 = arith.constant 0 : i32
    return %c0_i32, %c0_i32_0, %c0_i32_1 : i32, i32, i32
  }
  func.func @transform_5(%arg0: i32) -> (i32, i32, i32) {
    %c0_i32 = arith.constant 0 : i32
    %c0_i32_0 = arith.constant 0 : i32
    %c0_i32_1 = arith.constant 0 : i32
    %c0_i32_2 = arith.constant 0 : i32
    return %c0_i32, %c0_i32_0, %c0_i32_1 : i32, i32, i32
  }
  func.func @transform_6(%arg0: i32) -> (i32, i32, i32) {
    %c0_i32 = arith.constant 0 : i32
    %c0_i32_0 = arith.constant 0 : i32
    %c0_i32_1 = arith.constant 0 : i32
    %c0_i32_2 = arith.constant 0 : i32
    return %c0_i32, %c0_i32_0, %c0_i32_1 : i32, i32, i32
  }
  func.func @transform_7(%arg0: i32) -> (i32, i32, i32) {
    %c0_i32 = arith.constant 0 : i32
    %c0_i32_0 = arith.constant 0 : i32
    %c0_i32_1 = arith.constant 0 : i32
    %c0_i32_2 = arith.constant 0 : i32
    return %c0_i32, %c0_i32_0, %c0_i32_1 : i32, i32, i32
  }
  func.func @transform_8(%arg0: i32) -> (i32, i32, i32) {
    %c0_i32 = arith.constant 0 : i32
    %c0_i32_0 = arith.constant 0 : i32
    %c0_i32_1 = arith.constant 0 : i32
    %c0_i32_2 = arith.constant 0 : i32
    return %c0_i32, %c0_i32_0, %c0_i32_1 : i32, i32, i32
  }
  func.func @transform_9(%arg0: i32) -> (i32, i32, i32) {
    %c0_i32 = arith.constant 0 : i32
    %c0_i32_0 = arith.constant 0 : i32
    %c0_i32_1 = arith.constant 0 : i32
    return %arg0, %c0_i32, %c0_i32_0 : i32, i32, i32
  }
}

</mosaic_0001>

<bundles_post_ra>
// kernel: tpu_custom_call.1
= control target key start
LH: loop header
LB: loop body
LE: loop exit
PB: predicated region body
PF: predicated region fallthrough
CT: control target
= control target key end

     0   :  { %s12586_s30 = smov 0   ;;  %s15598_s0 = inlined_call_operand.vmem [shape: f32[2,201,1024], index: 0, kind: input, shape index: {}]   ;;  %s15599_s1 = inlined_call_operand.vmem [shape: f32[40,201], index: 1, kind: input, shape index: {}]   ;;  %s15600_s2 = inlined_call_operand.vmem [shape: f32[56,1024], index: 2, kind: input, shape index: {}]   ;;  %s15601_s3 = inlined_call_operand.vmem [shape: f32[41,40], index: 3, kind: input, shape index: {}]   ;;  %s15602_s4 = inlined_call_operand.vmem [shape: f32[2,40,120], index: 4, kind: input, shape index: {}]   ;;  %s15603_s5 = inlined_call_operand.vmem [shape: f32[2,40,40], index: 5, kind: input, shape index: {}]   ;;  %s15604_s6 = inlined_call_operand.vmem [shape: f32[2,40,160], index: 6, kind: input, shape index: {}]   ;;  %s15605_s7 = inlined_call_operand.vmem [shape: f32[2,160,40], index: 7, kind: input, shape index: {}]   ;;  %s15606_s8 = inlined_call_operand.vmem [shape: f32[2,8,160], index: 8, kind: input, shape index: {}]   ;;  %s15607_s9 = inlined_call_operand.vmem [shape: f32[2,56,40], index: 9, kind: output, shape index: {}]  }
   0x1 LB: > { %s9309_s10 = sadd.s32 4294967295, %s12515_s30   ;;  %p9313_p0 = scmp.ge.s32.totalorder %s12515_s30, 1  ;;  %s12515_s30 = sphi %s12586_s30, %s19_s30  }
   0x2   : > { %p287_p1 = scmp.lt.s32.totalorder %s12515_s30, 3 }
   0x4   : > { %p288_p2 = pnand %p9313_p0, %p287_p1 }
   0x6   : > { %291 = sbr.rel (%p288_p2) target bundleno = 14732 (0x398c), region = 56 }
   0xd   : > { %p323_p3 = scmp.lt.s32.totalorder %s9309_s10, 1  ;;  %v12597_v0 = vld [vmem:[%s15599_s1 + $0x8] sm:$0xff]  ;;  %vm551_vm0 = vcmask 596992   ;;  %vm567_vm1 = vcmask 1040384   ;;  %vm12517_vm2 = vmmov 1   ;;  %vm12520_vm4 = vmmov 0  }
   0xe   : > { %9318 = vmatprep.mubr.msk.f32.mxu0 %vm551_vm0, %v12597_v0  ;;  %9325 = vmatprep.mubr.msk.f32.mxu1 %vm551_vm0, %v12597_v0  ;;  %vm12708_vm3 = vmpackc.low %vm567_vm1, %vm12517_vm2  ;;  %vm1438_vm5 = vcmask 326656   ;;  %vm1704_vm6 = vcmask 64512   ;;  %s12521_s19 = smov 88   ;;  %vm1879_vm7 = vcmask 1043456   ;;  %vm1810_vm9 = vcmask 228352   ;;  %s12522_s20 = smov 48  }
   0xf   : > { %s15675_s10 = smov (!%p323_p3, %s9309_s10), 1  ;;  %vm13258_vm8 = vmpackc.low %vm1704_vm6, %vm1704_vm6  ;;  %vm1820_vm10 = vcmask 224256   ;;  %s12523_s21 = smov 80   ;;  %vm3135_vm12 = vcmask 130048   ;;  %vm3140_vm13 = vcmask 195584   ;;  %vm3145_vm14 = vcmask 261120  }
  0x10   : > { %s11644_s13 = smul.u32 1664, %s15675_s10  ;;  %s12524_s22 = smov 120   ;;  %vm13294_vm11 = vmpackc.low %vm1879_vm7, %vm12517_vm2 }
  0x11   : > { %s12525_s23 = smov 40   ;;  %s12526_s24 = smov 72  }
  0x12   : > { %s12609_s16 = scalar_lea.vmem %s15598_s0, %s11644_s13  ;;  %s15621_s25 = smov 64  }
  0x13   : > { %v344_v1 = vld [vmem:[%s12609_s16 + $0x8] sm:$0xff]  ;;  %v343_v3 = vld [vmem:[%s12609_s16] sm:$0xff]  ;;  %v346_v16 = vld [vmem:[%s12609_s16 + $0x18] sm:$0xff]  ;;  %s12528_s26 = smov 112   ;;  %s15619_s27 = smov 104  }
  0x14   : > { %v352_v2 = vld [vmem:[%s12609_s16 + $0x48] sm:$0xff]  ;;  %v351_v5 = vld [vmem:[%s12609_s16 + $0x40] sm:$0xff]  ;;  %v354_v20 = vld [vmem:[%s12609_s16 + $0x58] sm:$0xff]  ;;  %s12530_s28 = smov 32   ;;  %s12531_s29 = smov 24  }
  0x15   : > { %v10807_v4 = vpack.c.bf16 %v352_v2, %v344_v1  ;;  %v360_v6 = vld [vmem:[%s12609_s16 + $0x88] sm:$0xff]  ;;  %v10809_v8 = vpack.c.bf16 %v351_v5, %v343_v3  ;;  %v359_v10 = vld [vmem:[%s12609_s16 + $0x80] sm:$0xff]  ;;  %v10861_v22 = vpack.c.bf16 %v354_v20, %v346_v16  ;;  %v345_v23 = vld [vmem:[%s12609_s16 + $0x10] sm:$0xff]  ;;  %s15617_s11 = smov 56   ;;  %s15615_s12 = smov 96  }
  0x16   : > { %v368_v7 = vld [vmem:[%s12609_s16 + $0xc8] sm:$0xff]  ;;  %v367_v11 = vld [vmem:[%s12609_s16 + $0xc0] sm:$0xff]  ;;  %v353_v24 = vld [vmem:[%s12609_s16 + $0x50] sm:$0xff]  ;;  %s15625_s13 = smov 16   ;;  %s15623_s14 = smov 8  }
  0x17   : > { %v10811_v9 = vpack.c.bf16 %v368_v7, %v360_v6  ;;  %v376_v12 = vld [vmem:[%s12609_s16 + $0x108] sm:$0xff]  ;;  %10808 = vmatprep.subr.bf16.mxu0 %v10807_v4  ;;  %v10813_v14 = vpack.c.bf16 %v367_v11, %v359_v10  ;;  %v375_v15 = vld [vmem:[%s12609_s16 + $0x100] sm:$0xff]  ;;  %v10863_v25 = vpack.c.bf16 %v353_v24, %v345_v23  ;;  %v362_v26 = vld [vmem:[%s12609_s16 + $0x98] sm:$0xff]  ;;  %10862 = vmatprep.subr.bf16.mxu1 %v10861_v22 }
  0x18   : > { %v384_v13 = vld [vmem:[%s12609_s16 + $0x148] sm:$0xff]  ;;  %10810 = vmatpush1.bf16.msra.mxu0 %v10809_v8  ;;  %v383_v18 = vld [vmem:[%s12609_s16 + $0x140] sm:$0xff]  ;;  %v370_v27 = vld [vmem:[%s12609_s16 + $0xd8] sm:$0xff] }
  0x19   : > { %10812 = vmatprep.subr.bf16.mxu0 %v10811_v9  ;;  %v10815_v17 = vpack.c.bf16 %v384_v13, %v376_v12  ;;  %v392_v19 = vld [vmem:[%s12609_s16 + $0x188] sm:$0xff]  ;;  %v10817_v28 = vpack.c.bf16 %v383_v18, %v375_v15  ;;  %v391_v29 = vld [vmem:[%s12609_s16 + $0x180] sm:$0xff]  ;;  %v10865_v30 = vpack.c.bf16 %v370_v27, %v362_v26  ;;  %v361_v31 = vld [vmem:[%s12609_s16 + $0x90] sm:$0xff]  ;;  %10864 = vmatpush1.bf16.msra.mxu1 %v10863_v25 }
  0x1a   : > { %v400_v21 = vld [vmem:[%s12609_s16 + $0x1c8] sm:$0xff]  ;;  %v399_v33 = vld [vmem:[%s12609_s16 + $0x1c0] sm:$0xff]  ;;  %v369_v35 = vld [vmem:[%s12609_s16 + $0xd0] sm:$0xff] }
  0x1b   : > { %v10819_v32 = vpack.c.bf16 %v400_v21, %v392_v19  ;;  %v408_v34 = vld [vmem:[%s12609_s16 + $0x208] sm:$0xff]  ;;  %10866 = vmatprep.subr.bf16.mxu1 %v10865_v30  ;;  %v10867_v37 = vpack.c.bf16 %v369_v35, %v361_v31  ;;  %v378_v38 = vld [vmem:[%s12609_s16 + $0x118] sm:$0xff]  ;;  %v377_v41 = vld [vmem:[%s12609_s16 + $0x110] sm:$0xff]  ;;  %v10821_v43 = vpack.c.bf16 %v399_v33, %v391_v29 }
  0x1c   : > { %10814 = vmatpush1.bf16.msra.mxu0 %v10813_v14  ;;  %v416_v36 = vld [vmem:[%s12609_s16 + $0x248] sm:$0xff]  ;;  %v386_v39 = vld [vmem:[%s12609_s16 + $0x158] sm:$0xff]  ;;  %v385_v42 = vld [vmem:[%s12609_s16 + $0x150] sm:$0xff] }
  0x1d   : > { %10816 = vmatprep.subr.bf16.mxu0 %v10815_v17  ;;  %v10869_v40 = vpack.c.bf16 %v386_v39, %v378_v38  ;;  %v407_v44 = vld [vmem:[%s12609_s16 + $0x200] sm:$0xff]  ;;  %v394_v45 = vld [vmem:[%s12609_s16 + $0x198] sm:$0xff]  ;;  %v10823_v46 = vpack.c.bf16 %v416_v36, %v408_v34  ;;  %10868 = vmatpush1.bf16.msra.mxu1 %v10867_v37  ;;  %v424_v48 = vld [vmem:[%s12609_s16 + $0x288] sm:$0xff]  ;;  %v10871_v49 = vpack.c.bf16 %v385_v42, %v377_v41 }
  0x1e   : > { %v415_v47 = vld [vmem:[%s12609_s16 + $0x240] sm:$0xff]  ;;  %v402_v50 = vld [vmem:[%s12609_s16 + $0x1d8] sm:$0xff]  ;;  %v432_v51 = vld [vmem:[%s12609_s16 + $0x2c8] sm:$0xff] }
  0x1f   : > { %10870 = vmatprep.subr.bf16.mxu1 %v10869_v40  ;;  %v10873_v52 = vpack.c.bf16 %v402_v50, %v394_v45  ;;  %v393_v53 = vld [vmem:[%s12609_s16 + $0x190] sm:$0xff]  ;;  %v410_v55 = vld [vmem:[%s12609_s16 + $0x218] sm:$0xff]  ;;  %v10825_v57 = vpack.c.bf16 %v415_v47, %v407_v44  ;;  %v10827_v58 = vpack.c.bf16 %v432_v51, %v424_v48  ;;  %v423_v59 = vld [vmem:[%s12609_s16 + $0x280] sm:$0xff] }
  0x20   : > { %10818 = vmatpush1.bf16.msra.mxu0 %v10817_v28  ;;  %v401_v54 = vld [vmem:[%s12609_s16 + $0x1d0] sm:$0xff]  ;;  %v418_v56 = vld [vmem:[%s12609_s16 + $0x258] sm:$0xff]  ;;  %v431_v60 = vld [vmem:[%s12609_s16 + $0x2c0] sm:$0xff] }
  0x21   : > { %10820 = vmatprep.subr.bf16.mxu0 %v10819_v32  ;;  %10872 = vmatpush1.bf16.msra.mxu1 %v10871_v49  ;;  %v440_v61 = vld [vmem:[%s12609_s16 + $0x308] sm:$0xff]  ;;  %v10875_v62 = vpack.c.bf16 %v401_v54, %v393_v53  ;;  %v10877_v1 = vpack.c.bf16 %v418_v56, %v410_v55  ;;  %v409_v2 = vld [vmem:[%s12609_s16 + $0x210] sm:$0xff]  ;;  %v426_v4 = vld [vmem:[%s12609_s16 + $0x298] sm:$0xff]  ;;  %v10829_v6 = vpack.c.bf16 %v431_v60, %v423_v59 }
  0x22   : > { %v448_v63 = vld [vmem:[%s12609_s16 + $0x348] sm:$0xff]  ;;  %10874 = vmatprep.subr.bf16.mxu1 %v10873_v52  ;;  %v417_v3 = vld [vmem:[%s12609_s16 + $0x250] sm:$0xff]  ;;  %v434_v5 = vld [vmem:[%s12609_s16 + $0x2d8] sm:$0xff] }
  0x23   : > { %v10831_v7 = vpack.c.bf16 %v448_v63, %v440_v61  ;;  %v439_v8 = vld [vmem:[%s12609_s16 + $0x300] sm:$0xff]  ;;  %v456_v10 = vld [vmem:[%s12609_s16 + $0x388] sm:$0xff]  ;;  %v10879_v11 = vpack.c.bf16 %v417_v3, %v409_v2  ;;  %v10881_v13 = vpack.c.bf16 %v434_v5, %v426_v4  ;;  %v425_v14 = vld [vmem:[%s12609_s16 + $0x290] sm:$0xff] }
  0x24   : > { %10822 = vmatpush1.bf16.msra.mxu0 %v10821_v43  ;;  %v447_v9 = vld [vmem:[%s12609_s16 + $0x340] sm:$0xff]  ;;  %v464_v12 = vld [vmem:[%s12609_s16 + $0x3c8] sm:$0xff]  ;;  %v433_v15 = vld [vmem:[%s12609_s16 + $0x2d0] sm:$0xff] }
  0x25   : > { %10824 = vmatprep.subr.bf16.mxu0 %v10823_v46  ;;  %10876 = vmatpush1.bf16.msra.mxu1 %v10875_v62  ;;  %v442_v16 = vld [vmem:[%s12609_s16 + $0x318] sm:$0xff]  ;;  %v10833_v18 = vpack.c.bf16 %v447_v9, %v439_v8  ;;  %v10835_v19 = vpack.c.bf16 %v464_v12, %v456_v10  ;;  %v455_v20 = vld [vmem:[%s12609_s16 + $0x380] sm:$0xff]  ;;  %v472_v22 = vld [vmem:[%s12609_s16 + $0x408] sm:$0xff]  ;;  %v10883_v23 = vpack.c.bf16 %v433_v15, %v425_v14 }
  0x26   : > { %10878 = vmatprep.subr.bf16.mxu1 %v10877_v1  ;;  %v450_v17 = vld [vmem:[%s12609_s16 + $0x358] sm:$0xff]  ;;  %v463_v21 = vld [vmem:[%s12609_s16 + $0x3c0] sm:$0xff]  ;;  %v480_v24 = vld [vmem:[%s12609_s16 + $0x448] sm:$0xff] }
  0x27   : > { %v10885_v25 = vpack.c.bf16 %v450_v17, %v442_v16  ;;  %v441_v26 = vld [vmem:[%s12609_s16 + $0x310] sm:$0xff]  ;;  %v458_v28 = vld [vmem:[%s12609_s16 + $0x398] sm:$0xff]  ;;  %v10837_v30 = vpack.c.bf16 %v463_v21, %v455_v20  ;;  %v10839_v31 = vpack.c.bf16 %v480_v24, %v472_v22  ;;  %v471_v32 = vld [vmem:[%s12609_s16 + $0x400] sm:$0xff] }
  0x28   : > { %10826 = vmatpush1.bf16.msra.mxu0 %v10825_v57  ;;  %v449_v27 = vld [vmem:[%s12609_s16 + $0x350] sm:$0xff]  ;;  %v466_v29 = vld [vmem:[%s12609_s16 + $0x3d8] sm:$0xff]  ;;  %v479_v33 = vld [vmem:[%s12609_s16 + $0x440] sm:$0xff] }
  0x29   : > { %10828 = vmatprep.subr.bf16.mxu0 %v10827_v58  ;;  %10880 = vmatpush1.bf16.msra.mxu1 %v10879_v11  ;;  %v488_v34 = vld [vmem:[%s12609_s16 + $0x488] sm:$0xff]  ;;  %v10887_v35 = vpack.c.bf16 %v449_v27, %v441_v26  ;;  %v10889_v37 = vpack.c.bf16 %v466_v29, %v458_v28  ;;  %v457_v38 = vld [vmem:[%s12609_s16 + $0x390] sm:$0xff]  ;;  %v474_v40 = vld [vmem:[%s12609_s16 + $0x418] sm:$0xff]  ;;  %v10841_v42 = vpack.c.bf16 %v479_v33, %v471_v32 }
  0x2a   : > { %10882 = vmatprep.subr.bf16.mxu1 %v10881_v13  ;;  %v496_v36 = vld [vmem:[%s12609_s16 + $0x4c8] sm:$0xff]  ;;  %v465_v39 = vld [vmem:[%s12609_s16 + $0x3d0] sm:$0xff]  ;;  %v482_v41 = vld [vmem:[%s12609_s16 + $0x458] sm:$0xff] }
  0x2b   : > { %v10843_v43 = vpack.c.bf16 %v496_v36, %v488_v34  ;;  %v487_v44 = vld [vmem:[%s12609_s16 + $0x480] sm:$0xff]  ;;  %v504_v46 = vld [vmem:[%s12609_s16 + $0x508] sm:$0xff]  ;;  %v10891_v47 = vpack.c.bf16 %v465_v39, %v457_v38  ;;  %v10893_v49 = vpack.c.bf16 %v482_v41, %v474_v40  ;;  %v473_v50 = vld [vmem:[%s12609_s16 + $0x410] sm:$0xff] }
  0x2c   : > { %10830 = vmatpush1.bf16.msra.mxu0 %v10829_v6  ;;  %v495_v45 = vld [vmem:[%s12609_s16 + $0x4c0] sm:$0xff]  ;;  %v512_v48 = vld [vmem:[%s12609_s16 + $0x548] sm:$0xff]  ;;  %v481_v51 = vld [vmem:[%s12609_s16 + $0x450] sm:$0xff] }
  0x2d   : > { %10832 = vmatprep.subr.bf16.mxu0 %v10831_v7  ;;  %10884 = vmatpush1.bf16.msra.mxu1 %v10883_v23  ;;  %v490_v52 = vld [vmem:[%s12609_s16 + $0x498] sm:$0xff]  ;;  %v10845_v54 = vpack.c.bf16 %v495_v45, %v487_v44  ;;  %v10847_v55 = vpack.c.bf16 %v512_v48, %v504_v46  ;;  %v503_v56 = vld [vmem:[%s12609_s16 + $0x500] sm:$0xff]  ;;  %v520_v58 = vld [vmem:[%s12609_s16 + $0x588] sm:$0xff]  ;;  %v10895_v59 = vpack.c.bf16 %v481_v51, %v473_v50 }
  0x2e   : > { %10886 = vmatprep.subr.bf16.mxu1 %v10885_v25  ;;  %v498_v53 = vld [vmem:[%s12609_s16 + $0x4d8] sm:$0xff]  ;;  %v511_v57 = vld [vmem:[%s12609_s16 + $0x540] sm:$0xff]  ;;  %v528_v60 = vld [vmem:[%s12609_s16 + $0x5c8] sm:$0xff] }
  0x2f   : > { %v10897_v61 = vpack.c.bf16 %v498_v53, %v490_v52  ;;  %v489_v62 = vld [vmem:[%s12609_s16 + $0x490] sm:$0xff]  ;;  %v506_v1 = vld [vmem:[%s12609_s16 + $0x518] sm:$0xff]  ;;  %v10849_v3 = vpack.c.bf16 %v511_v57, %v503_v56  ;;  %v10851_v4 = vpack.c.bf16 %v528_v60, %v520_v58  ;;  %v519_v5 = vld [vmem:[%s12609_s16 + $0x580] sm:$0xff] }
  0x30   : > { %10834 = vmatpush1.bf16.msra.mxu0 %v10833_v18  ;;  %v497_v63 = vld [vmem:[%s12609_s16 + $0x4d0] sm:$0xff]  ;;  %v514_v2 = vld [vmem:[%s12609_s16 + $0x558] sm:$0xff]  ;;  %v527_v6 = vld [vmem:[%s12609_s16 + $0x5c0] sm:$0xff] }
  0x31   : > { %10836 = vmatprep.subr.bf16.mxu0 %v10835_v19  ;;  %10888 = vmatpush1.bf16.msra.mxu1 %v10887_v35  ;;  %v536_v7 = vld [vmem:[%s12609_s16 + $0x608] sm:$0xff]  ;;  %v10899_v8 = vpack.c.bf16 %v497_v63, %v489_v62  ;;  %v10901_v10 = vpack.c.bf16 %v514_v2, %v506_v1  ;;  %v505_v11 = vld [vmem:[%s12609_s16 + $0x510] sm:$0xff]  ;;  %v522_v13 = vld [vmem:[%s12609_s16 + $0x598] sm:$0xff]  ;;  %v10853_v15 = vpack.c.bf16 %v527_v6, %v519_v5 }
  0x32   : > { %10890 = vmatprep.subr.bf16.mxu1 %v10889_v37  ;;  %v544_v9 = vld [vmem:[%s12609_s16 + $0x648] sm:$0x1]  ;;  %v513_v12 = vld [vmem:[%s12609_s16 + $0x550] sm:$0xff]  ;;  %v530_v14 = vld [vmem:[%s12609_s16 + $0x5d8] sm:$0xff] }
  0x33   : > { %v10855_v17 = vpack.c.bf16 %v544_v9, %v536_v7  ;;  %v535_v18 = vld [vmem:[%s12609_s16 + $0x600] sm:$0xff]  ;;  %v348_v20 = vld [vmem:[%s12609_s16 + $0x28] sm:$0xff]  ;;  %v10903_v21 = vpack.c.bf16 %v513_v12, %v505_v11  ;;  %v10905_v23 = vpack.c.bf16 %v530_v14, %v522_v13  ;;  %v521_v24 = vld [vmem:[%s12609_s16 + $0x590] sm:$0xff] }
  0x34   : > { %10838 = vmatpush1.bf16.msra.mxu0 %v10837_v30  ;;  %v543_v19 = vld [vmem:[%s12609_s16 + $0x640] sm:$0x1]  ;;  %v356_v22 = vld [vmem:[%s12609_s16 + $0x68] sm:$0xff]  ;;  %v529_v25 = vld [vmem:[%s12609_s16 + $0x5d0] sm:$0xff] }
  0x35   : > { %10840 = vmatprep.subr.bf16.mxu0 %v10839_v31  ;;  %10892 = vmatpush1.bf16.msra.mxu1 %v10891_v47  ;;  %v538_v26 = vld [vmem:[%s12609_s16 + $0x618] sm:$0xff]  ;;  %v10858_v28 = vpack.c.bf16 %v543_v19, %v535_v18  ;;  %v10915_v29 = vpack.c.bf16 %v356_v22, %v348_v20  ;;  %v347_v30 = vld [vmem:[%s12609_s16 + $0x20] sm:$0xff]  ;;  %v364_v32 = vld [vmem:[%s12609_s16 + $0xa8] sm:$0xff]  ;;  %v10907_v33 = vpack.c.bf16 %v529_v25, %v521_v24 }
  0x36   : > { %10894 = vmatprep.subr.bf16.mxu1 %v10893_v49  ;;  %v546_v27 = vld [vmem:[%s12609_s16 + $0x658] sm:$0x1]  ;;  %v355_v31 = vld [vmem:[%s12609_s16 + $0x60] sm:$0xff]  ;;  %v372_v34 = vld [vmem:[%s12609_s16 + $0xe8] sm:$0xff] }
  0x37   : > { %v10909_v35 = vpack.c.bf16 %v546_v27, %v538_v26  ;;  %v537_v36 = vld [vmem:[%s12609_s16 + $0x610] sm:$0xff]  ;;  %v350_v38 = vld [vmem:[%s12609_s16 + $0x38] sm:$0xff]  ;;  %v12735_v40 = vld [vmem:[%s15599_s1] sm:$0xff]  ;;  %v10917_v41 = vpack.c.bf16 %v355_v31, %v347_v30 }
  0x38   : > { %10842 = vmatpush1.bf16.msra.mxu0 %v10841_v42  ;;  %v545_v37 = vld [vmem:[%s12609_s16 + $0x650] sm:$0x1]  ;;  %v358_v39 = vld [vmem:[%s12609_s16 + $0x78] sm:$0xff]  ;;  %v363_v44 = vld [vmem:[%s12609_s16 + $0xa0] sm:$0xff] }
  0x39   : > { %10844 = vmatprep.subr.bf16.mxu0 %v10843_v43  ;;  %10896 = vmatpush1.bf16.msra.mxu1 %v10895_v59  ;;  %v12740_v42 = vld [vmem:[%s15599_s1 + $0x18] sm:$0xff]  ;;  %v10919_v43 = vpack.c.bf16 %v372_v34, %v364_v32  ;;  %v371_v45 = vld [vmem:[%s12609_s16 + $0xe0] sm:$0xff]  ;;  %v10912_v46 = vpack.c.bf16 %v545_v37, %v537_v36  ;;  %v380_v47 = vld [vmem:[%s12609_s16 + $0x128] sm:$0xff]  ;;  %v10969_v49 = vpack.c.bf16 %v358_v39, %v350_v38 }
  0x3a   : > { %10898 = vmatprep.subr.bf16.mxu1 %v10897_v61  ;;  %v388_v48 = vld [vmem:[%s12609_s16 + $0x168] sm:$0xff]  ;;  %v349_v50 = vld [vmem:[%s12609_s16 + $0x30] sm:$0xff]  ;;  %v10921_v53 = vpack.c.bf16 %v371_v45, %v363_v44  ;;  %v379_v58 = vld [vmem:[%s12609_s16 + $0x120] sm:$0xff] }
  0x3b   : > { %v357_v51 = vld [vmem:[%s12609_s16 + $0x70] sm:$0xff]  ;;  %v12763_v56 = vld [vmem:[%s15599_s1 + $0x28] sm:$0xff]  ;;  %v10923_v57 = vpack.c.bf16 %v388_v48, %v380_v47  ;;  %v387_v59 = vld [vmem:[%s12609_s16 + $0x160] sm:$0xff] }
  0x3c   : > { %10846 = vmatpush1.bf16.msra.mxu0 %v10845_v54  ;;  %v12756_v52 = vld [vmem:[%s15599_s1 + $0x10] sm:$0xff]  ;;  %v366_v54 = vld [vmem:[%s12609_s16 + $0xb8] sm:$0xff]  ;;  %v396_v60 = vld [vmem:[%s12609_s16 + $0x1a8] sm:$0xff]  ;;  %v10971_v62 = vpack.c.bf16 %v357_v51, %v349_v50 }
  0x3d   : > { %10848 = vmatprep.subr.bf16.mxu0 %v10847_v55  ;;  %10900 = vmatpush1.bf16.msra.mxu1 %v10899_v8  ;;  %v374_v55 = vld [vmem:[%s12609_s16 + $0xf8] sm:$0xff]  ;;  %v404_v61 = vld [vmem:[%s12609_s16 + $0x1e8] sm:$0xff]  ;;  %v365_v1 = vld [vmem:[%s12609_s16 + $0xb0] sm:$0xff] }
  0x3e   : > { %10902 = vmatprep.subr.bf16.mxu1 %v10901_v10  ;;  %v10973_v63 = vpack.c.bf16 %v374_v55, %v366_v54  ;;  %v373_v2 = vld [vmem:[%s12609_s16 + $0xf0] sm:$0xff]  ;;  %v382_v5 = vld [vmem:[%s12609_s16 + $0x138] sm:$0xff]  ;;  %v10927_v8 = vpack.c.bf16 %v404_v61, %v396_v60  ;;  %v395_v9 = vld [vmem:[%s12609_s16 + $0x1a0] sm:$0xff] }
  0x3f   : > { %v390_v6 = vld [vmem:[%s12609_s16 + $0x178] sm:$0xff]  ;;  %v403_v10 = vld [vmem:[%s12609_s16 + $0x1e0] sm:$0xff]  ;;  %v412_v11 = vld [vmem:[%s12609_s16 + $0x228] sm:$0xff]  ;;  %v10975_v13 = vpack.c.bf16 %v373_v2, %v365_v1 }
  0x40   : > { %10850 = vmatpush1.bf16.msra.mxu0 %v10849_v3  ;;  %v12779_v3 = vld [vmem:[%s15599_s1 + $0x20] sm:$0xff]  ;;  %v12786_v7 = vld [vmem:[%s15599_s1 + $0x38] sm:$0xff]  ;;  %v420_v12 = vld [vmem:[%s12609_s16 + $0x268] sm:$0xff]  ;;  %v10977_v14 = vpack.c.bf16 %v390_v6, %v382_v5  ;;  %v10929_v19 = vpack.c.bf16 %v403_v10, %v395_v9 }
  0x41   : > { %10852 = vmatprep.subr.bf16.mxu0 %v10851_v4  ;;  %10904 = vmatpush1.bf16.msra.mxu1 %v10903_v21  ;;  %v10925_v4 = vpack.c.bf16 %v387_v59, %v379_v58  ;;  %v12803_v18 = vld [vmem:[%s15599_s1 + $0x30] sm:$0xff]  ;;  %v398_v20 = vld [vmem:[%s12609_s16 + $0x1b8] sm:$0xff]  ;;  %v10931_v22 = vpack.c.bf16 %v420_v12, %v412_v11  ;;  %v419_v24 = vld [vmem:[%s12609_s16 + $0x260] sm:$0xff] }
  0x42   : > { %10906 = vmatprep.subr.bf16.mxu1 %v10905_v23  ;;  %v406_v21 = vld [vmem:[%s12609_s16 + $0x1f8] sm:$0xff]  ;;  %v411_v23 = vld [vmem:[%s12609_s16 + $0x220] sm:$0xff]  ;;  %v12812_v25 = vld [vmem:[%s15599_s1 + $0x48] sm:$0xff] }
  0x43   : > { %v428_v26 = vld [vmem:[%s12609_s16 + $0x2a8] sm:$0xff]  ;;  %v397_v30 = vld [vmem:[%s12609_s16 + $0x1b0] sm:$0xff]  ;;  %v10933_v32 = vpack.c.bf16 %v419_v24, %v411_v23  ;;  %v414_v34 = vld [vmem:[%s12609_s16 + $0x238] sm:$0xff] }
  0x44   : > { %10854 = vmatpush1.bf16.msra.mxu0 %v10853_v15  ;;  %v381_v15 = vld [vmem:[%s12609_s16 + $0x130] sm:$0xff]  ;;  %v436_v27 = vld [vmem:[%s12609_s16 + $0x2e8] sm:$0xff]  ;;  %v427_v37 = vld [vmem:[%s12609_s16 + $0x2a0] sm:$0xff] }
  0x45   : > { %10857 = vmatprep.subr.msk.bf16.mxu0 %vm12708_vm3, %v10855_v17  ;;  %10908 = vmatpush1.bf16.msra.mxu1 %v10907_v33  ;;  %v389_v17 = vld [vmem:[%s12609_s16 + $0x170] sm:$0xff]  ;;  %v12827_v33 = vld [vmem:[%s15599_s1 + $0x40] sm:$0xff]  ;;  %v10935_v36 = vpack.c.bf16 %v436_v27, %v428_v26  ;;  %v444_v39 = vld [vmem:[%s12609_s16 + $0x328] sm:$0xff] }
  0x46   : > { %10911 = vmatprep.subr.msk.bf16.mxu1 %vm12708_vm3, %v10909_v35  ;;  %v405_v31 = vld [vmem:[%s12609_s16 + $0x1f0] sm:$0xff]  ;;  %v422_v35 = vld [vmem:[%s12609_s16 + $0x278] sm:$0xff]  ;;  %v435_v38 = vld [vmem:[%s12609_s16 + $0x2e0] sm:$0xff] }
  0x47   : > { %v10985_v44 = vpack.c.bf16 %v422_v35, %v414_v34  ;;  %v413_v45 = vld [vmem:[%s12609_s16 + $0x230] sm:$0xff]  ;;  %v10937_v47 = vpack.c.bf16 %v435_v38, %v427_v37  ;;  %v430_v48 = vld [vmem:[%s12609_s16 + $0x2b8] sm:$0xff]  ;;  %v443_v51 = vld [vmem:[%s12609_s16 + $0x320] sm:$0xff] }
  0x48   : > { %10860 = vmatpush1.bf16.msk.msra.mxu0 %vm12708_vm3, %v10858_v28  ;;  %v10979_v28 = vpack.c.bf16 %v389_v17, %v381_v15  ;;  %v460_v54 = vld [vmem:[%s12609_s16 + $0x3a8] sm:$0xff]  ;;  %v429_v59 = vld [vmem:[%s12609_s16 + $0x2b0] sm:$0xff]  ;;  %v459_v2 = vld [vmem:[%s12609_s16 + $0x3a0] sm:$0xff] }
  0x49   : > { %10916 = vmatprep.subr.bf16.mxu0 %v10915_v29  ;;  %10914 = vmatpush1.bf16.msk.msra.mxu1 %vm12708_vm3, %v10912_v46  ;;  %v10981_v29 = vpack.c.bf16 %v406_v21, %v398_v20  ;;  %v421_v46 = vld [vmem:[%s12609_s16 + $0x270] sm:$0xff]  ;;  %v468_v55 = vld [vmem:[%s12609_s16 + $0x3e8] sm:$0xff]  ;;  %v475_v17 = vld [vmem:[%s12609_s16 + $0x420] sm:$0xff] }
  0x4a   : > { %10970 = vmatprep.subr.bf16.mxu1 %v10969_v49  ;;  %v438_v49 = vld [vmem:[%s12609_s16 + $0x2f8] sm:$0xff]  ;;  %v437_v60 = vld [vmem:[%s12609_s16 + $0x2f0] sm:$0xff]  ;;  %v10943_v1 = vpack.c.bf16 %v468_v55, %v460_v54  ;;  %v476_v5 = vld [vmem:[%s12609_s16 + $0x428] sm:$0xff] }
  0x4b   : > { %657 = vmatmul.mubr.f32.vlgmr.msra.gmra.mrb[0].mxu0 %v12735_v40  ;;  %v10989_v58 = vpack.c.bf16 %v438_v49, %v430_v48  ;;  %v484_v6 = vld [vmem:[%s12609_s16 + $0x468] sm:$0xff]  ;;  %v445_v10 = vld [vmem:[%s12609_s16 + $0x330] sm:$0xff]  ;;  %v478_v27 = vld [vmem:[%s12609_s16 + $0x438] sm:$0xff] }
  0x4c   : > { %10918 = vmatpush1.bf16.msra.mxu0 %v10917_v41  ;;  %9319 = vmatprep.mubr.msk.f32.mxu0 %vm551_vm0, %v12740_v42  ;;  %v452_v41 = vld [vmem:[%s12609_s16 + $0x368] sm:$0xff]  ;;  %v453_v11 = vld [vmem:[%s12609_s16 + $0x370] sm:$0xff]  ;;  %v10947_v15 = vpack.c.bf16 %v484_v6, %v476_v5  ;;  %v510_v55 = vld [vmem:[%s12609_s16 + $0x538] sm:$0xff] }
  0x4d   : > { %10920 = vmatprep.subr.bf16.mxu0 %v10919_v43  ;;  %752 = vmatmul.mubr.f32.vlgmr.msra.gmra.mrb[0].mxu1 %v12735_v40  ;;  %v10983_v43 = vpack.c.bf16 %v405_v31, %v397_v30  ;;  %v10939_v50 = vpack.c.bf16 %v452_v41, %v444_v39  ;;  %v500_v20 = vld [vmem:[%s12609_s16 + $0x4e8] sm:$0xff]  ;;  %v10995_v21 = vpack.c.bf16 %v453_v11, %v445_v10  ;;  %v461_v23 = vld [vmem:[%s12609_s16 + $0x3b0] sm:$0xff]  ;;  %v491_v30 = vld [vmem:[%s12609_s16 + $0x4a0] sm:$0xff] }
  0x4e   : > { %10972 = vmatpush1.bf16.msra.mxu1 %v10971_v62  ;;  %9326 = vmatprep.mubr.msk.f32.mxu1 %vm551_vm0, %v12740_v42  ;;  %v446_v62 = vld [vmem:[%s12609_s16 + $0x338] sm:$0xff]  ;;  %v469_v24 = vld [vmem:[%s12609_s16 + $0x3f0] sm:$0xff]  ;;  %v499_v31 = vld [vmem:[%s12609_s16 + $0x4e0] sm:$0xff] }
  0x4f   : > { %663 = vmatmul.mubr.f32.gmra.mrb[2].mxu0 %v12756_v52  ;;  %10974 = vmatprep.subr.bf16.mxu1 %v10973_v63  ;;  %v454_v63 = vld [vmem:[%s12609_s16 + $0x378] sm:$0xff]  ;;  %v516_v34 = vld [vmem:[%s12609_s16 + $0x568] sm:$0xff]  ;;  %v10999_v35 = vpack.c.bf16 %v469_v24, %v461_v23  ;;  %v477_v37 = vld [vmem:[%s12609_s16 + $0x430] sm:$0xff]  ;;  %v10953_v39 = vpack.c.bf16 %v499_v31, %v491_v30 }
  0x50   : > { %10922 = vmatpush1.bf16.msra.mxu0 %v10921_v53  ;;  %9320 = vmatprep.mubr.msk.f32.mxu0 %vm551_vm0, %v12763_v56  ;;  %v451_v53 = vld [vmem:[%s12609_s16 + $0x360] sm:$0xff]  ;;  %v10993_v9 = vpack.c.bf16 %v454_v63, %v446_v62  ;;  %v485_v38 = vld [vmem:[%s12609_s16 + $0x470] sm:$0xff]  ;;  %v494_v41 = vld [vmem:[%s12609_s16 + $0x4b8] sm:$0xff] }
  0x51   : > { %10924 = vmatprep.subr.bf16.mxu0 %v10923_v57  ;;  %758 = vmatmul.mubr.f32.gmra.mrb[2].mxu1 %v12756_v52  ;;  %v10987_v57 = vpack.c.bf16 %v421_v46, %v413_v45  ;;  %v10941_v61 = vpack.c.bf16 %v451_v53, %v443_v51  ;;  %v507_v45 = vld [vmem:[%s12609_s16 + $0x520] sm:$0xff]  ;;  %v532_v48 = vld [vmem:[%s12609_s16 + $0x5e8] sm:$0xff]  ;;  %v11003_v49 = vpack.c.bf16 %v485_v38, %v477_v37  ;;  %v493_v51 = vld [vmem:[%s12609_s16 + $0x4b0] sm:$0xff] }
  0x52   : > { %10976 = vmatpush1.bf16.msra.mxu1 %v10975_v13  ;;  %9327 = vmatprep.mubr.msk.f32.mxu1 %vm551_vm0, %v12763_v56  ;;  %v462_v13 = vld [vmem:[%s12609_s16 + $0x3b8] sm:$0xff]  ;;  %v515_v46 = vld [vmem:[%s12609_s16 + $0x560] sm:$0xff]  ;;  %v501_v53 = vld [vmem:[%s12609_s16 + $0x4f0] sm:$0xff] }
  0x53   : > { %669 = vmatmul.mubr.f32.gmra.mrb[4].mxu0 %v12779_v3  ;;  %10978 = vmatprep.subr.bf16.mxu1 %v10977_v14  ;;  %v470_v14 = vld [vmem:[%s12609_s16 + $0x3f8] sm:$0xff]  ;;  %v10957_v54 = vpack.c.bf16 %v515_v46, %v507_v45  ;;  %v548_v62 = vld [vmem:[%s12609_s16 + $0x668] sm:$0x1]  ;;  %v11007_v63 = vpack.c.bf16 %v501_v53, %v493_v51  ;;  %v539_v10 = vld [vmem:[%s12609_s16 + $0x620] sm:$0xff] }
  0x54   : > { %10926 = vmatpush1.bf16.msra.mxu0 %v10925_v4  ;;  %9321 = vmatprep.mubr.msk.f32.mxu0 %vm551_vm0, %v12786_v7  ;;  %v467_v4 = vld [vmem:[%s12609_s16 + $0x3e0] sm:$0xff]  ;;  %v526_v6 = vld [vmem:[%s12609_s16 + $0x5b8] sm:$0xff]  ;;  %v549_v23 = vld [vmem:[%s12609_s16 + $0x670] sm:$0x1] }
  0x55   : > { %10928 = vmatprep.subr.bf16.mxu0 %v10927_v8  ;;  %764 = vmatmul.mubr.f32.gmra.mrb[4].mxu1 %v12779_v3  ;;  %v10991_v8 = vpack.c.bf16 %v437_v60, %v429_v59  ;;  %v10945_v12 = vpack.c.bf16 %v467_v4, %v459_v2  ;;  %v523_v59 = vld [vmem:[%s12609_s16 + $0x5a0] sm:$0xff]  ;;  %v509_v2 = vld [vmem:[%s12609_s16 + $0x530] sm:$0xff]  ;;  %v973_v16 = vld [vmem:[%s15600_s2 + $0x8] sm:$0xff] }
  0x56   : > { %10980 = vmatpush1.bf16.msra.mxu1 %v10979_v28  ;;  %9328 = vmatprep.mubr.msk.f32.mxu1 %vm551_vm0, %v12786_v7  ;;  %v486_v28 = vld [vmem:[%s12609_s16 + $0x478] sm:$0xff]  ;;  %v531_v60 = vld [vmem:[%s12609_s16 + $0x5e0] sm:$0xff]  ;;  %v517_v4 = vld [vmem:[%s12609_s16 + $0x570] sm:$0xff] }
  0x57   : > { %675 = vmatmul.mubr.f32.gmra.mrb[6].mxu0 %v12803_v18  ;;  %10982 = vmatprep.subr.bf16.mxu1 %v10981_v29  ;;  %v10961_v5 = vpack.c.bf16 %v531_v60, %v523_v59  ;;  %v547_v11 = vld [vmem:[%s12609_s16 + $0x660] sm:$0x1]  ;;  %v989_v53 = vld [vmem:[%s15600_s2 + $0x88] sm:$0xff] }
  0x58   : > { %10930 = vmatpush1.bf16.msra.mxu0 %v10929_v19  ;;  %9322 = vmatprep.mubr.msk.f32.mxu0 %vm551_vm0, %v12812_v25  ;;  %v483_v19 = vld [vmem:[%s12609_s16 + $0x460] sm:$0xff]  ;;  %v1013_v60 = vld [vmem:[%s15600_s2 + $0x148] sm:$0xff] }
  0x59   : > { %10932 = vmatprep.subr.bf16.mxu0 %v10931_v22  ;;  %770 = vmatmul.mubr.f32.gmra.mrb[6].mxu1 %v12803_v18  ;;  %v10997_v22 = vpack.c.bf16 %v470_v14, %v462_v13  ;;  %v10949_v26 = vpack.c.bf16 %v483_v19, %v475_v17  ;;  %v525_v14 = vld [vmem:[%s12609_s16 + $0x5b0] sm:$0xff]  ;;  %v10966_v17 = vpack.c.bf16 %v547_v11, %v539_v10  ;;  %v542_v19 = vld [vmem:[%s12609_s16 + $0x638] sm:$0xff]  ;;  %v980_v51 = vld [vmem:[%s15600_s2 + $0x40] sm:$0xff] }
  0x5a   : > { %10984 = vmatpush1.bf16.msra.mxu1 %v10983_v43  ;;  %9329 = vmatprep.mubr.msk.f32.mxu1 %vm551_vm0, %v12812_v25  ;;  %v502_v43 = vld [vmem:[%s12609_s16 + $0x4f8] sm:$0xff]  ;;  %v1004_v59 = vld [vmem:[%s15600_s2 + $0x100] sm:$0xff]  ;;  %v982_v11 = vld [vmem:[%s15600_s2 + $0x50] sm:$0xff] }
  0x5b   : > { %681 = vmatmul.mubr.f32.gmra.mrb[8].mxu0 %v12827_v33  ;;  %10986 = vmatprep.subr.bf16.mxu1 %v10985_v44 }
  0x5c   : > { %10934 = vmatpush1.bf16.msra.mxu0 %v10933_v32  ;;  %9332 = vmatprep.mubr.msk.f32.mxu0 %vm551_vm0, %v12597_v0  ;;  %v508_v32 = vld [vmem:[%s12609_s16 + $0x528] sm:$0xff] }
  0x5d   : > { %10936 = vmatprep.subr.bf16.mxu0 %v10935_v36  ;;  %776 = vmatmul.mubr.f32.gmra.mrb[8].mxu1 %v12827_v33  ;;  %v11001_v36 = vpack.c.bf16 %v486_v28, %v478_v27  ;;  %v10955_v44 = vpack.c.bf16 %v516_v34, %v508_v32 }
  0x5e   : > { %10988 = vmatpush1.bf16.msra.mxu1 %v10987_v57  ;;  %9339 = vmatprep.mubr.msk.f32.mxu1 %vm551_vm0, %v12597_v0  ;;  %v492_v0 = vld [vmem:[%s12609_s16 + $0x4a8] sm:$0xff]  ;;  %v518_v57 = vld [vmem:[%s12609_s16 + $0x578] sm:$0xff] }
  0x5f   : > { %10990 = vmatprep.subr.bf16.mxu1 %v10989_v58  ;;  %v10951_v29 = vpack.c.bf16 %v500_v20, %v492_v0  ;;  %v550_v0 = vld [vmem:[%s12609_s16 + $0x678] sm:$0x1] }
  0x60   : > { %10938 = vmatpush1.bf16.msra.mxu0 %v10937_v47  ;;  %v524_v47 = vld [vmem:[%s12609_s16 + $0x5a8] sm:$0xff] }
  0x61   : > { %10940 = vmatprep.subr.bf16.mxu0 %v10939_v50  ;;  %v11005_v50 = vpack.c.bf16 %v502_v43, %v494_v41  ;;  %v10959_v58 = vpack.c.bf16 %v532_v48, %v524_v47 }
  0x62   : > { %10992 = vmatpush1.bf16.msra.mxu1 %v10991_v8  ;;  %v534_v8 = vld [vmem:[%s12609_s16 + $0x5f8] sm:$0xff] }
  0x63   : > { %10994 = vmatprep.subr.bf16.mxu1 %v10993_v9  ;;  %v11013_v13 = vpack.c.bf16 %v534_v8, %v526_v6  ;;  %v983_v6 = vld [vmem:[%s15600_s2 + $0x58] sm:$0xff] }
  0x64   : > { %10942 = vmatpush1.bf16.msra.mxu0 %v10941_v61  ;;  %v540_v61 = vld [vmem:[%s12609_s16 + $0x628] sm:$0xff] }
  0x65   : > { %10944 = vmatprep.subr.bf16.mxu0 %v10943_v1  ;;  %v11009_v1 = vpack.c.bf16 %v518_v57, %v510_v55  ;;  %v10963_v9 = vpack.c.bf16 %v548_v62, %v540_v61  ;;  %v997_v55 = vld [vmem:[%s15600_s2 + $0xc8] sm:$0xff]  ;;  %v996_v57 = vld [vmem:[%s15600_s2 + $0xc0] sm:$0xff] }
  0x66   : > { %10996 = vmatpush1.bf16.msra.mxu1 %v10995_v21  ;;  %v11017_v21 = vpack.c.bf16 %v550_v0, %v542_v19  ;;  %v1012_v61 = vld [vmem:[%s15600_s2 + $0x140] sm:$0xff]  ;;  %v1021_v62 = vld [vmem:[%s15600_s2 + $0x188] sm:$0xff]  ;;  %v990_v0 = vld [vmem:[%s15600_s2 + $0x90] sm:$0xff] }
  0x67   : > { %10998 = vmatprep.subr.bf16.mxu1 %v10997_v22  ;;  %v541_v22 = vld [vmem:[%s12609_s16 + $0x630] sm:$0xff] }
  0x68   : > { %10946 = vmatpush1.bf16.msra.mxu0 %v10945_v12  ;;  %v11011_v12 = vpack.c.bf16 %v517_v4, %v509_v2  ;;  %v11020_v24 = vpack.c.bf16 %v549_v23, %v541_v22 }
  0x69   : > { %10948 = vmatprep.subr.bf16.mxu0 %v10947_v15  ;;  %v533_v15 = vld [vmem:[%s12609_s16 + $0x5f0] sm:$0xff] }
  0x6a   : > { %11000 = vmatpush1.bf16.msra.mxu1 %v10999_v35  ;;  %v11015_v20 = vpack.c.bf16 %v533_v15, %v525_v14 }
  0x6b   : > { %11002 = vmatprep.subr.bf16.mxu1 %v11001_v36 }
  0x6c   : > { %10950 = vmatpush1.bf16.msra.mxu0 %v10949_v26 }
  0x6d   : > { %10952 = vmatprep.subr.bf16.mxu0 %v10951_v29 }
  0x6e   : > { %11004 = vmatpush1.bf16.msra.mxu1 %v11003_v49  ;;  %v972_v49 = vld [vmem:[%s15600_s2] sm:$0xff] }
  0x6f   : > { %11006 = vmatprep.subr.bf16.mxu1 %v11005_v50  ;;  %v981_v50 = vld [vmem:[%s15600_s2 + $0x48] sm:$0xff] }
  0x70   : > { %10954 = vmatpush1.bf16.msra.mxu0 %v10953_v39 }
  0x71   : > { %10956 = vmatprep.subr.bf16.mxu0 %v10955_v44 }
  0x72   : > { %11008 = vmatpush1.bf16.msra.mxu1 %v11007_v63  ;;  %v1020_v63 = vld [vmem:[%s15600_s2 + $0x180] sm:$0xff] }
  0x73   : > { %11010 = vmatprep.subr.bf16.mxu1 %v11009_v1  ;;  %v975_v1 = vld [vmem:[%s15600_s2 + $0x18] sm:$0xff] }
  0x74   : > { %10958 = vmatpush1.bf16.msra.mxu0 %v10957_v54  ;;  %v988_v54 = vld [vmem:[%s15600_s2 + $0x80] sm:$0xff] }
  0x75   : > { %10960 = vmatprep.subr.bf16.mxu0 %v10959_v58  ;;  %v1005_v58 = vld [vmem:[%s15600_s2 + $0x108] sm:$0xff] }
  0x76   : > { %11012 = vmatpush1.bf16.msra.mxu1 %v11011_v12 }
  0x77   : > { %11014 = vmatprep.subr.bf16.mxu1 %v11013_v13  ;;  %v991_v13 = vld [vmem:[%s15600_s2 + $0x98] sm:$0xff] }
  0x78   : > { %10962 = vmatpush1.bf16.msra.mxu0 %v10961_v5  ;;  %v974_v5 = vld [vmem:[%s15600_s2 + $0x10] sm:$0xff] }
  0x79   : > { %10965 = vmatprep.subr.msk.bf16.mxu0 %vm12708_vm3, %v10963_v9 }
  0x7a   : > { %11016 = vmatpush1.bf16.msra.mxu1 %v11015_v20  ;;  %v999_v20 = vld [vmem:[%s15600_s2 + $0xd8] sm:$0xff] }
  0x7b   : > { %11019 = vmatprep.subr.msk.bf16.mxu1 %vm12708_vm3, %v11017_v21 }
  0x7c   : > { %10968 = vmatpush1.bf16.msk.msra.mxu0 %vm12708_vm3, %v10966_v17 }
  0x7e   : > { %11022 = vmatpush1.bf16.msk.msra.mxu1 %vm12708_vm3, %v11020_v24 }
  0x7f   : > { %847 = vmatmul.mubr.f32.vlgmr.msra.gmra.mrb[10].mxu0 %v12735_v40 }
  0x80   : > { %9333 = vmatprep.mubr.msk.f32.mxu0 %vm551_vm0, %v12740_v42 }
  0x81   : > { %942 = vmatmul.mubr.f32.vlgmr.msra.gmra.mrb[10].mxu1 %v12735_v40  ;;  %v995_v40 = vld [vmem:[%s15600_s2 + $0xb8] sm:$0xff] }
  0x82   : > { %9340 = vmatprep.mubr.msk.f32.mxu1 %vm551_vm0, %v12740_v42 }
  0x83   : > { %853 = vmatmul.mubr.f32.gmra.mrb[12].mxu0 %v12756_v52 }
  0x84   : > { %9334 = vmatprep.mubr.msk.f32.mxu0 %vm551_vm0, %v12763_v56 }
  0x85   : > { %948 = vmatmul.mubr.f32.gmra.mrb[12].mxu1 %v12756_v52 }
  0x86   : > { %9341 = vmatprep.mubr.msk.f32.mxu1 %vm551_vm0, %v12763_v56 }
  0x87   : > { %859 = vmatmul.mubr.f32.gmra.mrb[14].mxu0 %v12779_v3 }
  0x88   : > { %9335 = vmatprep.mubr.msk.f32.mxu0 %vm551_vm0, %v12786_v7 }
  0x89   : > { %954 = vmatmul.mubr.f32.gmra.mrb[14].mxu1 %v12779_v3 }
  0x8a   : > { %9342 = vmatprep.mubr.msk.f32.mxu1 %vm551_vm0, %v12786_v7 }
  0x8b   : > { %865 = vmatmul.mubr.f32.gmra.mrb[16].mxu0 %v12803_v18 }
  0x8c   : > { %9336 = vmatprep.mubr.msk.f32.mxu0 %vm551_vm0, %v12812_v25 }
  0x8d   : > { %960 = vmatmul.mubr.f32.gmra.mrb[16].mxu1 %v12803_v18 }
  0x8e   : > { %9343 = vmatprep.mubr.msk.f32.mxu1 %vm551_vm0, %v12812_v25 }
  0x8f   : > { %871 = vmatmul.mubr.f32.gmra.mrb[18].mxu0 %v12827_v33 }
  0x90   : > { %1092 = vmatprep.mubr.f32.mxu0 %v973_v16 }
  0x91   : > { %966 = vmatmul.mubr.f32.gmra.mrb[18].mxu1 %v12827_v33 }
  0x92   : > { %1402 = vmatprep.mubr.f32.mxu1 %v995_v40 }
 0x11e   : > { %v658_v42 = vpop.f32.mrb[0].mxu0 }
 0x11f   : > { %v660_v52 = vpop.f32.mrb[1].mxu0 }
 0x120   : > { %v753_v26 = vpop.f32.mrb[0].mxu1 }
 0x121   : > { %v755_v25 = vpop.f32.mrb[1].mxu1 }
 0x122   : > { %v664_v56 = vpop.f32.mrb[2].mxu0 }
 0x123   : > { %v11025_v3 = vpack.c.bf16 %v664_v56, %v658_v42  ;;  %v666_v7 = vpop.f32.mrb[3].mxu0 }
 0x124   : > { %v11023_v18 = vpack.c.bf16 %v666_v7, %v660_v52  ;;  %v759_v28 = vpop.f32.mrb[2].mxu1  ;;  %v998_v52 = vld [vmem:[%s15600_s2 + $0xd0] sm:$0xff] }
 0x125   : > { %v11033_v29 = vpack.c.bf16 %v759_v28, %v753_v26  ;;  %v761_v30 = vpop.f32.mrb[3].mxu1 }
 0x126   : > { %v670_v27 = vpop.f32.mrb[4].mxu0  ;;  %11024 = vmatprep.subr.bf16.mxu0 %v11023_v18  ;;  %v11031_v32 = vpack.c.bf16 %v761_v30, %v755_v25  ;;  %v1006_v25 = vld [vmem:[%s15600_s2 + $0x110] sm:$0xff] }
 0x127   : > { %v672_v33 = vpop.f32.mrb[5].mxu0  ;;  %11026 = vmatpush1.bf16.xpose.msra.mxu0 %v11025_v3  ;;  %v1007_v3 = vld [vmem:[%s15600_s2 + $0x118] sm:$0xff] }
 0x128   : > { %v765_v37 = vpop.f32.mrb[4].mxu1 }
 0x129   : > { %v767_v38 = vpop.f32.mrb[5].mxu1 }
 0x12a   : > { %v676_v31 = vpop.f32.mrb[6].mxu0 }
 0x12b   : > { %v11029_v34 = vpack.c.bf16 %v676_v31, %v670_v27  ;;  %v678_v35 = vpop.f32.mrb[7].mxu0 }
 0x12c   : > { %v11027_v36 = vpack.c.bf16 %v678_v35, %v672_v33  ;;  %v771_v43 = vpop.f32.mrb[6].mxu1  ;;  %v1015_v33 = vld [vmem:[%s15600_s2 + $0x158] sm:$0xff] }
 0x12d   : > { %v11037_v44 = vpack.c.bf16 %v771_v43, %v765_v37  ;;  %v773_v45 = vpop.f32.mrb[7].mxu1  ;;  %v1022_v37 = vld [vmem:[%s15600_s2 + $0x190] sm:$0xff] }
 0x12e   : > { %11028 = vmatprep.subr.bf16.mxu0 %v11027_v36  ;;  %v682_v39 = vpop.f32.mrb[8].mxu0  ;;  %v11035_v46 = vpack.c.bf16 %v773_v45, %v767_v38  ;;  %v977_v38 = vld [vmem:[%s15600_s2 + $0x28] sm:$0xff]  ;;  %v994_v43 = vld [vmem:[%s15600_s2 + $0xb0] sm:$0xff]  ;;  %v984_v45 = vld [vmem:[%s15600_s2 + $0x60] sm:$0xff] }
 0x12f   : > { %11030 = vmatpush1.bf16.xpose.msra.mxu0 %v11029_v34  ;;  %v684_v41 = vpop.f32.mrb[9].mxu0  ;;  %v1023_v34 = vld [vmem:[%s15600_s2 + $0x198] sm:$0xff] }
 0x130   : > { %1036 = vmatprep.subr.mxu0 %v684_v41  ;;  %v777_v47 = vpop.f32.mrb[8].mxu1  ;;  %v985_v41 = vld [vmem:[%s15600_s2 + $0x68] sm:$0xff] }
 0x131   : > { %v779_v48 = vpop.f32.mrb[9].mxu1 }
 0x137   : > { %1037 = vmatpush1.xpose.msra.mxu0 %v682_v39  ;;  %v976_v39 = vld [vmem:[%s15600_s2 + $0x20] sm:$0xff] }
 0x138   : > { %11032 = vmatprep.subr.bf16.mxu0 %v11031_v32  ;;  %v1014_v32 = vld [vmem:[%s15600_s2 + $0x150] sm:$0xff] }
 0x13a   : > { %1093 = vmatmul.mubr.f32.vlgmr.msra.gmra.mrb[20].mxu0 %v972_v49  ;;  %v992_v49 = vld [vmem:[%s15600_s2 + $0xa0] sm:$0xff] }
 0x13b   : > { %1097 = vmatprep.mubr.f32.mxu0 %v981_v50  ;;  %11034 = vmatpush1.bf16.xpose.msra.mxu0 %v11033_v29  ;;  %v1001_v50 = vld [vmem:[%s15600_s2 + $0xe8] sm:$0xff] }
 0x13c   : > { %11036 = vmatprep.subr.bf16.mxu0 %v11035_v46  ;;  %v993_v46 = vld [vmem:[%s15600_s2 + $0xa8] sm:$0xff] }
 0x13e   : > { %1098 = vmatmul.mubr.f32.gmra.mrb[22].mxu0 %v980_v51  ;;  %v1010_v51 = vld [vmem:[%s15600_s2 + $0x130] sm:$0xff] }
 0x13f   : > { %1102 = vmatprep.mubr.f32.mxu0 %v989_v53  ;;  %v1019_v53 = vld [vmem:[%s15600_s2 + $0x178] sm:$0xff] }
 0x142   : > { %1103 = vmatmul.mubr.f32.gmra.mrb[24].mxu0 %v988_v54  ;;  %v1000_v54 = vld [vmem:[%s15600_s2 + $0xe0] sm:$0xff] }
 0x143   : > { %1107 = vmatprep.mubr.f32.mxu0 %v997_v55  ;;  %11038 = vmatpush1.bf16.xpose.msra.mxu0 %v11037_v44  ;;  %v1003_v44 = vld [vmem:[%s15600_s2 + $0xf8] sm:$0xff]  ;;  %v1009_v55 = vld [vmem:[%s15600_s2 + $0x128] sm:$0xff] }
 0x144   : > { %1136 = vmatprep.subr.mxu0 %v779_v48  ;;  %v1011_v48 = vld [vmem:[%s15600_s2 + $0x138] sm:$0xff] }
 0x146   : > { %1108 = vmatmul.mubr.f32.gmra.mrb[26].mxu0 %v996_v57  ;;  %v1018_v57 = vld [vmem:[%s15600_s2 + $0x170] sm:$0xff] }
 0x147   : > { %1112 = vmatprep.mubr.f32.mxu0 %v1005_v58  ;;  %v1027_v58 = vld [vmem:[%s15600_s2 + $0x1b8] sm:$0xff] }
 0x14a   : > { %1113 = vmatmul.mubr.f32.gmra.mrb[28].mxu0 %v1004_v59  ;;  %v1008_v59 = vld [vmem:[%s15600_s2 + $0x120] sm:$0xff] }
 0x14b   : > { %1117 = vmatprep.mubr.f32.mxu0 %v1013_v60  ;;  %1137 = vmatpush1.xpose.msra.mxu0 %v777_v47  ;;  %v1002_v47 = vld [vmem:[%s15600_s2 + $0xf0] sm:$0xff]  ;;  %v1017_v60 = vld [vmem:[%s15600_s2 + $0x168] sm:$0xff] }
 0x14e   : > { %1118 = vmatmul.mubr.f32.gmra.mrb[30].mxu0 %v1012_v61  ;;  %v1026_v61 = vld [vmem:[%s15600_s2 + $0x1b0] sm:$0xff] }
 0x14f   : > { %1122 = vmatprep.mubr.f32.mxu0 %v1021_v62  ;;  %v1016_v62 = vld [vmem:[%s15600_s2 + $0x160] sm:$0xff] }
 0x152   : > { %1123 = vmatmul.mubr.f32.gmra.mrb[32].mxu0 %v1020_v63  ;;  %v848_v2 = vpop.f32.mrb[10].mxu0  ;;  %v1025_v63 = vld [vmem:[%s15600_s2 + $0x1a8] sm:$0xff] }
 0x153   : > { %v850_v4 = vpop.f32.mrb[11].mxu0  ;;  %1192 = vmatprep.mubr.f32.mxu0 %v975_v1  ;;  %v1024_v1 = vld [vmem:[%s15600_s2 + $0x1a0] sm:$0xff] }
 0x154   : > { %v943_v14 = vpop.f32.mrb[10].mxu1 }
 0x155   : > { %v945_v15 = vpop.f32.mrb[11].mxu1 }
 0x156   : > { %v854_v8 = vpop.f32.mrb[12].mxu0  ;;  %1193 = vmatmul.mubr.f32.vlgmr.msra.gmra.mrb[20].mxu0 %v974_v5  ;;  %v987_v5 = vld [vmem:[%s15600_s2 + $0x78] sm:$0xff] }
 0x157   : > { %v11041_v9 = vpack.c.bf16 %v854_v8, %v848_v2  ;;  %v856_v10 = vpop.f32.mrb[13].mxu0  ;;  %1197 = vmatprep.mubr.f32.mxu0 %v983_v6  ;;  %v979_v2 = vld [vmem:[%s15600_s2 + $0x38] sm:$0xff]  ;;  %v986_v6 = vld [vmem:[%s15600_s2 + $0x70] sm:$0xff]  ;;  %v1428_v8 = vld [vmem:[%s15601_s3] sm:$0xff] }
 0x158   : > { %v11039_v12 = vpack.c.bf16 %v856_v10, %v850_v4  ;;  %v949_v21 = vpop.f32.mrb[12].mxu1  ;;  %v978_v4 = vld [vmem:[%s15600_s2 + $0x30] sm:$0xff]  ;;  %v15609_v10 = vmov 0.0|0.0  }
 0x159   : > { %v11049_v22 = vpack.c.bf16 %v949_v21, %v943_v14  ;;  %v951_v23 = vpop.f32.mrb[13].mxu1 }
 0x15a   : > { %1198 = vmatmul.mubr.f32.gmra.mrb[22].mxu0 %v982_v11  ;;  %11040 = vmatprep.subr.bf16.mxu0 %v11039_v12  ;;  %v860_v17 = vpop.f32.mrb[14].mxu0  ;;  %v11047_v16 = vpack.c.bf16 %v951_v23, %v945_v15  ;;  %v1430_v12 = vld [vmem:[%s15601_s3 + $0x10] sm:$0xff]  ;;  %v15611_v15 = vmov 0.0  }
 0x15b   : > { %11042 = vmatpush1.bf16.xpose.msra.mxu0 %v11041_v9  ;;  %v862_v19 = vpop.f32.mrb[15].mxu0  ;;  %1202 = vmatprep.mubr.f32.mxu0 %v991_v13  ;;  %v1429_v9 = vld [vmem:[%s15601_s3 + $0x8] sm:$0xff]  ;;  %v1431_v13 = vld [vmem:[%s15601_s3 + $0x18] sm:$0xff] }
 0x15c   : > { %11601 = vmatprep.subr.bf16.mxu1 %v11047_v16  ;;  %v955_v7 = vpop.f32.mrb[14].mxu1  ;;  %v11056_v11 = vpack.c.bf16 %v1429_v9, %v1428_v8  ;;  %v11059_v14 = vpack.c.bf16 %v1431_v13, %v1430_v12  ;;  %v1567_v12 = vlaneseq }
 0x15d   : > { %11604 = vmatpush1.bf16.xpose.msra.mxu1 %v11049_v22  ;;  %v957_v18 = vpop.f32.mrb[15].mxu1 }
 0x15e   : > { %v866_v24 = vpop.f32.mrb[16].mxu0  ;;  %1203 = vmatmul.mubr.f32.gmra.mrb[24].mxu0 %v990_v0  ;;  %v13211_v13 = vshrl.u32 %v1567_v12, 7 }
 0x15f   : > { %v11045_v40 = vpack.c.bf16 %v866_v24, %v860_v17  ;;  %v868_v42 = vpop.f32.mrb[17].mxu0  ;;  %1207 = vmatprep.mubr.f32.mxu0 %v999_v20  ;;  %v1432_v17 = vld [vmem:[%s15601_s3 + $0x20] sm:$0xff] }
 0x160   : > { %v11043_v56 = vpack.c.bf16 %v868_v42, %v862_v19  ;;  %v961_v28 = vpop.f32.mrb[16].mxu1 }
 0x161   : > { %v11053_v29 = vpack.c.bf16 %v961_v28, %v955_v7  ;;  %v963_v30 = vpop.f32.mrb[17].mxu1 }
 0x162   : > { %1208 = vmatmul.mubr.f32.gmra.mrb[26].mxu0 %v998_v52  ;;  %11044 = vmatprep.subr.bf16.mxu0 %v11043_v56  ;;  %v872_v26 = vpop.f32.mrb[18].mxu0  ;;  %v11051_v31 = vpack.c.bf16 %v963_v30, %v957_v18 }
 0x163   : > { %11046 = vmatpush1.bf16.xpose.msra.mxu0 %v11045_v40  ;;  %1212 = vmatprep.mubr.f32.mxu0 %v1007_v3  ;;  %v874_v27 = vpop.f32.mrb[19].mxu0 }
 0x164   : > { %1236 = vmatprep.subr.mxu0 %v874_v27  ;;  %11602 = vmatprep.subr.bf16.mxu1 %v11051_v31  ;;  %v967_v35 = vpop.f32.mrb[18].mxu1 }
 0x165   : > { %11605 = vmatpush1.bf16.xpose.msra.mxu1 %v11053_v29  ;;  %v969_v36 = vpop.f32.mrb[19].mxu1 }
 0x166   : > { %1213 = vmatmul.mubr.f32.gmra.mrb[28].mxu0 %v1006_v25  ;;  %11603 = vmatprep.subr.mxu1 %v969_v36 }
 0x167   : > { %1217 = vmatprep.mubr.f32.mxu0 %v1015_v33 }
 0x16a   : > { %1218 = vmatmul.mubr.f32.gmra.mrb[30].mxu0 %v1014_v32  ;;  %v1563_v32 = vld [vmem:[%s15602_s4 + $0x8] sm:$0xff] }
 0x16b   : > { %1222 = vmatprep.mubr.f32.mxu0 %v1023_v34  ;;  %1237 = vmatpush1.xpose.msra.mxu0 %v872_v26 }
 0x16c   : > { %11048 = vmatprep.subr.bf16.mxu0 %v11047_v16 }
 0x16d   : > { %11606 = vmatpush1.xpose.msra.mxu1 %v967_v35 }
 0x16e   : > { %1223 = vmatmul.mubr.f32.gmra.mrb[32].mxu0 %v1022_v37  ;;  %11055 = vmatprep.subr.bf16.mxu1 %v15609_v10 }
 0x16f   : > { %1292 = vmatprep.mubr.f32.mxu0 %v977_v38  ;;  %v1564_v38 = vld [vmem:[%s15602_s4 + $0x10] sm:$0xff] }
 0x170   : > { %1403 = vmatmul.mubr.f32.vlgmr.msra.gmra.mrb[20].mxu1 %v994_v43 }
 0x171   : > { %1407 = vmatprep.mubr.f32.mxu1 %v1003_v44  ;;  %11057 = vmatpush3.bf16.msra.mxu1 %v11056_v11 }
 0x172   : > { %1293 = vmatmul.mubr.f32.vlgmr.msra.gmra.mrb[20].mxu0 %v976_v39  ;;  %11058 = vmatprep.subr.bf16.mxu1 %v15609_v10  ;;  %v1565_v39 = vld [vmem:[%s15602_s4 + $0x18] sm:$0xff] }
 0x173   : > { %1297 = vmatprep.mubr.f32.mxu0 %v985_v41  ;;  %11050 = vmatpush1.bf16.xpose.msra.mxu0 %v11049_v22  ;;  %v11065_v44 = vpack.c.bf16 %v1565_v39, %v1564_v38 }
 0x174   : > { %11052 = vmatprep.subr.bf16.mxu0 %v11051_v31  ;;  %1408 = vmatmul.mubr.f32.gmra.mrb[22].mxu1 %v1002_v47  ;;  %v1562_v31 = vld [vmem:[%s15602_s4] sm:$0xff] }
 0x175   : > { %1412 = vmatprep.mubr.f32.mxu1 %v1011_v48  ;;  %11060 = vmatpush3.bf16.msra.mxu1 %v11059_v14  ;;  %v11062_v37 = vpack.c.bf16 %v1563_v32, %v1562_v31  ;;  %v1566_v47 = vld [vmem:[%s15602_s4 + $0x20] sm:$0xff]  ;;  %v9344_v48 = vld [vmem:[%s15601_s3 + $0x28] ss:$0 sm:$0xff]  ;;  %v15608_v14 = vsub.s32 0, %v13211_v13 }
 0x176   : > { %1298 = vmatmul.mubr.f32.gmra.mrb[22].mxu0 %v984_v45  ;;  %10100 = vmatprep.subr.mxu1 %v15611_v15 }
 0x177   : > { %1302 = vmatprep.mubr.f32.mxu0 %v993_v46 }
 0x178   : > { %1413 = vmatmul.mubr.f32.gmra.mrb[24].mxu1 %v1010_v51 }
 0x179   : > { %1417 = vmatprep.mubr.f32.mxu1 %v1019_v53  ;;  %10101 = vmatpush3.msra.mxu1 %v1432_v17  ;;  %v1560_v17 = vld [vmem:[%s15606_s8] sm:$0xff] }
 0x17a   : > { %1303 = vmatmul.mubr.f32.gmra.mrb[24].mxu0 %v992_v49  ;;  %11061 = vmatprep.subr.bf16.mxu1 %v15609_v10 }
 0x17b   : > { %1307 = vmatprep.mubr.f32.mxu0 %v1001_v50  ;;  %11054 = vmatpush1.bf16.xpose.msra.mxu0 %v11053_v29 }
 0x17c   : > { %1336 = vmatprep.subr.mxu0 %v969_v36  ;;  %1418 = vmatmul.mubr.f32.gmra.mrb[26].mxu1 %v1018_v57 }
 0x17d   : > { %1422 = vmatprep.mubr.f32.mxu1 %v1027_v58 }
 0x17e   : > { %1308 = vmatmul.mubr.f32.gmra.mrb[26].mxu0 %v1000_v54 }
 0x17f   : > { %1312 = vmatprep.mubr.f32.mxu0 %v1009_v55 }
 0x180   : > { %1423 = vmatmul.mubr.f32.gmra.mrb[28].mxu1 %v1026_v61 }
 0x181   : > { %10102 = vmatprep.mubr.msk.f32.mxu1 %vm12520_vm4, %v15611_v15 }
 0x182   : > { %1313 = vmatmul.mubr.f32.gmra.mrb[28].mxu0 %v1008_v59 }
 0x183   : > { %1317 = vmatprep.mubr.f32.mxu0 %v1017_v60  ;;  %1337 = vmatpush1.xpose.msra.mxu0 %v967_v35 }
 0x186   : > { %1318 = vmatmul.mubr.f32.gmra.mrb[30].mxu0 %v1016_v62 }
 0x187   : > { %1322 = vmatprep.mubr.f32.mxu0 %v1025_v63 }
 0x18a   : > { %1323 = vmatmul.mubr.f32.gmra.mrb[32].mxu0 %v1024_v1 }
 0x18b   : > { %1392 = vmatprep.mubr.f32.mxu0 %v979_v2 }
 0x18e   : > { %1393 = vmatmul.mubr.f32.vlgmr.msra.gmra.mrb[20].mxu0 %v978_v4 }
 0x18f   : > { %1397 = vmatprep.mubr.f32.mxu0 %v987_v5 }
 0x192   : > { %1398 = vmatmul.mubr.f32.gmra.mrb[22].mxu0 %v986_v6 }
 0x243   : > { %v1404_v19 = vpop.f32.mrb[20].mxu1 }
 0x244   : > { %v1406_v0 = vpop.f32.mrb[21].mxu1 }
 0x247   : > { %v1409_v20 = vpop.f32.mrb[22].mxu1 }
 0x248   : > { %v1411_v21 = vpop.f32.mrb[23].mxu1 }
 0x24b   : > { %v1414_v16 = vpop.f32.mrb[24].mxu1 }
 0x24c   : > { %v1416_v40 = vpop.f32.mrb[25].mxu1 }
 0x24d   : > { %v1304_v22 = vpop.f32.mrb[24].mxu0 }
 0x24e   : > { %v11607_v23 = vadd.f32 %v1404_v19, %v1304_v22  ;;  %v1306_v24 = vpop.f32.mrb[25].mxu0  ;;  %v1570_v19 = vrot.slane %v1560_v17, %v15608_v14 }
 0x24f   : > { %v1419_v3 = vpop.f32.mrb[26].mxu1 }
 0x250   : > { %v1421_v7 = vpop.f32.mrb[27].mxu1 }
 0x251   : > { %v1309_v42 = vpop.f32.mrb[26].mxu0 }
 0x252   : > { %v11608_v52 = vadd.f32 %v1409_v20, %v1309_v42  ;;  %v1311_v56 = vpop.f32.mrb[27].mxu0 }
 0x253   : > { %v1424_v27 = vpop.f32.mrb[28].mxu1 }
 0x254   : > { %v1426_v33 = vpop.f32.mrb[29].mxu1 }
 0x255   : > { %v1314_v18 = vpop.f32.mrb[28].mxu0 }
 0x256   : > { %v11609_v26 = vadd.f32 %v1414_v16, %v1314_v18  ;;  %v1316_v25 = vpop.f32.mrb[29].mxu0 }
 0x259   : > { %v1319_v28 = vpop.f32.mrb[30].mxu0 }
 0x25a   : > { %v11610_v29 = vadd.f32 %v1419_v3, %v1319_v28  ;;  %v1321_v30 = vpop.f32.mrb[31].mxu0 }
 0x25d   : > { %v1324_v34 = vpop.f32.mrb[32].mxu0 }
 0x25e   : > { %v11611_v35 = vadd.f32 %v1424_v27, %v1324_v34  ;;  %v1326_v36 = vpop.f32.mrb[33].mxu0 }
 0x261   : > { %v1394_v41 = vpop.f32.mrb[20].mxu0 }
 0x262   : > { %v1396_v43 = vpop.f32.mrb[21].mxu0  ;;  %10103 = vmatmul.mubr.msk.f32.vlgmr.msra.gmra.mrb[30].mxu1 %vm1438_vm5, %v1394_v41 }
 0x263   : > { %10105 = vmatprep.mubr.msk.f32.mxu1 %vm12520_vm4, %v15611_v15  ;;  %11063 = vmatpush3.bf16.msra.mxu1 %v11062_v37 }
 0x264   : > { %11064 = vmatprep.subr.bf16.mxu1 %v15609_v10 }
 0x265   : > { %v1399_v45 = vpop.f32.mrb[22].mxu0 }
 0x266   : > { %v1401_v46 = vpop.f32.mrb[23].mxu0  ;;  %10106 = vmatmul.mubr.msk.f32.gmra.mrb[32].mxu1 %vm1438_vm5, %v1399_v45 }
 0x267   : > { %10108 = vmatprep.mubr.msk.f32.mxu1 %vm12520_vm4, %v15611_v15  ;;  %11066 = vmatpush3.bf16.msra.mxu1 %v11065_v44 }
 0x268   : > { %10131 = vmatprep.subr.mxu1 %v15611_v15 }
 0x26a   : > { %10109 = vmatmul.mubr.msk.f32.gmra.mrb[34].mxu1 %vm1438_vm5, %v11607_v23 }
 0x26b   : > { %10111 = vmatprep.mubr.msk.f32.mxu1 %vm12520_vm4, %v15611_v15  ;;  %10132 = vmatpush3.msra.mxu1 %v1566_v47 }
 0x26e   : > { %10112 = vmatmul.mubr.msk.f32.gmra.mrb[36].mxu1 %vm1438_vm5, %v11608_v52 }
 0x26f   : > { %10114 = vmatprep.mubr.msk.f32.mxu1 %vm12520_vm4, %v15611_v15 }
 0x272   : > { %10115 = vmatmul.mubr.msk.f32.gmra.mrb[38].mxu1 %vm1438_vm5, %v11609_v26 }
 0x273   : > { %10117 = vmatprep.mubr.msk.f32.mxu1 %vm12520_vm4, %v15611_v15 }
 0x276   : > { %10118 = vmatmul.mubr.msk.f32.gmra.mrb[40].mxu1 %vm1438_vm5, %v11610_v29 }
 0x277   : > { %10120 = vmatprep.mubr.msk.f32.mxu1 %vm12520_vm4, %v15611_v15 }
 0x27a   : > { %10121 = vmatmul.mubr.msk.f32.gmra.mrb[42].mxu1 %vm1438_vm5, %v11611_v35 }
 0x27b   : > { %10133 = vmatprep.mubr.msk.f32.mxu1 %vm12520_vm4, %v15611_v15 }
 0x335   : > { %v1526_v49 = vpop.f32.mrb[30].mxu1 }
 0x336   : > { %v13171_v50 = vadd.f32 %v9344_v48, %v1526_v49  ;;  %v10104_v51 = vpop.f32.mrb[31].mxu1 }
 0x338   : > { %10134 = vmatmul.mubr.msk.f32.vlgmr.msra.gmra.mrb[44].mxu1 %vm1438_vm5, %v13171_v50 }
 0x339   : > { %v1531_v53 = vpop.f32.mrb[32].mxu1  ;;  %10136 = vmatprep.mubr.msk.f32.mxu1 %vm12520_vm4, %v15611_v15 }
 0x33a   : > { %v13177_v54 = vadd.f32 %v9344_v48, %v1531_v53  ;;  %v10107_v55 = vpop.f32.mrb[33].mxu1 }
 0x33c   : > { %10137 = vmatmul.mubr.msk.f32.gmra.mrb[46].mxu1 %vm1438_vm5, %v13177_v54 }
 0x33d   : > { %v1536_v57 = vpop.f32.mrb[34].mxu1  ;;  %10139 = vmatprep.mubr.msk.f32.mxu1 %vm12520_vm4, %v15611_v15 }
 0x33e   : > { %v13183_v58 = vadd.f32 %v9344_v48, %v1536_v57  ;;  %v10110_v59 = vpop.f32.mrb[35].mxu1 }
 0x340   : > { %10140 = vmatmul.mubr.msk.f32.gmra.mrb[48].mxu1 %vm1438_vm5, %v13183_v58 }
 0x341   : > { %v1541_v60 = vpop.f32.mrb[36].mxu1  ;;  %10142 = vmatprep.mubr.msk.f32.mxu1 %vm12520_vm4, %v15611_v15 }
 0x342   : > { %v13189_v61 = vadd.f32 %v9344_v48, %v1541_v60  ;;  %v10113_v62 = vpop.f32.mrb[37].mxu1 }
 0x344   : > { %10143 = vmatmul.mubr.msk.f32.gmra.mrb[50].mxu1 %vm1438_vm5, %v13189_v61 }
 0x345   : > { %v1546_v63 = vpop.f32.mrb[38].mxu1  ;;  %10145 = vmatprep.mubr.msk.f32.mxu1 %vm12520_vm4, %v15611_v15 }
 0x346   : > { %v13195_v1 = vadd.f32 %v9344_v48, %v1546_v63  ;;  %v10116_v2 = vpop.f32.mrb[39].mxu1 }
 0x348   : > { %10146 = vmatmul.mubr.msk.f32.gmra.mrb[52].mxu1 %vm1438_vm5, %v13195_v1 }
 0x349   : > { %v1551_v4 = vpop.f32.mrb[40].mxu1  ;;  %10148 = vmatprep.mubr.msk.f32.mxu1 %vm12520_vm4, %v15611_v15 }
 0x34a   : > { %v13201_v5 = vadd.f32 %v9344_v48, %v1551_v4  ;;  %v10119_v6 = vpop.f32.mrb[41].mxu1 }
 0x34c   : > { %15641 = vst [vmem:[#allocation2_spill] sm:$0xff] %v13201_v5  ;;  %10149 = vmatmul.mubr.msk.f32.gmra.mrb[54].mxu1 %vm1438_vm5, %v13201_v5 }
 0x34d   : > { %v1556_v8 = vpop.f32.mrb[42].mxu1  ;;  %10151 = vmatprep.mubr.msk.f32.mxu1 %vm12520_vm4, %v15611_v15 }
 0x34e   : > { %v13207_v9 = vadd.f32 %v9344_v48, %v1556_v8  ;;  %v10122_v11 = vpop.f32.mrb[43].mxu1 }
 0x350   : > { %15642 = vst [vmem:[#allocation3_spill] sm:$0xff] %v13207_v9  ;;  %10152 = vmatmul.mubr.msk.f32.gmra.mrb[56].mxu1 %vm1438_vm5, %v13207_v9 }
 0x40b   : > { %v1658_v0 = vpop.f32.mrb[44].mxu1 }
 0x40c   : > { %v13219_v20 = vadd.f32 %v1658_v0, %v1570_v19  ;;  %v10135_v21 = vpop.f32.mrb[45].mxu1 }
 0x40e   : > { %10162 = vmatprep.mubr.msk.f32.mxu1 %vm1704_vm6, %v13219_v20 }
 0x40f   : > { %v1663_v22 = vpop.f32.mrb[46].mxu1 }
 0x410   : > { %v13223_v23 = vadd.f32 %v1663_v22, %v1570_v19  ;;  %v10138_v24 = vpop.f32.mrb[47].mxu1 }
 0x412   : > { %v13227_v16 = vpack.i.bf16 %v13223_v23, %v13219_v20 }
 0x413   : > { %v1668_v40 = vpop.f32.mrb[48].mxu1 }
 0x414   : > { %11674 = vrot.lane.b32.xlu0 %v13227_v16, %s12521_s19  ;;  %v10141_v42 = vpop.f32.mrb[49].mxu1  ;;  %v13231_v56 = vadd.f32 %v1668_v40, %v1570_v19 }
 0x417   : > { %v1673_v52 = vpop.f32.mrb[50].mxu1 }
 0x418   : > { %v13233_v3 = vadd.f32 %v1673_v52, %v1570_v19  ;;  %v10144_v7 = vpop.f32.mrb[51].mxu1 }
 0x41a   : > { %v13237_v18 = vpack.i.bf16 %v13233_v3, %v13231_v56 }
 0x41b   : > { %v1678_v26 = vpop.f32.mrb[52].mxu1 }
 0x41c   : > { %v13239_v25 = vadd.f32 %v1678_v26, %v1570_v19  ;;  %11679 = vrot.lane.b32.xlu0 %v13237_v18, %s12521_s19  ;;  %v10147_v27 = vpop.f32.mrb[53].mxu1 }
 0x41e   : > { %v3154_v30 = vrot.slane %v13239_v25, 4 }
 0x41f   : > { %v1683_v33 = vpop.f32.mrb[54].mxu1 }
 0x420   : > { %v13243_v28 = vadd.f32 %v1683_v33, %v1570_v19  ;;  %v10150_v29 = vpop.f32.mrb[55].mxu1 }
 0x422   : > { %v3156_v31 = vrot.slane %v13243_v28, 4 }
 0x423   : > { %v1688_v32 = vpop.f32.mrb[56].mxu1 }
 0x424   : > { %v13252_v34 = vsel %vm1879_vm7, %v3154_v30, %v3156_v31  ;;  %v13254_v35 = vadd.f32 %v1688_v32, %v1570_v19  ;;  %v10153_v36 = vpop.f32.mrb[57].mxu1 }
 0x426   : > { %v13551_v25 = vrot.slane %v13254_v35, 4 }
 0x486   : > { %v11675_v37 = vpop.permute.xlu0 %11674 }
 0x487   : > { %v11677_v38 = vunpack.i.h.bf16 %v11675_v37  ;;  %v11676_v39 = vunpack.i.l.bf16 %v11675_v37 }
 0x489   : > { %v11067_v43 = vpack.c.bf16 %v11677_v38, %v11676_v39 }
 0x48b   : > { %11069 = vmatprep.subr.msk.bf16.mxu1 %vm13258_vm8, %v11067_v43 }
 0x48c   : > { %11072 = vmatpush3.bf16.xpose.msk.msra.mxu1 %vm13258_vm8, %v11067_v43 }
 0x48e   : > { %v11680_v44 = vpop.permute.xlu0 %11679 }
 0x48f   : > { %v11682_v45 = vunpack.i.h.bf16 %v11680_v44  ;;  %v11681_v46 = vunpack.i.l.bf16 %v11680_v44 }
 0x491   : > { %v11073_v47 = vpack.c.bf16 %v11682_v45, %v11681_v46 }
 0x493   : > { %11075 = vmatprep.subr.msk.bf16.mxu1 %vm13258_vm8, %v11073_v47 }
 0x494   : > { %11078 = vmatpush3.bf16.xpose.msk.msra.mxu1 %vm13258_vm8, %v11073_v47 }
 0x49b   : > { %10163 = vmatmul.mubr.msk.f32.vlgmr.msra.gmra.mrb[58].mxu1 %vm1704_vm6, %v13223_v23 }
 0x49c   : > { %10165 = vmatprep.mubr.msk.f32.mxu1 %vm1704_vm6, %v13231_v56 }
 0x49f   : > { %10166 = vmatmul.mubr.msk.f32.gmra.mrb[60].mxu1 %vm1704_vm6, %v13233_v3 }
 0x56e   : > { %v10164_v48 = vpop.f32.mrb[58].mxu1 }
 0x56f   : > { %v1787_v49 = vpop.f32.mrb[59].mxu1  ;;  %v1807_v53 = vmul.f32 0.35355338, %v10164_v48 }
 0x570   : > { %v1806_v51 = vmul.f32 0.35355338, %v1787_v49 }
 0x571   : > { %v1814_v63 = vsel %vm1810_vm9, %v1807_v53, -inf }
 0x572   : > { %v10167_v55 = vpop.f32.mrb[60].mxu1  ;;  %v1811_v57 = vsel %vm1810_vm9, %v1806_v51, -inf }
 0x573   : > { %1812 = vmax.xlane.f32.xlu1 %v1811_v57  ;;  %v1797_v59 = vpop.f32.mrb[61].mxu1  ;;  %v1809_v62 = vmul.f32 0.35355338, %v10167_v55 }
 0x574   : > { %v1808_v60 = vmul.f32 0.35355338, %v1797_v59 }
 0x575   : > { %v1821_v4 = vsel %vm1820_vm10, %v1809_v62, -inf }
 0x576   : > { %v1817_v2 = vsel %vm1810_vm9, %v1808_v60, -inf }
 0x577   : > { %1815 = vmax.xlane.f32.xlu1 %v1814_v63  ;;  %1818 = vmax.xlane.f32.xlu0 %v1817_v2 }
 0x57b   : > { %1822 = vmax.xlane.f32.xlu1 %v1821_v4 }
 0x58c   : > { %11684 = vrot.lane.b32.xlu1 %v13227_v16, %s12522_s20 }
 0x58d   : > { %11689 = vrot.lane.b32.xlu0 %v13237_v18, %s12522_s20 }
 0x590   : > { %11694 = vrot.lane.b32.xlu1 %v13227_v16, %s12523_s21 }
 0x591   : > { %1971 = vrot.lane.b32.xlu0 %v13231_v56, %s12524_s22 }
 0x594   : > { %11699 = vrot.lane.b32.xlu1 %v13237_v18, %s12523_s21 }
 0x598   : > { %1967 = vrot.lane.b32.xlu1 %v13219_v20, %s12524_s22 }
 0x600   : > { %v1813_v6 = vpop.xlane.xlu1 %1812 }
 0x601   : > { %v1824_v8 = vsub.f32 %v1806_v51, %v1813_v6 }
 0x603   : > { %v1828_v19 = vmul.f32 1.442695, %v1824_v8 }
 0x604   : > { %v1816_v11 = vpop.xlane.xlu1 %1815  ;;  %v1819_v12 = vpop.xlane.xlu0 %1818 }
 0x605   : > { %v1825_v17 = vsub.f32 %v1807_v53, %v1816_v11  ;;  %v1826_v40 = vsub.f32 %v1808_v60, %v1819_v12 }
 0x607   : > { %v1830_v0 = vmul.f32 1.442695, %v1825_v17  ;;  %v1832_v29 = vmul.f32 1.442695, %v1826_v40 }
 0x608   : > { %v1823_v21 = vpop.xlane.xlu1 %1822  ;;  %v11690_v24 = vpop.permute.xlu0 %11689 }
 0x609   : > { %12073 = vpow2.f32 %v1830_v0  ;;  %v1827_v22 = vsub.f32 %v1809_v62, %v1823_v21  ;;  %v11692_v7 = vunpack.i.h.bf16 %v11690_v24  ;;  %v11691_v26 = vunpack.i.l.bf16 %v11690_v24 }
 0x60a   : > { %12075 = vpow2.f32 %v1828_v19 }
 0x60b   : > { %v1834_v42 = vmul.f32 1.442695, %v1827_v22  ;;  %v11083_v38 = vpack.c.bf16 %v11692_v7, %v11691_v26 }
 0x60c   : > { %v11685_v52 = vpop.permute.xlu1 %11684 }
 0x60d   : > { %v11687_v27 = vunpack.i.h.bf16 %v11685_v52  ;;  %v11686_v33 = vunpack.i.l.bf16 %v11685_v52  ;;  %12077 = vpow2.f32 %v1834_v42  ;;  %v1972_v42 = vpop.permute.xlu0 %1971 }
 0x60e   : > { %12079 = vpow2.f32 %v1832_v29 }
 0x60f   : > { %v11079_v32 = vpack.c.bf16 %v11687_v27, %v11686_v33 }
 0x610   : > { %v11695_v37 = vpop.permute.xlu1 %11694 }
 0x611   : > { %v11697_v39 = vunpack.i.h.bf16 %v11695_v37  ;;  %v11696_v43 = vunpack.i.l.bf16 %v11695_v37  ;;  %11080 = vmatprep.subr.bf16.mxu1 %v11079_v32 }
 0x612   : > { %11082 = vmatpush3.bf16.msra.mxu1 %v11079_v32 }
 0x613   : > { %v12074_v44 = vpop.eup %12073  ;;  %11085 = vmatprep.subr.msk.bf16.mxu1 %vm13294_vm11, %v11083_v38  ;;  %v11089_v47 = vpack.c.bf16 %v11697_v39, %v11696_v43 }
 0x614   : > { %v1839_v45 = vsel %vm1810_vm9, %v12074_v44, 0.0  ;;  %v12076_v46 = vpop.eup %12075  ;;  %v11700_v57 = vpop.permute.xlu1 %11699 }
 0x615   : > { %1840 = vadd.xlane.f32.xlu1 %v1839_v45  ;;  %v1836_v48 = vsel %vm1810_vm9, %v12076_v46, 0.0  ;;  %v11702_v8 = vunpack.i.h.bf16 %v11700_v57  ;;  %v11701_v11 = vunpack.i.l.bf16 %v11700_v57 }
 0x616   : > { %11088 = vmatpush3.bf16.msk.msra.mxu1 %vm13294_vm11, %v11083_v38 }
 0x617   : > { %11091 = vmatprep.subr.msk.bf16.mxu1 %vm13258_vm8, %v11089_v47  ;;  %v12078_v49 = vpop.eup %12077  ;;  %v11095_v19 = vpack.c.bf16 %v11702_v8, %v11701_v11 }
 0x618   : > { %v1845_v51 = vsel %vm1820_vm10, %v12078_v49, 0.0  ;;  %v12080_v53 = vpop.eup %12079  ;;  %v1968_v59 = vpop.permute.xlu1 %1967 }
 0x619   : > { %1837 = vadd.xlane.f32.xlu1 %v1836_v48  ;;  %v1842_v55 = vsel %vm1810_vm9, %v12080_v53, 0.0 }
 0x61d   : > { %1846 = vadd.xlane.f32.xlu1 %v1845_v51 }
 0x621   : > { %1843 = vadd.xlane.f32.xlu1 %v1842_v55 }
 0x632   : > { %1969 = vrot.lane.b32.xlu1 %v13223_v23, %s12524_s22 }
 0x636   : > { %1973 = vrot.lane.b32.xlu1 %v13233_v3, %s12524_s22 }
 0x6a2   : > { %v1841_v60 = vpop.xlane.xlu1 %1840 }
 0x6a3   : > { %12081 = vrcp.f32 %v1841_v60 }
 0x6a6   : > { %v1838_v62 = vpop.xlane.xlu1 %1837 }
 0x6a7   : > { %12083 = vrcp.f32 %v1838_v62 }
 0x6aa   : > { %v1847_v63 = vpop.xlane.xlu1 %1846 }
 0x6ab   : > { %12085 = vrcp.f32 %v1847_v63 }
 0x6ad   : > { %v12082_v4 = vpop.eup %12081 }
 0x6ae   : > { %v1844_v2 = vpop.xlane.xlu1 %1843  ;;  %v1853_v17 = vmul.f32 %v12082_v4, %v12074_v44 }
 0x6af   : > { %12087 = vrcp.f32 %v1844_v2 }
 0x6b1   : > { %v12084_v6 = vpop.eup %12083 }
 0x6b2   : > { %v1852_v12 = vmul.f32 %v12084_v6, %v12076_v46  ;;  %v1970_v40 = vpop.permute.xlu1 %1969 }
 0x6b4   : > { %10176 = vmatprep.mubr.msk.f32.mxu1 %vm1810_vm9, %v1852_v12 }
 0x6b5   : > { %10177 = vmatmul.mubr.msk.f32.vlgmr.msra.gmra.mrb[62].mxu1 %vm1810_vm9, %v1853_v17  ;;  %v12086_v0 = vpop.eup %12085 }
 0x6b6   : > { %11094 = vmatpush3.bf16.xpose.msk.msra.mxu1 %vm13258_vm8, %v11089_v47  ;;  %v1855_v24 = vmul.f32 %v12086_v0, %v12078_v49  ;;  %v1974_v52 = vpop.permute.xlu1 %1973 }
 0x6b7   : > { %11097 = vmatprep.subr.msk.bf16.mxu1 %vm13258_vm8, %v11095_v19 }
 0x6b9   : > { %v12088_v21 = vpop.eup %12087 }
 0x6ba   : > { %v1854_v22 = vmul.f32 %v12088_v21, %v12080_v53 }
 0x6bc   : > { %10179 = vmatprep.mubr.msk.f32.mxu1 %vm1810_vm9, %v1854_v22 }
 0x6bd   : > { %10180 = vmatmul.mubr.msk.f32.gmra.mrb[64].mxu1 %vm1810_vm9, %v1855_v24 }
 0x6be   : > { %11100 = vmatpush3.bf16.xpose.msk.msra.mxu1 %vm13258_vm8, %v11095_v19  ;;  %10190 = vmatprep.mubr.msk.f32.mxu1 %vm1704_vm6, %v1968_v59 }
 0x6c5   : > { %10191 = vmatmul.mubr.msk.f32.vlgmr.msra.gmra.mrb[66].mxu1 %vm1704_vm6, %v1970_v40 }
 0x6c6   : > { %10193 = vmatprep.mubr.msk.f32.mxu1 %vm1704_vm6, %v1972_v42 }
 0x6c9   : > { %10194 = vmatmul.mubr.msk.f32.gmra.mrb[68].mxu1 %vm1704_vm6, %v1974_v52 }
 0x788   : > { %v13326_v7 = vpop.f32.mrb[62].mxu1 }
 0x789   : > { %v13328_v26 = vpop.f32.mrb[63].mxu1 }
 0x790   : > { %v13330_v27 = vpop.f32.mrb[64].mxu1 }
 0x791   : > { %v13332_v33 = vpop.f32.mrb[65].mxu1 }
 0x798   : > { %v10192_v29 = vpop.f32.mrb[66].mxu1 }
 0x799   : > { %v2085_v32 = vmul.f32 0.35355338, %v10192_v29  ;;  %v2065_v37 = vpop.f32.mrb[67].mxu1 }
 0x79a   : > { %v2084_v38 = vmul.f32 0.35355338, %v2065_v37 }
 0x79b   : > { %v2091_v39 = vsel %vm1810_vm9, %v2085_v32, -inf }
 0x79c   : > { %2092 = vmax.xlane.f32.xlu1 %v2091_v39  ;;  %v10195_v43 = vpop.f32.mrb[68].mxu1  ;;  %v2088_v44 = vsel %vm1810_vm9, %v2084_v38, -inf }
 0x79d   : > { %2089 = vmax.xlane.f32.xlu0 %v2088_v44  ;;  %v2075_v45 = vpop.f32.mrb[69].mxu1  ;;  %v2087_v47 = vmul.f32 0.35355338, %v10195_v43 }
 0x79e   : > { %v2086_v46 = vmul.f32 0.35355338, %v2075_v45 }
 0x79f   : > { %v2097_v49 = vsel %vm1820_vm10, %v2087_v47, -inf }
 0x7a0   : > { %v2094_v48 = vsel %vm1810_vm9, %v2086_v46, -inf }
 0x7a1   : > { %2095 = vmax.xlane.f32.xlu0 %v2094_v48 }
 0x7a5   : > { %2098 = vmax.xlane.f32.xlu0 %v2097_v49 }
 0x7ad   : > { %11709 = vrot.lane.b32.xlu1 %v13237_v18, %s12525_s23 }
 0x7b1   : > { %11719 = vrot.lane.b32.xlu1 %v13237_v18, %s12526_s24 }
 0x7bb   : > { %11704 = vrot.lane.b32.xlu0 %v13227_v16, %s12525_s23 }
 0x829   : > { %v2093_v51 = vpop.xlane.xlu1 %2092 }
 0x82a   : > { %v2101_v53 = vsub.f32 %v2085_v32, %v2093_v51  ;;  %v2090_v55 = vpop.xlane.xlu0 %2089 }
 0x82b   : > { %v2100_v57 = vsub.f32 %v2084_v38, %v2090_v55 }
 0x82c   : > { %v2106_v59 = vmul.f32 1.442695, %v2101_v53 }
 0x82d   : > { %v2104_v60 = vmul.f32 1.442695, %v2100_v57  ;;  %v11710_v4 = vpop.permute.xlu1 %11709 }
 0x82e   : > { %12089 = vpow2.f32 %v2106_v59  ;;  %v2096_v62 = vpop.xlane.xlu0 %2095  ;;  %v11712_v12 = vunpack.i.h.bf16 %v11710_v4  ;;  %v11711_v19 = vunpack.i.l.bf16 %v11710_v4 }
 0x82f   : > { %12091 = vpow2.f32 %v2104_v60  ;;  %v2102_v63 = vsub.f32 %v2086_v46, %v2096_v62 }
 0x830   : > { %v11105_v29 = vpack.c.bf16 %v11712_v12, %v11711_v19 }
 0x831   : > { %v2108_v8 = vmul.f32 1.442695, %v2102_v63  ;;  %v11720_v43 = vpop.permute.xlu1 %11719 }
 0x832   : > { %v2099_v2 = vpop.xlane.xlu0 %2098  ;;  %v11722_v57 = vunpack.i.h.bf16 %v11720_v43  ;;  %v11721_v59 = vunpack.i.l.bf16 %v11720_v43 }
 0x833   : > { %v2103_v6 = vsub.f32 %v2087_v47, %v2099_v2 }
 0x834   : > { %v11117_v2 = vpack.c.bf16 %v11722_v57, %v11721_v59 }
 0x835   : > { %v2110_v11 = vmul.f32 1.442695, %v2103_v6 }
 0x836   : > { %v11705_v17 = vpop.permute.xlu0 %11704 }
 0x837   : > { %12093 = vpow2.f32 %v2110_v11  ;;  %v11707_v0 = vunpack.i.h.bf16 %v11705_v17  ;;  %v11706_v21 = vunpack.i.l.bf16 %v11705_v17 }
 0x838   : > { %v12090_v22 = vpop.eup %12089  ;;  %12095 = vpow2.f32 %v2108_v8 }
 0x839   : > { %v12092_v24 = vpop.eup %12091  ;;  %v2115_v40 = vsel %vm1810_vm9, %v12090_v22, 0.0  ;;  %v11101_v42 = vpack.c.bf16 %v11707_v0, %v11706_v21 }
 0x83a   : > { %2116 = vadd.xlane.f32.xlu0 %v2115_v40  ;;  %v2112_v52 = vsel %vm1810_vm9, %v12092_v24, 0.0 }
 0x83b   : > { %2113 = vadd.xlane.f32.xlu1 %v2112_v52  ;;  %11102 = vmatprep.subr.bf16.mxu1 %v11101_v42 }
 0x83c   : > { %11104 = vmatpush3.bf16.msra.mxu1 %v11101_v42 }
 0x83d   : > { %11107 = vmatprep.subr.msk.bf16.mxu1 %vm13294_vm11, %v11105_v29 }
 0x840   : > { %11110 = vmatpush3.bf16.msk.msra.mxu1 %vm13294_vm11, %v11105_v29 }
 0x841   : > { %v12094_v32 = vpop.eup %12093 }
 0x842   : > { %v2121_v37 = vsel %vm1820_vm10, %v12094_v32, 0.0  ;;  %v12096_v38 = vpop.eup %12095 }
 0x843   : > { %2122 = vadd.xlane.f32.xlu1 %v2121_v37  ;;  %v2118_v39 = vsel %vm1810_vm9, %v12096_v38, 0.0 }
 0x847   : > { %2119 = vadd.xlane.f32.xlu1 %v2118_v39 }
 0x850   : > { %11714 = vrot.lane.b32.xlu0 %v13227_v16, %s12526_s24 }
 0x854   : > { %11724 = vrot.lane.b32.xlu0 %v13227_v16, %s15621_s25 }
 0x858   : > { %2244 = vrot.lane.b32.xlu0 %v13223_v23, %s12528_s26  ;;  %2242 = vrot.lane.b32.xlu1 %v13219_v20, %s12528_s26 }
 0x85c   : > { %2246 = vrot.lane.b32.xlu0 %v13231_v56, %s12528_s26  ;;  %11729 = vrot.lane.b32.xlu1 %v13237_v18, %s15621_s25 }
 0x860   : > { %2517 = vrot.lane.b32.xlu0 %v13219_v20, %s15619_s27  ;;  %2248 = vrot.lane.b32.xlu1 %v13233_v3, %s12528_s26 }
 0x864   : > { %2521 = vrot.lane.b32.xlu0 %v13231_v56, %s15619_s27  ;;  %2519 = vrot.lane.b32.xlu1 %v13223_v23, %s15619_s27 }
 0x868   : > { %2523 = vrot.lane.b32.xlu1 %v13233_v3, %s15619_s27 }
 0x86c   : > { %11734 = vrot.lane.b32.xlu1 %v13227_v16, %s12530_s28 }
 0x8c7   : > { %v2117_v44 = vpop.xlane.xlu0 %2116 }
 0x8c8   : > { %12097 = vrcp.f32 %v2117_v44  ;;  %v2114_v45 = vpop.xlane.xlu1 %2113 }
 0x8c9   : > { %12099 = vrcp.f32 %v2114_v45 }
 0x8cb   : > { %v11715_v46 = vpop.permute.xlu0 %11714 }
 0x8cc   : > { %v11717_v47 = vunpack.i.h.bf16 %v11715_v46  ;;  %v11716_v48 = vunpack.i.l.bf16 %v11715_v46 }
 0x8ce   : > { %v11111_v49 = vpack.c.bf16 %v11717_v47, %v11716_v48 }
 0x8cf   : > { %v11725_v4 = vpop.permute.xlu0 %11724 }
 0x8d0   : > { %v2123_v51 = vpop.xlane.xlu1 %2122  ;;  %11113 = vmatprep.subr.msk.bf16.mxu1 %vm13258_vm8, %v11111_v49  ;;  %v11727_v8 = vunpack.i.h.bf16 %v11725_v4  ;;  %v11726_v11 = vunpack.i.l.bf16 %v11725_v4 }
 0x8d1   : > { %12101 = vrcp.f32 %v2123_v51 }
 0x8d2   : > { %v12098_v53 = vpop.eup %12097  ;;  %v11133_v0 = vpack.c.bf16 %v11727_v8, %v11726_v11 }
 0x8d3   : > { %v12100_v55 = vpop.eup %12099  ;;  %v2129_v63 = vmul.f32 %v12098_v53, %v12090_v22  ;;  %v2245_v21 = vpop.permute.xlu0 %2244 }
 0x8d4   : > { %v2120_v60 = vpop.xlane.xlu1 %2119  ;;  %v2128_v62 = vmul.f32 %v12100_v55, %v12092_v24 }
 0x8d5   : > { %12103 = vrcp.f32 %v2120_v60 }
 0x8d6   : > { %10204 = vmatprep.mubr.msk.f32.mxu1 %vm1810_vm9, %v2128_v62 }
 0x8d7   : > { %10205 = vmatmul.mubr.msk.f32.vlgmr.msra.gmra.mrb[70].mxu1 %vm1810_vm9, %v2129_v63  ;;  %v2247_v37 = vpop.permute.xlu0 %2246 }
 0x8d8   : > { %11116 = vmatpush3.bf16.xpose.msk.msra.mxu1 %vm13258_vm8, %v11111_v49  ;;  %v2243_v6 = vpop.permute.xlu1 %2242 }
 0x8d9   : > { %11119 = vmatprep.subr.msk.bf16.mxu1 %vm13258_vm8, %v11117_v2 }
 0x8db   : > { %v12102_v17 = vpop.eup %12101 }
 0x8dc   : > { %v11730_v12 = vpop.permute.xlu1 %11729  ;;  %v2131_v40 = vmul.f32 %v12102_v17, %v12094_v32  ;;  %v2518_v32 = vpop.permute.xlu0 %2517 }
 0x8dd   : > { %v11732_v42 = vunpack.i.h.bf16 %v11730_v12  ;;  %v11731_v52 = vunpack.i.l.bf16 %v11730_v12 }
 0x8df   : > { %v12104_v19 = vpop.eup %12103  ;;  %v11139_v39 = vpack.c.bf16 %v11732_v42, %v11731_v52 }
 0x8e0   : > { %11122 = vmatpush3.bf16.xpose.msk.msra.mxu1 %vm13258_vm8, %v11117_v2  ;;  %v2249_v22 = vpop.permute.xlu1 %2248  ;;  %v2130_v24 = vmul.f32 %v12104_v19, %v12096_v38  ;;  %v2522_v47 = vpop.permute.xlu0 %2521 }
 0x8e1   : > { %11135 = vmatprep.subr.msk.bf16.mxu1 %vm13258_vm8, %v11133_v0 }
 0x8e2   : > { %10207 = vmatprep.mubr.msk.f32.mxu1 %vm1810_vm9, %v2130_v24 }
 0x8e3   : > { %10208 = vmatmul.mubr.msk.f32.gmra.mrb[72].mxu1 %vm1810_vm9, %v2131_v40 }
 0x8e4   : > { %v2520_v29 = vpop.permute.xlu1 %2519  ;;  %10218 = vmatprep.mubr.msk.f32.mxu1 %vm1704_vm6, %v2243_v6 }
 0x8e7   : > { %10219 = vmatmul.mubr.msk.f32.vlgmr.msra.gmra.mrb[74].mxu1 %vm1704_vm6, %v2245_v21 }
 0x8e8   : > { %11138 = vmatpush3.bf16.xpose.msk.msra.mxu1 %vm13258_vm8, %v11133_v0  ;;  %v2524_v38 = vpop.permute.xlu1 %2523  ;;  %10221 = vmatprep.mubr.msk.f32.mxu1 %vm1704_vm6, %v2247_v37 }
 0x8e9   : > { %11141 = vmatprep.subr.msk.bf16.mxu1 %vm13258_vm8, %v11139_v39 }
 0x8eb   : > { %10222 = vmatmul.mubr.msk.f32.gmra.mrb[76].mxu1 %vm1704_vm6, %v2249_v22 }
 0x8ec   : > { %v11735_v43 = vpop.permute.xlu1 %11734  ;;  %10246 = vmatprep.mubr.msk.f32.mxu1 %vm1704_vm6, %v2518_v32 }
 0x8ed   : > { %v11737_v44 = vunpack.i.h.bf16 %v11735_v43  ;;  %v11736_v45 = vunpack.i.l.bf16 %v11735_v43 }
 0x8ef   : > { %v11123_v46 = vpack.c.bf16 %v11737_v44, %v11736_v45 }
 0x8f0   : > { %11144 = vmatpush3.bf16.xpose.msk.msra.mxu1 %vm13258_vm8, %v11139_v39 }
 0x8f1   : > { %11124 = vmatprep.subr.bf16.mxu0 %v11123_v46 }
 0x8f2   : > { %11126 = vmatpush3.bf16.msra.mxu0 %v11123_v46 }
 0x8f7   : > { %10247 = vmatmul.mubr.msk.f32.vlgmr.msra.gmra.mrb[78].mxu1 %vm1704_vm6, %v2520_v29 }
 0x8f8   : > { %10249 = vmatprep.mubr.msk.f32.mxu1 %vm1704_vm6, %v2522_v47 }
 0x8fb   : > { %10250 = vmatmul.mubr.msk.f32.gmra.mrb[80].mxu1 %vm1704_vm6, %v2524_v38 }
 0x9aa   : > { %v13404_v48 = vpop.f32.mrb[70].mxu1 }
 0x9ab   : > { %v13406_v49 = vpop.f32.mrb[71].mxu1 }
 0x9b6   : > { %v13408_v51 = vpop.f32.mrb[72].mxu1 }
 0x9b7   : > { %v13410_v53 = vpop.f32.mrb[73].mxu1 }
 0x9ba   : > { %v10220_v55 = vpop.f32.mrb[74].mxu1 }
 0x9bb   : > { %v2360_v57 = vmul.f32 0.35355338, %v10220_v55  ;;  %v2340_v59 = vpop.f32.mrb[75].mxu1 }
 0x9bc   : > { %v2359_v60 = vmul.f32 0.35355338, %v2340_v59 }
 0x9bd   : > { %v2366_v62 = vsel %vm1810_vm9, %v2360_v57, -inf }
 0x9be   : > { %2367 = vmax.xlane.f32.xlu1 %v2366_v62  ;;  %v10223_v63 = vpop.f32.mrb[76].mxu1  ;;  %v2363_v2 = vsel %vm1810_vm9, %v2359_v60, -inf }
 0x9bf   : > { %v2362_v4 = vmul.f32 0.35355338, %v10223_v63  ;;  %2364 = vmax.xlane.f32.xlu0 %v2363_v2  ;;  %v2350_v6 = vpop.f32.mrb[77].mxu1 }
 0x9c0   : > { %v2361_v11 = vmul.f32 0.35355338, %v2350_v6 }
 0x9c1   : > { %v2372_v8 = vsel %vm1820_vm10, %v2362_v4, -inf }
 0x9c2   : > { %v2369_v12 = vsel %vm1810_vm9, %v2361_v11, -inf }
 0x9c3   : > { %2373 = vmax.xlane.f32.xlu0 %v2372_v8 }
 0x9c7   : > { %2370 = vmax.xlane.f32.xlu0 %v2369_v12 }
 0x9ca   : > { %v10248_v17 = vpop.f32.mrb[78].mxu1 }
 0x9cb   : > { %v2635_v19 = vmul.f32 0.35355338, %v10248_v17  ;;  %v2615_v0 = vpop.f32.mrb[79].mxu1 }
 0x9cc   : > { %v13416_v21 = vmul.f32 0.35355338, %v2615_v0 }
 0x9cd   : > { %v2641_v22 = vsel %vm1810_vm9, %v2635_v19, -inf }
 0x9ce   : > { %v10251_v24 = vpop.f32.mrb[80].mxu1  ;;  %2642 = vmax.xlane.f32.xlu0 %v2641_v22  ;;  %v2638_v40 = vsel %vm1810_vm9, %v13416_v21, -inf }
 0x9cf   : > { %v13421_v42 = vmul.f32 0.35355338, %v10251_v24  ;;  %2639 = vmax.xlane.f32.xlu1 %v2638_v40  ;;  %v2625_v52 = vpop.f32.mrb[81].mxu1 }
 0x9d0   : > { %v13429_v37 = vmul.f32 0.35355338, %v2625_v52 }
 0x9d1   : > { %v2647_v29 = vsel %vm1820_vm10, %v13421_v42, -inf }
 0x9d2   : > { %2648 = vmax.xlane.f32.xlu0 %v2647_v29  ;;  %v2644_v39 = vsel %vm1810_vm9, %v13429_v37, -inf }
 0x9e0   : > { %11744 = vrot.lane.b32.xlu1 %v13227_v16, %s12531_s29 }
 0x9e8   : > { %11739 = vrot.lane.b32.xlu0 %v13237_v18, %s12530_s28 }
 0xa04   : > { %2645 = vmax.xlane.f32.xlu1 %v2644_v39 }
 0xa4b   : > { %v2368_v38 = vpop.xlane.xlu1 %2367 }
 0xa4c   : > { %v2376_v32 = vsub.f32 %v2360_v57, %v2368_v38  ;;  %v2365_v43 = vpop.xlane.xlu0 %2364 }
 0xa4d   : > { %v2375_v44 = vsub.f32 %v2359_v60, %v2365_v43 }
 0xa4e   : > { %v2381_v45 = vmul.f32 1.442695, %v2376_v32 }
 0xa4f   : > { %v2379_v46 = vmul.f32 1.442695, %v2375_v44 }
 0xa50   : > { %12105 = vpow2.f32 %v2381_v45  ;;  %v2374_v47 = vpop.xlane.xlu0 %2373 }
 0xa51   : > { %12107 = vpow2.f32 %v2379_v46  ;;  %v2378_v55 = vsub.f32 %v2362_v4, %v2374_v47 }
 0xa53   : > { %v2385_v59 = vmul.f32 1.442695, %v2378_v55 }
 0xa54   : > { %v2371_v62 = vpop.xlane.xlu0 %2370 }
 0xa55   : > { %12109 = vpow2.f32 %v2385_v59  ;;  %v2377_v63 = vsub.f32 %v2361_v11, %v2371_v62 }
 0xa57   : > { %v2383_v2 = vmul.f32 1.442695, %v2377_v63 }
 0xa59   : > { %12111 = vpow2.f32 %v2383_v2 }
 0xa5a   : > { %v13433_v6 = vpop.eup %12105 }
 0xa5b   : > { %v13435_v8 = vpop.eup %12107  ;;  %v2643_v12 = vpop.xlane.xlu0 %2642  ;;  %v2390_v57 = vsel %vm1810_vm9, %v13433_v6, 0.0 }
 0xa5c   : > { %v2651_v60 = vsub.f32 %v2635_v19, %v2643_v12  ;;  %v2640_v17 = vpop.xlane.xlu1 %2639  ;;  %2391 = vadd.xlane.f32.xlu0 %v2390_v57  ;;  %v2387_v4 = vsel %vm1810_vm9, %v13435_v8, 0.0 }
 0xa5d   : > { %2388 = vadd.xlane.f32.xlu1 %v2387_v4  ;;  %v2650_v55 = vsub.f32 %v13416_v21, %v2640_v17 }
 0xa5e   : > { %v2656_v0 = vmul.f32 1.442695, %v2651_v60 }
 0xa5f   : > { %v13441_v22 = vpop.eup %12109  ;;  %v2649_v11 = vpop.xlane.xlu0 %2648  ;;  %v2654_v59 = vmul.f32 1.442695, %v2650_v55 }
 0xa60   : > { %12113 = vpow2.f32 %v2656_v0  ;;  %v11745_v24 = vpop.permute.xlu1 %11744  ;;  %v2396_v40 = vsel %vm1820_vm10, %v13441_v22, 0.0  ;;  %v2653_v62 = vsub.f32 %v13421_v42, %v2649_v11 }
 0xa61   : > { %2397 = vadd.xlane.f32.xlu0 %v2396_v40  ;;  %v11747_v29 = vunpack.i.h.bf16 %v11745_v24  ;;  %v11746_v39 = vunpack.i.l.bf16 %v11745_v24  ;;  %12115 = vpow2.f32 %v2654_v59 }
 0xa62   : > { %v2660_v63 = vmul.f32 1.442695, %v2653_v62 }
 0xa63   : > { %v13445_v52 = vpop.eup %12111  ;;  %v11740_v19 = vpop.permute.xlu0 %11739  ;;  %v11145_v45 = vpack.c.bf16 %v11747_v29, %v11746_v39 }
 0xa64   : > { %v11742_v38 = vunpack.i.h.bf16 %v11740_v19  ;;  %v11741_v32 = vunpack.i.l.bf16 %v11740_v19  ;;  %v2393_v43 = vsel %vm1810_vm9, %v13445_v52, 0.0  ;;  %12117 = vpow2.f32 %v2660_v63 }
 0xa65   : > { %2394 = vadd.xlane.f32.xlu1 %v2393_v43 }
 0xa66   : > { %v11127_v44 = vpack.c.bf16 %v11742_v38, %v11741_v32 }
 0xa68   : > { %11129 = vmatprep.subr.msk.bf16.mxu0 %vm13294_vm11, %v11127_v44 }
 0xa69   : > { %11132 = vmatpush3.bf16.msk.msra.mxu0 %vm13294_vm11, %v11127_v44 }
 0xa6a   : > { %v13453_v46 = vpop.eup %12113  ;;  %11146 = vmatprep.subr.bf16.mxu0 %v11145_v45 }
 0xa6b   : > { %v2665_v47 = vsel %vm1810_vm9, %v13453_v46, 0.0  ;;  %v12116_v2 = vpop.eup %12115 }
 0xa6c   : > { %2666 = vadd.xlane.f32.xlu0 %v2665_v47  ;;  %v2662_v12 = vsel %vm1810_vm9, %v12116_v2, 0.0 }
 0xa6e   : > { %v13464_v57 = vpop.eup %12117 }
 0xa6f   : > { %v2671_v60 = vsel %vm1820_vm10, %v13464_v57, 0.0 }
 0xa76   : > { %11754 = vrot.lane.b32.xlu1 %v13227_v16, %s15617_s11 }
 0xa82   : > { %11749 = vrot.lane.b32.xlu0 %v13237_v18, %s12531_s29 }
 0xa91   : > { %v2646_v21 = vpop.xlane.xlu1 %2645 }
 0xa92   : > { %v2652_v42 = vsub.f32 %v13429_v37, %v2646_v21 }
 0xa94   : > { %v2658_v17 = vmul.f32 1.442695, %v2652_v42 }
 0xa96   : > { %12119 = vpow2.f32 %v2658_v17 }
 0xa9a   : > { %2663 = vadd.xlane.f32.xlu1 %v2662_v12 }
 0xaa0   : > { %v12120_v4 = vpop.eup %12119 }
 0xaa1   : > { %2672 = vadd.xlane.f32.xlu0 %v2671_v60  ;;  %v2668_v0 = vsel %vm1810_vm9, %v12120_v4, 0.0 }
 0xaab   : > { %11759 = vrot.lane.b32.xlu1 %v13237_v18, %s15617_s11 }
 0xab7   : > { %2792 = vrot.lane.b32.xlu0 %v13219_v20, %s15615_s12 }
 0xabb   : > { %2796 = vrot.lane.b32.xlu0 %v13231_v56, %s15615_s12 }
 0xacf   : > { %2669 = vadd.xlane.f32.xlu1 %v2668_v0 }
 0xae0   : > { %2794 = vrot.lane.b32.xlu1 %v13223_v23, %s15615_s12 }
 0xae4   : > { %2798 = vrot.lane.b32.xlu1 %v13233_v3, %s15615_s12 }
 0xae9   : > { %v2392_v11 = vpop.xlane.xlu0 %2391 }
 0xaea   : > { %12121 = vrcp.f32 %v2392_v11  ;;  %v2389_v20 = vpop.xlane.xlu1 %2388 }
 0xaeb   : > { %12123 = vrcp.f32 %v2389_v20 }
 0xaee   : > { %v2398_v37 = vpop.xlane.xlu0 %2397 }
 0xaef   : > { %12125 = vrcp.f32 %v2398_v37 }
 0xaf2   : > { %v2395_v24 = vpop.xlane.xlu1 %2394 }
 0xaf3   : > { %12127 = vrcp.f32 %v2395_v24 }
 0xaf4   : > { %v12122_v56 = vpop.eup %12121 }
 0xaf5   : > { %v12124_v40 = vpop.eup %12123  ;;  %v2404_v19 = vmul.f32 %v12122_v56, %v13433_v6 }
 0xaf6   : > { %v2403_v29 = vmul.f32 %v12124_v40, %v13435_v8  ;;  %v11755_v39 = vpop.permute.xlu1 %11754 }
 0xaf7   : > { %v11757_v43 = vunpack.i.h.bf16 %v11755_v39  ;;  %v11756_v47 = vunpack.i.l.bf16 %v11755_v39 }
 0xaf8   : > { %10232 = vmatprep.mubr.msk.f32.mxu0 %vm1810_vm9, %v2403_v29 }
 0xaf9   : > { %v2667_v23 = vpop.xlane.xlu0 %2666  ;;  %10233 = vmatmul.mubr.msk.f32.vlgmr.msra.gmra.mrb[34].mxu0 %vm1810_vm9, %v2404_v19  ;;  %v12126_v38 = vpop.eup %12125  ;;  %v11155_v6 = vpack.c.bf16 %v11757_v43, %v11756_v47 }
 0xafa   : > { %11148 = vmatpush3.bf16.msra.mxu0 %v11145_v45  ;;  %v2406_v8 = vmul.f32 %v12126_v38, %v13441_v22  ;;  %12129 = vrcp.f32 %v2667_v23 }
 0xafd   : > { %v12128_v32 = vpop.eup %12127  ;;  %v11750_v44 = vpop.permute.xlu0 %11749 }
 0xafe   : > { %v11752_v55 = vunpack.i.h.bf16 %v11750_v44  ;;  %v11751_v59 = vunpack.i.l.bf16 %v11750_v44  ;;  %v2405_v62 = vmul.f32 %v12128_v32, %v13445_v52 }
 0xb00   : > { %v11149_v63 = vpack.c.bf16 %v11752_v55, %v11751_v59  ;;  %10235 = vmatprep.mubr.msk.f32.mxu0 %vm1810_vm9, %v2405_v62 }
 0xb01   : > { %10236 = vmatmul.mubr.msk.f32.gmra.mrb[36].mxu0 %vm1810_vm9, %v2406_v8 }
 0xb02   : > { %11151 = vmatprep.subr.msk.bf16.mxu0 %vm13294_vm11, %v11149_v63 }
 0xb03   : > { %11154 = vmatpush3.bf16.msk.msra.mxu0 %vm13294_vm11, %v11149_v63 }
 0xb04   : > { %11157 = vmatprep.subr.msk.bf16.mxu0 %vm13258_vm8, %v11155_v6  ;;  %v12130_v22 = vpop.eup %12129 }
 0xb05   : > { %v2679_v17 = vmul.f32 %v12130_v22, %v13453_v46 }
 0xb27   : > { %v2664_v45 = vpop.xlane.xlu1 %2663 }
 0xb28   : > { %12131 = vrcp.f32 %v2664_v45 }
 0xb2b   : > { %v11760_v52 = vpop.permute.xlu1 %11759 }
 0xb2c   : > { %v11762_v60 = vunpack.i.h.bf16 %v11760_v52  ;;  %v11761_v21 = vunpack.i.l.bf16 %v11760_v52 }
 0xb2e   : > { %v11161_v0 = vpack.c.bf16 %v11762_v60, %v11761_v21  ;;  %v2673_v11 = vpop.xlane.xlu0 %2672 }
 0xb2f   : > { %12133 = vrcp.f32 %v2673_v11 }
 0xb32   : > { %v12132_v12 = vpop.eup %12131  ;;  %v2793_v24 = vpop.permute.xlu0 %2792 }
 0xb33   : > { %v2678_v42 = vmul.f32 %v12132_v12, %v12116_v2 }
 0xb35   : > { %10260 = vmatprep.mubr.msk.f32.mxu0 %vm1810_vm9, %v2678_v42 }
 0xb36   : > { %10261 = vmatmul.mubr.msk.f32.vlgmr.msra.gmra.mrb[38].mxu0 %vm1810_vm9, %v2679_v17  ;;  %v2797_v29 = vpop.permute.xlu0 %2796 }
 0xb37   : > { %11160 = vmatpush3.bf16.xpose.msk.msra.mxu0 %vm13258_vm8, %v11155_v6 }
 0xb38   : > { %11163 = vmatprep.subr.msk.bf16.mxu0 %vm13258_vm8, %v11161_v0 }
 0xb39   : > { %v12134_v2 = vpop.eup %12133 }
 0xb3a   : > { %v2681_v56 = vmul.f32 %v12134_v2, %v13464_v57 }
 0xb3f   : > { %11166 = vmatpush3.bf16.xpose.msk.msra.mxu0 %vm13258_vm8, %v11161_v0 }
 0xb5c   : > { %v2670_v20 = vpop.xlane.xlu1 %2669 }
 0xb5d   : > { %12135 = vrcp.f32 %v2670_v20 }
 0xb60   : > { %v2795_v40 = vpop.permute.xlu1 %2794 }
 0xb64   : > { %v2799_v19 = vpop.permute.xlu1 %2798 }
 0xb67   : > { %v12136_v46 = vpop.eup %12135 }
 0xb68   : > { %v2680_v37 = vmul.f32 %v12136_v46, %v12120_v4 }
 0xb6a   : > { %10263 = vmatprep.mubr.msk.f32.mxu0 %vm1810_vm9, %v2680_v37 }
 0xb6b   : > { %10264 = vmatmul.mubr.msk.f32.gmra.mrb[40].mxu0 %vm1810_vm9, %v2681_v56 }
 0xb6c   : > { %10274 = vmatprep.mubr.msk.f32.mxu0 %vm1704_vm6, %v2793_v24 }
 0xb6f   : > { %10275 = vmatmul.mubr.msk.f32.vlgmr.msra.gmra.mrb[42].mxu0 %vm1704_vm6, %v2795_v40 }
 0xb70   : > { %10277 = vmatprep.mubr.msk.f32.mxu0 %vm1704_vm6, %v2797_v29 }
 0xb73   : > { %10278 = vmatmul.mubr.msk.f32.gmra.mrb[44].mxu0 %vm1704_vm6, %v2799_v19 }
 0xbcc   : > { %v13510_v23 = vpop.f32.mrb[34].mxu0 }
 0xbcd   : > { %v13512_v4 = vpop.f32.mrb[35].mxu0 }
 0xbd4   : > { %v13514_v57 = vpop.f32.mrb[36].mxu0 }
 0xbd5   : > { %v13516_v39 = vpop.f32.mrb[37].mxu0 }
 0xc09   : > { %v13518_v38 = vpop.f32.mrb[38].mxu0 }
 0xc0a   : > { %v13520_v32 = vpop.f32.mrb[39].mxu0 }
 0xc3e   : > { %v13522_v43 = vpop.f32.mrb[40].mxu0 }
 0xc3f   : > { %v13524_v44 = vpop.f32.mrb[41].mxu0 }
 0xc42   : > { %v10276_v47 = vpop.f32.mrb[42].mxu0 }
 0xc43   : > { %v2910_v55 = vmul.f32 0.35355338, %v10276_v47  ;;  %v2890_v59 = vpop.f32.mrb[43].mxu0 }
 0xc44   : > { %v2909_v62 = vmul.f32 0.35355338, %v2890_v59 }
 0xc45   : > { %v2916_v8 = vsel %vm1810_vm9, %v2910_v55, -inf }
 0xc46   : > { %2917 = vmax.xlane.f32.xlu1 %v2916_v8  ;;  %v10279_v63 = vpop.f32.mrb[44].mxu0  ;;  %v2913_v6 = vsel %vm1810_vm9, %v2909_v62, -inf }
 0xc47   : > { %2914 = vmax.xlane.f32.xlu0 %v2913_v6  ;;  %v2900_v45 = vpop.f32.mrb[45].mxu0  ;;  %v2912_v22 = vmul.f32 0.35355338, %v10279_v63  ;;  %v3153_v63 = vrot.slane %v13233_v3, 4 }
 0xc48   : > { %v2911_v52 = vmul.f32 0.35355338, %v2900_v45 }
 0xc49   : > { %v2922_v60 = vsel %vm1820_vm10, %v2912_v22, -inf  ;;  %v13539_v6 = vsel %vm1879_vm7, %v3153_v63, %v3154_v30  ;;  %v13557_v30 = vsel %vm1879_vm7, %v3156_v31, %v13551_v25 }
 0xc4a   : > { %v2919_v12 = vsel %vm1810_vm9, %v2911_v52, -inf  ;;  %v13543_v45 = vpack.i.bf16 %v13252_v34, %v13539_v6 }
 0xc4b   : > { %2920 = vmax.xlane.f32.xlu0 %v2919_v12 }
 0xc4f   : > { %2923 = vmax.xlane.f32.xlu0 %v2922_v60 }
 0xc57   : > { %11764 = vrot.lane.b32.xlu1 %v13227_v16, %s15625_s13 }
 0xcd3   : > { %v2918_v21 = vpop.xlane.xlu1 %2917 }
 0xcd4   : > { %v2926_v42 = vsub.f32 %v2910_v55, %v2918_v21  ;;  %v2915_v17 = vpop.xlane.xlu0 %2914  ;;  %v13561_v21 = vpack.i.bf16 %v13551_v25, %v13557_v30 }
 0xcd5   : > { %v2925_v0 = vsub.f32 %v2909_v62, %v2915_v17 }
 0xcd6   : > { %v2931_v11 = vmul.f32 1.442695, %v2926_v42 }
 0xcd7   : > { %v2929_v20 = vmul.f32 1.442695, %v2925_v0  ;;  %v11765_v2 = vpop.permute.xlu1 %11764 }
 0xcd8   : > { %12137 = vpow2.f32 %v2931_v11  ;;  %v11767_v46 = vunpack.i.h.bf16 %v11765_v2  ;;  %v11766_v37 = vunpack.i.l.bf16 %v11765_v2  ;;  %v2921_v24 = vpop.xlane.xlu0 %2920 }
 0xcd9   : > { %12139 = vpow2.f32 %v2929_v20 }
 0xcda   : > { %v11167_v56 = vpack.c.bf16 %v11767_v46, %v11766_v37 }
 0xcdc   : > { %11168 = vmatprep.subr.bf16.mxu1 %v11167_v56  ;;  %v2924_v40 = vpop.xlane.xlu0 %2923 }
 0xcdd   : > { %v2928_v29 = vsub.f32 %v2912_v22, %v2924_v40  ;;  %11170 = vmatpush3.bf16.msra.mxu1 %v11167_v56  ;;  %v2927_v22 = vsub.f32 %v2911_v52, %v2921_v24 }
 0xcdf   : > { %v2935_v19 = vmul.f32 1.442695, %v2928_v29  ;;  %v2933_v12 = vmul.f32 1.442695, %v2927_v22 }
 0xce1   : > { %12141 = vpow2.f32 %v2935_v19 }
 0xce2   : > { %v12138_v16 = vpop.eup %12137  ;;  %12143 = vpow2.f32 %v2933_v12 }
 0xce3   : > { %v12140_v47 = vpop.eup %12139  ;;  %v2940_v55 = vsel %vm1810_vm9, %v12138_v16, 0.0 }
 0xce4   : > { %2941 = vadd.xlane.f32.xlu0 %v2940_v55  ;;  %v2937_v59 = vsel %vm1810_vm9, %v12140_v47, 0.0 }
 0xce5   : > { %2938 = vadd.xlane.f32.xlu1 %v2937_v59 }
 0xceb   : > { %v12142_v62 = vpop.eup %12141 }
 0xcec   : > { %v2946_v8 = vsel %vm1820_vm10, %v12142_v62, 0.0  ;;  %v12144_v60 = vpop.eup %12143 }
 0xced   : > { %2947 = vadd.xlane.f32.xlu0 %v2946_v8  ;;  %v2943_v3 = vsel %vm1810_vm9, %v12144_v60, 0.0 }
 0xcf6   : > { %11774 = vrot.lane.b32.xlu1 %v13543_v45, %s12521_s19 }
 0xd03   : > { %11769 = vrot.lane.b32.xlu0 %v13237_v18, %s15625_s13 }
 0xd1a   : > { %2944 = vadd.xlane.f32.xlu1 %v2943_v3 }
 0xd2b   : > { %11779 = vrot.lane.b32.xlu1 %v13561_v21, %s12521_s19 }
 0xd71   : > { %v2942_v52 = vpop.xlane.xlu0 %2941 }
 0xd72   : > { %v2939_v18 = vpop.xlane.xlu1 %2938 }
 0xd73   : > { %12145 = vrcp.f32 %v2939_v18 }
 0xd74   : > { %12147 = vrcp.f32 %v2942_v52 }
 0xd76   : > { %v11775_v35 = vpop.permute.xlu1 %11774 }
 0xd77   : > { %v11777_v28 = vunpack.i.h.bf16 %v11775_v35  ;;  %v11776_v20 = vunpack.i.l.bf16 %v11775_v35 }
 0xd79   : > { %v11177_v24 = vpack.c.bf16 %v11777_v28, %v11776_v20 }
 0xd7a   : > { %v2948_v42 = vpop.xlane.xlu0 %2947 }
 0xd7b   : > { %12149 = vrcp.f32 %v2948_v42 }
 0xd7d   : > { %v12146_v17 = vpop.eup %12145 }
 0xd7e   : > { %v11770_v0 = vpop.permute.xlu0 %11769  ;;  %v2953_v11 = vmul.f32 %v12146_v17, %v12140_v47  ;;  %v12148_v37 = vpop.eup %12147 }
 0xd7f   : > { %v11772_v31 = vunpack.i.h.bf16 %v11770_v0  ;;  %v11771_v2 = vunpack.i.l.bf16 %v11770_v0  ;;  %v2954_v56 = vmul.f32 %v12148_v37, %v12138_v16 }
 0xd80   : > { %10288 = vmatprep.mubr.msk.f32.mxu1 %vm1810_vm9, %v2953_v11 }
 0xd81   : > { %v11171_v46 = vpack.c.bf16 %v11772_v31, %v11771_v2 }
 0xd83   : > { %11173 = vmatprep.subr.msk.bf16.mxu1 %vm13294_vm11, %v11171_v46 }
 0xd84   : > { %11176 = vmatpush3.bf16.msk.msra.mxu1 %vm13294_vm11, %v11171_v46 }
 0xd85   : > { %11179 = vmatprep.subr.msk.bf16.mxu1 %vm13258_vm8, %v11177_v24  ;;  %v12150_v59 = vpop.eup %12149 }
 0xd86   : > { %v2956_v63 = vmul.f32 %v12150_v59, %v12142_v62 }
 0xd87   : > { %10289 = vmatmul.mubr.msk.f32.vlgmr.msra.gmra.mrb[82].mxu1 %vm1810_vm9, %v2954_v56 }
 0xd8d   : > { %11182 = vmatpush3.bf16.xpose.msk.msra.mxu1 %vm13258_vm8, %v11177_v24 }
 0xda7   : > { %v2945_v40 = vpop.xlane.xlu1 %2944 }
 0xda8   : > { %12151 = vrcp.f32 %v2945_v40 }
 0xdab   : > { %v11780_v29 = vpop.permute.xlu1 %11779 }
 0xdac   : > { %v11782_v19 = vunpack.i.h.bf16 %v11780_v29  ;;  %v11781_v47 = vunpack.i.l.bf16 %v11780_v29 }
 0xdae   : > { %v11183_v55 = vpack.c.bf16 %v11782_v19, %v11781_v47 }
 0xdb0   : > { %11185 = vmatprep.subr.msk.bf16.mxu1 %vm13258_vm8, %v11183_v55 }
 0xdb1   : > { %11188 = vmatpush3.bf16.xpose.msk.msra.mxu1 %vm13258_vm8, %v11183_v55 }
 0xdb2   : > { %v12152_v16 = vpop.eup %12151 }
 0xdb3   : > { %v2955_v8 = vmul.f32 %v12152_v16, %v12144_v60 }
 0xdb5   : > { %10291 = vmatprep.mubr.msk.f32.mxu1 %vm1810_vm9, %v2955_v8 }
 0xdb6   : > { %10292 = vmatmul.mubr.msk.f32.gmra.mrb[84].mxu1 %vm1810_vm9, %v2956_v63 }
 0xdb7   : > { %10302 = vmatprep.mubr.msk.f32.mxu1 %vm1704_vm6, %v13539_v6 }
 0xdba   : > { %10303 = vmatmul.mubr.msk.f32.vlgmr.msra.gmra.mrb[86].mxu1 %vm1704_vm6, %v13252_v34 }
 0xdbb   : > { %10305 = vmatprep.mubr.msk.f32.mxu1 %vm1704_vm6, %v13557_v30 }
 0xdbe   : > { %10306 = vmatmul.mubr.msk.f32.gmra.mrb[88].mxu1 %vm1704_vm6, %v13551_v25 }
 0xe5a   : > { %v13589_v22 = vpop.f32.mrb[82].mxu1 }
 0xe5b   : > { %v13591_v12 = vpop.f32.mrb[83].mxu1 }
 0xe89   : > { %v13593_v62 = vpop.f32.mrb[84].mxu1 }
 0xe8a   : > { %v13595_v60 = vpop.f32.mrb[85].mxu1 }
 0xe8d   : > { %v10304_v3 = vpop.f32.mrb[86].mxu1 }
 0xe8e   : > { %v3270_v18 = vmul.f32 0.35355338, %v10304_v3  ;;  %v3250_v52 = vpop.f32.mrb[87].mxu1 }
 0xe8f   : > { %v3269_v42 = vmul.f32 0.35355338, %v3250_v52 }
 0xe90   : > { %v3276_v35 = vsel %vm1810_vm9, %v3270_v18, -inf }
 0xe91   : > { %3277 = vmax.xlane.f32.xlu1 %v3276_v35  ;;  %v10307_v17 = vpop.f32.mrb[88].mxu1  ;;  %v3273_v0 = vsel %vm1810_vm9, %v3269_v42, -inf }
 0xe92   : > { %3274 = vmax.xlane.f32.xlu0 %v3273_v0  ;;  %v3260_v11 = vpop.f32.mrb[89].mxu1  ;;  %v3272_v20 = vmul.f32 0.35355338, %v10307_v17 }
 0xe93   : > { %v3271_v28 = vmul.f32 0.35355338, %v3260_v11 }
 0xe94   : > { %v3282_v2 = vsel %vm1820_vm10, %v3272_v20, -inf }
 0xe95   : > { %v3279_v31 = vsel %vm1810_vm9, %v3271_v28, -inf }
 0xe96   : > { %3280 = vmax.xlane.f32.xlu0 %v3279_v31 }
 0xe9a   : > { %3283 = vmax.xlane.f32.xlu0 %v3282_v2 }
 0xea2   : > { %11784 = vrot.lane.b32.xlu1 %v13543_v45, %s12522_s20 }
 0xea6   : > { %11794 = vrot.lane.b32.xlu1 %v13543_v45, %s12523_s21 }
 0xf1e   : > { %v3278_v46 = vpop.xlane.xlu1 %3277 }
 0xf1f   : > { %v3286_v37 = vsub.f32 %v3270_v18, %v3278_v46  ;;  %v3275_v24 = vpop.xlane.xlu0 %3274 }
 0xf20   : > { %v3285_v56 = vsub.f32 %v3269_v42, %v3275_v24 }
 0xf21   : > { %v3291_v40 = vmul.f32 1.442695, %v3286_v37 }
 0xf22   : > { %v3289_v29 = vmul.f32 1.442695, %v3285_v56  ;;  %v11785_v19 = vpop.permute.xlu1 %11784 }
 0xf23   : > { %12153 = vpow2.f32 %v3291_v40  ;;  %v11787_v47 = vunpack.i.h.bf16 %v11785_v19  ;;  %v11786_v55 = vunpack.i.l.bf16 %v11785_v19  ;;  %v3281_v18 = vpop.xlane.xlu0 %3280 }
 0xf24   : > { %12155 = vpow2.f32 %v3289_v29  ;;  %v3287_v35 = vsub.f32 %v3271_v28, %v3281_v18 }
 0xf25   : > { %v11189_v59 = vpack.c.bf16 %v11787_v47, %v11786_v55 }
 0xf26   : > { %v3293_v0 = vmul.f32 1.442695, %v3287_v35  ;;  %v11795_v28 = vpop.permute.xlu1 %11794 }
 0xf27   : > { %11190 = vmatprep.subr.bf16.mxu0 %v11189_v59  ;;  %v3284_v52 = vpop.xlane.xlu0 %3283  ;;  %v11797_v56 = vunpack.i.h.bf16 %v11795_v28  ;;  %v11796_v40 = vunpack.i.l.bf16 %v11795_v28 }
 0xf28   : > { %11192 = vmatpush3.bf16.msra.mxu0 %v11189_v59  ;;  %v3288_v42 = vsub.f32 %v3272_v20, %v3284_v52 }
 0xf29   : > { %v11199_v55 = vpack.c.bf16 %v11797_v56, %v11796_v40 }
 0xf2a   : > { %v3295_v17 = vmul.f32 1.442695, %v3288_v42 }
 0xf2c   : > { %12157 = vpow2.f32 %v3295_v17 }
 0xf2d   : > { %v12154_v16 = vpop.eup %12153  ;;  %12159 = vpow2.f32 %v3293_v0 }
 0xf2e   : > { %v12156_v8 = vpop.eup %12155  ;;  %v3300_v63 = vsel %vm1810_vm9, %v12154_v16, 0.0 }
 0xf2f   : > { %3301 = vadd.xlane.f32.xlu0 %v3300_v63  ;;  %v3297_v3 = vsel %vm1810_vm9, %v12156_v8, 0.0 }
 0xf30   : > { %3298 = vadd.xlane.f32.xlu1 %v3297_v3 }
 0xf36   : > { %v12158_v11 = vpop.eup %12157 }
 0xf37   : > { %v12160_v31 = vpop.eup %12159  ;;  %v3306_v2 = vsel %vm1820_vm10, %v12158_v11, 0.0 }
 0xf38   : > { %v3303_v46 = vsel %vm1810_vm9, %v12160_v31, 0.0 }
 0xf41   : > { %11799 = vrot.lane.b32.xlu1 %v13561_v21, %s12523_s21 }
 0xf45   : > { %11789 = vrot.lane.b32.xlu0 %v13561_v21, %s12522_s20 }
 0xf64   : > { %3307 = vadd.xlane.f32.xlu0 %v3306_v2 }
 0xf65   : > { %3304 = vadd.xlane.f32.xlu1 %v3303_v46 }
 0xf76   : > { %3429 = vrot.lane.b32.xlu1 %v13252_v34, %s12524_s22 }
 0xf7a   : > { %3433 = vrot.lane.b32.xlu1 %v13551_v25, %s12524_s22  ;;  %3427 = vrot.lane.b32.xlu0 %v13539_v6, %s12524_s22 }
 0xf7e   : > { %3431 = vrot.lane.b32.xlu0 %v13557_v30, %s12524_s22 }
 0xfbc   : > { %v3302_v20 = vpop.xlane.xlu0 %3301 }
 0xfbd   : > { %12161 = vrcp.f32 %v3302_v20  ;;  %v3299_v37 = vpop.xlane.xlu1 %3298 }
 0xfbe   : > { %12163 = vrcp.f32 %v3299_v37 }
 0xfc0   : > { %v11790_v24 = vpop.permute.xlu0 %11789 }
 0xfc1   : > { %v11792_v29 = vunpack.i.h.bf16 %v11790_v24  ;;  %v11791_v19 = vunpack.i.l.bf16 %v11790_v24  ;;  %v11800_v63 = vpop.permute.xlu1 %11799 }
 0xfc2   : > { %v11802_v42 = vunpack.i.h.bf16 %v11800_v63  ;;  %v11801_v35 = vunpack.i.l.bf16 %v11800_v63 }
 0xfc3   : > { %v11193_v47 = vpack.c.bf16 %v11792_v29, %v11791_v19 }
 0xfc4   : > { %v11205_v17 = vpack.c.bf16 %v11802_v42, %v11801_v35 }
 0xfc5   : > { %11195 = vmatprep.subr.msk.bf16.mxu0 %vm13294_vm11, %v11193_v47 }
 0xfc6   : > { %11198 = vmatpush3.bf16.msk.msra.mxu0 %vm13294_vm11, %v11193_v47 }
 0xfc7   : > { %v12162_v59 = vpop.eup %12161  ;;  %11201 = vmatprep.subr.msk.bf16.mxu0 %vm13258_vm8, %v11199_v55 }
 0xfc8   : > { %v12164_v3 = vpop.eup %12163  ;;  %v3314_v52 = vmul.f32 %v12162_v59, %v12154_v16 }
 0xfc9   : > { %v3313_v18 = vmul.f32 %v12164_v3, %v12156_v8 }
 0xfcb   : > { %10316 = vmatprep.mubr.msk.f32.mxu0 %vm1810_vm9, %v3313_v18 }
 0xfcc   : > { %10317 = vmatmul.mubr.msk.f32.vlgmr.msra.gmra.mrb[46].mxu0 %vm1810_vm9, %v3314_v52 }
 0xfcf   : > { %11204 = vmatpush3.bf16.xpose.msk.msra.mxu0 %vm13258_vm8, %v11199_v55 }
 0xfd0   : > { %11207 = vmatprep.subr.msk.bf16.mxu0 %vm13258_vm8, %v11205_v17 }
 0xfd7   : > { %11210 = vmatpush3.bf16.xpose.msk.msra.mxu0 %vm13258_vm8, %v11205_v17 }
 0xff1   : > { %v3308_v0 = vpop.xlane.xlu0 %3307 }
 0xff2   : > { %12165 = vrcp.f32 %v3308_v0  ;;  %v3305_v8 = vpop.xlane.xlu1 %3304 }
 0xff3   : > { %12167 = vrcp.f32 %v3305_v8 }
 0xff5   : > { %v3428_v28 = vpop.permute.xlu0 %3427 }
 0xff6   : > { %v3430_v37 = vpop.permute.xlu1 %3429 }
 0xff9   : > { %v3432_v24 = vpop.permute.xlu0 %3431 }
 0xffa   : > { %v3434_v56 = vpop.permute.xlu1 %3433 }
 0xffc   : > { %v12166_v16 = vpop.eup %12165 }
 0xffd   : > { %v12168_v2 = vpop.eup %12167  ;;  %v3316_v20 = vmul.f32 %v12166_v16, %v12158_v11 }
 0xffe   : > { %v3315_v46 = vmul.f32 %v12168_v2, %v12160_v31 }
0x1000   : > { %10319 = vmatprep.mubr.msk.f32.mxu0 %vm1810_vm9, %v3315_v46 }
0x1001   : > { %10320 = vmatmul.mubr.msk.f32.gmra.mrb[48].mxu0 %vm1810_vm9, %v3316_v20 }
0x1002   : > { %10330 = vmatprep.mubr.msk.f32.mxu0 %vm1704_vm6, %v3428_v28 }
0x1005   : > { %10331 = vmatmul.mubr.msk.f32.vlgmr.msra.gmra.mrb[50].mxu0 %vm1704_vm6, %v3430_v37 }
0x1006   : > { %10333 = vmatprep.mubr.msk.f32.mxu0 %vm1704_vm6, %v3432_v24 }
0x1009   : > { %10334 = vmatmul.mubr.msk.f32.gmra.mrb[52].mxu0 %vm1704_vm6, %v3434_v56 }
0x109f   : > { %v13641_v40 = vpop.f32.mrb[46].mxu0 }
0x10a0   : > { %v13643_v31 = vpop.f32.mrb[47].mxu0 }
0x10d4   : > { %v13645_v11 = vpop.f32.mrb[48].mxu0 }
0x10d5   : > { %v13647_v29 = vpop.f32.mrb[49].mxu0 }
0x10d8   : > { %v10332_v19 = vpop.f32.mrb[50].mxu0 }
0x10d9   : > { %v3545_v47 = vmul.f32 0.35355338, %v10332_v19  ;;  %v3525_v55 = vpop.f32.mrb[51].mxu0 }
0x10da   : > { %v3544_v59 = vmul.f32 0.35355338, %v3525_v55 }
0x10db   : > { %v3551_v63 = vsel %vm1810_vm9, %v3545_v47, -inf }
0x10dc   : > { %3552 = vmax.xlane.f32.xlu1 %v3551_v63  ;;  %v10335_v3 = vpop.f32.mrb[52].mxu0  ;;  %v3548_v18 = vsel %vm1810_vm9, %v3544_v59, -inf }
0x10dd   : > { %3549 = vmax.xlane.f32.xlu0 %v3548_v18  ;;  %v3535_v52 = vpop.f32.mrb[53].mxu0  ;;  %v3547_v35 = vmul.f32 0.35355338, %v10335_v3 }
0x10de   : > { %v3546_v42 = vmul.f32 0.35355338, %v3535_v52 }
0x10df   : > { %v3557_v0 = vsel %vm1820_vm10, %v3547_v35, -inf }
0x10e0   : > { %v3554_v17 = vsel %vm1810_vm9, %v3546_v42, -inf }
0x10e1   : > { %3555 = vmax.xlane.f32.xlu0 %v3554_v17 }
0x10e5   : > { %3558 = vmax.xlane.f32.xlu0 %v3557_v0 }
0x10ed   : > { %11804 = vrot.lane.b32.xlu1 %v13543_v45, %s12525_s23 }
0x10f1   : > { %11814 = vrot.lane.b32.xlu1 %v13543_v45, %s12526_s24 }
0x1169   : > { %v3553_v8 = vpop.xlane.xlu1 %3552 }
0x116a   : > { %v3561_v16 = vsub.f32 %v3545_v47, %v3553_v8  ;;  %v3550_v2 = vpop.xlane.xlu0 %3549 }
0x116b   : > { %v3560_v46 = vsub.f32 %v3544_v59, %v3550_v2 }
0x116c   : > { %v3566_v28 = vmul.f32 1.442695, %v3561_v16 }
0x116d   : > { %v3564_v20 = vmul.f32 1.442695, %v3560_v46  ;;  %v11805_v37 = vpop.permute.xlu1 %11804 }
0x116e   : > { %12169 = vpow2.f32 %v3566_v28  ;;  %v11807_v24 = vunpack.i.h.bf16 %v11805_v37  ;;  %v11806_v56 = vunpack.i.l.bf16 %v11805_v37  ;;  %v3556_v47 = vpop.xlane.xlu0 %3555 }
0x116f   : > { %12171 = vpow2.f32 %v3564_v20  ;;  %v3562_v17 = vsub.f32 %v3546_v42, %v3556_v47 }
0x1170   : > { %v11211_v19 = vpack.c.bf16 %v11807_v24, %v11806_v56 }
0x1171   : > { %v3568_v8 = vmul.f32 1.442695, %v3562_v17  ;;  %v11815_v42 = vpop.permute.xlu1 %11814 }
0x1172   : > { %11212 = vmatprep.subr.bf16.mxu1 %v11211_v19  ;;  %v3559_v59 = vpop.xlane.xlu0 %3558  ;;  %v11817_v24 = vunpack.i.h.bf16 %v11815_v42  ;;  %v11816_v56 = vunpack.i.l.bf16 %v11815_v42 }
0x1173   : > { %11214 = vmatpush3.bf16.msra.mxu1 %v11211_v19  ;;  %v3563_v52 = vsub.f32 %v3547_v35, %v3559_v59 }
0x1174   : > { %v11221_v47 = vpack.c.bf16 %v11817_v24, %v11816_v56 }
0x1175   : > { %v3570_v0 = vmul.f32 1.442695, %v3563_v52 }
0x1177   : > { %12173 = vpow2.f32 %v3570_v0 }
0x1178   : > { %v12170_v55 = vpop.eup %12169  ;;  %12175 = vpow2.f32 %v3568_v8 }
0x1179   : > { %v12172_v63 = vpop.eup %12171  ;;  %v3575_v3 = vsel %vm1810_vm9, %v12170_v55, 0.0 }
0x117a   : > { %3576 = vadd.xlane.f32.xlu0 %v3575_v3  ;;  %v3572_v18 = vsel %vm1810_vm9, %v12172_v63, 0.0 }
0x117b   : > { %3573 = vadd.xlane.f32.xlu1 %v3572_v18 }
0x1181   : > { %v12174_v16 = vpop.eup %12173 }
0x1182   : > { %v12176_v2 = vpop.eup %12175  ;;  %v3581_v46 = vsel %vm1820_vm10, %v12174_v16, 0.0 }
0x1183   : > { %v3578_v28 = vsel %vm1810_vm9, %v12176_v2, 0.0 }
0x118c   : > { %11819 = vrot.lane.b32.xlu1 %v13561_v21, %s12526_s24 }
0x1190   : > { %11809 = vrot.lane.b32.xlu0 %v13561_v21, %s12525_s23 }
0x11af   : > { %3582 = vadd.xlane.f32.xlu0 %v3581_v46 }
0x11b0   : > { %3579 = vadd.xlane.f32.xlu1 %v3578_v28 }
0x11c1   : > { %3704 = vrot.lane.b32.xlu1 %v13252_v34, %s12528_s26 }
0x11c5   : > { %3708 = vrot.lane.b32.xlu1 %v13551_v25, %s12528_s26  ;;  %3702 = vrot.lane.b32.xlu0 %v13539_v6, %s12528_s26 }
0x11c9   : > { %3706 = vrot.lane.b32.xlu0 %v13557_v30, %s12528_s26 }
0x1207   : > { %v3577_v35 = vpop.xlane.xlu0 %3576 }
0x1208   : > { %12177 = vrcp.f32 %v3577_v35  ;;  %v3574_v20 = vpop.xlane.xlu1 %3573 }
0x1209   : > { %12179 = vrcp.f32 %v3574_v20 }
0x120b   : > { %v11810_v37 = vpop.permute.xlu0 %11809 }
0x120c   : > { %v11812_v19 = vunpack.i.h.bf16 %v11810_v37  ;;  %v11811_v3 = vunpack.i.l.bf16 %v11810_v37  ;;  %v11820_v52 = vpop.permute.xlu1 %11819 }
0x120d   : > { %v11822_v46 = vunpack.i.h.bf16 %v11820_v52  ;;  %v11821_v28 = vunpack.i.l.bf16 %v11820_v52 }
0x120e   : > { %v11215_v18 = vpack.c.bf16 %v11812_v19, %v11811_v3 }
0x120f   : > { %v11227_v42 = vpack.c.bf16 %v11822_v46, %v11821_v28 }
0x1210   : > { %11217 = vmatprep.subr.msk.bf16.mxu1 %vm13294_vm11, %v11215_v18 }
0x1211   : > { %11220 = vmatpush3.bf16.msk.msra.mxu1 %vm13294_vm11, %v11215_v18 }
0x1212   : > { %v12178_v59 = vpop.eup %12177  ;;  %11223 = vmatprep.subr.msk.bf16.mxu1 %vm13258_vm8, %v11221_v47 }
0x1213   : > { %v12180_v17 = vpop.eup %12179  ;;  %v3589_v8 = vmul.f32 %v12178_v59, %v12170_v55 }
0x1214   : > { %v3588_v0 = vmul.f32 %v12180_v17, %v12172_v63 }
0x1216   : > { %10344 = vmatprep.mubr.msk.f32.mxu1 %vm1810_vm9, %v3588_v0 }
0x1217   : > { %10345 = vmatmul.mubr.msk.f32.vlgmr.msra.gmra.mrb[90].mxu1 %vm1810_vm9, %v3589_v8 }
0x121a   : > { %11226 = vmatpush3.bf16.xpose.msk.msra.mxu1 %vm13258_vm8, %v11221_v47 }
0x121b   : > { %11229 = vmatprep.subr.msk.bf16.mxu1 %vm13258_vm8, %v11227_v42 }
0x1222   : > { %11232 = vmatpush3.bf16.xpose.msk.msra.mxu1 %vm13258_vm8, %v11227_v42 }
0x123c   : > { %v3583_v35 = vpop.xlane.xlu0 %3582 }
0x123d   : > { %12181 = vrcp.f32 %v3583_v35  ;;  %v3580_v63 = vpop.xlane.xlu1 %3579 }
0x123e   : > { %12183 = vrcp.f32 %v3580_v63 }
0x1240   : > { %v3703_v24 = vpop.permute.xlu0 %3702 }
0x1241   : > { %v3705_v19 = vpop.permute.xlu1 %3704 }
0x1244   : > { %v3707_v3 = vpop.permute.xlu0 %3706 }
0x1245   : > { %v3709_v18 = vpop.permute.xlu1 %3708 }
0x1247   : > { %v12182_v55 = vpop.eup %12181 }
0x1248   : > { %v12184_v20 = vpop.eup %12183  ;;  %v3591_v56 = vmul.f32 %v12182_v55, %v12174_v16 }
0x1249   : > { %v3590_v37 = vmul.f32 %v12184_v20, %v12176_v2 }
0x124b   : > { %10347 = vmatprep.mubr.msk.f32.mxu1 %vm1810_vm9, %v3590_v37 }
0x124c   : > { %10348 = vmatmul.mubr.msk.f32.gmra.mrb[92].mxu1 %vm1810_vm9, %v3591_v56 }
0x124d   : > { %10358 = vmatprep.mubr.msk.f32.mxu1 %vm1704_vm6, %v3703_v24 }
0x1250   : > { %10359 = vmatmul.mubr.msk.f32.vlgmr.msra.gmra.mrb[94].mxu1 %vm1704_vm6, %v3705_v19 }
0x1251   : > { %10361 = vmatprep.mubr.msk.f32.mxu1 %vm1704_vm6, %v3707_v3 }
0x1254   : > { %10362 = vmatmul.mubr.msk.f32.gmra.mrb[96].mxu1 %vm1704_vm6, %v3709_v18 }
0x12ea   : > { %v13693_v47 = vpop.f32.mrb[90].mxu1 }
0x12eb   : > { %v13695_v2 = vpop.f32.mrb[91].mxu1 }
0x131f   : > { %v13697_v16 = vpop.f32.mrb[92].mxu1 }
0x1320   : > { %v13699_v59 = vpop.f32.mrb[93].mxu1 }
0x1323   : > { %v10360_v52 = vpop.f32.mrb[94].mxu1 }
0x1324   : > { %v3820_v17 = vmul.f32 0.35355338, %v10360_v52  ;;  %v3800_v0 = vpop.f32.mrb[95].mxu1 }
0x1325   : > { %v3819_v8 = vmul.f32 0.35355338, %v3800_v0 }
0x1326   : > { %v3826_v46 = vsel %vm1810_vm9, %v3820_v17, -inf }
0x1327   : > { %3827 = vmax.xlane.f32.xlu1 %v3826_v46  ;;  %v10363_v28 = vpop.f32.mrb[96].mxu1  ;;  %v3823_v42 = vsel %vm1810_vm9, %v3819_v8, -inf }
0x1328   : > { %3824 = vmax.xlane.f32.xlu0 %v3823_v42  ;;  %v3810_v35 = vpop.f32.mrb[97].mxu1  ;;  %v3822_v55 = vmul.f32 0.35355338, %v10363_v28 }
0x1329   : > { %v3821_v63 = vmul.f32 0.35355338, %v3810_v35 }
0x132a   : > { %v3832_v37 = vsel %vm1820_vm10, %v3822_v55, -inf }
0x132b   : > { %v3829_v20 = vsel %vm1810_vm9, %v3821_v63, -inf }
0x132c   : > { %3830 = vmax.xlane.f32.xlu0 %v3829_v20 }
0x1330   : > { %3833 = vmax.xlane.f32.xlu0 %v3832_v37 }
0x1338   : > { %11824 = vrot.lane.b32.xlu1 %v13543_v45, %s12530_s28 }
0x133c   : > { %11834 = vrot.lane.b32.xlu1 %v13543_v45, %s15621_s25 }
0x13b4   : > { %v3828_v24 = vpop.xlane.xlu1 %3827 }
0x13b5   : > { %v3836_v56 = vsub.f32 %v3820_v17, %v3828_v24  ;;  %v3825_v19 = vpop.xlane.xlu0 %3824 }
0x13b6   : > { %v3835_v3 = vsub.f32 %v3819_v8, %v3825_v19 }
0x13b7   : > { %v3841_v18 = vmul.f32 1.442695, %v3836_v56 }
0x13b8   : > { %v3839_v52 = vmul.f32 1.442695, %v3835_v3  ;;  %v11825_v0 = vpop.permute.xlu1 %11824 }
0x13b9   : > { %12185 = vpow2.f32 %v3841_v18  ;;  %v11827_v46 = vunpack.i.h.bf16 %v11825_v0  ;;  %v11826_v28 = vunpack.i.l.bf16 %v11825_v0  ;;  %v3831_v17 = vpop.xlane.xlu0 %3830 }
0x13ba   : > { %12187 = vpow2.f32 %v3839_v52  ;;  %v3837_v56 = vsub.f32 %v3821_v63, %v3831_v17 }
0x13bb   : > { %v11233_v42 = vpack.c.bf16 %v11827_v46, %v11826_v28 }
0x13bc   : > { %v3843_v3 = vmul.f32 1.442695, %v3837_v56  ;;  %v11835_v63 = vpop.permute.xlu1 %11834 }
0x13bd   : > { %11234 = vmatprep.subr.bf16.mxu0 %v11233_v42  ;;  %v3834_v8 = vpop.xlane.xlu0 %3833 }
0x13be   : > { %11236 = vmatpush3.bf16.msra.mxu0 %v11233_v42  ;;  %v3838_v24 = vsub.f32 %v3822_v55, %v3834_v8  ;;  %v11837_v42 = vunpack.i.h.bf16 %v11835_v63 }
0x13c0   : > { %v3845_v19 = vmul.f32 1.442695, %v3838_v24 }
0x13c2   : > { %12189 = vpow2.f32 %v3845_v19 }
0x13c3   : > { %v12186_v35 = vpop.eup %12185  ;;  %12191 = vpow2.f32 %v3843_v3 }
0x13c4   : > { %v12188_v20 = vpop.eup %12187  ;;  %v3850_v37 = vsel %vm1810_vm9, %v12186_v35, 0.0 }
0x13c5   : > { %3851 = vadd.xlane.f32.xlu0 %v3850_v37  ;;  %v3847_v14 = vsel %vm1810_vm9, %v12188_v20, 0.0  ;;  %v11836_v37 = vunpack.i.l.bf16 %v11835_v63 }
0x13c6   : > { %3848 = vadd.xlane.f32.xlu1 %v3847_v14 }
0x13c7   : > { %v11243_v56 = vpack.c.bf16 %v11837_v42, %v11836_v37 }
0x13cc   : > { %v12190_v18 = vpop.eup %12189 }
0x13cd   : > { %v12192_v52 = vpop.eup %12191  ;;  %v3856_v0 = vsel %vm1820_vm10, %v12190_v18, 0.0 }
0x13ce   : > { %v3853_v14 = vsel %vm1810_vm9, %v12192_v52, 0.0 }
0x13d7   : > { %11839 = vrot.lane.b32.xlu1 %v13561_v21, %s15621_s25  ;;  %s15657_s25 = smov 64  }
0x13db   : > { %11829 = vrot.lane.b32.xlu0 %v13561_v21, %s12530_s28 }
0x13fa   : > { %3857 = vadd.xlane.f32.xlu0 %v3856_v0 }
0x13fb   : > { %3854 = vadd.xlane.f32.xlu1 %v3853_v14 }
0x140c   : > { %3979 = vrot.lane.b32.xlu1 %v13252_v34, %s15619_s27 }
0x1410   : > { %3983 = vrot.lane.b32.xlu1 %v13551_v25, %s15619_s27  ;;  %3977 = vrot.lane.b32.xlu0 %v13539_v6, %s15619_s27 }
0x1414   : > { %3981 = vrot.lane.b32.xlu0 %v13557_v30, %s15619_s27  ;;  %s15658_s27 = smov 104  }
0x1452   : > { %v3852_v55 = vpop.xlane.xlu0 %3851 }
0x1453   : > { %12193 = vrcp.f32 %v3852_v55  ;;  %v3849_v46 = vpop.xlane.xlu1 %3848 }
0x1454   : > { %12195 = vrcp.f32 %v3849_v46 }
0x1456   : > { %v11830_v28 = vpop.permute.xlu0 %11829 }
0x1457   : > { %v11832_v17 = vunpack.i.h.bf16 %v11830_v28  ;;  %v11831_v8 = vunpack.i.l.bf16 %v11830_v28  ;;  %v11840_v3 = vpop.permute.xlu1 %11839 }
0x1458   : > { %v11842_v46 = vunpack.i.h.bf16 %v11840_v3  ;;  %v11841_v63 = vunpack.i.l.bf16 %v11840_v3 }
0x1459   : > { %v11237_v24 = vpack.c.bf16 %v11832_v17, %v11831_v8 }
0x145a   : > { %v11249_v28 = vpack.c.bf16 %v11842_v46, %v11841_v63 }
0x145b   : > { %11239 = vmatprep.subr.msk.bf16.mxu0 %vm13294_vm11, %v11237_v24 }
0x145c   : > { %11242 = vmatpush3.bf16.msk.msra.mxu0 %vm13294_vm11, %v11237_v24 }
0x145d   : > { %v12194_v19 = vpop.eup %12193  ;;  %11245 = vmatprep.subr.msk.bf16.mxu0 %vm13258_vm8, %v11243_v56 }
0x145e   : > { %v12196_v0 = vpop.eup %12195  ;;  %v3864_v55 = vmul.f32 %v12194_v19, %v12186_v35 }
0x145f   : > { %v3863_v14 = vmul.f32 %v12196_v0, %v12188_v20 }
0x1461   : > { %10372 = vmatprep.mubr.msk.f32.mxu0 %vm1810_vm9, %v3863_v14 }
0x1462   : > { %10373 = vmatmul.mubr.msk.f32.vlgmr.msra.gmra.mrb[54].mxu0 %vm1810_vm9, %v3864_v55 }
0x1465   : > { %11248 = vmatpush3.bf16.xpose.msk.msra.mxu0 %vm13258_vm8, %v11243_v56 }
0x1466   : > { %11251 = vmatprep.subr.msk.bf16.mxu0 %vm13258_vm8, %v11249_v28 }
0x146d   : > { %11254 = vmatpush3.bf16.xpose.msk.msra.mxu0 %vm13258_vm8, %v11249_v28 }
0x1487   : > { %v3858_v42 = vpop.xlane.xlu0 %3857 }
0x1488   : > { %12197 = vrcp.f32 %v3858_v42  ;;  %v3855_v20 = vpop.xlane.xlu1 %3854 }
0x1489   : > { %12199 = vrcp.f32 %v3855_v20 }
0x148b   : > { %v3978_v8 = vpop.permute.xlu0 %3977 }
0x148c   : > { %v3980_v56 = vpop.permute.xlu1 %3979 }
0x148f   : > { %v3982_v19 = vpop.permute.xlu0 %3981 }
0x1490   : > { %v3984_v3 = vpop.permute.xlu1 %3983 }
0x1492   : > { %v12198_v35 = vpop.eup %12197 }
0x1493   : > { %v12200_v37 = vpop.eup %12199  ;;  %v3866_v24 = vmul.f32 %v12198_v35, %v12190_v18 }
0x1494   : > { %v3865_v17 = vmul.f32 %v12200_v37, %v12192_v52 }
0x1496   : > { %10375 = vmatprep.mubr.msk.f32.mxu0 %vm1810_vm9, %v3865_v17 }
0x1497   : > { %10376 = vmatmul.mubr.msk.f32.gmra.mrb[56].mxu0 %vm1810_vm9, %v3866_v24 }
0x1498   : > { %10386 = vmatprep.mubr.msk.f32.mxu0 %vm1704_vm6, %v3978_v8 }
0x149b   : > { %10387 = vmatmul.mubr.msk.f32.vlgmr.msra.gmra.mrb[58].mxu0 %vm1704_vm6, %v3980_v56 }
0x149c   : > { %10389 = vmatprep.mubr.msk.f32.mxu0 %vm1704_vm6, %v3982_v19 }
0x149f   : > { %10390 = vmatmul.mubr.msk.f32.gmra.mrb[60].mxu0 %vm1704_vm6, %v3984_v3 }
0x1535   : > { %v13745_v0 = vpop.f32.mrb[54].mxu0 }
0x1536   : > { %v13747_v52 = vpop.f32.mrb[55].mxu0 }
0x156a   : > { %v13749_v18 = vpop.f32.mrb[56].mxu0 }
0x156b   : > { %v13751_v14 = vpop.f32.mrb[57].mxu0 }
0x156e   : > { %v10388_v55 = vpop.f32.mrb[58].mxu0 }
0x156f   : > { %v4095_v46 = vmul.f32 0.35355338, %v10388_v55  ;;  %v4075_v63 = vpop.f32.mrb[59].mxu0 }
0x1570   : > { %v4094_v28 = vmul.f32 0.35355338, %v4075_v63 }
0x1571   : > { %v4101_v42 = vsel %vm1810_vm9, %v4095_v46, -inf }
0x1572   : > { %4102 = vmax.xlane.f32.xlu1 %v4101_v42  ;;  %v10391_v20 = vpop.f32.mrb[60].mxu0  ;;  %v4098_v35 = vsel %vm1810_vm9, %v4094_v28, -inf }
0x1573   : > { %4099 = vmax.xlane.f32.xlu0 %v4098_v35  ;;  %v4085_v37 = vpop.f32.mrb[61].mxu0  ;;  %v4097_v8 = vmul.f32 0.35355338, %v10391_v20 }
0x1574   : > { %v4096_v17 = vmul.f32 0.35355338, %v4085_v37 }
0x1575   : > { %v4107_v56 = vsel %vm1820_vm10, %v4097_v8, -inf }
0x1576   : > { %v4104_v24 = vsel %vm1810_vm9, %v4096_v17, -inf }
0x1577   : > { %4105 = vmax.xlane.f32.xlu0 %v4104_v24 }
0x157b   : > { %4108 = vmax.xlane.f32.xlu0 %v4107_v56 }
0x1583   : > { %11844 = vrot.lane.b32.xlu1 %v13543_v45, %s12531_s29 }
0x1587   : > { %11854 = vrot.lane.b32.xlu1 %v13543_v45, %s15617_s11 }
0x15ff   : > { %v4103_v19 = vpop.xlane.xlu1 %4102 }
0x1600   : > { %v4111_v3 = vsub.f32 %v4095_v46, %v4103_v19  ;;  %v4100_v55 = vpop.xlane.xlu0 %4099 }
0x1601   : > { %v4110_v63 = vsub.f32 %v4094_v28, %v4100_v55 }
0x1602   : > { %v4116_v42 = vmul.f32 1.442695, %v4111_v3 }
0x1603   : > { %v4114_v35 = vmul.f32 1.442695, %v4110_v63  ;;  %v11845_v37 = vpop.permute.xlu1 %11844 }
0x1604   : > { %12201 = vpow2.f32 %v4116_v42  ;;  %v11847_v20 = vunpack.i.h.bf16 %v11845_v37  ;;  %v11846_v10 = vunpack.i.l.bf16 %v11845_v37  ;;  %v4106_v46 = vpop.xlane.xlu0 %4105 }
0x1605   : > { %12203 = vpow2.f32 %v4114_v35 }
0x1606   : > { %v11255_v24 = vpack.c.bf16 %v11847_v20, %v11846_v10  ;;  %v4112_v10 = vsub.f32 %v4096_v17, %v4106_v46 }
0x1607   : > { %v11855_v17 = vpop.permute.xlu1 %11854 }
0x1608   : > { %11256 = vmatprep.subr.bf16.mxu1 %v11255_v24  ;;  %v4109_v28 = vpop.xlane.xlu0 %4108  ;;  %v4118_v55 = vmul.f32 1.442695, %v4112_v10  ;;  %v11857_v20 = vunpack.i.h.bf16 %v11855_v17 }
0x1609   : > { %11258 = vmatpush3.bf16.msra.mxu1 %v11255_v24  ;;  %v4113_v19 = vsub.f32 %v4097_v8, %v4109_v28  ;;  %v11856_v24 = vunpack.i.l.bf16 %v11855_v17 }
0x160b   : > { %v4120_v3 = vmul.f32 1.442695, %v4113_v19  ;;  %v11265_v19 = vpack.c.bf16 %v11857_v20, %v11856_v24 }
0x160d   : > { %12205 = vpow2.f32 %v4120_v3 }
0x160e   : > { %v12202_v56 = vpop.eup %12201  ;;  %12207 = vpow2.f32 %v4118_v55 }
0x160f   : > { %v12204_v15 = vpop.eup %12203  ;;  %v4125_v9 = vsel %vm1810_vm9, %v12202_v56, 0.0 }
0x1610   : > { %4126 = vadd.xlane.f32.xlu0 %v4125_v9  ;;  %v4122_v5 = vsel %vm1810_vm9, %v12204_v15, 0.0 }
0x1611   : > { %4123 = vadd.xlane.f32.xlu1 %v4122_v5 }
0x1617   : > { %v12206_v63 = vpop.eup %12205 }
0x1618   : > { %v12208_v42 = vpop.eup %12207  ;;  %v4131_v9 = vsel %vm1820_vm10, %v12206_v63, 0.0 }
0x1619   : > { %v4128_v5 = vsel %vm1810_vm9, %v12208_v42, 0.0 }
0x1622   : > { %11859 = vrot.lane.b32.xlu1 %v13561_v21, %s15617_s11  ;;  %s15661_s11 = smov 16  }
0x1626   : > { %11849 = vrot.lane.b32.xlu0 %v13561_v21, %s12531_s29 }
0x1645   : > { %4132 = vadd.xlane.f32.xlu0 %v4131_v9 }
0x1646   : > { %4129 = vadd.xlane.f32.xlu1 %v4128_v5 }
0x1657   : > { %4254 = vrot.lane.b32.xlu1 %v13252_v34, %s15615_s12 }
0x165b   : > { %4258 = vrot.lane.b32.xlu1 %v13551_v25, %s15615_s12  ;;  %4252 = vrot.lane.b32.xlu0 %v13539_v6, %s15615_s12 }
0x165f   : > { %4256 = vrot.lane.b32.xlu0 %v13557_v30, %s15615_s12 }
0x169d   : > { %v4127_v8 = vpop.xlane.xlu0 %4126 }
0x169e   : > { %12209 = vrcp.f32 %v4127_v8  ;;  %v4124_v35 = vpop.xlane.xlu1 %4123 }
0x169f   : > { %12211 = vrcp.f32 %v4124_v35 }
0x16a1   : > { %v11850_v37 = vpop.permute.xlu0 %11849 }
0x16a2   : > { %v11852_v46 = vunpack.i.h.bf16 %v11850_v37  ;;  %v11851_v28 = vunpack.i.l.bf16 %v11850_v37  ;;  %v11860_v25 = vpop.permute.xlu1 %11859 }
0x16a3   : > { %v11862_v55 = vunpack.i.h.bf16 %v11860_v25  ;;  %v11861_v9 = vunpack.i.l.bf16 %v11860_v25 }
0x16a4   : > { %v11259_v34 = vpack.c.bf16 %v11852_v46, %v11851_v28 }
0x16a5   : > { %v11271_v5 = vpack.c.bf16 %v11862_v55, %v11861_v9 }
0x16a6   : > { %11261 = vmatprep.subr.msk.bf16.mxu1 %vm13294_vm11, %v11259_v34 }
0x16a7   : > { %11264 = vmatpush3.bf16.msk.msra.mxu1 %vm13294_vm11, %v11259_v34  ;;  %v15647_v34 = vmov 0.0  }
0x16a8   : > { %v12210_v6 = vpop.eup %12209  ;;  %11267 = vmatprep.subr.msk.bf16.mxu1 %vm13258_vm8, %v11265_v19 }
0x16a9   : > { %v12212_v30 = vpop.eup %12211  ;;  %v4139_v3 = vmul.f32 %v12210_v6, %v12202_v56 }
0x16aa   : > { %v4138_v10 = vmul.f32 %v12212_v30, %v12204_v15 }
0x16ac   : > { %10400 = vmatprep.mubr.msk.f32.mxu1 %vm1810_vm9, %v4138_v10 }
0x16ad   : > { %10401 = vmatmul.mubr.msk.f32.vlgmr.msra.gmra.mrb[98].mxu1 %vm1810_vm9, %v4139_v3 }
0x16b0   : > { %11270 = vmatpush3.bf16.xpose.msk.msra.mxu1 %vm13258_vm8, %v11265_v19 }
0x16b1   : > { %11273 = vmatprep.subr.msk.bf16.mxu1 %vm13258_vm8, %v11271_v5 }
0x16b8   : > { %11276 = vmatpush3.bf16.xpose.msk.msra.mxu1 %vm13258_vm8, %v11271_v5 }
0x16d2   : > { %v4133_v17 = vpop.xlane.xlu0 %4132 }
0x16d3   : > { %12213 = vrcp.f32 %v4133_v17  ;;  %v4130_v15 = vpop.xlane.xlu1 %4129 }
0x16d4   : > { %12215 = vrcp.f32 %v4130_v15 }
0x16d6   : > { %v4253_v37 = vpop.permute.xlu0 %4252 }
0x16d7   : > { %v4255_v24 = vpop.permute.xlu1 %4254 }
0x16da   : > { %v4257_v46 = vpop.permute.xlu0 %4256 }
0x16db   : > { %v4259_v28 = vpop.permute.xlu1 %4258 }
0x16dd   : > { %v12214_v56 = vpop.eup %12213 }
0x16de   : > { %v12216_v8 = vpop.eup %12215  ;;  %v4141_v20 = vmul.f32 %v12214_v56, %v12206_v63 }
0x16df   : > { %v4140_v35 = vmul.f32 %v12216_v8, %v12208_v42 }
0x16e1   : > { %10403 = vmatprep.mubr.msk.f32.mxu1 %vm1810_vm9, %v4140_v35 }
0x16e2   : > { %10404 = vmatmul.mubr.msk.f32.gmra.mrb[100].mxu1 %vm1810_vm9, %v4141_v20 }
0x16e3   : > { %10414 = vmatprep.mubr.msk.f32.mxu1 %vm1704_vm6, %v4253_v37 }
0x16e6   : > { %10415 = vmatmul.mubr.msk.f32.vlgmr.msra.gmra.mrb[102].mxu1 %vm1704_vm6, %v4255_v24 }
0x16e7   : > { %10417 = vmatprep.mubr.msk.f32.mxu1 %vm1704_vm6, %v4257_v46 }
0x16ea   : > { %10418 = vmatmul.mubr.msk.f32.gmra.mrb[104].mxu1 %vm1704_vm6, %v4259_v28 }
0x16eb   : > { %4971 = vmatprep.mubr.f32.mxu1 %v15647_v34 }
0x1780   : > { %v13798_v42 = vpop.f32.mrb[98].mxu1 }
0x1781   : > { %v4233_v63 = vpop.f32.mrb[99].mxu1 }
0x17b5   : > { %v13800_v19 = vpop.f32.mrb[100].mxu1 }
0x17b6   : > { %v13802_v6 = vpop.f32.mrb[101].mxu1 }
0x17b9   : > { %v10416_v25 = vpop.f32.mrb[102].mxu1 }
0x17ba   : > { %v4370_v30 = vmul.f32 0.35355338, %v10416_v25  ;;  %v4350_v10 = vpop.f32.mrb[103].mxu1 }
0x17bb   : > { %v4369_v3 = vmul.f32 0.35355338, %v4350_v10 }
0x17bc   : > { %v4376_v55 = vsel %vm1810_vm9, %v4370_v30, -inf }
0x17bd   : > { %4377 = vmax.xlane.f32.xlu1 %v4376_v55  ;;  %v10419_v9 = vpop.f32.mrb[104].mxu1  ;;  %v4373_v5 = vsel %vm1810_vm9, %v4369_v3, -inf }
0x17be   : > { %4374 = vmax.xlane.f32.xlu0 %v4373_v5  ;;  %v4360_v17 = vpop.f32.mrb[105].mxu1  ;;  %v4372_v10 = vmul.f32 0.35355338, %v10419_v9 }
0x17bf   : > { %v4371_v15 = vmul.f32 0.35355338, %v4360_v17 }
0x17c0   : > { %v4382_v55 = vsel %vm1820_vm10, %v4372_v10, -inf }
0x17c1   : > { %v4379_v56 = vsel %vm1810_vm9, %v4371_v15, -inf }
0x17ce   : > { %11864 = vrot.lane.b32.xlu1 %v13543_v45, %s15625_s13 }
0x17f2   : > { %4380 = vmax.xlane.f32.xlu1 %v4379_v56 }
0x1803   : > { %3071 = vrot.lane.b32.xlu1 %v13406_v49, %s15623_s14 }
0x1807   : > { %3103 = vrot.lane.b32.xlu1 %v13520_v32, %s12531_s29 }
0x180b   : > { %3119 = vrot.lane.b32.xlu1 %v13591_v12, %s12530_s28 }
0x180f   : > { %3089 = vrot.lane.b32.xlu1 %v13510_v23, %s15625_s13 }
0x1813   : > { %3121 = vrot.lane.b32.xlu1 %v13589_v22, %s12530_s28 }
0x1817   : > { %3091 = vrot.lane.b32.xlu1 %v13516_v39, %s15625_s13 }
0x181b   : > { %3107 = vrot.lane.b32.xlu1 %v13524_v44, %s12531_s29 }
0x181f   : > { %3077 = vrot.lane.b32.xlu1 %v13408_v51, %s15623_s14 }
0x184a   : > { %v4378_v49 = vpop.xlane.xlu1 %4377 }
0x184b   : > { %v4386_v32 = vsub.f32 %v4370_v30, %v4378_v49  ;;  %v4375_v45 = vpop.xlane.xlu0 %4374 }
0x184c   : > { %v4385_v8 = vsub.f32 %v4369_v3, %v4375_v45 }
0x184d   : > { %v4391_v12 = vmul.f32 1.442695, %v4386_v32 }
0x184e   : > { %v4389_v35 = vmul.f32 1.442695, %v4385_v8  ;;  %v11865_v37 = vpop.permute.xlu1 %11864 }
0x184f   : > { %12217 = vpow2.f32 %v4391_v12  ;;  %v11867_v23 = vunpack.i.h.bf16 %v11865_v37  ;;  %v11866_v20 = vunpack.i.l.bf16 %v11865_v37 }
0x1850   : > { %12219 = vpow2.f32 %v4389_v35 }
0x1851   : > { %v11277_v22 = vpack.c.bf16 %v11867_v23, %v11866_v20 }
0x1853   : > { %11278 = vmatprep.subr.bf16.mxu0 %v11277_v22 }
0x1854   : > { %11280 = vmatpush3.bf16.msra.mxu0 %v11277_v22 }
0x1859   : > { %v12218_v39 = vpop.eup %12217 }
0x185a   : > { %v4400_v44 = vsel %vm1810_vm9, %v12218_v39, 0.0  ;;  %v12220_v24 = vpop.eup %12219 }
0x185b   : > { %4401 = vadd.xlane.f32.xlu0 %v4400_v44  ;;  %v4397_v51 = vsel %vm1810_vm9, %v12220_v24, 0.0 }
0x185f   : > { %4398 = vadd.xlane.f32.xlu0 %v4397_v51 }
0x1875   : > { %11869 = vrot.lane.b32.xlu0 %v13561_v21, %s15625_s13 }
0x187f   : > { %v4381_v46 = vpop.xlane.xlu1 %4380 }
0x1880   : > { %v4387_v28 = vsub.f32 %v4371_v15, %v4381_v46 }
0x1882   : > { %v4393_v25 = vmul.f32 1.442695, %v4387_v28  ;;  %v4620_v28 = vld [vmem:[%s15603_s5] sm:$0xff] }
0x1884   : > { %12221 = vpow2.f32 %v4393_v25  ;;  %v4621_v25 = vld [vmem:[%s15603_s5 + $0x8] sm:$0xff] }
0x188e   : > { %v12222_v30 = vpop.eup %12221 }
0x188f   : > { %v4403_v3 = vsel %vm1810_vm9, %v12222_v30, 0.0 }
0x1890   : > { %4404 = vadd.xlane.f32.xlu1 %v4403_v3  ;;  %v11288_v3 = vpack.c.bf16 %v4621_v25, %v4620_v28 }
0x1894   : > { %4383 = vmax.xlane.f32.xlu0 %v4382_v55 }
0x18a1   : > { %4563 = vrot.lane.b32.xlu1 %v4233_v63, %s12531_s29  ;;  %v3072_v63 = vpop.permute.xlu1 %3071 }
0x18a5   : > { %v13842_v56 = vpop.permute.xlu1 %3103 }
0x18a9   : > { %v3120_v32 = vpop.permute.xlu1 %3119 }
0x18aa   : > { %3087 = vrot.lane.b32.xlu0 %v13512_v4, %s15625_s13 }
0x18ad   : > { %v3090_v45 = vpop.permute.xlu1 %3089 }
0x18ae   : > { %3073 = vrot.lane.b32.xlu0 %v13404_v48, %s15623_s14 }
0x18b1   : > { %v13851_v8 = vpop.permute.xlu1 %3121 }
0x18b2   : > { %3105 = vrot.lane.b32.xlu0 %v13518_v38, %s12531_s29  ;;  %v15648_v38 = vmov 0.0|0.0  }
0x18b5   : > { %v13853_v12 = vpop.permute.xlu1 %3091 }
0x18b6   : > { %3075 = vrot.lane.b32.xlu0 %v13410_v53, %s15623_s14 }
0x18b9   : > { %v13855_v35 = vpop.permute.xlu1 %3107 }
0x18ba   : > { %4531 = vrot.lane.b32.xlu0 %v13695_v2, %s15623_s14 }
0x18bd   : > { %v13857_v37 = vpop.permute.xlu1 %3077 }
0x18be   : > { %v3134_v28 = vsel %vm1704_vm6, %v13330_v27, %v13857_v37 }
0x18e8   : > { %v4402_v21 = vpop.xlane.xlu0 %4401 }
0x18e9   : > { %12223 = vrcp.f32 %v4402_v21 }
0x18ec   : > { %v4399_v9 = vpop.xlane.xlu0 %4398 }
0x18ed   : > { %12225 = vrcp.f32 %v4399_v9 }
0x18f0   : > { %v11870_v5 = vpop.permute.xlu0 %11869 }
0x18f1   : > { %v11872_v17 = vunpack.i.h.bf16 %v11870_v5  ;;  %v11871_v4 = vunpack.i.l.bf16 %v11870_v5 }
0x18f3   : > { %v11281_v15 = vpack.c.bf16 %v11872_v17, %v11871_v4  ;;  %v12224_v48 = vpop.eup %12223 }
0x18f4   : > { %v4414_v49 = vmul.f32 %v12224_v48, %v12218_v39 }
0x18f5   : > { %11283 = vmatprep.subr.msk.bf16.mxu0 %vm13294_vm11, %v11281_v15 }
0x18f6   : > { %11286 = vmatpush3.bf16.msk.msra.mxu0 %vm13294_vm11, %v11281_v15 }
0x18f7   : > { %v12226_v53 = vpop.eup %12225  ;;  %11287 = vmatprep.subr.bf16.mxu0 %v15648_v38 }
0x18f8   : > { %v4413_v2 = vmul.f32 %v12226_v53, %v12220_v24 }
0x18fa   : > { %10428 = vmatprep.mubr.msk.f32.mxu0 %vm1810_vm9, %v4413_v2 }
0x18fb   : > { %10429 = vmatmul.mubr.msk.f32.vlgmr.msra.gmra.mrb[62].mxu0 %vm1810_vm9, %v4414_v49 }
0x18fc   : > { %11289 = vmatpush3.bf16.msra.mxu0 %v11288_v3 }
0x18fd   : > { %11290 = vmatprep.subr.bf16.mxu0 %v15648_v38 }
0x191d   : > { %v4405_v23 = vpop.xlane.xlu1 %4404 }
0x191e   : > { %12227 = vrcp.f32 %v4405_v23 }
0x1921   : > { %v4384_v20 = vpop.xlane.xlu0 %4383 }
0x1922   : > { %v4388_v22 = vsub.f32 %v4372_v10, %v4384_v20  ;;  %v4623_v10 = vld [vmem:[%s15603_s5 + $0x18] sm:$0xff]  ;;  %v4564_v20 = vpop.permute.xlu1 %4563 }
0x1924   : > { %v4395_v44 = vmul.f32 1.442695, %v4388_v22 }
0x1926   : > { %12229 = vpow2.f32 %v4395_v44 }
0x1928   : > { %v12228_v39 = vpop.eup %12227 }
0x1929   : > { %v4415_v24 = vmul.f32 %v12228_v39, %v12222_v30  ;;  %v4622_v30 = vld [vmem:[%s15603_s5 + $0x10] sm:$0xff] }
0x192a   : > { %v11291_v55 = vpack.c.bf16 %v4623_v10, %v4622_v30 }
0x192b   : > { %10431 = vmatprep.mubr.msk.f32.mxu0 %vm1810_vm9, %v4415_v24 }
0x192c   : > { %11292 = vmatpush3.bf16.msra.mxu0 %v11291_v55 }
0x192d   : > { %10442 = vmatprep.subr.mxu0 %v15647_v34 }
0x1930   : > { %v12230_v51 = vpop.eup %12229 }
0x1931   : > { %v4406_v46 = vsel %vm1820_vm10, %v12230_v51, 0.0 }
0x1932   : > { %4407 = vadd.xlane.f32.xlu0 %v4406_v46 }
0x1948   : > { %4547 = vrot.lane.b32.xlu0 %v13747_v52, %s15625_s13  ;;  %v4624_v52 = vld [vmem:[%s15603_s5 + $0x20] sm:$0xff] }
0x1949   : > { %10443 = vmatpush3.msra.mxu0 %v4624_v52 }
0x194a   : > { %11301 = vmatprep.subr.bf16.mxu0 %v15648_v38 }
0x194c   : > { %3123 = vrot.lane.b32.xlu0 %v13595_v60, %s12530_s28 }
0x1950   : > { %3093 = vrot.lane.b32.xlu0 %v13514_v57, %s15625_s13  ;;  %v3088_v57 = vpop.permute.xlu0 %3087 }
0x1954   : > { %3109 = vrot.lane.b32.xlu0 %v13522_v43, %s12531_s29  ;;  %v3074_v60 = vpop.permute.xlu0 %3073  ;;  %v3131_v43 = vsel %vm1704_vm6, %v13328_v26, %v3072_v63 }
0x1958   : > { %4533 = vrot.lane.b32.xlu0 %v13693_v47, %s15623_s14  ;;  %v3106_v21 = vpop.permute.xlu0 %3105  ;;  %v3136_v47 = vsel %vm3135_vm12, %v3131_v43, %v3088_v57 }
0x195c   : > { %4549 = vrot.lane.b32.xlu0 %v13745_v0, %s15625_s13  ;;  %v3076_v9 = vpop.permute.xlu0 %3075  ;;  %v3141_v0 = vsel %vm3140_vm13, %v3136_v47, %v13842_v56 }
0x195d   : > { %v3146_v63 = vsel %vm3145_vm14, %v3141_v0, %v3120_v32 }
0x1960   : > { %4565 = vrot.lane.b32.xlu0 %v13798_v42, %s12531_s29  ;;  %v4532_v5 = vpop.permute.xlu0 %4531  ;;  %v3132_v42 = vsel %vm1704_vm6, %v13326_v7, %v3074_v60  ;;  %v3133_v7 = vsel %vm1704_vm6, %v13332_v33, %v3076_v9 }
0x1961   : > { %v3137_v2 = vsel %vm3135_vm12, %v3132_v42, %v3090_v45  ;;  %v3138_v49 = vsel %vm3135_vm12, %v3133_v7, %v13853_v12 }
0x1962   : > { %v3142_v56 = vsel %vm3140_vm13, %v3137_v2, %v3106_v21  ;;  %v3143_v33 = vsel %vm3140_vm13, %v3138_v49, %v13855_v35  ;;  %v4591_v35 = vsel %vm1704_vm6, %v13643_v31, %v4532_v5  ;;  %v15632_v21 = vsub.s32 2, %v13211_v13 }
0x1963   : > { %v3147_v32 = vsel %vm3145_vm14, %v3142_v56, %v13851_v8 }
0x19bf   : > { %v4408_v17 = vpop.xlane.xlu0 %4407 }
0x19c0   : > { %12231 = vrcp.f32 %v4408_v17  ;;  %v13963_v17 = vld [vmem:[%s15606_s8] sm:$0xff] }
0x19c1   : > { %v13968_v43 = vrot.slane %v13963_v17, %v15632_v21 }
0x19c3   : > { %v4548_v53 = vpop.permute.xlu0 %4547 }
0x19c7   : > { %v3124_v45 = vpop.permute.xlu0 %3123 }
0x19ca   : > { %v12232_v4 = vpop.eup %12231 }
0x19cb   : > { %v4416_v15 = vmul.f32 %v12232_v4, %v12230_v51 }
0x19cd   : > { %10432 = vmatmul.mubr.msk.f32.gmra.mrb[64].mxu0 %vm1810_vm9, %v4416_v15 }
0x19ce   : > { %v10430_v48 = vpop.f32.mrb[62].mxu0  ;;  %10444 = vmatprep.mubr.msk.f32.mxu0 %vm12520_vm4, %v15647_v34 }
0x19cf   : > { %v4508_v26 = vpop.f32.mrb[63].mxu0  ;;  %4581 = vrot.lane.b32.xlu0 %v10430_v48, %s12530_s28 }
0x19d0   : > { %4579 = vrot.lane.b32.xlu1 %v4508_v26, %s12530_s28 }
0x19d1   : > { %10445 = vmatmul.mubr.msk.f32.vlgmr.msra.gmra.mrb[66].mxu0 %vm1438_vm5, %v3146_v63 }
0x19d2   : > { %10447 = vmatprep.mubr.msk.f32.mxu0 %vm12520_vm4, %v15647_v34 }
0x19d3   : > { %4535 = vrot.lane.b32.xlu0 %v13699_v59, %s15623_s14  ;;  %v3148_v59 = vsel %vm3145_vm14, %v3143_v33, %v3124_v45 }
0x19d4   : > { %3125 = vrot.lane.b32.xlu1 %v13593_v62, %s12530_s28  ;;  %v3094_v62 = vpop.permute.xlu0 %3093 }
0x19d5   : > { %10448 = vmatmul.mubr.msk.f32.gmra.mrb[68].mxu0 %vm1438_vm5, %v3147_v32  ;;  %v3139_v25 = vsel %vm3135_vm12, %v3134_v28, %v3094_v62 }
0x19d6   : > { %10450 = vmatprep.mubr.msk.f32.mxu0 %vm12520_vm4, %v15647_v34 }
0x19d7   : > { %4567 = vrot.lane.b32.xlu0 %v13802_v6, %s12531_s29  ;;  %v4595_v6 = vsel %vm3135_vm12, %v4591_v35, %v4548_v53 }
0x19d8   : > { %4551 = vrot.lane.b32.xlu1 %v13751_v14, %s15625_s13  ;;  %v3110_v8 = vpop.permute.xlu0 %3109  ;;  %v4599_v39 = vsel %vm3140_vm13, %v4595_v6, %v4564_v20 }
0x19d9   : > { %10451 = vmatmul.mubr.msk.f32.gmra.mrb[70].mxu0 %vm1438_vm5, %v3148_v59 }
0x19da   : > { %10453 = vmatprep.mubr.msk.f32.mxu0 %vm12520_vm4, %v15647_v34 }
0x19dc   : > { %v4534_v12 = vpop.permute.xlu0 %4533 }
0x19dd   : > { %v4592_v44 = vsel %vm1704_vm6, %v13641_v40, %v4534_v12  ;;  %v3144_v40 = vsel %vm3140_vm13, %v3139_v25, %v3110_v8 }
0x19e0   : > { %v4550_v23 = vpop.permute.xlu0 %4549 }
0x19e1   : > { %v4596_v51 = vsel %vm3135_vm12, %v4592_v44, %v4550_v23 }
0x19e4   : > { %v4566_v22 = vpop.permute.xlu0 %4565 }
0x19e5   : > { %v4600_v31 = vsel %vm3140_vm13, %v4596_v51, %v4566_v22 }
0x1a41   : > { %v4582_v14 = vpop.permute.xlu0 %4581 }
0x1a42   : > { %v4580_v24 = vpop.permute.xlu1 %4579  ;;  %v4604_v3 = vsel %vm3145_vm14, %v4600_v31, %v4582_v14 }
0x1a43   : > { %v4603_v46 = vsel %vm3145_vm14, %v4599_v39, %v4580_v24  ;;  %v4612_v52 = vrot.slane %v4604_v3, 4 }
0x1a44   : > { %v4611_v30 = vrot.slane %v4603_v46, 4 }
0x1a46   : > { %v3126_v10 = vpop.permute.xlu1 %3125  ;;  %v4613_v27 = vsel %vm1879_vm7, %v4611_v30, %v4612_v52 }
0x1a47   : > { %v3149_v55 = vsel %vm3145_vm14, %v3144_v40, %v3126_v10 }
0x1a48   : > { %v4619_v57 = vsel %vm1879_vm7, %v3149_v55, %v4611_v30 }
0x1a49   : > { %10454 = vmatmul.mubr.msk.f32.gmra.mrb[72].mxu0 %vm1438_vm5, %v4619_v57 }
0x1a4a   : > { %10456 = vmatprep.mubr.msk.f32.mxu0 %vm12520_vm4, %v15647_v34  ;;  %v4552_v7 = vpop.permute.xlu1 %4551 }
0x1a4d   : > { %10457 = vmatmul.mubr.msk.f32.gmra.mrb[74].mxu0 %vm1438_vm5, %v4613_v27  ;;  %v4869_v27 = vld [vmem:[%s15604_s6 + $0x8] sm:$0xff] }
0x1a4e   : > { %10459 = vmatprep.mubr.msk.f32.mxu0 %vm12520_vm4, %v15647_v34 }
0x1aa0   : > { %v10433_v37 = vpop.f32.mrb[64].mxu0 }
0x1aa1   : > { %v4518_v60 = vpop.f32.mrb[65].mxu0 }
0x1aa2   : > { %4583 = vrot.lane.b32.xlu1 %v4518_v60, %s12530_s28 }
0x1aa4   : > { %v4713_v9 = vpop.f32.mrb[66].mxu0 }
0x1aa5   : > { %v10446_v5 = vpop.f32.mrb[67].mxu0  ;;  %v4714_v26 = vadd.f32 %v4713_v9, %v13968_v43  ;;  %v4868_v9 = vld [vmem:[%s15604_s6] sm:$0xff] }
0x1aa6   : > { %v4870_v5 = vld [vmem:[%s15604_s6 + $0x10] sm:$0xff] }
0x1aa7   : > { %v4747_v63 = vadd.f32 %v4714_v26, %v13171_v50  ;;  %v4877_v26 = vld [vmem:[%s15604_s6 + $0x48] sm:$0xff] }
0x1aa8   : > { %v4718_v4 = vpop.f32.mrb[68].mxu0 }
0x1aa9   : > { %v4719_v47 = vadd.f32 %v4718_v4, %v13968_v43  ;;  %v10449_v15 = vpop.f32.mrb[69].mxu0  ;;  %v4754_v2 = vsel %vm1438_vm5, %v4747_v63, 0.0  ;;  %v11295_v4 = vpack.c.bf16 %v4870_v5, %v4868_v9 }
0x1aaa   : > { %v4875_v15 = vld [vmem:[%s15604_s6 + $0x38] sm:$0xff] }
0x1aab   : > { %v4748_v0 = vadd.f32 %v4719_v47, %v13177_v54  ;;  %v4873_v47 = vld [vmem:[%s15604_s6 + $0x28] sm:$0xff] }
0x1aac   : > { %v4723_v42 = vpop.f32.mrb[70].mxu0 }
0x1aad   : > { %v10452_v48 = vpop.f32.mrb[71].mxu0  ;;  %v4757_v53 = vsel %vm1438_vm5, %v4748_v0, 0.0  ;;  %v4724_v54 = vadd.f32 %v4723_v42, %v13968_v43  ;;  %v4872_v42 = vld [vmem:[%s15604_s6 + $0x20] sm:$0xff] }
0x1aae   : > { %4758 = vadd.xlane.f32.xlu0 %v4757_v53  ;;  %v4874_v48 = vld [vmem:[%s15604_s6 + $0x30] sm:$0xff] }
0x1aaf   : > { %v13985_v56 = vadd.f32 %v4724_v54, %v13183_v58  ;;  %v11299_v53 = vpack.c.bf16 %v4874_v48, %v4872_v42  ;;  %v5140_v48 = vld [vmem:[%s15605_s7] sm:$0xff] }
0x1ab1   : > { %v4760_v50 = vsel %vm1438_vm5, %v13985_v56, 0.0 }
0x1ac4   : > { %4553 = vrot.lane.b32.xlu0 %v13749_v18, %s15625_s13  ;;  %v4536_v18 = vpop.permute.xlu0 %4535  ;;  %s15659_s13 = smov 56  }
0x1ac5   : > { %v4593_v49 = vsel %vm1704_vm6, %v13647_v29, %v4536_v18 }
0x1ac6   : > { %4755 = vadd.xlane.f32.xlu1 %v4754_v2 }
0x1ac8   : > { %4569 = vrot.lane.b32.xlu0 %v13800_v19, %s12531_s29  ;;  %v4597_v19 = vsel %vm3135_vm12, %v4593_v49, %v4552_v7  ;;  %v4568_v32 = vpop.permute.xlu0 %4567 }
0x1ac9   : > { %v4601_v45 = vsel %vm3140_vm13, %v4597_v19, %v4568_v32 }
0x1acc   : > { %4585 = vrot.lane.b32.xlu0 %v10433_v37, %s12530_s28  ;;  %v4871_v37 = vld [vmem:[%s15604_s6 + $0x18] sm:$0xff] }
0x1acd   : > { %v11293_v60 = vpack.c.bf16 %v4871_v37, %v4869_v27 }
0x1acf   : > { %11294 = vmatprep.subr.bf16.mxu1 %v11293_v60 }
0x1ad0   : > { %11296 = vmatpush1.bf16.msra.mxu1 %v11295_v4  ;;  %v15650_v4 = vld [vmem:[#allocation3_spill] sm:$0xff] }
0x1ad7   : > { %4537 = vrot.lane.b32.xlu1 %v13697_v16, %s15623_s14  ;;  %s15660_s14 = smov 96  }
0x1afb   : > { %4761 = vadd.xlane.f32.xlu1 %v4760_v50 }
0x1b14   : > { %v4584_v16 = vpop.permute.xlu1 %4583 }
0x1b15   : > { %v4605_v33 = vsel %vm3145_vm14, %v4601_v45, %v4584_v16 }
0x1b16   : > { %v4614_v59 = vrot.slane %v4605_v33, 4 }
0x1b18   : > { %v4615_v58 = vsel %vm1879_vm7, %v4612_v52, %v4614_v59 }
0x1b19   : > { %10460 = vmatmul.mubr.msk.f32.gmra.mrb[76].mxu0 %vm1438_vm5, %v4615_v58 }
0x1b1a   : > { %10462 = vmatprep.mubr.msk.f32.mxu0 %vm12520_vm4, %v15647_v34 }
0x1b1c   : > { %v4728_v62 = vpop.f32.mrb[72].mxu0 }
0x1b1d   : > { %v4729_v8 = vadd.f32 %v4728_v62, %v13968_v43  ;;  %v10455_v29 = vpop.f32.mrb[73].mxu0 }
0x1b1f   : > { %v4750_v12 = vadd.f32 %v4729_v8, %v13189_v61 }
0x1b20   : > { %v4733_v23 = vpop.f32.mrb[74].mxu0 }
0x1b21   : > { %v10458_v20 = vpop.f32.mrb[75].mxu0  ;;  %v4763_v35 = vsel %vm1438_vm5, %v4750_v12, 0.0  ;;  %v4734_v32 = vadd.f32 %v4733_v23, %v13968_v43 }
0x1b22   : > { %4764 = vadd.xlane.f32.xlu0 %v4763_v35 }
0x1b23   : > { %v14057_v33 = vadd.f32 %v4734_v32, %v13195_v1  ;;  %v5145_v32 = vld [vmem:[%s15605_s7 + $0x28] sm:$0xff] }
0x1b3b   : > { %v4759_v22 = vpop.xlane.xlu0 %4758 }
0x1b3c   : > { %v4777_v44 = vmul.f32 0.025, %v4759_v22  ;;  %v15649_v22 = vld [vmem:[#allocation2_spill] sm:$0xff] }
0x1b3e   : > { %v14001_v51 = vsub.f32 %v4748_v0, %v4777_v44  ;;  %v11297_v0 = vpack.c.bf16 %v4875_v15, %v4873_v47 }
0x1b3f   : > { %v4554_v6 = vpop.permute.xlu0 %4553 }
0x1b40   : > { %v4791_v10 = vmul.f32 %v14001_v51, %v14001_v51  ;;  %11298 = vmatprep.subr.bf16.mxu1 %v11297_v0 }
0x1b41   : > { %11300 = vmatpush1.bf16.msra.mxu1 %v11299_v53 }
0x1b42   : > { %v4800_v57 = vsel %vm1438_vm5, %v4791_v10, 0.0  ;;  %4915 = vmatprep.subr.mxu1 %v4877_v26 }
0x1b43   : > { %v4570_v39 = vpop.permute.xlu0 %4569 }
0x1b47   : > { %v4586_v3 = vpop.permute.xlu0 %4585 }
0x1b53   : > { %v4756_v14 = vpop.xlane.xlu1 %4755 }
0x1b54   : > { %v4776_v24 = vmul.f32 0.025, %v4756_v14  ;;  %v15631_v14 = vsub.s32 3, %v13211_v13 }
0x1b56   : > { %v14003_v46 = vsub.f32 %v4747_v63, %v4776_v24  ;;  %v4876_v63 = vld [vmem:[%s15604_s6 + $0x40] sm:$0xff]  ;;  %v14073_v24 = vrot.slane %v13963_v17, %v15631_v14 }
0x1b57   : > { %v4538_v28 = vpop.permute.xlu1 %4537  ;;  %4916 = vmatpush1.msra.mxu1 %v4876_v63 }
0x1b58   : > { %v4594_v31 = vsel %vm1704_vm6, %v13645_v11, %v4538_v28  ;;  %v4790_v61 = vmul.f32 %v14003_v46, %v14003_v46  ;;  %11331 = vmatprep.subr.bf16.mxu1 %v15648_v38 }
0x1b59   : > { %v4598_v25 = vsel %vm3135_vm12, %v4594_v31, %v4554_v6 }
0x1b5a   : > { %v4602_v40 = vsel %vm3140_vm13, %v4598_v25, %v4570_v39  ;;  %v4797_v30 = vsel %vm1438_vm5, %v4790_v61, 0.0  ;;  %v15630_v39 = vsub.s32 4, %v13211_v13 }
0x1b5b   : > { %4798 = vadd.xlane.f32.xlu1 %v4797_v30  ;;  %v4606_v55 = vsel %vm3145_vm14, %v4602_v40, %v4586_v3 }
0x1b5c   : > { %v4616_v52 = vrot.slane %v4606_v55, 4  ;;  %v14079_v61 = vrot.slane %v13963_v17, %v15630_v39 }
0x1b5e   : > { %v4617_v11 = vsel %vm1879_vm7, %v4614_v59, %v4616_v52 }
0x1b5f   : > { %4801 = vadd.xlane.f32.xlu1 %v4800_v57  ;;  %10463 = vmatmul.mubr.msk.f32.gmra.mrb[78].mxu0 %vm1438_vm5, %v4617_v11 }
0x1b88   : > { %v4762_v2 = vpop.xlane.xlu1 %4761 }
0x1b89   : > { %v4778_v54 = vmul.f32 0.025, %v4762_v2  ;;  %v5142_v2 = vld [vmem:[%s15605_s7 + $0x10] sm:$0xff] }
0x1b8b   : > { %v4785_v50 = vsub.f32 %v13985_v56, %v4778_v54  ;;  %v4766_v56 = vsel %vm1438_vm5, %v14057_v33, 0.0  ;;  %v5143_v54 = vld [vmem:[%s15605_s7 + $0x18] sm:$0xff] }
0x1b8d   : > { %v4792_v18 = vmul.f32 %v4785_v50, %v4785_v50 }
0x1b8f   : > { %v4803_v7 = vsel %vm1438_vm5, %v4792_v18, 0.0  ;;  %v11305_v18 = vpack.c.bf16 %v5143_v54, %v5142_v2 }
0x1b90   : > { %4804 = vadd.xlane.f32.xlu1 %v4803_v7 }
0x1baf   : > { %v4765_v49 = vpop.xlane.xlu0 %4764 }
0x1bb0   : > { %v4779_v19 = vmul.f32 0.025, %v4765_v49 }
0x1bb2   : > { %v14052_v45 = vsub.f32 %v4750_v12, %v4779_v19  ;;  %v5144_v19 = vld [vmem:[%s15605_s7 + $0x20] sm:$0xff] }
0x1bb4   : > { %v4793_v16 = vmul.f32 %v14052_v45, %v14052_v45 }
0x1bb6   : > { %v4806_v59 = vsel %vm1438_vm5, %v4793_v16, 0.0  ;;  %v11308_v16 = vpack.c.bf16 %v5145_v32, %v5144_v19 }
0x1bb7   : > { %4807 = vadd.xlane.f32.xlu1 %v4806_v59 }
0x1bbb   : > { %4767 = vadd.xlane.f32.xlu1 %v4766_v56  ;;  %v5147_v56 = vld [vmem:[%s15605_s7 + $0x38] sm:$0xff] }
0x1be8   : > { %v4799_v58 = vpop.xlane.xlu1 %4798 }
0x1be9   : > { %v4818_v62 = vmul.f32 0.025, %v4799_v58 }
0x1beb   : > { %v4825_v8 = vadd.f32 1e-05, %v4818_v62 }
0x1bec   : > { %v4738_v29 = vpop.f32.mrb[76].mxu0  ;;  %v4802_v23 = vpop.xlane.xlu1 %4801 }
0x1bed   : > { %12233 = vrsqrt.f32 %v4825_v8  ;;  %v4739_v12 = vadd.f32 %v4738_v29, %v13968_v43  ;;  %v4819_v20 = vmul.f32 0.025, %v4802_v23  ;;  %v10461_v35 = vpop.f32.mrb[77].mxu0  ;;  %v5148_v23 = vld [vmem:[%s15605_s7 + $0x40] sm:$0xff] }
0x1bef   : > { %v14064_v1 = vadd.f32 %v4739_v12, %v15649_v22  ;;  %v4826_v6 = vadd.f32 1e-05, %v4819_v20  ;;  %v5149_v12 = vld [vmem:[%s15605_s7 + $0x48] sm:$0xff]  ;;  %v5151_v22 = vld [vmem:[%s15605_s7 + $0x58] sm:$0xff] }
0x1bf0   : > { %v11314_v20 = vpack.c.bf16 %v5149_v12, %v5148_v23 }
0x1bf1   : > { %12235 = vrsqrt.f32 %v4826_v6  ;;  %v4769_v44 = vsel %vm1438_vm5, %v14064_v1, 0.0 }
0x1bf2   : > { %4770 = vadd.xlane.f32.xlu0 %v4769_v44  ;;  %v5152_v44 = vld [vmem:[%s15605_s7 + $0x60] sm:$0xff] }
0x1bf7   : > { %v12234_v28 = vpop.eup %12233 }
0x1bf8   : > { %v4839_v31 = vmul.f32 %v12234_v28, %v14003_v46  ;;  %v5153_v28 = vld [vmem:[%s15605_s7 + $0x68] sm:$0xff] }
0x1bfa   : > { %v4850_v25 = vmul.f32 %v14073_v24, %v4839_v31  ;;  %v11320_v31 = vpack.c.bf16 %v5153_v28, %v5152_v44 }
0x1bfb   : > { %v12236_v3 = vpop.eup %12235 }
0x1bfc   : > { %v14083_v40 = vadd.f32 %v14079_v61, %v4850_v25  ;;  %v4840_v30 = vmul.f32 %v12236_v3, %v14001_v51  ;;  %v5154_v25 = vld [vmem:[%s15605_s7 + $0x70] sm:$0xff]  ;;  %v5155_v3 = vld [vmem:[%s15605_s7 + $0x78] sm:$0xff] }
0x1bfe   : > { %9496 = vmatmul.mubr.msk.f32.vlgmr.msra.gmra.mrb[106].mxu1 %vm1438_vm5, %v14083_v40  ;;  %v4851_v10 = vmul.f32 %v14073_v24, %v4840_v30  ;;  %v11323_v30 = vpack.c.bf16 %v5155_v3, %v5154_v25 }
0x1bff   : > { %4977 = vmatprep.mubr.f32.mxu1 %v15647_v34 }
0x1c00   : > { %v14091_v46 = vadd.f32 %v14079_v61, %v4851_v10  ;;  %v5156_v10 = vld [vmem:[%s15605_s7 + $0x80] sm:$0xff] }
0x1c02   : > { %9497 = vmatmul.mubr.msk.f32.gmra.mrb[108].mxu1 %vm1438_vm5, %v14091_v46 }
0x1c03   : > { %4983 = vmatprep.mubr.f32.mxu1 %v15647_v34 }
0x1c1d   : > { %v4805_v55 = vpop.xlane.xlu1 %4804 }
0x1c1e   : > { %v4820_v52 = vmul.f32 0.025, %v4805_v55  ;;  %v5157_v55 = vld [vmem:[%s15605_s7 + $0x88] sm:$0xff] }
0x1c20   : > { %v4827_v57 = vadd.f32 1e-05, %v4820_v52  ;;  %v11326_v52 = vpack.c.bf16 %v5157_v55, %v5156_v10 }
0x1c22   : > { %12237 = vrsqrt.f32 %v4827_v57  ;;  %v5158_v57 = vld [vmem:[%s15605_s7 + $0x90] sm:$0xff] }
0x1c2c   : > { %v12238_v51 = vpop.eup %12237 }
0x1c2d   : > { %v4841_v11 = vmul.f32 %v12238_v51, %v4785_v50  ;;  %v5159_v51 = vld [vmem:[%s15605_s7 + $0x98] sm:$0xff] }
0x1c2f   : > { %v4852_v27 = vmul.f32 %v14073_v24, %v4841_v11  ;;  %v11329_v11 = vpack.c.bf16 %v5159_v51, %v5158_v57 }
0x1c31   : > { %v14098_v37 = vadd.f32 %v14079_v61, %v4852_v27 }
0x1c32   : > { %v4743_v60 = vpop.f32.mrb[78].mxu0 }
0x1c33   : > { %v4744_v9 = vadd.f32 %v4743_v60, %v13968_v43  ;;  %v10464_v5 = vpop.f32.mrb[79].mxu0  ;;  %9498 = vmatmul.mubr.msk.f32.gmra.mrb[110].mxu1 %vm1438_vm5, %v14098_v37  ;;  %v5141_v43 = vld [vmem:[%s15605_s7 + $0x8] sm:$0xff] }
0x1c34   : > { %4989 = vmatprep.mubr.f32.mxu1 %v15647_v34  ;;  %v11302_v26 = vpack.c.bf16 %v5141_v43, %v5140_v48  ;;  %v14204_v43 = vsub.s32 1, %v13211_v13 }
0x1c35   : > { %v14105_v47 = vadd.f32 %v4744_v9, %v15650_v4 }
0x1c36   : > { %11303 = vmatpush1.bf16.msra.mxu0 %v11302_v26  ;;  %15651 = vst [vmem:[#allocation2_spill] sm:$0xff] %v14204_v43  ;;  %v14212_v26 = vrot.slane %v13963_v17, %v14204_v43 }
0x1c37   : > { %v4772_v15 = vsel %vm1438_vm5, %v14105_v47, 0.0  ;;  %11304 = vmatprep.subr.bf16.mxu0 %v15648_v38 }
0x1c38   : > { %4773 = vadd.xlane.f32.xlu1 %v4772_v15 }
0x1c3a   : > { %11306 = vmatpush1.bf16.msra.mxu0 %v11305_v18 }
0x1c3b   : > { %11307 = vmatprep.subr.bf16.mxu0 %v15648_v38 }
0x1c3e   : > { %11309 = vmatpush1.bf16.msra.mxu0 %v11308_v16 }
0x1c3f   : > { %11310 = vmatprep.subr.bf16.mxu0 %v15648_v38 }
0x1c44   : > { %v4808_v0 = vpop.xlane.xlu1 %4807 }
0x1c45   : > { %v4821_v42 = vmul.f32 0.025, %v4808_v0 }
0x1c47   : > { %v4828_v53 = vadd.f32 1e-05, %v4821_v42 }
0x1c48   : > { %v4768_v63 = vpop.xlane.xlu1 %4767 }
0x1c49   : > { %12239 = vrsqrt.f32 %v4828_v53  ;;  %v4780_v50 = vmul.f32 0.025, %v4768_v63  ;;  %v1561_v53 = vld [vmem:[%s15606_s8 + $0x8] sm:$0xff] }
0x1c4b   : > { %v14123_v7 = vsub.f32 %v14057_v33, %v4780_v50  ;;  %v5146_v33 = vld [vmem:[%s15605_s7 + $0x30] sm:$0xff] }
0x1c4c   : > { %v11311_v62 = vpack.c.bf16 %v5147_v56, %v5146_v33 }
0x1c4d   : > { %v4794_v49 = vmul.f32 %v14123_v7, %v14123_v7 }
0x1c4e   : > { %11312 = vmatpush1.bf16.msra.mxu0 %v11311_v62 }
0x1c4f   : > { %v4809_v59 = vsel %vm1438_vm5, %v4794_v49, 0.0  ;;  %11313 = vmatprep.subr.bf16.mxu0 %v15648_v38 }
0x1c50   : > { %4810 = vadd.xlane.f32.xlu0 %v4809_v59 }
0x1c52   : > { %11315 = vmatpush1.bf16.msra.mxu0 %v11314_v20 }
0x1c53   : > { %v12240_v58 = vpop.eup %12239  ;;  %11316 = vmatprep.subr.bf16.mxu0 %v15648_v38 }
0x1c54   : > { %v4842_v8 = vmul.f32 %v12240_v58, %v14052_v45  ;;  %v5150_v45 = vld [vmem:[%s15605_s7 + $0x50] sm:$0xff] }
0x1c55   : > { %v11317_v6 = vpack.c.bf16 %v5151_v22, %v5150_v45 }
0x1c56   : > { %v4853_v29 = vmul.f32 %v14073_v24, %v4842_v8 }
0x1c57   : > { %11318 = vmatpush1.bf16.msra.mxu0 %v11317_v6 }
0x1c58   : > { %v14152_v35 = vadd.f32 %v14079_v61, %v4853_v29  ;;  %11319 = vmatprep.subr.bf16.mxu0 %v15648_v38 }
0x1c5a   : > { %9499 = vmatmul.mubr.msk.f32.gmra.mrb[112].mxu1 %vm1438_vm5, %v14152_v35 }
0x1c5b   : > { %4995 = vmatprep.mubr.f32.mxu1 %v15647_v34  ;;  %11321 = vmatpush1.bf16.msra.mxu0 %v11320_v31 }
0x1c5c   : > { %11322 = vmatprep.subr.bf16.mxu0 %v15648_v38 }
0x1c5f   : > { %11324 = vmatpush1.bf16.msra.mxu0 %v11323_v30 }
0x1c60   : > { %11325 = vmatprep.subr.bf16.mxu0 %v15648_v38 }
0x1c63   : > { %11327 = vmatpush1.bf16.msra.mxu0 %v11326_v52 }
0x1c64   : > { %11328 = vmatprep.subr.bf16.mxu0 %v15648_v38 }
0x1c67   : > { %11330 = vmatpush1.bf16.msra.mxu0 %v11329_v11 }
0x1c7f   : > { %v4771_v27 = vpop.xlane.xlu0 %4770 }
0x1c80   : > { %v4781_v60 = vmul.f32 0.025, %v4771_v27 }
0x1c82   : > { %v14193_v9 = vsub.f32 %v14064_v1, %v4781_v60 }
0x1c84   : > { %v4795_v5 = vmul.f32 %v14193_v9, %v14193_v9 }
0x1c86   : > { %v4812_v4 = vsel %vm1438_vm5, %v4795_v5, 0.0 }
0x1c87   : > { %4813 = vadd.xlane.f32.xlu1 %v4812_v4 }
0x1cc5   : > { %v4774_v15 = vpop.xlane.xlu1 %4773 }
0x1cc6   : > { %v4782_v0 = vmul.f32 0.025, %v4774_v15 }
0x1cc8   : > { %v14199_v42 = vsub.f32 %v14105_v47, %v4782_v0  ;;  %v14215_v47 = vrot.slane %v1561_v53, %v14204_v43 }
0x1cca   : > { %v4796_v48 = vmul.f32 %v14199_v42, %v14199_v42 }
0x1ccc   : > { %v4815_v1 = vsel %vm1438_vm5, %v4796_v48, 0.0 }
0x1ccd   : > { %4816 = vadd.xlane.f32.xlu0 %v4815_v1 }
0x1cd1   : > { %v4973_v63 = vpop.f32.mrb[106].mxu1 }
0x1cd2   : > { %v4974_v2 = vadd.f32 %v4973_v63, %v14212_v26  ;;  %v4975_v54 = vpop.f32.mrb[107].mxu1 }
0x1cd3   : > { %v4976_v50 = vadd.f32 %v4975_v54, %v14215_v47 }
0x1cd4   : > { %v5028_v18 = vmul.f32 %v4974_v2, %v4974_v2  ;;  %v5014_v5 = vmul.f32 0.5, %v4974_v2 }
0x1cd5   : > { %v5029_v49 = vmul.f32 %v4976_v50, %v4976_v50  ;;  %v4979_v19 = vpop.f32.mrb[108].mxu1  ;;  %v5015_v27 = vmul.f32 0.5, %v4976_v50 }
0x1cd6   : > { %v5042_v32 = vmul.f32 %v5028_v18, %v4974_v2  ;;  %v4980_v16 = vadd.f32 %v4979_v19, %v14212_v26  ;;  %v4981_v59 = vpop.f32.mrb[109].mxu1 }
0x1cd7   : > { %v5043_v33 = vmul.f32 %v5029_v49, %v4976_v50  ;;  %v4982_v56 = vadd.f32 %v4981_v59, %v14215_v47 }
0x1cd8   : > { %v5056_v58 = vmul.f32 0.044715, %v5042_v32  ;;  %v5030_v62 = vmul.f32 %v4980_v16, %v4980_v16  ;;  %v5016_v49 = vmul.f32 0.5, %v4980_v16 }
0x1cd9   : > { %v5057_v8 = vmul.f32 0.044715, %v5043_v33  ;;  %v5031_v29 = vmul.f32 %v4982_v56, %v4982_v56  ;;  %v5017_v63 = vmul.f32 0.5, %v4982_v56 }
0x1cda   : > { %v5070_v23 = vadd.f32 %v5056_v58, %v4974_v2  ;;  %v5044_v12 = vmul.f32 %v5030_v62, %v4980_v16 }
0x1cdb   : > { %v5071_v20 = vadd.f32 %v5057_v8, %v4976_v50  ;;  %v5045_v45 = vmul.f32 %v5031_v29, %v4982_v56 }
0x1cdc   : > { %v5084_v22 = vmul.f32 0.7978846, %v5070_v23  ;;  %v5058_v6 = vmul.f32 0.044715, %v5044_v12 }
0x1cdd   : > { %v5085_v44 = vmul.f32 0.7978846, %v5071_v20  ;;  %v5059_v28 = vmul.f32 0.044715, %v5045_v45  ;;  %v4811_v31 = vpop.xlane.xlu0 %4810 }
0x1cde   : > { %12241 = vtanh.f32 %v5084_v22  ;;  %v5072_v25 = vadd.f32 %v5058_v6, %v4980_v16  ;;  %v4822_v3 = vmul.f32 0.025, %v4811_v31 }
0x1cdf   : > { %12243 = vtanh.f32 %v5085_v44  ;;  %v5073_v30 = vadd.f32 %v5059_v28, %v4982_v56 }
0x1ce0   : > { %v5086_v10 = vmul.f32 0.7978846, %v5072_v25  ;;  %v4829_v55 = vadd.f32 1e-05, %v4822_v3 }
0x1ce1   : > { %v5087_v52 = vmul.f32 0.7978846, %v5073_v30 }
0x1ce2   : > { %12245 = vrsqrt.f32 %v4829_v55 }
0x1ce3   : > { %12247 = vtanh.f32 %v5087_v52 }
0x1ce4   : > { %12249 = vtanh.f32 %v5086_v10 }
0x1ce8   : > { %v12242_v57 = vpop.eup %12241 }
0x1ce9   : > { %v12244_v51 = vpop.eup %12243  ;;  %v5112_v11 = vadd.f32 1.0, %v12242_v57 }
0x1cea   : > { %v5113_v60 = vadd.f32 1.0, %v12244_v51 }
0x1ceb   : > { %v5126_v48 = vmul.f32 %v5112_v11, %v5014_v5 }
0x1cec   : > { %v12246_v4 = vpop.eup %12245  ;;  %v5127_v15 = vmul.f32 %v5113_v60, %v5015_v27 }
0x1ced   : > { %v12248_v0 = vpop.eup %12247  ;;  %v4843_v1 = vmul.f32 %v12246_v4, %v14123_v7 }
0x1cee   : > { %v12250_v53 = vpop.eup %12249  ;;  %9503 = vmatprep.mubr.msk.f32.mxu0 %vm3145_vm14, %v5127_v15  ;;  %v5115_v54 = vadd.f32 1.0, %v12248_v0 }
0x1cef   : > { %5250 = vmatmul.mubr.f32.vlgmr.msra.gmra.mrb[80].mxu0 %v5126_v48  ;;  %v4854_v18 = vmul.f32 %v14073_v24, %v4843_v1  ;;  %v5114_v19 = vadd.f32 1.0, %v12250_v53 }
0x1cf0   : > { %v5129_v32 = vmul.f32 %v5115_v54, %v5017_v63 }
0x1cf1   : > { %v14225_v50 = vadd.f32 %v14079_v61, %v4854_v18  ;;  %v5128_v2 = vmul.f32 %v5114_v19, %v5016_v49 }
0x1cf2   : > { %9504 = vmatprep.mubr.msk.f32.mxu0 %vm3145_vm14, %v5129_v32 }
0x1cf3   : > { %9500 = vmatmul.mubr.msk.f32.gmra.mrb[114].mxu1 %vm1438_vm5, %v14225_v50  ;;  %5255 = vmatmul.mubr.f32.gmra.mrb[82].mxu0 %v5128_v2 }
0x1cf4   : > { %5001 = vmatprep.mubr.f32.mxu1 %v15647_v34 }
0x1d06   : > { %v4985_v7 = vpop.f32.mrb[110].mxu1 }
0x1d07   : > { %v4986_v59 = vadd.f32 %v4985_v7, %v14212_v26  ;;  %v4987_v33 = vpop.f32.mrb[111].mxu1 }
0x1d08   : > { %v4988_v16 = vadd.f32 %v4987_v33, %v14215_v47 }
0x1d09   : > { %v5032_v56 = vmul.f32 %v4986_v59, %v4986_v59  ;;  %v5018_v55 = vmul.f32 0.5, %v4986_v59 }
0x1d0a   : > { %v5033_v58 = vmul.f32 %v4988_v16, %v4988_v16  ;;  %v5019_v30 = vmul.f32 0.5, %v4988_v16 }
0x1d0b   : > { %v5046_v62 = vmul.f32 %v5032_v56, %v4986_v59 }
0x1d0c   : > { %v5047_v8 = vmul.f32 %v5033_v58, %v4988_v16 }
0x1d0d   : > { %v5060_v29 = vmul.f32 0.044715, %v5046_v62 }
0x1d0e   : > { %v5061_v23 = vmul.f32 0.044715, %v5047_v8 }
0x1d0f   : > { %v5074_v12 = vadd.f32 %v5060_v29, %v4986_v59 }
0x1d10   : > { %v5075_v20 = vadd.f32 %v5061_v23, %v4988_v16 }
0x1d11   : > { %v5088_v45 = vmul.f32 0.7978846, %v5074_v12 }
0x1d12   : > { %v5089_v22 = vmul.f32 0.7978846, %v5075_v20 }
0x1d13   : > { %12251 = vtanh.f32 %v5088_v45 }
0x1d14   : > { %12253 = vtanh.f32 %v5089_v22  ;;  %v4814_v6 = vpop.xlane.xlu1 %4813 }
0x1d15   : > { %v4823_v44 = vmul.f32 0.025, %v4814_v6  ;;  %v15629_v6 = vsub.s32 5, %v13211_v13 }
0x1d17   : > { %v4830_v28 = vadd.f32 1e-05, %v4823_v44  ;;  %v14258_v44 = vrot.slane %v13963_v17, %v15629_v6 }
0x1d19   : > { %12255 = vrsqrt.f32 %v4830_v28 }
0x1d1d   : > { %v12252_v31 = vpop.eup %12251 }
0x1d1e   : > { %v12254_v25 = vpop.eup %12253  ;;  %v5116_v3 = vadd.f32 1.0, %v12252_v31 }
0x1d1f   : > { %v5117_v10 = vadd.f32 1.0, %v12254_v25 }
0x1d20   : > { %v5130_v57 = vmul.f32 %v5116_v3, %v5018_v55 }
0x1d21   : > { %v5131_v52 = vmul.f32 %v5117_v10, %v5019_v30 }
0x1d23   : > { %v12256_v51 = vpop.eup %12255  ;;  %9505 = vmatprep.mubr.msk.f32.mxu0 %vm3145_vm14, %v5131_v52 }
0x1d24   : > { %5260 = vmatmul.mubr.f32.gmra.mrb[84].mxu0 %v5130_v57  ;;  %v4844_v11 = vmul.f32 %v12256_v51, %v14193_v9 }
0x1d26   : > { %v4855_v27 = vmul.f32 %v14073_v24, %v4844_v11 }
0x1d28   : > { %v14237_v60 = vadd.f32 %v14079_v61, %v4855_v27 }
0x1d2a   : > { %9501 = vmatmul.mubr.msk.f32.gmra.mrb[116].mxu1 %vm1438_vm5, %v14237_v60 }
0x1d2b   : > { %5007 = vmatprep.mubr.f32.mxu1 %v15647_v34 }
0x1d2d   : > { %v4991_v5 = vpop.f32.mrb[112].mxu1 }
0x1d2e   : > { %v4992_v4 = vadd.f32 %v4991_v5, %v14212_v26  ;;  %v4993_v15 = vpop.f32.mrb[113].mxu1 }
0x1d2f   : > { %v4994_v0 = vadd.f32 %v4993_v15, %v14215_v47 }
0x1d30   : > { %v5034_v48 = vmul.f32 %v4992_v4, %v4992_v4  ;;  %v5020_v56 = vmul.f32 0.5, %v4992_v4 }
0x1d31   : > { %v5035_v1 = vmul.f32 %v4994_v0, %v4994_v0  ;;  %v5021_v33 = vmul.f32 0.5, %v4994_v0 }
0x1d32   : > { %v5048_v53 = vmul.f32 %v5034_v48, %v4992_v4 }
0x1d33   : > { %v5049_v9 = vmul.f32 %v5035_v1, %v4994_v0 }
0x1d34   : > { %v5062_v63 = vmul.f32 0.044715, %v5048_v53 }
0x1d35   : > { %v5063_v54 = vmul.f32 0.044715, %v5049_v9 }
0x1d36   : > { %v5076_v18 = vadd.f32 %v5062_v63, %v4992_v4 }
0x1d37   : > { %v5077_v49 = vadd.f32 %v5063_v54, %v4994_v0 }
0x1d38   : > { %v5090_v19 = vmul.f32 0.7978846, %v5076_v18 }
0x1d39   : > { %v5091_v32 = vmul.f32 0.7978846, %v5077_v49 }
0x1d3a   : > { %12257 = vtanh.f32 %v5090_v19 }
0x1d3b   : > { %12259 = vtanh.f32 %v5091_v32 }
0x1d44   : > { %v12258_v2 = vpop.eup %12257 }
0x1d45   : > { %v12260_v7 = vpop.eup %12259  ;;  %v5118_v59 = vadd.f32 1.0, %v12258_v2 }
0x1d46   : > { %v5119_v16 = vadd.f32 1.0, %v12260_v7 }
0x1d47   : > { %v5132_v62 = vmul.f32 %v5118_v59, %v5020_v56 }
0x1d48   : > { %v5133_v58 = vmul.f32 %v5119_v16, %v5021_v33 }
0x1d4a   : > { %9506 = vmatprep.mubr.msk.f32.mxu0 %vm3145_vm14, %v5133_v58 }
0x1d4b   : > { %5265 = vmatmul.mubr.f32.gmra.mrb[86].mxu0 %v5132_v62 }
0x1d5a   : > { %v4817_v8 = vpop.xlane.xlu0 %4816 }
0x1d5b   : > { %v4824_v29 = vmul.f32 0.025, %v4817_v8 }
0x1d5d   : > { %v4831_v23 = vadd.f32 1e-05, %v4824_v29 }
0x1d5f   : > { %12261 = vrsqrt.f32 %v4831_v23 }
0x1d69   : > { %v12262_v12 = vpop.eup %12261 }
0x1d6a   : > { %v4845_v20 = vmul.f32 %v12262_v12, %v14199_v42 }
0x1d6c   : > { %v4856_v45 = vmul.f32 %v14073_v24, %v4845_v20 }
0x1d6e   : > { %v14248_v22 = vadd.f32 %v14079_v61, %v4856_v45 }
0x1d70   : > { %9502 = vmatmul.mubr.msk.f32.gmra.mrb[118].mxu1 %vm1438_vm5, %v14248_v22 }
0x1d71   : > { %10475 = vmatprep.mubr.msk.f32.mxu1 %vm12520_vm4, %v15647_v34 }
0x1dc2   : > { %v5251_v28 = vpop.f32.mrb[80].mxu0 }
0x1dc3   : > { %v5252_v42 = vadd.f32 %v5251_v28, %v14258_v44  ;;  %v5253_v24 = vpop.f32.mrb[81].mxu0 }
0x1dc5   : > { %v14262_v61 = vadd.f32 %v5252_v42, %v14083_v40 }
0x1dc6   : > { %v4997_v31 = vpop.f32.mrb[114].mxu1  ;;  %v5256_v25 = vpop.f32.mrb[82].mxu0 }
0x1dc7   : > { %v4998_v3 = vadd.f32 %v4997_v31, %v14212_v26  ;;  %v5257_v30 = vadd.f32 %v5256_v25, %v14258_v44  ;;  %v4999_v10 = vpop.f32.mrb[115].mxu1  ;;  %v5258_v55 = vpop.f32.mrb[83].mxu0  ;;  %v5292_v52 = vsel %vm1438_vm5, %v14262_v61, 0.0 }
0x1dc8   : > { %v5000_v17 = vadd.f32 %v4999_v10, %v14215_v47  ;;  %5293 = vadd.xlane.f32.xlu1 %v5292_v52 }
0x1dc9   : > { %v5036_v57 = vmul.f32 %v4998_v3, %v4998_v3  ;;  %v14270_v51 = vadd.f32 %v5257_v30, %v14091_v46  ;;  %v5022_v49 = vmul.f32 0.5, %v4998_v3 }
0x1dca   : > { %v5037_v40 = vmul.f32 %v5000_v17, %v5000_v17  ;;  %v5023_v46 = vmul.f32 0.5, %v5000_v17 }
0x1dcb   : > { %v5050_v11 = vmul.f32 %v5036_v57, %v4998_v3  ;;  %v5295_v27 = vsel %vm1438_vm5, %v14270_v51, 0.0 }
0x1dcc   : > { %v5051_v5 = vmul.f32 %v5037_v40, %v5000_v17  ;;  %5296 = vadd.xlane.f32.xlu0 %v5295_v27 }
0x1dcd   : > { %v5064_v4 = vmul.f32 0.044715, %v5050_v11 }
0x1dce   : > { %v5065_v15 = vmul.f32 0.044715, %v5051_v5 }
0x1dcf   : > { %v5078_v0 = vadd.f32 %v5064_v4, %v4998_v3 }
0x1dd0   : > { %v5079_v48 = vadd.f32 %v5065_v15, %v5000_v17 }
0x1dd1   : > { %v5092_v1 = vmul.f32 0.7978846, %v5078_v0 }
0x1dd2   : > { %v5093_v53 = vmul.f32 0.7978846, %v5079_v48 }
0x1dd3   : > { %12263 = vtanh.f32 %v5092_v1 }
0x1dd4   : > { %12265 = vtanh.f32 %v5093_v53 }
0x1ddd   : > { %v12264_v9 = vpop.eup %12263 }
0x1dde   : > { %v12266_v63 = vpop.eup %12265  ;;  %v5120_v54 = vadd.f32 1.0, %v12264_v9 }
0x1ddf   : > { %v5121_v18 = vadd.f32 1.0, %v12266_v63 }
0x1de0   : > { %v5134_v32 = vmul.f32 %v5120_v54, %v5022_v49 }
0x1de1   : > { %v5135_v19 = vmul.f32 %v5121_v18, %v5023_v46 }
0x1de3   : > { %9507 = vmatprep.mubr.msk.f32.mxu0 %vm3145_vm14, %v5135_v19 }
0x1de4   : > { %5270 = vmatmul.mubr.f32.gmra.mrb[88].mxu0 %v5134_v32 }
0x1df7   : > { %v5261_v2 = vpop.f32.mrb[84].mxu0 }
0x1df8   : > { %v5262_v7 = vadd.f32 %v5261_v2, %v14258_v44  ;;  %v5263_v59 = vpop.f32.mrb[85].mxu0 }
0x1dfa   : > { %v14277_v33 = vadd.f32 %v5262_v7, %v14098_v37 }
0x1dfc   : > { %v5298_v16 = vsel %vm1438_vm5, %v14277_v33, 0.0 }
0x1dfd   : > { %5299 = vadd.xlane.f32.xlu1 %v5298_v16  ;;  %v5003_v56 = vpop.f32.mrb[116].mxu1 }
0x1dfe   : > { %v5004_v58 = vadd.f32 %v5003_v56, %v14212_v26  ;;  %v5005_v62 = vpop.f32.mrb[117].mxu1 }
0x1dff   : > { %v5006_v8 = vadd.f32 %v5005_v62, %v14215_v47 }
0x1e00   : > { %v5038_v29 = vmul.f32 %v5004_v58, %v5004_v58  ;;  %v5024_v52 = vmul.f32 0.5, %v5004_v58 }
0x1e01   : > { %v5039_v23 = vmul.f32 %v5006_v8, %v5006_v8  ;;  %v5025_v10 = vmul.f32 0.5, %v5006_v8 }
0x1e02   : > { %v5052_v12 = vmul.f32 %v5038_v29, %v5004_v58 }
0x1e03   : > { %v5053_v20 = vmul.f32 %v5039_v23, %v5006_v8 }
0x1e04   : > { %v5066_v45 = vmul.f32 0.044715, %v5052_v12 }
0x1e05   : > { %v5067_v28 = vmul.f32 0.044715, %v5053_v20 }
0x1e06   : > { %v5080_v42 = vadd.f32 %v5066_v45, %v5004_v58 }
0x1e07   : > { %v5081_v24 = vadd.f32 %v5067_v28, %v5006_v8 }
0x1e08   : > { %v5094_v37 = vmul.f32 0.7978846, %v5080_v42 }
0x1e09   : > { %v5095_v31 = vmul.f32 0.7978846, %v5081_v24  ;;  %v9513_v24 = vld [vmem:[%s15602_s4 + $0x30] sm:$0xff] }
0x1e0a   : > { %12267 = vtanh.f32 %v5094_v37 }
0x1e0b   : > { %12269 = vtanh.f32 %v5095_v31  ;;  %v9514_v31 = vld [vmem:[%s15602_s4 + $0x38] sm:$0xff] }
0x1e14   : > { %v12268_v25 = vpop.eup %12267 }
0x1e15   : > { %v12270_v3 = vpop.eup %12269  ;;  %v5122_v30 = vadd.f32 1.0, %v12268_v25  ;;  %v9515_v25 = vld [vmem:[%s15602_s4 + $0x40] sm:$0xff] }
0x1e16   : > { %v5123_v55 = vadd.f32 1.0, %v12270_v3  ;;  %v11335_v3 = vpack.c.bf16 %v9515_v25, %v9514_v31 }
0x1e17   : > { %v5136_v57 = vmul.f32 %v5122_v30, %v5024_v52  ;;  %v9516_v30 = vld [vmem:[%s15602_s4 + $0x48] sm:$0xff] }
0x1e18   : > { %v5137_v17 = vmul.f32 %v5123_v55, %v5025_v10 }
0x1e1a   : > { %9508 = vmatprep.mubr.msk.f32.mxu0 %vm3145_vm14, %v5137_v17 }
0x1e1b   : > { %5275 = vmatmul.mubr.f32.gmra.mrb[90].mxu0 %v5136_v57 }
0x1e1e   : > { %v5266_v40 = vpop.f32.mrb[86].mxu0 }
0x1e1f   : > { %v5267_v11 = vadd.f32 %v5266_v40, %v14258_v44  ;;  %v5268_v27 = vpop.f32.mrb[87].mxu0 }
0x1e21   : > { %v5288_v5 = vadd.f32 %v5267_v11, %v14152_v35 }
0x1e23   : > { %v5301_v4 = vsel %vm1438_vm5, %v5288_v5, 0.0 }
0x1e24   : > { %5302 = vadd.xlane.f32.xlu0 %v5301_v4 }
0x1e43   : > { %v5009_v15 = vpop.f32.mrb[118].mxu1 }
0x1e44   : > { %v5010_v0 = vadd.f32 %v5009_v15, %v14212_v26  ;;  %v5011_v48 = vpop.f32.mrb[119].mxu1 }
0x1e45   : > { %v5012_v1 = vadd.f32 %v5011_v48, %v14215_v47 }
0x1e46   : > { %v5040_v53 = vmul.f32 %v5010_v0, %v5010_v0  ;;  %v5026_v20 = vmul.f32 0.5, %v5010_v0 }
0x1e47   : > { %v5041_v9 = vmul.f32 %v5012_v1, %v5012_v1  ;;  %v5027_v8 = vmul.f32 0.5, %v5012_v1 }
0x1e48   : > { %v5054_v63 = vmul.f32 %v5040_v53, %v5010_v0 }
0x1e49   : > { %v5055_v54 = vmul.f32 %v5041_v9, %v5012_v1 }
0x1e4a   : > { %v5068_v46 = vmul.f32 0.044715, %v5054_v63 }
0x1e4b   : > { %v5069_v18 = vmul.f32 0.044715, %v5055_v54 }
0x1e4c   : > { %v5082_v49 = vadd.f32 %v5068_v46, %v5010_v0 }
0x1e4d   : > { %v5083_v19 = vadd.f32 %v5069_v18, %v5012_v1 }
0x1e4e   : > { %v5096_v32 = vmul.f32 0.7978846, %v5082_v49 }
0x1e4f   : > { %v5097_v2 = vmul.f32 0.7978846, %v5083_v19 }
0x1e50   : > { %12271 = vtanh.f32 %v5096_v32 }
0x1e51   : > { %12273 = vtanh.f32 %v5097_v2 }
0x1e55   : > { %v5294_v35 = vpop.xlane.xlu1 %5293 }
0x1e56   : > { %v5313_v7 = vmul.f32 0.025, %v5294_v35 }
0x1e58   : > { %v14290_v59 = vsub.f32 %v14262_v61, %v5313_v7  ;;  %v15627_v7 = vsub.s32 7, %v13211_v13 }
0x1e59   : > { %v5297_v26 = vpop.xlane.xlu0 %5296 }
0x1e5a   : > { %v12272_v16 = vpop.eup %12271  ;;  %v5314_v47 = vmul.f32 0.025, %v5297_v26  ;;  %v5327_v56 = vmul.f32 %v14290_v59, %v14290_v59  ;;  %v12506_v26 = vld [vmem:[%s15606_s8] sm:$0xff] }
0x1e5b   : > { %v12274_v58 = vpop.eup %12273  ;;  %v5124_v62 = vadd.f32 1.0, %v12272_v16 }
0x1e5c   : > { %v14295_v29 = vsub.f32 %v14270_v51, %v5314_v47  ;;  %v5334_v23 = vsel %vm1438_vm5, %v5327_v56, 0.0  ;;  %v5125_v12 = vadd.f32 1.0, %v12274_v58  ;;  %v9512_v51 = vld [vmem:[%s15602_s4 + $0x28] sm:$0xff] }
0x1e5d   : > { %5335 = vadd.xlane.f32.xlu1 %v5334_v23  ;;  %v5138_v28 = vmul.f32 %v5124_v62, %v5026_v20  ;;  %v11332_v37 = vpack.c.bf16 %v9513_v24, %v9512_v51 }
0x1e5e   : > { %v5139_v45 = vmul.f32 %v5125_v12, %v5027_v8  ;;  %v5328_v61 = vmul.f32 %v14295_v29, %v14295_v29 }
0x1e5f   : > { %11333 = vmatpush3.bf16.msra.mxu1 %v11332_v37 }
0x1e60   : > { %9509 = vmatprep.mubr.msk.f32.mxu0 %vm3145_vm14, %v5139_v45  ;;  %v5337_v42 = vsel %vm1438_vm5, %v5328_v61, 0.0  ;;  %11334 = vmatprep.subr.bf16.mxu1 %v15648_v38 }
0x1e61   : > { %5338 = vadd.xlane.f32.xlu0 %v5337_v42  ;;  %5280 = vmatmul.mubr.f32.gmra.mrb[92].mxu0 %v5138_v28 }
0x1e63   : > { %11336 = vmatpush3.bf16.msra.mxu1 %v11335_v3 }
0x1e64   : > { %10473 = vmatprep.subr.mxu1 %v15647_v34 }
0x1e67   : > { %10474 = vmatpush3.msra.mxu1 %v9516_v30 }
0x1e8a   : > { %v5300_v10 = vpop.xlane.xlu1 %5299 }
0x1e8b   : > { %v5315_v55 = vmul.f32 0.025, %v5300_v10 }
0x1e8d   : > { %v5322_v52 = vsub.f32 %v14277_v33, %v5315_v55 }
0x1e8f   : > { %v5329_v17 = vmul.f32 %v5322_v52, %v5322_v52 }
0x1e91   : > { %v5340_v57 = vsel %vm1438_vm5, %v5329_v17, 0.0 }
0x1e92   : > { %5341 = vadd.xlane.f32.xlu1 %v5340_v57 }
0x1eb1   : > { %v5303_v40 = vpop.xlane.xlu0 %5302 }
0x1eb2   : > { %v5316_v11 = vmul.f32 0.025, %v5303_v40 }
0x1eb4   : > { %v14321_v27 = vsub.f32 %v5288_v5, %v5316_v11 }
0x1eb6   : > { %v5330_v4 = vmul.f32 %v14321_v27, %v14321_v27 }
0x1eb7   : > { %v5271_v15 = vpop.f32.mrb[88].mxu0 }
0x1eb8   : > { %v5272_v0 = vadd.f32 %v5271_v15, %v14258_v44  ;;  %v5273_v48 = vpop.f32.mrb[89].mxu0  ;;  %v5343_v1 = vsel %vm1438_vm5, %v5330_v4, 0.0 }
0x1eb9   : > { %5344 = vadd.xlane.f32.xlu0 %v5343_v1 }
0x1eba   : > { %v5289_v33 = vadd.f32 %v5272_v0, %v14225_v50  ;;  %v15628_v50 = vsub.s32 6, %v13211_v13 }
0x1ebc   : > { %v5304_v53 = vsel %vm1438_vm5, %v5289_v33, 0.0  ;;  %v14339_v16 = vrot.slane %v12506_v26, %v15628_v50 }
0x1ebd   : > { %5305 = vadd.xlane.f32.xlu1 %v5304_v53 }
0x1eea   : > { %v5336_v9 = vpop.xlane.xlu1 %5335 }
0x1eeb   : > { %v5355_v63 = vmul.f32 0.025, %v5336_v9 }
0x1eed   : > { %v5362_v54 = vadd.f32 1e-05, %v5355_v63 }
0x1eee   : > { %v5339_v5 = vpop.xlane.xlu0 %5338  ;;  %v5276_v46 = vpop.f32.mrb[90].mxu0 }
0x1eef   : > { %12275 = vrsqrt.f32 %v5362_v54  ;;  %v5356_v18 = vmul.f32 0.025, %v5339_v5  ;;  %v5277_v49 = vadd.f32 %v5276_v46, %v14258_v44  ;;  %v5278_v19 = vpop.f32.mrb[91].mxu0  ;;  %v9510_v46 = vld [vmem:[%s15606_s8 + $0x10] sm:$0xff] }
0x1ef1   : > { %v5363_v32 = vadd.f32 1e-05, %v5356_v18  ;;  %v5290_v2 = vadd.f32 %v5277_v49, %v14237_v60  ;;  %v14344_v60 = vrot.slane %v12506_v26, %v15627_v7  ;;  %v15653_v49 = vsub.s32 0, %v13211_v13 }
0x1ef3   : > { %12277 = vrsqrt.f32 %v5363_v32  ;;  %v5307_v35 = vsel %vm1438_vm5, %v5290_v2, 0.0  ;;  %v14395_v19 = vrot.slane %v9510_v46, %v15653_v49 }
0x1ef4   : > { %5308 = vadd.xlane.f32.xlu0 %v5307_v35 }
0x1ef9   : > { %v12276_v47 = vpop.eup %12275 }
0x1efa   : > { %v5376_v56 = vmul.f32 %v12276_v47, %v14290_v59 }
0x1efc   : > { %v5387_v58 = vmul.f32 %v14339_v16, %v5376_v56 }
0x1efd   : > { %v12278_v62 = vpop.eup %12277 }
0x1efe   : > { %v14348_v8 = vadd.f32 %v14344_v60, %v5387_v58  ;;  %v5377_v23 = vmul.f32 %v12278_v62, %v14295_v29 }
0x1f00   : > { %10476 = vmatmul.mubr.msk.f32.vlgmr.msra.gmra.mrb[120].mxu1 %vm1438_vm5, %v14348_v8  ;;  %v5388_v12 = vmul.f32 %v14339_v16, %v5377_v23 }
0x1f01   : > { %10478 = vmatprep.mubr.msk.f32.mxu1 %vm12520_vm4, %v15647_v34 }
0x1f02   : > { %v14357_v59 = vadd.f32 %v14344_v60, %v5388_v12 }
0x1f04   : > { %10479 = vmatmul.mubr.msk.f32.gmra.mrb[122].mxu1 %vm1438_vm5, %v14357_v59 }
0x1f05   : > { %10481 = vmatprep.mubr.msk.f32.mxu1 %vm12520_vm4, %v15647_v34 }
0x1f1f   : > { %v5342_v20 = vpop.xlane.xlu1 %5341 }
0x1f20   : > { %v5357_v45 = vmul.f32 0.025, %v5342_v20 }
0x1f22   : > { %v5364_v29 = vadd.f32 1e-05, %v5357_v45 }
0x1f24   : > { %12279 = vrsqrt.f32 %v5364_v29 }
0x1f2e   : > { %v12280_v61 = vpop.eup %12279 }
0x1f2f   : > { %v5378_v28 = vmul.f32 %v12280_v61, %v5322_v52 }
0x1f31   : > { %v5389_v42 = vmul.f32 %v14339_v16, %v5378_v28 }
0x1f33   : > { %v14365_v51 = vadd.f32 %v14344_v60, %v5389_v42 }
0x1f34   : > { %v5281_v24 = vpop.f32.mrb[92].mxu0 }
0x1f35   : > { %v5282_v37 = vadd.f32 %v5281_v24, %v14258_v44  ;;  %v5283_v31 = vpop.f32.mrb[93].mxu0  ;;  %10482 = vmatmul.mubr.msk.f32.gmra.mrb[124].mxu1 %vm1438_vm5, %v14365_v51 }
0x1f36   : > { %10484 = vmatprep.mubr.msk.f32.mxu1 %vm12520_vm4, %v15647_v34 }
0x1f37   : > { %v5291_v25 = vadd.f32 %v5282_v37, %v14248_v22 }
0x1f39   : > { %v5310_v3 = vsel %vm1438_vm5, %v5291_v25, 0.0 }
0x1f3a   : > { %5311 = vadd.xlane.f32.xlu1 %v5310_v3 }
0x1f46   : > { %v5345_v30 = vpop.xlane.xlu0 %5344 }
0x1f47   : > { %v5358_v10 = vmul.f32 0.025, %v5345_v30 }
0x1f49   : > { %v5365_v55 = vadd.f32 1e-05, %v5358_v10 }
0x1f4a   : > { %v5306_v52 = vpop.xlane.xlu1 %5305 }
0x1f4b   : > { %12281 = vrsqrt.f32 %v5365_v55  ;;  %v5317_v17 = vmul.f32 0.025, %v5306_v52 }
0x1f4d   : > { %v5324_v57 = vsub.f32 %v5289_v33, %v5317_v17 }
0x1f4f   : > { %v5331_v44 = vmul.f32 %v5324_v57, %v5324_v57 }
0x1f51   : > { %v5346_v40 = vsel %vm1438_vm5, %v5331_v44, 0.0 }
0x1f52   : > { %5347 = vadd.xlane.f32.xlu0 %v5346_v40 }
0x1f55   : > { %v12282_v11 = vpop.eup %12281 }
0x1f56   : > { %v5379_v4 = vmul.f32 %v12282_v11, %v14321_v27 }
0x1f58   : > { %v5390_v15 = vmul.f32 %v14339_v16, %v5379_v4 }
0x1f5a   : > { %v14378_v22 = vadd.f32 %v14344_v60, %v5390_v15 }
0x1f5c   : > { %15652 = vst [vmem:[#allocation3_spill] sm:$0xff] %v14378_v22  ;;  %10485 = vmatmul.mubr.msk.f32.gmra.mrb[126].mxu1 %vm1438_vm5, %v14378_v22 }
0x1f5d   : > { %10487 = vmatprep.mubr.msk.f32.mxu1 %vm12520_vm4, %v15647_v34 }
0x1f81   : > { %v5309_v0 = vpop.xlane.xlu0 %5308 }
0x1f82   : > { %v5318_v48 = vmul.f32 0.025, %v5309_v0 }
0x1f84   : > { %v5325_v1 = vsub.f32 %v5290_v2, %v5318_v48 }
0x1f86   : > { %v5332_v33 = vmul.f32 %v5325_v1, %v5325_v1 }
0x1f88   : > { %v5349_v53 = vsel %vm1438_vm5, %v5332_v33, 0.0 }
0x1f89   : > { %5350 = vadd.xlane.f32.xlu1 %v5349_v53 }
0x1fc7   : > { %v5312_v9 = vpop.xlane.xlu1 %5311 }
0x1fc8   : > { %v5319_v27 = vmul.f32 0.025, %v5312_v9 }
0x1fca   : > { %v14385_v63 = vsub.f32 %v5291_v25, %v5319_v27 }
0x1fcc   : > { %v5333_v54 = vmul.f32 %v14385_v63, %v14385_v63 }
0x1fce   : > { %v5352_v5 = vsel %vm1438_vm5, %v5333_v54, 0.0 }
0x1fcf   : > { %5353 = vadd.xlane.f32.xlu0 %v5352_v5 }
0x1fd3   : > { %v5505_v18 = vpop.f32.mrb[120].mxu1 }
0x1fd4   : > { %v10477_v32 = vpop.f32.mrb[121].mxu1  ;;  %v14398_v35 = vadd.f32 %v5505_v18, %v14395_v19 }
0x1fd7   : > { %v5510_v2 = vpop.f32.mrb[122].mxu1 }
0x1fd8   : > { %v14401_v26 = vadd.f32 %v5510_v2, %v14395_v19  ;;  %v10480_v47 = vpop.f32.mrb[123].mxu1 }
0x1fda   : > { %v14405_v56 = vpack.i.bf16 %v14401_v26, %v14398_v35 }
0x1fdc   : > { %11874 = vrot.lane.b32.xlu1 %v14405_v56, %s12521_s19 }
0x1fdf   : > { %v5348_v58 = vpop.xlane.xlu0 %5347 }
0x1fe0   : > { %v5359_v62 = vmul.f32 0.025, %v5348_v58 }
0x1fe2   : > { %v5366_v23 = vadd.f32 1e-05, %v5359_v62 }
0x1fe4   : > { %12283 = vrsqrt.f32 %v5366_v23 }
0x1fe5   : > { %11879 = vrot.lane.b32.xlu0 %v14405_v56, %s12523_s21 }
0x1fe9   : > { %11894 = vrot.lane.b32.xlu0 %v14405_v56, %s12526_s24 }
0x1fed   : > { %5812 = vrot.lane.b32.xlu0 %v14401_v26, %s12524_s22 }
0x1fee   : > { %v12284_v12 = vpop.eup %12283 }
0x1fef   : > { %v5380_v20 = vmul.f32 %v12284_v12, %v5324_v57 }
0x1ff1   : > { %v5391_v45 = vmul.f32 %v14339_v16, %v5380_v20 }
0x1ff3   : > { %v14417_v29 = vadd.f32 %v14344_v60, %v5391_v45 }
0x1ff5   : > { %15654 = vst [vmem:[#allocation4_spill] sm:$0xff] %v14417_v29  ;;  %10488 = vmatmul.mubr.msk.f32.gmra.mrb[128].mxu1 %vm1438_vm5, %v14417_v29 }
0x1ff6   : > { %10490 = vmatprep.mubr.msk.f32.mxu1 %vm12520_vm4, %v15647_v34 }
0x2008   : > { %v5515_v61 = vpop.f32.mrb[124].mxu1 }
0x2009   : > { %v14424_v28 = vadd.f32 %v5515_v61, %v14395_v19  ;;  %v10483_v42 = vpop.f32.mrb[125].mxu1 }
0x200b   : > { %5814 = vrot.lane.b32.xlu0 %v14424_v28, %s12524_s22 }
0x200f   : > { %6085 = vrot.lane.b32.xlu0 %v14398_v35, %s12528_s26 }
0x2013   : > { %6089 = vrot.lane.b32.xlu0 %v14424_v28, %s12528_s26 }
0x2016   : > { %v5351_v24 = vpop.xlane.xlu1 %5350 }
0x2017   : > { %v5360_v37 = vmul.f32 0.025, %v5351_v24 }
0x2019   : > { %v5367_v31 = vadd.f32 1e-05, %v5360_v37 }
0x201b   : > { %12285 = vrsqrt.f32 %v5367_v31 }
0x2025   : > { %v12286_v25 = vpop.eup %12285 }
0x2026   : > { %v5381_v3 = vmul.f32 %v12286_v25, %v5325_v1 }
0x2028   : > { %v5392_v30 = vmul.f32 %v14339_v16, %v5381_v3 }
0x202a   : > { %v14434_v10 = vadd.f32 %v14344_v60, %v5392_v30 }
0x202c   : > { %15655 = vst [vmem:[#allocation5_spill] sm:$0xff] %v14434_v10  ;;  %10491 = vmatmul.mubr.msk.f32.gmra.mrb[130].mxu1 %vm1438_vm5, %v14434_v10 }
0x202d   : > { %10493 = vmatprep.mubr.msk.f32.mxu1 %vm12520_vm4, %v15647_v34 }
0x202f   : > { %v5520_v55 = vpop.f32.mrb[126].mxu1 }
0x2030   : > { %v14441_v52 = vadd.f32 %v5520_v55, %v14395_v19  ;;  %v10486_v17 = vpop.f32.mrb[127].mxu1 }
0x2032   : > { %v14445_v57 = vpack.i.bf16 %v14441_v52, %v14424_v28 }
0x2034   : > { %11884 = vrot.lane.b32.xlu1 %v14445_v57, %s12521_s19 }
0x2038   : > { %11889 = vrot.lane.b32.xlu1 %v14445_v57, %s12523_s21 }
0x203c   : > { %5810 = vrot.lane.b32.xlu1 %v14398_v35, %s12524_s22 }
0x2040   : > { %11899 = vrot.lane.b32.xlu1 %v14445_v57, %s12526_s24 }
0x2044   : > { %5816 = vrot.lane.b32.xlu1 %v14441_v52, %s12524_s22 }
0x2048   : > { %6087 = vrot.lane.b32.xlu1 %v14401_v26, %s12528_s26 }
0x204c   : > { %6091 = vrot.lane.b32.xlu1 %v14441_v52, %s12528_s26 }
0x204e   : > { %v11875_v44 = vpop.permute.xlu1 %11874 }
0x204f   : > { %v11877_v40 = vunpack.i.h.bf16 %v11875_v44  ;;  %v11876_v11 = vunpack.i.l.bf16 %v11875_v44 }
0x2050   : > { %11904 = vrot.lane.b32.xlu1 %v14405_v56, %s12522_s20 }
0x2051   : > { %v11337_v4 = vpack.c.bf16 %v11877_v40, %v11876_v11 }
0x2053   : > { %11339 = vmatprep.subr.msk.bf16.mxu1 %vm13258_vm8, %v11337_v4 }
0x2054   : > { %11342 = vmatpush3.bf16.xpose.msk.msra.mxu1 %vm13258_vm8, %v11337_v4 }
0x205c   : > { %v5354_v15 = vpop.xlane.xlu0 %5353 }
0x205d   : > { %v5361_v0 = vmul.f32 0.025, %v5354_v15 }
0x205f   : > { %v5368_v48 = vadd.f32 1e-05, %v5361_v0 }
0x2060   : > { %v11880_v1 = vpop.permute.xlu0 %11879 }
0x2061   : > { %12287 = vrsqrt.f32 %v5368_v48  ;;  %v11882_v33 = vunpack.i.h.bf16 %v11880_v1  ;;  %v11881_v53 = vunpack.i.l.bf16 %v11880_v1 }
0x2063   : > { %v11359_v9 = vpack.c.bf16 %v11882_v33, %v11881_v53 }
0x2064   : > { %v11895_v2 = vpop.permute.xlu0 %11894 }
0x2065   : > { %11361 = vmatprep.subr.msk.bf16.mxu0 %vm13258_vm8, %v11359_v9  ;;  %v11897_v62 = vunpack.i.h.bf16 %v11895_v2  ;;  %v11896_v23 = vunpack.i.l.bf16 %v11895_v2 }
0x2066   : > { %11364 = vmatpush3.bf16.xpose.msk.msra.mxu0 %vm13258_vm8, %v11359_v9 }
0x2067   : > { %v11381_v20 = vpack.c.bf16 %v11897_v62, %v11896_v23 }
0x2068   : > { %v5813_v45 = vpop.permute.xlu0 %5812 }
0x206b   : > { %v12288_v27 = vpop.eup %12287 }
0x206c   : > { %v5382_v54 = vmul.f32 %v12288_v27, %v14385_v63 }
0x206e   : > { %v5393_v5 = vmul.f32 %v14339_v16, %v5382_v54 }
0x2070   : > { %v14474_v46 = vadd.f32 %v14344_v60, %v5393_v5 }
0x2072   : > { %15656 = vst [vmem:[#allocation6_spill] sm:$0xff] %v14474_v46  ;;  %10494 = vmatmul.mubr.msk.f32.gmra.mrb[132].mxu1 %vm1438_vm5, %v14474_v46 }
0x2073   : > { %10504 = vmatprep.mubr.msk.f32.mxu1 %vm1704_vm6, %v14398_v35 }
0x207d   : > { %v5815_v37 = vpop.permute.xlu0 %5814 }
0x2081   : > { %v6086_v30 = vpop.permute.xlu0 %6085 }
0x2085   : > { %v6090_v4 = vpop.permute.xlu0 %6089 }
0x20a6   : > { %v11885_v18 = vpop.permute.xlu1 %11884 }
0x20a7   : > { %v11887_v49 = vunpack.i.h.bf16 %v11885_v18  ;;  %v11886_v32 = vunpack.i.l.bf16 %v11885_v18 }
0x20a9   : > { %v11343_v47 = vpack.c.bf16 %v11887_v49, %v11886_v32 }
0x20aa   : > { %v11890_v58 = vpop.permute.xlu1 %11889 }
0x20ab   : > { %v11892_v63 = vunpack.i.h.bf16 %v11890_v58  ;;  %v11891_v12 = vunpack.i.l.bf16 %v11890_v58  ;;  %11345 = vmatprep.subr.msk.bf16.mxu1 %vm13258_vm8, %v11343_v47 }
0x20ac   : > { %11348 = vmatpush3.bf16.xpose.msk.msra.mxu1 %vm13258_vm8, %v11343_v47 }
0x20ad   : > { %v11365_v16 = vpack.c.bf16 %v11892_v63, %v11891_v12 }
0x20ae   : > { %v5811_v60 = vpop.permute.xlu1 %5810 }
0x20af   : > { %11367 = vmatprep.subr.msk.bf16.mxu0 %vm13258_vm8, %v11365_v16  ;;  %10532 = vmatprep.mubr.msk.f32.mxu0 %vm1704_vm6, %v5811_v60 }
0x20b0   : > { %11370 = vmatpush3.bf16.xpose.msk.msra.mxu0 %vm13258_vm8, %v11365_v16 }
0x20b1   : > { %11383 = vmatprep.subr.msk.bf16.mxu0 %vm13258_vm8, %v11381_v20 }
0x20b2   : > { %v11900_v61 = vpop.permute.xlu1 %11899 }
0x20b3   : > { %v11902_v42 = vunpack.i.h.bf16 %v11900_v61  ;;  %v11901_v24 = vunpack.i.l.bf16 %v11900_v61  ;;  %10505 = vmatmul.mubr.msk.f32.vlgmr.msra.gmra.mrb[134].mxu1 %vm1704_vm6, %v14401_v26 }
0x20b4   : > { %10507 = vmatprep.mubr.msk.f32.mxu1 %vm1704_vm6, %v14424_v28 }
0x20b5   : > { %v11387_v25 = vpack.c.bf16 %v11902_v42, %v11901_v24 }
0x20b6   : > { %v5817_v31 = vpop.permute.xlu1 %5816 }
0x20b7   : > { %10508 = vmatmul.mubr.msk.f32.gmra.mrb[136].mxu1 %vm1704_vm6, %v14441_v52  ;;  %10533 = vmatmul.mubr.msk.f32.vlgmr.msra.gmra.mrb[94].mxu0 %vm1704_vm6, %v5813_v45 }
0x20b8   : > { %10535 = vmatprep.mubr.msk.f32.mxu0 %vm1704_vm6, %v5815_v37  ;;  %11386 = vmatpush3.bf16.xpose.msk.msra.mxu0 %vm13258_vm8, %v11381_v20 }
0x20b9   : > { %11389 = vmatprep.subr.msk.bf16.mxu0 %vm13258_vm8, %v11387_v25 }
0x20ba   : > { %v6088_v3 = vpop.permute.xlu1 %6087 }
0x20bb   : > { %10536 = vmatmul.mubr.msk.f32.gmra.mrb[96].mxu0 %vm1704_vm6, %v5817_v31 }
0x20bc   : > { %10560 = vmatprep.mubr.msk.f32.mxu0 %vm1704_vm6, %v6086_v30 }
0x20be   : > { %v6092_v55 = vpop.permute.xlu1 %6091 }
0x20c0   : > { %11392 = vmatpush3.bf16.xpose.msk.msra.mxu0 %vm13258_vm8, %v11387_v25 }
0x20c2   : > { %v11905_v17 = vpop.permute.xlu1 %11904 }
0x20c3   : > { %v11907_v44 = vunpack.i.h.bf16 %v11905_v17  ;;  %v11906_v40 = vunpack.i.l.bf16 %v11905_v17 }
0x20c5   : > { %v11349_v11 = vpack.c.bf16 %v11907_v44, %v11906_v40 }
0x20c7   : > { %11350 = vmatprep.subr.bf16.mxu1 %v11349_v11  ;;  %10561 = vmatmul.mubr.msk.f32.vlgmr.msra.gmra.mrb[98].mxu0 %vm1704_vm6, %v6088_v3 }
0x20c8   : > { %v5525_v15 = vpop.f32.mrb[128].mxu1  ;;  %11352 = vmatpush3.bf16.msra.mxu1 %v11349_v11  ;;  %10563 = vmatprep.mubr.msk.f32.mxu0 %vm1704_vm6, %v6090_v4 }
0x20c9   : > { %v10489_v0 = vpop.f32.mrb[129].mxu1  ;;  %v14511_v48 = vadd.f32 %v5525_v15, %v14395_v19 }
0x20cb   : > { %10564 = vmatmul.mubr.msk.f32.gmra.mrb[100].mxu0 %vm1704_vm6, %v6092_v55  ;;  %v6994_v9 = vrot.slane %v14511_v48, 4 }
0x20ff   : > { %v5530_v1 = vpop.f32.mrb[130].mxu1 }
0x2100   : > { %v14514_v33 = vadd.f32 %v5530_v1, %v14395_v19  ;;  %v10492_v53 = vpop.f32.mrb[131].mxu1 }
0x2102   : > { %v6996_v27 = vrot.slane %v14514_v33, 4 }
0x2104   : > { %v14523_v54 = vsel %vm1879_vm7, %v6994_v9, %v6996_v27 }
0x2145   : > { %v14525_v5 = vpop.f32.mrb[132].mxu1 }
0x2146   : > { %v10495_v18 = vpop.f32.mrb[133].mxu1  ;;  %v5536_v48 = vadd.f32 %v14525_v5, %v14395_v19 }
0x2186   : > { %v10506_v49 = vpop.f32.mrb[134].mxu1 }
0x2187   : > { %v5653_v32 = vmul.f32 0.35355338, %v10506_v49  ;;  %v5633_v2 = vpop.f32.mrb[135].mxu1 }
0x2188   : > { %v5652_v60 = vmul.f32 0.35355338, %v5633_v2 }
0x2189   : > { %v5659_v47 = vsel %vm1810_vm9, %v5653_v32, -inf }
0x218a   : > { %v10534_v58 = vpop.f32.mrb[94].mxu0  ;;  %5660 = vmax.xlane.f32.xlu1 %v5659_v47  ;;  %v10509_v62 = vpop.f32.mrb[136].mxu1  ;;  %v5656_v37 = vsel %vm1810_vm9, %v5652_v60, -inf }
0x218b   : > { %v5928_v23 = vmul.f32 0.35355338, %v10534_v58  ;;  %v5643_v63 = vpop.f32.mrb[137].mxu1  ;;  %v5908_v12 = vpop.f32.mrb[95].mxu0  ;;  %v5655_v24 = vmul.f32 0.35355338, %v10509_v62 }
0x218c   : > { %v5927_v16 = vmul.f32 0.35355338, %v5908_v12  ;;  %v5654_v3 = vmul.f32 0.35355338, %v5643_v63 }
0x218d   : > { %v5934_v20 = vsel %vm1810_vm9, %v5928_v23, -inf  ;;  %v5665_v25 = vsel %vm1820_vm10, %v5655_v24, -inf }
0x218e   : > { %5935 = vmax.xlane.f32.xlu0 %v5934_v20  ;;  %v10537_v45 = vpop.f32.mrb[96].mxu0  ;;  %v5931_v61 = vsel %vm1810_vm9, %v5927_v16, -inf  ;;  %v5662_v44 = vsel %vm1810_vm9, %v5654_v3, -inf }
0x218f   : > { %v5918_v42 = vpop.f32.mrb[97].mxu0  ;;  %5932 = vmax.xlane.f32.xlu1 %v5931_v61  ;;  %v5930_v31 = vmul.f32 0.35355338, %v10537_v45 }
0x2190   : > { %v14538_v4 = vmul.f32 0.35355338, %v5918_v42 }
0x2191   : > { %v5940_v30 = vsel %vm1820_vm10, %v5930_v31, -inf }
0x2192   : > { %5657 = vmax.xlane.f32.xlu0 %v5656_v37  ;;  %v5937_v0 = vsel %vm1810_vm9, %v14538_v4, -inf }
0x2196   : > { %5666 = vmax.xlane.f32.xlu0 %v5665_v25 }
0x219a   : > { %v10562_v55 = vpop.f32.mrb[98].mxu0  ;;  %5941 = vmax.xlane.f32.xlu0 %v5940_v30 }
0x219b   : > { %v6183_v17 = vpop.f32.mrb[99].mxu0  ;;  %v14550_v49 = vmul.f32 0.35355338, %v10562_v55 }
0x219c   : > { %v14540_v15 = vmul.f32 0.35355338, %v6183_v17 }
0x219d   : > { %v6209_v47 = vsel %vm1810_vm9, %v14550_v49, -inf }
0x219e   : > { %v10565_v40 = vpop.f32.mrb[100].mxu0  ;;  %5663 = vmax.xlane.f32.xlu0 %v5662_v44  ;;  %v6206_v53 = vsel %vm1810_vm9, %v14540_v15, -inf }
0x219f   : > { %v6193_v11 = vpop.f32.mrb[101].mxu0  ;;  %v14552_v2 = vmul.f32 0.35355338, %v10565_v40 }
0x21a0   : > { %11914 = vrot.lane.b32.xlu1 %v14405_v56, %s12525_s23  ;;  %v14544_v1 = vmul.f32 0.35355338, %v6193_v11 }
0x21a1   : > { %v6215_v58 = vsel %vm1820_vm10, %v14552_v2, -inf }
0x21a2   : > { %v6212_v18 = vsel %vm1810_vm9, %v14544_v1, -inf }
0x21b4   : > { %11909 = vrot.lane.b32.xlu0 %v14445_v57, %s12522_s20 }
0x21c4   : > { %5938 = vmax.xlane.f32.xlu1 %v5937_v0 }
0x21c8   : > { %6207 = vmax.xlane.f32.xlu1 %v6206_v53 }
0x21cc   : > { %6213 = vmax.xlane.f32.xlu1 %v6212_v18 }
0x21d3   : > { %6210 = vmax.xlane.f32.xlu0 %v6209_v47 }
0x21d7   : > { %6216 = vmax.xlane.f32.xlu0 %v6215_v58 }
0x21dd   : > { %11924 = vrot.lane.b32.xlu1 %v14405_v56, %s12530_s28 }
0x21ed   : > { %11919 = vrot.lane.b32.xlu0 %v14445_v57, %s12525_s23 }
0x2217   : > { %v5661_v62 = vpop.xlane.xlu1 %5660 }
0x2218   : > { %v5669_v63 = vsub.f32 %v5653_v32, %v5661_v62 }
0x221a   : > { %v5674_v12 = vmul.f32 1.442695, %v5669_v63 }
0x221b   : > { %v5936_v20 = vpop.xlane.xlu0 %5935 }
0x221c   : > { %12289 = vpow2.f32 %v5674_v12  ;;  %v5944_v45 = vsub.f32 %v5928_v23, %v5936_v20  ;;  %v5933_v61 = vpop.xlane.xlu1 %5932 }
0x221d   : > { %v5943_v37 = vsub.f32 %v5927_v16, %v5933_v61 }
0x221e   : > { %v5949_v42 = vmul.f32 1.442695, %v5944_v45 }
0x221f   : > { %v5658_v25 = vpop.xlane.xlu0 %5657  ;;  %v5947_v55 = vmul.f32 1.442695, %v5943_v37 }
0x2220   : > { %12291 = vpow2.f32 %v5949_v42  ;;  %v5668_v30 = vsub.f32 %v5652_v60, %v5658_v25  ;;  %v11915_v62 = vpop.permute.xlu1 %11914 }
0x2221   : > { %v11917_v42 = vunpack.i.h.bf16 %v11915_v62  ;;  %v11916_v37 = vunpack.i.l.bf16 %v11915_v62 }
0x2222   : > { %v5672_v17 = vmul.f32 1.442695, %v5668_v30 }
0x2223   : > { %v5667_v44 = vpop.xlane.xlu0 %5666 }
0x2224   : > { %12293 = vpow2.f32 %v5672_v17  ;;  %v5671_v40 = vsub.f32 %v5655_v24, %v5667_v44  ;;  %v14584_v17 = vpack.c.bf16 %v11917_v42, %v11916_v37 }
0x2225   : > { %12295 = vpow2.f32 %v5947_v55 }
0x2226   : > { %v14562_v11 = vpop.eup %12289  ;;  %v5678_v0 = vmul.f32 1.442695, %v5671_v40 }
0x2227   : > { %v5942_v32 = vpop.xlane.xlu0 %5941  ;;  %v5683_v53 = vsel %vm1810_vm9, %v14562_v11, 0.0 }
0x2228   : > { %12297 = vpow2.f32 %v5678_v0  ;;  %v5946_v23 = vsub.f32 %v5930_v31, %v5942_v32  ;;  %5684 = vadd.xlane.f32.xlu0 %v5683_v53 }
0x222a   : > { %v14566_v16 = vpop.eup %12291  ;;  %v5953_v18 = vmul.f32 1.442695, %v5946_v23 }
0x222b   : > { %v5664_v60 = vpop.xlane.xlu0 %5663  ;;  %v5958_v47 = vsel %vm1810_vm9, %v14566_v16, 0.0 }
0x222c   : > { %12299 = vpow2.f32 %v5953_v18  ;;  %v5670_v24 = vsub.f32 %v5654_v3, %v5664_v60  ;;  %5959 = vadd.xlane.f32.xlu0 %v5958_v47 }
0x222e   : > { %v14570_v58 = vpop.eup %12293  ;;  %v5676_v63 = vmul.f32 1.442695, %v5670_v24 }
0x222f   : > { %v11910_v12 = vpop.permute.xlu0 %11909  ;;  %v5680_v20 = vsel %vm1810_vm9, %v14570_v58, 0.0  ;;  %v14574_v31 = vpop.eup %12295 }
0x2230   : > { %12301 = vpow2.f32 %v5676_v63  ;;  %v11912_v45 = vunpack.i.h.bf16 %v11910_v12  ;;  %v11911_v61 = vunpack.i.l.bf16 %v11910_v12  ;;  %5681 = vadd.xlane.f32.xlu1 %v5680_v20  ;;  %v5955_v30 = vsel %vm1810_vm9, %v14574_v31, 0.0 }
0x2232   : > { %v14576_v25 = vpop.eup %12297  ;;  %v11353_v3 = vpack.c.bf16 %v11912_v45, %v11911_v61 }
0x2233   : > { %v5689_v55 = vsel %vm1820_vm10, %v14576_v25, 0.0 }
0x2234   : > { %5956 = vadd.xlane.f32.xlu1 %v5955_v30  ;;  %5690 = vadd.xlane.f32.xlu0 %v5689_v55 }
0x2235   : > { %11355 = vmatprep.subr.msk.bf16.mxu1 %vm13294_vm11, %v11353_v3 }
0x2236   : > { %v14586_v44 = vpop.eup %12299  ;;  %11358 = vmatpush3.bf16.msk.msra.mxu1 %vm13294_vm11, %v11353_v3 }
0x2237   : > { %11372 = vmatprep.subr.bf16.mxu1 %v14584_v17  ;;  %v5964_v40 = vsel %vm1820_vm10, %v14586_v44, 0.0 }
0x2238   : > { %5965 = vadd.xlane.f32.xlu0 %v5964_v40 }
0x223a   : > { %v14593_v0 = vpop.eup %12301 }
0x223b   : > { %v5686_v32 = vsel %vm1810_vm9, %v14593_v0, 0.0 }
0x223c   : > { %5687 = vadd.xlane.f32.xlu1 %v5686_v32 }
0x2251   : > { %v5939_v53 = vpop.xlane.xlu1 %5938 }
0x2252   : > { %v5945_v23 = vsub.f32 %v14538_v4, %v5939_v53 }
0x2254   : > { %v5951_v18 = vmul.f32 1.442695, %v5945_v23 }
0x2255   : > { %v6208_v60 = vpop.xlane.xlu1 %6207 }
0x2256   : > { %12303 = vpow2.f32 %v5951_v18  ;;  %v6218_v47 = vsub.f32 %v14540_v15, %v6208_v60 }
0x2258   : > { %v6222_v24 = vmul.f32 1.442695, %v6218_v47 }
0x225a   : > { %12305 = vpow2.f32 %v6222_v24 }
0x2260   : > { %v14599_v62 = vpop.eup %12303  ;;  %v6211_v63 = vpop.xlane.xlu0 %6210 }
0x2261   : > { %v6219_v12 = vsub.f32 %v14550_v49, %v6211_v63  ;;  %v5961_v20 = vsel %vm1810_vm9, %v14599_v62, 0.0 }
0x2262   : > { %5962 = vadd.xlane.f32.xlu0 %v5961_v20 }
0x2263   : > { %v6224_v45 = vmul.f32 1.442695, %v6219_v12 }
0x2264   : > { %v14604_v61 = vpop.eup %12305  ;;  %v6217_v4 = vpop.xlane.xlu0 %6216 }
0x2265   : > { %12307 = vpow2.f32 %v6224_v45  ;;  %v6221_v42 = vsub.f32 %v14552_v2, %v6217_v4  ;;  %v6230_v15 = vsel %vm1810_vm9, %v14604_v61, 0.0  ;;  %v6214_v2 = vpop.xlane.xlu1 %6213 }
0x2266   : > { %6231 = vadd.xlane.f32.xlu1 %v6230_v15  ;;  %v6220_v40 = vsub.f32 %v14544_v1, %v6214_v2 }
0x2267   : > { %v6228_v37 = vmul.f32 1.442695, %v6221_v42 }
0x2268   : > { %v6226_v32 = vmul.f32 1.442695, %v6220_v40  ;;  %v11920_v18 = vpop.permute.xlu0 %11919 }
0x2269   : > { %12309 = vpow2.f32 %v6228_v37  ;;  %v11925_v60 = vpop.permute.xlu1 %11924  ;;  %v11922_v4 = vunpack.i.h.bf16 %v11920_v18  ;;  %v11921_v42 = vunpack.i.l.bf16 %v11920_v18 }
0x226a   : > { %12311 = vpow2.f32 %v6226_v32  ;;  %v11926_v2 = vunpack.i.l.bf16 %v11925_v60 }
0x226b   : > { %v11375_v40 = vpack.c.bf16 %v11922_v4, %v11921_v42 }
0x226f   : > { %v14609_v3 = vpop.eup %12307 }
0x2270   : > { %v6233_v49 = vsel %vm1810_vm9, %v14609_v3, 0.0 }
0x2271   : > { %6234 = vadd.xlane.f32.xlu0 %v6233_v49 }
0x2273   : > { %v14613_v30 = vpop.eup %12309 }
0x2274   : > { %v6239_v55 = vsel %vm1820_vm10, %v14613_v30, 0.0  ;;  %v14628_v53 = vpop.eup %12311 }
0x2275   : > { %6240 = vadd.xlane.f32.xlu0 %v6239_v55  ;;  %v6236_v23 = vsel %vm1810_vm9, %v14628_v53, 0.0  ;;  %v11927_v55 = vunpack.i.h.bf16 %v11925_v60 }
0x2277   : > { %11934 = vrot.lane.b32.xlu1 %v14405_v56, %s15657_s25  ;;  %v11393_v32 = vpack.c.bf16 %v11927_v55, %v11926_v2 }
0x227b   : > { %11939 = vrot.lane.b32.xlu1 %v14445_v57, %s15657_s25 }
0x227f   : > { %6360 = vrot.lane.b32.xlu1 %v14398_v35, %s15658_s27 }
0x228b   : > { %11929 = vrot.lane.b32.xlu0 %v14445_v57, %s12530_s28 }
0x228f   : > { %6364 = vrot.lane.b32.xlu0 %v14424_v28, %s15658_s27 }
0x22a3   : > { %6237 = vadd.xlane.f32.xlu1 %v6236_v23 }
0x22b4   : > { %6362 = vrot.lane.b32.xlu1 %v14401_v26, %s15658_s27 }
0x22b5   : > { %v5685_v1 = vpop.xlane.xlu0 %5684 }
0x22b6   : > { %12313 = vrcp.f32 %v5685_v1 }
0x22b8   : > { %6366 = vrot.lane.b32.xlu1 %v14441_v52, %s15658_s27 }
0x22b9   : > { %v5960_v24 = vpop.xlane.xlu0 %5959 }
0x22bd   : > { %v5682_v47 = vpop.xlane.xlu1 %5681 }
0x22be   : > { %12315 = vrcp.f32 %v5682_v47 }
0x22c0   : > { %v12314_v20 = vpop.eup %12313 }
0x22c1   : > { %v5957_v63 = vpop.xlane.xlu1 %5956  ;;  %v5691_v12 = vpop.xlane.xlu0 %5690  ;;  %v5697_v49 = vmul.f32 %v12314_v20, %v14562_v11 }
0x22c2   : > { %12317 = vrcp.f32 %v5957_v63 }
0x22c3   : > { %12319 = vrcp.f32 %v5691_v12 }
0x22c8   : > { %v12316_v45 = vpop.eup %12315 }
0x22c9   : > { %v5688_v15 = vpop.xlane.xlu1 %5687  ;;  %v5696_v37 = vmul.f32 %v12316_v45, %v14570_v58 }
0x22ca   : > { %12321 = vrcp.f32 %v5688_v15 }
0x22cb   : > { %10518 = vmatprep.mubr.msk.f32.mxu1 %vm1810_vm9, %v5696_v37  ;;  %12323 = vrcp.f32 %v5960_v24  ;;  %v5966_v24 = vpop.xlane.xlu0 %5965 }
0x22cc   : > { %10519 = vmatmul.mubr.msk.f32.vlgmr.msra.gmra.mrb[138].mxu1 %vm1810_vm9, %v5697_v49  ;;  %v12318_v58 = vpop.eup %12317  ;;  %12325 = vrcp.f32 %v5966_v24 }
0x22cd   : > { %11374 = vmatpush3.bf16.msra.mxu1 %v14584_v17  ;;  %v12320_v11 = vpop.eup %12319  ;;  %v5971_v17 = vmul.f32 %v12318_v58, %v14574_v31 }
0x22ce   : > { %11377 = vmatprep.subr.msk.bf16.mxu1 %vm13294_vm11, %v11375_v40  ;;  %v5699_v60 = vmul.f32 %v12320_v11, %v14576_v25 }
0x22d1   : > { %11380 = vmatpush3.bf16.msk.msra.mxu1 %vm13294_vm11, %v11375_v40 }
0x22d2   : > { %11394 = vmatprep.subr.bf16.mxu1 %v11393_v32 }
0x22d4   : > { %v12322_v23 = vpop.eup %12321 }
0x22d5   : > { %v5698_v18 = vmul.f32 %v12322_v23, %v14593_v0  ;;  %v12324_v1 = vpop.eup %12323 }
0x22d6   : > { %v5972_v47 = vmul.f32 %v12324_v1, %v14566_v16  ;;  %v12326_v25 = vpop.eup %12325 }
0x22d7   : > { %10521 = vmatprep.mubr.msk.f32.mxu1 %vm1810_vm9, %v5698_v18  ;;  %v5974_v31 = vmul.f32 %v12326_v25, %v14586_v44 }
0x22d8   : > { %10522 = vmatmul.mubr.msk.f32.gmra.mrb[140].mxu1 %vm1810_vm9, %v5699_v60 }
0x22d9   : > { %10546 = vmatprep.mubr.msk.f32.mxu1 %vm1810_vm9, %v5971_v17 }
0x22dc   : > { %10547 = vmatmul.mubr.msk.f32.vlgmr.msra.gmra.mrb[142].mxu1 %vm1810_vm9, %v5972_v47 }
0x22dd   : > { %11396 = vmatpush3.bf16.msra.mxu1 %v11393_v32 }
0x22ef   : > { %v5963_v63 = vpop.xlane.xlu0 %5962 }
0x22f0   : > { %12327 = vrcp.f32 %v5963_v63 }
0x22f3   : > { %v6232_v0 = vpop.xlane.xlu1 %6231 }
0x22f4   : > { %12329 = vrcp.f32 %v6232_v0 }
0x22f7   : > { %v11935_v15 = vpop.permute.xlu1 %11934 }
0x22f8   : > { %v11937_v49 = vunpack.i.h.bf16 %v11935_v15  ;;  %v11936_v55 = vunpack.i.l.bf16 %v11935_v15 }
0x22fa   : > { %v12328_v12 = vpop.eup %12327  ;;  %v11403_v32 = vpack.c.bf16 %v11937_v49, %v11936_v55 }
0x22fb   : > { %v5973_v20 = vmul.f32 %v12328_v12, %v14599_v62 }
0x22fd   : > { %10549 = vmatprep.mubr.msk.f32.mxu1 %vm1810_vm9, %v5973_v20 }
0x22fe   : > { %v12330_v45 = vpop.eup %12329  ;;  %v6235_v4 = vpop.xlane.xlu0 %6234  ;;  %10550 = vmatmul.mubr.msk.f32.gmra.mrb[144].mxu1 %vm1810_vm9, %v5974_v31 }
0x22ff   : > { %v6246_v16 = vmul.f32 %v12330_v45, %v14604_v61  ;;  %12331 = vrcp.f32 %v6235_v4  ;;  %v11940_v61 = vpop.permute.xlu1 %11939 }
0x2300   : > { %v11942_v11 = vunpack.i.h.bf16 %v11940_v61  ;;  %v11941_v23 = vunpack.i.l.bf16 %v11940_v61 }
0x2301   : > { %10574 = vmatprep.mubr.msk.f32.mxu1 %vm1810_vm9, %v6246_v16 }
0x2302   : > { %v6241_v42 = vpop.xlane.xlu0 %6240  ;;  %v11409_v18 = vpack.c.bf16 %v11942_v11, %v11941_v23 }
0x2303   : > { %v6361_v60 = vpop.permute.xlu1 %6360  ;;  %12333 = vrcp.f32 %v6241_v42 }
0x2306   : > { %v11930_v37 = vpop.permute.xlu0 %11929 }
0x2307   : > { %v11932_v2 = vunpack.i.h.bf16 %v11930_v37  ;;  %v11931_v62 = vunpack.i.l.bf16 %v11930_v37 }
0x2309   : > { %v11397_v40 = vpack.c.bf16 %v11932_v2, %v11931_v62  ;;  %v12332_v44 = vpop.eup %12331 }
0x230a   : > { %v6247_v58 = vmul.f32 %v12332_v44, %v14609_v3  ;;  %v6365_v0 = vpop.permute.xlu0 %6364 }
0x230b   : > { %11399 = vmatprep.subr.msk.bf16.mxu1 %vm13294_vm11, %v11397_v40 }
0x230c   : > { %11402 = vmatpush3.bf16.msk.msra.mxu1 %vm13294_vm11, %v11397_v40 }
0x230d   : > { %11405 = vmatprep.subr.msk.bf16.mxu1 %vm13258_vm8, %v11403_v32  ;;  %v12334_v1 = vpop.eup %12333 }
0x230e   : > { %v6249_v24 = vmul.f32 %v12334_v1, %v14613_v30 }
0x230f   : > { %10575 = vmatmul.mubr.msk.f32.vlgmr.msra.gmra.mrb[146].mxu1 %vm1810_vm9, %v6247_v58 }
0x2315   : > { %11408 = vmatpush3.bf16.xpose.msk.msra.mxu1 %vm13258_vm8, %v11403_v32 }
0x2316   : > { %11411 = vmatprep.subr.msk.bf16.mxu1 %vm13258_vm8, %v11409_v18 }
0x231d   : > { %11414 = vmatpush3.bf16.xpose.msk.msra.mxu1 %vm13258_vm8, %v11409_v18 }
0x2330   : > { %v6238_v3 = vpop.xlane.xlu1 %6237 }
0x2331   : > { %12335 = vrcp.f32 %v6238_v3 }
0x2334   : > { %v6363_v63 = vpop.permute.xlu1 %6362 }
0x2338   : > { %v6367_v25 = vpop.permute.xlu1 %6366 }
0x233b   : > { %v12336_v17 = vpop.eup %12335 }
0x233c   : > { %v6248_v47 = vmul.f32 %v12336_v17, %v14628_v53 }
0x233e   : > { %10577 = vmatprep.mubr.msk.f32.mxu1 %vm1810_vm9, %v6248_v47 }
0x233f   : > { %10578 = vmatmul.mubr.msk.f32.gmra.mrb[148].mxu1 %vm1810_vm9, %v6249_v24 }
0x2340   : > { %10588 = vmatprep.mubr.msk.f32.mxu1 %vm1704_vm6, %v6361_v60 }
0x2343   : > { %10589 = vmatmul.mubr.msk.f32.vlgmr.msra.gmra.mrb[150].mxu1 %vm1704_vm6, %v6363_v63 }
0x2344   : > { %10591 = vmatprep.mubr.msk.f32.mxu1 %vm1704_vm6, %v6365_v0 }
0x2347   : > { %10592 = vmatmul.mubr.msk.f32.gmra.mrb[152].mxu1 %vm1704_vm6, %v6367_v25 }
0x239f   : > { %v14681_v12 = vpop.f32.mrb[138].mxu1 }
0x23a0   : > { %v14683_v53 = vpop.f32.mrb[139].mxu1 }
0x23ab   : > { %v14685_v30 = vpop.f32.mrb[140].mxu1 }
0x23ac   : > { %v14687_v20 = vpop.f32.mrb[141].mxu1 }
0x23af   : > { %v14689_v31 = vpop.f32.mrb[142].mxu1 }
0x23b0   : > { %v14691_v45 = vpop.f32.mrb[143].mxu1 }
0x23d1   : > { %v14693_v4 = vpop.f32.mrb[144].mxu1 }
0x23d2   : > { %v14695_v16 = vpop.f32.mrb[145].mxu1 }
0x23e2   : > { %v14697_v42 = vpop.f32.mrb[146].mxu1 }
0x23e3   : > { %v14699_v15 = vpop.f32.mrb[147].mxu1 }
0x2412   : > { %v14701_v37 = vpop.f32.mrb[148].mxu1 }
0x2413   : > { %v14703_v49 = vpop.f32.mrb[149].mxu1 }
0x2416   : > { %v10590_v55 = vpop.f32.mrb[150].mxu1 }
0x2417   : > { %v6478_v2 = vmul.f32 0.35355338, %v10590_v55  ;;  %v6458_v62 = vpop.f32.mrb[151].mxu1 }
0x2418   : > { %v6477_v40 = vmul.f32 0.35355338, %v6458_v62 }
0x2419   : > { %v6484_v44 = vsel %vm1810_vm9, %v6478_v2, -inf }
0x241a   : > { %6485 = vmax.xlane.f32.xlu1 %v6484_v44  ;;  %v10593_v32 = vpop.f32.mrb[152].mxu1  ;;  %v6481_v61 = vsel %vm1810_vm9, %v6477_v40, -inf }
0x241b   : > { %6482 = vmax.xlane.f32.xlu0 %v6481_v61  ;;  %v6468_v58 = vpop.f32.mrb[153].mxu1  ;;  %v6480_v23 = vmul.f32 0.35355338, %v10593_v32 }
0x241c   : > { %v6479_v11 = vmul.f32 0.35355338, %v6468_v58 }
0x241d   : > { %v6490_v60 = vsel %vm1820_vm10, %v6480_v23, -inf }
0x241e   : > { %v6487_v18 = vsel %vm1810_vm9, %v6479_v11, -inf }
0x241f   : > { %6488 = vmax.xlane.f32.xlu0 %v6487_v18 }
0x2423   : > { %6491 = vmax.xlane.f32.xlu0 %v6490_v60 }
0x242b   : > { %11944 = vrot.lane.b32.xlu1 %v14405_v56, %s12531_s29 }
0x242f   : > { %11954 = vrot.lane.b32.xlu1 %v14405_v56, %s15659_s13 }
0x24a7   : > { %v6486_v3 = vpop.xlane.xlu1 %6485 }
0x24a8   : > { %v6494_v1 = vsub.f32 %v6478_v2, %v6486_v3  ;;  %v6483_v17 = vpop.xlane.xlu0 %6482 }
0x24a9   : > { %v6493_v47 = vsub.f32 %v6477_v40, %v6483_v17 }
0x24aa   : > { %v6499_v24 = vmul.f32 1.442695, %v6494_v1 }
0x24ab   : > { %v6497_v63 = vmul.f32 1.442695, %v6493_v47  ;;  %v11945_v0 = vpop.permute.xlu1 %11944 }
0x24ac   : > { %12337 = vpow2.f32 %v6499_v24  ;;  %v11947_v25 = vunpack.i.h.bf16 %v11945_v0  ;;  %v11946_v55 = vunpack.i.l.bf16 %v11945_v0  ;;  %v6489_v2 = vpop.xlane.xlu0 %6488 }
0x24ad   : > { %12339 = vpow2.f32 %v6497_v63  ;;  %v6495_v60 = vsub.f32 %v6479_v11, %v6489_v2 }
0x24ae   : > { %v11415_v62 = vpack.c.bf16 %v11947_v25, %v11946_v55 }
0x24af   : > { %v6501_v1 = vmul.f32 1.442695, %v6495_v60  ;;  %v11955_v11 = vpop.permute.xlu1 %11954 }
0x24b0   : > { %11416 = vmatprep.subr.bf16.mxu0 %v11415_v62  ;;  %v6492_v40 = vpop.xlane.xlu0 %6491  ;;  %v11957_v55 = vunpack.i.h.bf16 %v11955_v11 }
0x24b1   : > { %11418 = vmatpush3.bf16.msra.mxu0 %v11415_v62  ;;  %v6496_v18 = vsub.f32 %v6480_v23, %v6492_v40  ;;  %v11956_v62 = vunpack.i.l.bf16 %v11955_v11 }
0x24b3   : > { %v6503_v3 = vmul.f32 1.442695, %v6496_v18  ;;  %v11425_v2 = vpack.c.bf16 %v11957_v55, %v11956_v62 }
0x24b5   : > { %12341 = vpow2.f32 %v6503_v3 }
0x24b6   : > { %v12338_v44 = vpop.eup %12337  ;;  %12343 = vpow2.f32 %v6501_v1 }
0x24b7   : > { %v12340_v32 = vpop.eup %12339  ;;  %v6508_v61 = vsel %vm1810_vm9, %v12338_v44, 0.0 }
0x24b8   : > { %6509 = vadd.xlane.f32.xlu0 %v6508_v61  ;;  %v6505_v58 = vsel %vm1810_vm9, %v12340_v32, 0.0 }
0x24b9   : > { %6506 = vadd.xlane.f32.xlu1 %v6505_v58 }
0x24bf   : > { %v12342_v17 = vpop.eup %12341 }
0x24c0   : > { %v12344_v47 = vpop.eup %12343  ;;  %v6514_v24 = vsel %vm1820_vm10, %v12342_v17, 0.0 }
0x24c1   : > { %v6511_v63 = vsel %vm1810_vm9, %v12344_v47, 0.0 }
0x24ca   : > { %11959 = vrot.lane.b32.xlu1 %v14445_v57, %s15659_s13 }
0x24ce   : > { %11949 = vrot.lane.b32.xlu0 %v14445_v57, %s12531_s29 }
0x24ed   : > { %6515 = vadd.xlane.f32.xlu0 %v6514_v24 }
0x24ee   : > { %6512 = vadd.xlane.f32.xlu1 %v6511_v63 }
0x24ff   : > { %6637 = vrot.lane.b32.xlu1 %v14401_v26, %s15660_s14 }
0x2503   : > { %6641 = vrot.lane.b32.xlu1 %v14441_v52, %s15660_s14  ;;  %6635 = vrot.lane.b32.xlu0 %v14398_v35, %s15660_s14 }
0x2507   : > { %6639 = vrot.lane.b32.xlu0 %v14424_v28, %s15660_s14 }
0x2545   : > { %v6510_v23 = vpop.xlane.xlu0 %6509 }
0x2546   : > { %12345 = vrcp.f32 %v6510_v23  ;;  %v6507_v0 = vpop.xlane.xlu1 %6506 }
0x2547   : > { %12347 = vrcp.f32 %v6507_v0 }
0x2549   : > { %v11950_v25 = vpop.permute.xlu0 %11949 }
0x254a   : > { %v11952_v61 = vunpack.i.h.bf16 %v11950_v25  ;;  %v11951_v58 = vunpack.i.l.bf16 %v11950_v25  ;;  %v11960_v28 = vpop.permute.xlu1 %11959 }
0x254b   : > { %v11962_v3 = vunpack.i.h.bf16 %v11960_v28  ;;  %v11961_v1 = vunpack.i.l.bf16 %v11960_v28 }
0x254c   : > { %v11419_v26 = vpack.c.bf16 %v11952_v61, %v11951_v58 }
0x254d   : > { %v11431_v24 = vpack.c.bf16 %v11962_v3, %v11961_v1 }
0x254e   : > { %11421 = vmatprep.subr.msk.bf16.mxu0 %vm13294_vm11, %v11419_v26 }
0x254f   : > { %11424 = vmatpush3.bf16.msk.msra.mxu0 %vm13294_vm11, %v11419_v26 }
0x2550   : > { %v12346_v35 = vpop.eup %12345  ;;  %11427 = vmatprep.subr.msk.bf16.mxu0 %vm13258_vm8, %v11425_v2 }
0x2551   : > { %v12348_v40 = vpop.eup %12347  ;;  %v6522_v60 = vmul.f32 %v12346_v35, %v12338_v44 }
0x2552   : > { %v6521_v18 = vmul.f32 %v12348_v40, %v12340_v32 }
0x2554   : > { %10602 = vmatprep.mubr.msk.f32.mxu0 %vm1810_vm9, %v6521_v18 }
0x2555   : > { %10603 = vmatmul.mubr.msk.f32.vlgmr.msra.gmra.mrb[102].mxu0 %vm1810_vm9, %v6522_v60 }
0x2558   : > { %11430 = vmatpush3.bf16.xpose.msk.msra.mxu0 %vm13258_vm8, %v11425_v2 }
0x2559   : > { %11433 = vmatprep.subr.msk.bf16.mxu0 %vm13258_vm8, %v11431_v24 }
0x2560   : > { %11436 = vmatpush3.bf16.xpose.msk.msra.mxu0 %vm13258_vm8, %v11431_v24 }
0x257a   : > { %v6516_v63 = vpop.xlane.xlu0 %6515 }
0x257b   : > { %12349 = vrcp.f32 %v6516_v63  ;;  %v6513_v32 = vpop.xlane.xlu1 %6512 }
0x257c   : > { %12351 = vrcp.f32 %v6513_v32 }
0x257e   : > { %v6636_v0 = vpop.permute.xlu0 %6635 }
0x257f   : > { %v6638_v55 = vpop.permute.xlu1 %6637 }
0x2582   : > { %v6640_v62 = vpop.permute.xlu0 %6639 }
0x2583   : > { %v6642_v61 = vpop.permute.xlu1 %6641 }
0x2585   : > { %v12350_v44 = vpop.eup %12349 }
0x2586   : > { %v12352_v11 = vpop.eup %12351  ;;  %v6524_v25 = vmul.f32 %v12350_v44, %v12342_v17 }
0x2587   : > { %v6523_v23 = vmul.f32 %v12352_v11, %v12344_v47 }
0x2589   : > { %10605 = vmatprep.mubr.msk.f32.mxu0 %vm1810_vm9, %v6523_v23 }
0x258a   : > { %10606 = vmatmul.mubr.msk.f32.gmra.mrb[104].mxu0 %vm1810_vm9, %v6524_v25 }
0x258b   : > { %10616 = vmatprep.mubr.msk.f32.mxu0 %vm1704_vm6, %v6636_v0 }
0x258e   : > { %10617 = vmatmul.mubr.msk.f32.vlgmr.msra.gmra.mrb[106].mxu0 %vm1704_vm6, %v6638_v55 }
0x258f   : > { %10619 = vmatprep.mubr.msk.f32.mxu0 %vm1704_vm6, %v6640_v62 }
0x2592   : > { %10620 = vmatmul.mubr.msk.f32.gmra.mrb[108].mxu0 %vm1704_vm6, %v6642_v61 }
0x2628   : > { %v14749_v58 = vpop.f32.mrb[102].mxu0 }
0x2629   : > { %v14751_v47 = vpop.f32.mrb[103].mxu0 }
0x265d   : > { %v14753_v17 = vpop.f32.mrb[104].mxu0 }
0x265e   : > { %v14755_v26 = vpop.f32.mrb[105].mxu0 }
0x2661   : > { %v10618_v2 = vpop.f32.mrb[106].mxu0 }
0x2662   : > { %v6753_v35 = vmul.f32 0.35355338, %v10618_v2  ;;  %v6733_v28 = vpop.f32.mrb[107].mxu0 }
0x2663   : > { %v6752_v40 = vmul.f32 0.35355338, %v6733_v28 }
0x2664   : > { %v6759_v18 = vsel %vm1810_vm9, %v6753_v35, -inf }
0x2665   : > { %6760 = vmax.xlane.f32.xlu1 %v6759_v18  ;;  %v10621_v60 = vpop.f32.mrb[108].mxu0  ;;  %v6756_v3 = vsel %vm1810_vm9, %v6752_v40, -inf }
0x2666   : > { %6757 = vmax.xlane.f32.xlu0 %v6756_v3  ;;  %v6743_v1 = vpop.f32.mrb[109].mxu0  ;;  %v6755_v63 = vmul.f32 0.35355338, %v10621_v60 }
0x2667   : > { %v6754_v24 = vmul.f32 0.35355338, %v6743_v1 }
0x2668   : > { %v6765_v44 = vsel %vm1820_vm10, %v6755_v63, -inf }
0x2669   : > { %v6762_v32 = vsel %vm1810_vm9, %v6754_v24, -inf }
0x266a   : > { %6763 = vmax.xlane.f32.xlu0 %v6762_v32 }
0x266e   : > { %6766 = vmax.xlane.f32.xlu0 %v6765_v44 }
0x2676   : > { %11964 = vrot.lane.b32.xlu1 %v14405_v56, %s15661_s11 }
0x26f2   : > { %v6761_v11 = vpop.xlane.xlu1 %6760 }
0x26f3   : > { %v6769_v23 = vsub.f32 %v6753_v35, %v6761_v11  ;;  %v6758_v0 = vpop.xlane.xlu0 %6757 }
0x26f4   : > { %v6768_v25 = vsub.f32 %v6752_v40, %v6758_v0  ;;  %v6993_v0 = vrot.slane %v14441_v52, 4 }
0x26f5   : > { %v6774_v55 = vmul.f32 1.442695, %v6769_v23 }
0x26f6   : > { %v6772_v62 = vmul.f32 1.442695, %v6768_v25  ;;  %v11965_v61 = vpop.permute.xlu1 %11964 }
0x26f7   : > { %12353 = vpow2.f32 %v6774_v55  ;;  %v11967_v2 = vunpack.i.h.bf16 %v11965_v61  ;;  %v11966_v28 = vunpack.i.l.bf16 %v11965_v61  ;;  %v6764_v18 = vpop.xlane.xlu0 %6763 }
0x26f8   : > { %12355 = vpow2.f32 %v6772_v62  ;;  %v6770_v55 = vsub.f32 %v6754_v24, %v6764_v18 }
0x26f9   : > { %v11437_v60 = vpack.c.bf16 %v11967_v2, %v11966_v28 }
0x26fa   : > { %v6776_v62 = vmul.f32 1.442695, %v6770_v55 }
0x26fb   : > { %11438 = vmatprep.subr.bf16.mxu1 %v11437_v60  ;;  %v6767_v3 = vpop.xlane.xlu0 %6766 }
0x26fc   : > { %v6771_v1 = vsub.f32 %v6755_v63, %v6767_v3  ;;  %11440 = vmatpush3.bf16.msra.mxu1 %v11437_v60  ;;  %v14770_v63 = vsel %vm1879_vm7, %v6993_v0, %v6994_v9  ;;  %v14783_v9 = vrot.slane %v5536_v48, 4 }
0x26fd   : > { %v14774_v25 = vpack.i.bf16 %v14523_v54, %v14770_v63 }
0x26fe   : > { %v6778_v32 = vmul.f32 1.442695, %v6771_v1  ;;  %v14789_v2 = vsel %vm1879_vm7, %v6996_v27, %v14783_v9 }
0x2700   : > { %12357 = vpow2.f32 %v6778_v32 }
0x2701   : > { %v12354_v56 = vpop.eup %12353  ;;  %12359 = vpow2.f32 %v6776_v62 }
0x2702   : > { %v12356_v44 = vpop.eup %12355  ;;  %v6783_v35 = vsel %vm1810_vm9, %v12354_v56, 0.0 }
0x2703   : > { %6784 = vadd.xlane.f32.xlu0 %v6783_v35  ;;  %v6780_v40 = vsel %vm1810_vm9, %v12356_v44, 0.0 }
0x2704   : > { %6781 = vadd.xlane.f32.xlu1 %v6780_v40 }
0x270a   : > { %v12358_v11 = vpop.eup %12357 }
0x270b   : > { %v6789_v23 = vsel %vm1820_vm10, %v12358_v11, 0.0  ;;  %v12360_v61 = vpop.eup %12359 }
0x270c   : > { %6790 = vadd.xlane.f32.xlu0 %v6789_v23  ;;  %v6786_v52 = vsel %vm1810_vm9, %v12360_v61, 0.0 }
0x2715   : > { %11974 = vrot.lane.b32.xlu1 %v14774_v25, %s12521_s19 }
0x2722   : > { %11969 = vrot.lane.b32.xlu0 %v14445_v57, %s15661_s11  ;;  %v14793_v57 = vpack.i.bf16 %v14783_v9, %v14789_v2 }
0x2739   : > { %6787 = vadd.xlane.f32.xlu1 %v6786_v52 }
0x274a   : > { %11979 = vrot.lane.b32.xlu1 %v14793_v57, %s12521_s19  ;;  %s15662_s19 = smov 8  }
0x2790   : > { %v6785_v28 = vpop.xlane.xlu0 %6784 }
0x2791   : > { %v6782_v24 = vpop.xlane.xlu1 %6781 }
0x2792   : > { %12361 = vrcp.f32 %v6782_v24 }
0x2793   : > { %12363 = vrcp.f32 %v6785_v28 }
0x2795   : > { %v11975_v5 = vpop.permute.xlu1 %11974 }
0x2796   : > { %v11977_v33 = vunpack.i.h.bf16 %v11975_v5  ;;  %v11976_v1 = vunpack.i.l.bf16 %v11975_v5 }
0x2798   : > { %v11447_v23 = vpack.c.bf16 %v11977_v33, %v11976_v1 }
0x2799   : > { %v6791_v19 = vpop.xlane.xlu0 %6790 }
0x279a   : > { %12365 = vrcp.f32 %v6791_v19 }
0x279c   : > { %v12362_v18 = vpop.eup %12361 }
0x279d   : > { %v11970_v60 = vpop.permute.xlu0 %11969  ;;  %v6796_v3 = vmul.f32 %v12362_v18, %v12356_v44  ;;  %v12364_v40 = vpop.eup %12363 }
0x279e   : > { %v11972_v27 = vunpack.i.h.bf16 %v11970_v60  ;;  %v11971_v32 = vunpack.i.l.bf16 %v11970_v60  ;;  %v6797_v0 = vmul.f32 %v12364_v40, %v12354_v56 }
0x279f   : > { %10630 = vmatprep.mubr.msk.f32.mxu1 %vm1810_vm9, %v6796_v3 }
0x27a0   : > { %v11441_v35 = vpack.c.bf16 %v11972_v27, %v11971_v32 }
0x27a2   : > { %11443 = vmatprep.subr.msk.bf16.mxu1 %vm13294_vm11, %v11441_v35 }
0x27a3   : > { %11446 = vmatpush3.bf16.msk.msra.mxu1 %vm13294_vm11, %v11441_v35 }
0x27a4   : > { %11449 = vmatprep.subr.msk.bf16.mxu1 %vm13258_vm8, %v11447_v23  ;;  %v12366_v24 = vpop.eup %12365 }
0x27a5   : > { %v6799_v5 = vmul.f32 %v12366_v24, %v12358_v11 }
0x27a6   : > { %10631 = vmatmul.mubr.msk.f32.vlgmr.msra.gmra.mrb[154].mxu1 %vm1810_vm9, %v6797_v0 }
0x27ac   : > { %11452 = vmatpush3.bf16.xpose.msk.msra.mxu1 %vm13258_vm8, %v11447_v23 }
0x27c6   : > { %v6788_v44 = vpop.xlane.xlu1 %6787 }
0x27c7   : > { %12367 = vrcp.f32 %v6788_v44 }
0x27ca   : > { %v11980_v55 = vpop.permute.xlu1 %11979 }
0x27cb   : > { %v11982_v62 = vunpack.i.h.bf16 %v11980_v55  ;;  %v11981_v52 = vunpack.i.l.bf16 %v11980_v55 }
0x27cd   : > { %v11453_v48 = vpack.c.bf16 %v11982_v62, %v11981_v52 }
0x27cf   : > { %11455 = vmatprep.subr.msk.bf16.mxu1 %vm13258_vm8, %v11453_v48 }
0x27d0   : > { %11458 = vmatpush3.bf16.xpose.msk.msra.mxu1 %vm13258_vm8, %v11453_v48 }
0x27d1   : > { %v12368_v56 = vpop.eup %12367 }
0x27d2   : > { %v6798_v28 = vmul.f32 %v12368_v56, %v12360_v61 }
0x27d4   : > { %10633 = vmatprep.mubr.msk.f32.mxu1 %vm1810_vm9, %v6798_v28 }
0x27d5   : > { %10634 = vmatmul.mubr.msk.f32.gmra.mrb[156].mxu1 %vm1810_vm9, %v6799_v5 }
0x27d6   : > { %10644 = vmatprep.mubr.msk.f32.mxu1 %vm1704_vm6, %v14770_v63 }
0x27d9   : > { %10645 = vmatmul.mubr.msk.f32.vlgmr.msra.gmra.mrb[158].mxu1 %vm1704_vm6, %v14523_v54 }
0x27da   : > { %10647 = vmatprep.mubr.msk.f32.mxu1 %vm1704_vm6, %v14789_v2 }
0x27dd   : > { %10648 = vmatmul.mubr.msk.f32.gmra.mrb[160].mxu1 %vm1704_vm6, %v14783_v9 }
0x2879   : > { %v14821_v19 = vpop.f32.mrb[154].mxu1 }
0x287a   : > { %v14823_v61 = vpop.f32.mrb[155].mxu1 }
0x28a8   : > { %v14825_v11 = vpop.f32.mrb[156].mxu1 }
0x28a9   : > { %v14827_v18 = vpop.f32.mrb[157].mxu1 }
0x28ac   : > { %v10646_v60 = vpop.f32.mrb[158].mxu1 }
0x28ad   : > { %v7110_v3 = vmul.f32 0.35355338, %v10646_v60  ;;  %v7090_v33 = vpop.f32.mrb[159].mxu1 }
0x28ae   : > { %v7109_v1 = vmul.f32 0.35355338, %v7090_v33 }
0x28af   : > { %v7116_v27 = vsel %vm1810_vm9, %v7110_v3, -inf }
0x28b0   : > { %7117 = vmax.xlane.f32.xlu1 %v7116_v27  ;;  %v10649_v32 = vpop.f32.mrb[160].mxu1  ;;  %v7113_v35 = vsel %vm1810_vm9, %v7109_v1, -inf }
0x28b1   : > { %7114 = vmax.xlane.f32.xlu0 %v7113_v35  ;;  %v7100_v40 = vpop.f32.mrb[161].mxu1  ;;  %v7112_v0 = vmul.f32 0.35355338, %v10649_v32 }
0x28b2   : > { %v7111_v23 = vmul.f32 0.35355338, %v7100_v40 }
0x28b3   : > { %v7122_v55 = vsel %vm1820_vm10, %v7112_v0, -inf }
0x28b4   : > { %v7119_v44 = vsel %vm1810_vm9, %v7111_v23, -inf }
0x28b5   : > { %7120 = vmax.xlane.f32.xlu0 %v7119_v44 }
0x28b9   : > { %7123 = vmax.xlane.f32.xlu0 %v7122_v55 }
0x28c1   : > { %11984 = vrot.lane.b32.xlu1 %v14774_v25, %s12522_s20 }
0x28c5   : > { %11994 = vrot.lane.b32.xlu1 %v14774_v25, %s12523_s21 }
0x293d   : > { %v7118_v62 = vpop.xlane.xlu1 %7117 }
0x293e   : > { %v7126_v52 = vsub.f32 %v7110_v3, %v7118_v62  ;;  %v7115_v48 = vpop.xlane.xlu0 %7114 }
0x293f   : > { %v7125_v24 = vsub.f32 %v7109_v1, %v7115_v48 }
0x2940   : > { %v7131_v56 = vmul.f32 1.442695, %v7126_v52 }
0x2941   : > { %v7129_v28 = vmul.f32 1.442695, %v7125_v24  ;;  %v11985_v5 = vpop.permute.xlu1 %11984 }
0x2942   : > { %12369 = vpow2.f32 %v7131_v56  ;;  %v11987_v60 = vunpack.i.h.bf16 %v11985_v5  ;;  %v11986_v33 = vunpack.i.l.bf16 %v11985_v5  ;;  %v7121_v3 = vpop.xlane.xlu0 %7120 }
0x2943   : > { %12371 = vpow2.f32 %v7129_v28  ;;  %v7127_v62 = vsub.f32 %v7111_v23, %v7121_v3 }
0x2944   : > { %v11459_v27 = vpack.c.bf16 %v11987_v60, %v11986_v33 }
0x2945   : > { %v7133_v48 = vmul.f32 1.442695, %v7127_v62  ;;  %v11995_v23 = vpop.permute.xlu1 %11994 }
0x2946   : > { %11460 = vmatprep.subr.bf16.mxu0 %v11459_v27  ;;  %v7124_v1 = vpop.xlane.xlu0 %7123 }
0x2947   : > { %11462 = vmatpush3.bf16.msra.mxu0 %v11459_v27  ;;  %v7128_v55 = vsub.f32 %v7112_v0, %v7124_v1  ;;  %v11997_v27 = vunpack.i.h.bf16 %v11995_v23 }
0x2949   : > { %v7135_v52 = vmul.f32 1.442695, %v7128_v55 }
0x294b   : > { %12373 = vpow2.f32 %v7135_v52 }
0x294c   : > { %v12370_v32 = vpop.eup %12369  ;;  %12375 = vpow2.f32 %v7133_v48 }
0x294d   : > { %v12372_v35 = vpop.eup %12371  ;;  %v7140_v40 = vsel %vm1810_vm9, %v12370_v32, 0.0 }
0x294e   : > { %7141 = vadd.xlane.f32.xlu0 %v7140_v40  ;;  %v7137_v44 = vsel %vm1810_vm9, %v12372_v35, 0.0  ;;  %v11996_v40 = vunpack.i.l.bf16 %v11995_v23 }
0x294f   : > { %7138 = vadd.xlane.f32.xlu1 %v7137_v44 }
0x2950   : > { %v11469_v55 = vpack.c.bf16 %v11997_v27, %v11996_v40 }
0x2955   : > { %v12374_v24 = vpop.eup %12373 }
0x2956   : > { %v12376_v56 = vpop.eup %12375  ;;  %v7146_v28 = vsel %vm1820_vm10, %v12374_v24, 0.0 }
0x2957   : > { %v7143_v5 = vsel %vm1810_vm9, %v12376_v56, 0.0 }
0x2960   : > { %11999 = vrot.lane.b32.xlu1 %v14793_v57, %s12523_s21 }
0x2964   : > { %11989 = vrot.lane.b32.xlu0 %v14793_v57, %s12522_s20  ;;  %s11645_s20 = smul.u32 56, %s15675_s10 }
0x2983   : > { %7147 = vadd.xlane.f32.xlu0 %v7146_v28 }
0x2984   : > { %7144 = vadd.xlane.f32.xlu1 %v7143_v5 }
0x2995   : > { %7269 = vrot.lane.b32.xlu1 %v14523_v54, %s12524_s22 }
0x2999   : > { %7273 = vrot.lane.b32.xlu1 %v14783_v9, %s12524_s22  ;;  %7267 = vrot.lane.b32.xlu0 %v14770_v63, %s12524_s22 }
0x299d   : > { %7271 = vrot.lane.b32.xlu0 %v14789_v2, %s12524_s22 }
0x29db   : > { %v7142_v0 = vpop.xlane.xlu0 %7141 }
0x29dc   : > { %12377 = vrcp.f32 %v7142_v0  ;;  %v7139_v60 = vpop.xlane.xlu1 %7138 }
0x29dd   : > { %12379 = vrcp.f32 %v7139_v60 }
0x29df   : > { %v11990_v33 = vpop.permute.xlu0 %11989 }
0x29e0   : > { %v11992_v44 = vunpack.i.h.bf16 %v11990_v33  ;;  %v11991_v3 = vunpack.i.l.bf16 %v11990_v33  ;;  %v12000_v52 = vpop.permute.xlu1 %11999 }
0x29e1   : > { %v12002_v0 = vunpack.i.h.bf16 %v12000_v52  ;;  %v12001_v23 = vunpack.i.l.bf16 %v12000_v52 }
0x29e2   : > { %v11463_v1 = vpack.c.bf16 %v11992_v44, %v11991_v3 }
0x29e3   : > { %v11475_v60 = vpack.c.bf16 %v12002_v0, %v12001_v23 }
0x29e4   : > { %11465 = vmatprep.subr.msk.bf16.mxu0 %vm13294_vm11, %v11463_v1 }
0x29e5   : > { %11468 = vmatpush3.bf16.msk.msra.mxu0 %vm13294_vm11, %v11463_v1 }
0x29e6   : > { %v12378_v62 = vpop.eup %12377  ;;  %11471 = vmatprep.subr.msk.bf16.mxu0 %vm13258_vm8, %v11469_v55 }
0x29e7   : > { %v12380_v48 = vpop.eup %12379  ;;  %v7154_v5 = vmul.f32 %v12378_v62, %v12370_v32 }
0x29e8   : > { %v7153_v28 = vmul.f32 %v12380_v48, %v12372_v35 }
0x29ea   : > { %10658 = vmatprep.mubr.msk.f32.mxu0 %vm1810_vm9, %v7153_v28 }
0x29eb   : > { %10659 = vmatmul.mubr.msk.f32.vlgmr.msra.gmra.mrb[110].mxu0 %vm1810_vm9, %v7154_v5 }
0x29ee   : > { %11474 = vmatpush3.bf16.xpose.msk.msra.mxu0 %vm13258_vm8, %v11469_v55 }
0x29ef   : > { %11477 = vmatprep.subr.msk.bf16.mxu0 %vm13258_vm8, %v11475_v60 }
0x29f6   : > { %11480 = vmatpush3.bf16.xpose.msk.msra.mxu0 %vm13258_vm8, %v11475_v60 }
0x2a10   : > { %v7148_v33 = vpop.xlane.xlu0 %7147 }
0x2a11   : > { %12381 = vrcp.f32 %v7148_v33  ;;  %v7145_v35 = vpop.xlane.xlu1 %7144 }
0x2a12   : > { %12383 = vrcp.f32 %v7145_v35 }
0x2a14   : > { %v7268_v44 = vpop.permute.xlu0 %7267 }
0x2a15   : > { %v7270_v1 = vpop.permute.xlu1 %7269 }
0x2a18   : > { %v7272_v55 = vpop.permute.xlu0 %7271 }
0x2a19   : > { %v7274_v62 = vpop.permute.xlu1 %7273 }
0x2a1b   : > { %v12382_v32 = vpop.eup %12381 }
0x2a1c   : > { %v12384_v27 = vpop.eup %12383  ;;  %v7156_v3 = vmul.f32 %v12382_v32, %v12374_v24 }
0x2a1d   : > { %v7155_v40 = vmul.f32 %v12384_v27, %v12376_v56 }
0x2a1f   : > { %10661 = vmatprep.mubr.msk.f32.mxu0 %vm1810_vm9, %v7155_v40 }
0x2a20   : > { %10662 = vmatmul.mubr.msk.f32.gmra.mrb[112].mxu0 %vm1810_vm9, %v7156_v3 }
0x2a21   : > { %10672 = vmatprep.mubr.msk.f32.mxu0 %vm1704_vm6, %v7268_v44 }
0x2a24   : > { %10673 = vmatmul.mubr.msk.f32.vlgmr.msra.gmra.mrb[114].mxu0 %vm1704_vm6, %v7270_v1 }
0x2a25   : > { %10675 = vmatprep.mubr.msk.f32.mxu0 %vm1704_vm6, %v7272_v55 }
0x2a28   : > { %10676 = vmatmul.mubr.msk.f32.gmra.mrb[116].mxu0 %vm1704_vm6, %v7274_v62 }
0x2abe   : > { %v14873_v52 = vpop.f32.mrb[110].mxu0 }
0x2abf   : > { %v14875_v56 = vpop.f32.mrb[111].mxu0 }
0x2af3   : > { %v14877_v24 = vpop.f32.mrb[112].mxu0 }
0x2af4   : > { %v14879_v48 = vpop.f32.mrb[113].mxu0 }
0x2af7   : > { %v10674_v28 = vpop.f32.mrb[114].mxu0 }
0x2af8   : > { %v7385_v5 = vmul.f32 0.35355338, %v10674_v28  ;;  %v7365_v0 = vpop.f32.mrb[115].mxu0 }
0x2af9   : > { %v7384_v23 = vmul.f32 0.35355338, %v7365_v0 }
0x2afa   : > { %v7391_v60 = vsel %vm1810_vm9, %v7385_v5, -inf }
0x2afb   : > { %7392 = vmax.xlane.f32.xlu1 %v7391_v60  ;;  %v10677_v33 = vpop.f32.mrb[116].mxu0  ;;  %v7388_v35 = vsel %vm1810_vm9, %v7384_v23, -inf }
0x2afc   : > { %7389 = vmax.xlane.f32.xlu0 %v7388_v35  ;;  %v7375_v32 = vpop.f32.mrb[117].mxu0  ;;  %v7387_v40 = vmul.f32 0.35355338, %v10677_v33 }
0x2afd   : > { %v7386_v27 = vmul.f32 0.35355338, %v7375_v32 }
0x2afe   : > { %v7397_v3 = vsel %vm1820_vm10, %v7387_v40, -inf }
0x2aff   : > { %v7394_v44 = vsel %vm1810_vm9, %v7386_v27, -inf }
0x2b00   : > { %7395 = vmax.xlane.f32.xlu0 %v7394_v44 }
0x2b04   : > { %7398 = vmax.xlane.f32.xlu0 %v7397_v3 }
0x2b0c   : > { %12004 = vrot.lane.b32.xlu1 %v14774_v25, %s12525_s23 }
0x2b10   : > { %12014 = vrot.lane.b32.xlu1 %v14774_v25, %s12526_s24 }
0x2b88   : > { %v7393_v1 = vpop.xlane.xlu1 %7392 }
0x2b89   : > { %v7401_v55 = vsub.f32 %v7385_v5, %v7393_v1  ;;  %v7390_v62 = vpop.xlane.xlu0 %7389 }
0x2b8a   : > { %v7400_v28 = vsub.f32 %v7384_v23, %v7390_v62 }
0x2b8b   : > { %v7406_v0 = vmul.f32 1.442695, %v7401_v55 }
0x2b8c   : > { %v7404_v60 = vmul.f32 1.442695, %v7400_v28  ;;  %v12005_v35 = vpop.permute.xlu1 %12004 }
0x2b8d   : > { %12385 = vpow2.f32 %v7406_v0  ;;  %v12007_v33 = vunpack.i.h.bf16 %v12005_v35  ;;  %v12006_v32 = vunpack.i.l.bf16 %v12005_v35  ;;  %v7396_v5 = vpop.xlane.xlu0 %7395 }
0x2b8e   : > { %12387 = vpow2.f32 %v7404_v60  ;;  %v7402_v55 = vsub.f32 %v7386_v27, %v7396_v5 }
0x2b8f   : > { %v11481_v44 = vpack.c.bf16 %v12007_v33, %v12006_v32 }
0x2b90   : > { %v7408_v28 = vmul.f32 1.442695, %v7402_v55  ;;  %v12015_v27 = vpop.permute.xlu1 %12014 }
0x2b91   : > { %11482 = vmatprep.subr.bf16.mxu1 %v11481_v44  ;;  %v7399_v23 = vpop.xlane.xlu0 %7398  ;;  %v12017_v32 = vunpack.i.h.bf16 %v12015_v27 }
0x2b92   : > { %11484 = vmatpush3.bf16.msra.mxu1 %v11481_v44  ;;  %v7403_v1 = vsub.f32 %v7387_v40, %v7399_v23  ;;  %v12016_v44 = vunpack.i.l.bf16 %v12015_v27 }
0x2b94   : > { %v7410_v62 = vmul.f32 1.442695, %v7403_v1  ;;  %v11491_v55 = vpack.c.bf16 %v12017_v32, %v12016_v44 }
0x2b96   : > { %12389 = vpow2.f32 %v7410_v62 }
0x2b97   : > { %v12386_v3 = vpop.eup %12385  ;;  %12391 = vpow2.f32 %v7408_v28 }
0x2b98   : > { %v12388_v7 = vpop.eup %12387  ;;  %v7415_v50 = vsel %vm1810_vm9, %v12386_v3, 0.0 }
0x2b99   : > { %7416 = vadd.xlane.f32.xlu0 %v7415_v50  ;;  %v7412_v6 = vsel %vm1810_vm9, %v12388_v7, 0.0 }
0x2b9a   : > { %7413 = vadd.xlane.f32.xlu1 %v7412_v6 }
0x2ba0   : > { %v12390_v0 = vpop.eup %12389 }
0x2ba1   : > { %v12392_v60 = vpop.eup %12391  ;;  %v7421_v50 = vsel %vm1820_vm10, %v12390_v0, 0.0 }
0x2ba2   : > { %v7418_v6 = vsel %vm1810_vm9, %v12392_v60, 0.0 }
0x2bab   : > { %12019 = vrot.lane.b32.xlu1 %v14793_v57, %s12526_s24 }
0x2baf   : > { %12009 = vrot.lane.b32.xlu0 %v14793_v57, %s12525_s23  ;;  %s15575_s23 = scalar_lea.vmem %s15607_s9, %s11645_s20 }
0x2bce   : > { %7422 = vadd.xlane.f32.xlu0 %v7421_v50 }
0x2bcf   : > { %7419 = vadd.xlane.f32.xlu1 %v7418_v6 }
0x2be0   : > { %7544 = vrot.lane.b32.xlu1 %v14523_v54, %s12528_s26 }
0x2be4   : > { %7548 = vrot.lane.b32.xlu1 %v14783_v9, %s12528_s26  ;;  %7542 = vrot.lane.b32.xlu0 %v14770_v63, %s12528_s26 }
0x2be8   : > { %7546 = vrot.lane.b32.xlu0 %v14789_v2, %s12528_s26 }
0x2c26   : > { %v7417_v40 = vpop.xlane.xlu0 %7416 }
0x2c27   : > { %12393 = vrcp.f32 %v7417_v40  ;;  %v7414_v35 = vpop.xlane.xlu1 %7413 }
0x2c28   : > { %12395 = vrcp.f32 %v7414_v35 }
0x2c2a   : > { %v12010_v33 = vpop.permute.xlu0 %12009 }
0x2c2b   : > { %v12012_v5 = vunpack.i.h.bf16 %v12010_v33  ;;  %v12011_v23 = vunpack.i.l.bf16 %v12010_v33  ;;  %v12020_v28 = vpop.permute.xlu1 %12019 }
0x2c2c   : > { %v12022_v35 = vunpack.i.h.bf16 %v12020_v28  ;;  %v12021_v27 = vunpack.i.l.bf16 %v12020_v28 }
0x2c2d   : > { %v11485_v1 = vpack.c.bf16 %v12012_v5, %v12011_v23 }
0x2c2e   : > { %v11497_v33 = vpack.c.bf16 %v12022_v35, %v12021_v27 }
0x2c2f   : > { %11487 = vmatprep.subr.msk.bf16.mxu1 %vm13294_vm11, %v11485_v1 }
0x2c30   : > { %11490 = vmatpush3.bf16.msk.msra.mxu1 %vm13294_vm11, %v11485_v1 }
0x2c31   : > { %v12394_v62 = vpop.eup %12393  ;;  %11493 = vmatprep.subr.msk.bf16.mxu1 %vm13258_vm8, %v11491_v55 }
0x2c32   : > { %v12396_v50 = vpop.eup %12395  ;;  %v7429_v40 = vmul.f32 %v12394_v62, %v12386_v3 }
0x2c33   : > { %v7428_v6 = vmul.f32 %v12396_v50, %v12388_v7 }
0x2c35   : > { %10686 = vmatprep.mubr.msk.f32.mxu1 %vm1810_vm9, %v7428_v6 }
0x2c36   : > { %10687 = vmatmul.mubr.msk.f32.vlgmr.msra.gmra.mrb[162].mxu1 %vm1810_vm9, %v7429_v40 }
0x2c39   : > { %11496 = vmatpush3.bf16.xpose.msk.msra.mxu1 %vm13258_vm8, %v11491_v55 }
0x2c3a   : > { %11499 = vmatprep.subr.msk.bf16.mxu1 %vm13258_vm8, %v11497_v33 }
0x2c41   : > { %11502 = vmatpush3.bf16.xpose.msk.msra.mxu1 %vm13258_vm8, %v11497_v33 }
0x2c5b   : > { %v7423_v32 = vpop.xlane.xlu0 %7422 }
0x2c5c   : > { %12397 = vrcp.f32 %v7423_v32  ;;  %v7420_v7 = vpop.xlane.xlu1 %7419 }
0x2c5d   : > { %12399 = vrcp.f32 %v7420_v7 }
0x2c5f   : > { %v7543_v23 = vpop.permute.xlu0 %7542 }
0x2c60   : > { %v7545_v55 = vpop.permute.xlu1 %7544 }
0x2c63   : > { %v7547_v62 = vpop.permute.xlu0 %7546 }
0x2c64   : > { %v7549_v28 = vpop.permute.xlu1 %7548 }
0x2c66   : > { %v12398_v3 = vpop.eup %12397 }
0x2c67   : > { %v12400_v44 = vpop.eup %12399  ;;  %v7431_v1 = vmul.f32 %v12398_v3, %v12390_v0 }
0x2c68   : > { %v7430_v5 = vmul.f32 %v12400_v44, %v12392_v60 }
0x2c6a   : > { %10689 = vmatprep.mubr.msk.f32.mxu1 %vm1810_vm9, %v7430_v5 }
0x2c6b   : > { %10690 = vmatmul.mubr.msk.f32.gmra.mrb[164].mxu1 %vm1810_vm9, %v7431_v1 }
0x2c6c   : > { %10700 = vmatprep.mubr.msk.f32.mxu1 %vm1704_vm6, %v7543_v23 }
0x2c6f   : > { %10701 = vmatmul.mubr.msk.f32.vlgmr.msra.gmra.mrb[166].mxu1 %vm1704_vm6, %v7545_v55 }
0x2c70   : > { %10703 = vmatprep.mubr.msk.f32.mxu1 %vm1704_vm6, %v7547_v62 }
0x2c73   : > { %10704 = vmatmul.mubr.msk.f32.gmra.mrb[168].mxu1 %vm1704_vm6, %v7549_v28 }
0x2d09   : > { %v14925_v50 = vpop.f32.mrb[162].mxu1 }
0x2d0a   : > { %v14927_v60 = vpop.f32.mrb[163].mxu1 }
0x2d3e   : > { %v14929_v0 = vpop.f32.mrb[164].mxu1 }
0x2d3f   : > { %v14931_v6 = vpop.f32.mrb[165].mxu1 }
0x2d42   : > { %v10702_v40 = vpop.f32.mrb[166].mxu1 }
0x2d43   : > { %v7660_v35 = vmul.f32 0.35355338, %v10702_v40  ;;  %v7640_v27 = vpop.f32.mrb[167].mxu1 }
0x2d44   : > { %v7659_v33 = vmul.f32 0.35355338, %v7640_v27 }
0x2d45   : > { %v7666_v32 = vsel %vm1810_vm9, %v7660_v35, -inf }
0x2d46   : > { %7667 = vmax.xlane.f32.xlu1 %v7666_v32  ;;  %v10705_v7 = vpop.f32.mrb[168].mxu1  ;;  %v7663_v3 = vsel %vm1810_vm9, %v7659_v33, -inf }
0x2d47   : > { %7664 = vmax.xlane.f32.xlu0 %v7663_v3  ;;  %v7650_v44 = vpop.f32.mrb[169].mxu1  ;;  %v7662_v23 = vmul.f32 0.35355338, %v10705_v7 }
0x2d48   : > { %v7661_v5 = vmul.f32 0.35355338, %v7650_v44 }
0x2d49   : > { %v7672_v55 = vsel %vm1820_vm10, %v7662_v23, -inf }
0x2d4a   : > { %v7669_v1 = vsel %vm1810_vm9, %v7661_v5, -inf }
0x2d4b   : > { %7670 = vmax.xlane.f32.xlu0 %v7669_v1 }
0x2d4f   : > { %7673 = vmax.xlane.f32.xlu0 %v7672_v55 }
0x2d57   : > { %12024 = vrot.lane.b32.xlu1 %v14774_v25, %s12530_s28 }
0x2d5b   : > { %12034 = vrot.lane.b32.xlu1 %v14774_v25, %s15657_s25 }
0x2dd3   : > { %v7668_v62 = vpop.xlane.xlu1 %7667 }
0x2dd4   : > { %v7676_v28 = vsub.f32 %v7660_v35, %v7668_v62  ;;  %v7665_v40 = vpop.xlane.xlu0 %7664 }
0x2dd5   : > { %v7675_v27 = vsub.f32 %v7659_v33, %v7665_v40 }
0x2dd6   : > { %v7681_v32 = vmul.f32 1.442695, %v7676_v28 }
0x2dd7   : > { %v7679_v3 = vmul.f32 1.442695, %v7675_v27  ;;  %v12025_v44 = vpop.permute.xlu1 %12024 }
0x2dd8   : > { %12401 = vpow2.f32 %v7681_v32  ;;  %v12027_v7 = vunpack.i.h.bf16 %v12025_v44  ;;  %v12026_v39 = vunpack.i.l.bf16 %v12025_v44  ;;  %v7671_v35 = vpop.xlane.xlu0 %7670 }
0x2dd9   : > { %12403 = vpow2.f32 %v7679_v3 }
0x2dda   : > { %v11503_v1 = vpack.c.bf16 %v12027_v7, %v12026_v39  ;;  %v7677_v39 = vsub.f32 %v7661_v5, %v7671_v35 }
0x2ddb   : > { %v12035_v5 = vpop.permute.xlu1 %12034 }
0x2ddc   : > { %11504 = vmatprep.subr.bf16.mxu0 %v11503_v1  ;;  %v7674_v33 = vpop.xlane.xlu0 %7673  ;;  %v7683_v40 = vmul.f32 1.442695, %v7677_v39  ;;  %v12037_v7 = vunpack.i.h.bf16 %v12035_v5 }
0x2ddd   : > { %11506 = vmatpush3.bf16.msra.mxu0 %v11503_v1  ;;  %v7678_v62 = vsub.f32 %v7662_v23, %v7674_v33  ;;  %v12036_v1 = vunpack.i.l.bf16 %v12035_v5 }
0x2ddf   : > { %v7685_v28 = vmul.f32 1.442695, %v7678_v62  ;;  %v11513_v39 = vpack.c.bf16 %v12037_v7, %v12036_v1 }
0x2de1   : > { %12405 = vpow2.f32 %v7685_v28 }
0x2de2   : > { %v12402_v55 = vpop.eup %12401  ;;  %12407 = vpow2.f32 %v7683_v40 }
0x2de3   : > { %v12404_v14 = vpop.eup %12403  ;;  %v7690_v21 = vsel %vm1810_vm9, %v12402_v55, 0.0 }
0x2de4   : > { %7691 = vadd.xlane.f32.xlu0 %v7690_v21  ;;  %v7687_v43 = vsel %vm1810_vm9, %v12404_v14, 0.0 }
0x2de5   : > { %7688 = vadd.xlane.f32.xlu1 %v7687_v43 }
0x2deb   : > { %v12406_v27 = vpop.eup %12405 }
0x2dec   : > { %v12408_v32 = vpop.eup %12407  ;;  %v7696_v21 = vsel %vm1820_vm10, %v12406_v27, 0.0 }
0x2ded   : > { %v7693_v43 = vsel %vm1810_vm9, %v12408_v32, 0.0 }
0x2df6   : > { %12039 = vrot.lane.b32.xlu1 %v14793_v57, %s15657_s25 }
0x2dfa   : > { %12029 = vrot.lane.b32.xlu0 %v14793_v57, %s12530_s28 }
0x2e19   : > { %7697 = vadd.xlane.f32.xlu0 %v7696_v21 }
0x2e1a   : > { %7694 = vadd.xlane.f32.xlu1 %v7693_v43 }
0x2e2b   : > { %7819 = vrot.lane.b32.xlu1 %v14523_v54, %s15658_s27 }
0x2e2f   : > { %7823 = vrot.lane.b32.xlu1 %v14783_v9, %s15658_s27  ;;  %7817 = vrot.lane.b32.xlu0 %v14770_v63, %s15658_s27 }
0x2e33   : > { %7821 = vrot.lane.b32.xlu0 %v14789_v2, %s15658_s27 }
0x2e71   : > { %v7692_v23 = vpop.xlane.xlu0 %7691 }
0x2e72   : > { %12409 = vrcp.f32 %v7692_v23  ;;  %v7689_v3 = vpop.xlane.xlu1 %7688 }
0x2e73   : > { %12411 = vrcp.f32 %v7689_v3 }
0x2e75   : > { %v12030_v44 = vpop.permute.xlu0 %12029 }
0x2e76   : > { %v12032_v35 = vunpack.i.h.bf16 %v12030_v44  ;;  %v12031_v33 = vunpack.i.l.bf16 %v12030_v44  ;;  %v12040_v40 = vpop.permute.xlu1 %12039 }
0x2e77   : > { %v12042_v3 = vunpack.i.h.bf16 %v12040_v40  ;;  %v12041_v5 = vunpack.i.l.bf16 %v12040_v40 }
0x2e78   : > { %v11507_v62 = vpack.c.bf16 %v12032_v35, %v12031_v33 }
0x2e79   : > { %v11519_v44 = vpack.c.bf16 %v12042_v3, %v12041_v5 }
0x2e7a   : > { %11509 = vmatprep.subr.msk.bf16.mxu0 %vm13294_vm11, %v11507_v62 }
0x2e7b   : > { %11512 = vmatpush3.bf16.msk.msra.mxu0 %vm13294_vm11, %v11507_v62 }
0x2e7c   : > { %v12410_v28 = vpop.eup %12409  ;;  %11515 = vmatprep.subr.msk.bf16.mxu0 %vm13258_vm8, %v11513_v39 }
0x2e7d   : > { %v12412_v21 = vpop.eup %12411  ;;  %v7704_v23 = vmul.f32 %v12410_v28, %v12402_v55 }
0x2e7e   : > { %v7703_v43 = vmul.f32 %v12412_v21, %v12404_v14 }
0x2e80   : > { %10714 = vmatprep.mubr.msk.f32.mxu0 %vm1810_vm9, %v7703_v43 }
0x2e81   : > { %10715 = vmatmul.mubr.msk.f32.vlgmr.msra.gmra.mrb[118].mxu0 %vm1810_vm9, %v7704_v23 }
0x2e84   : > { %11518 = vmatpush3.bf16.xpose.msk.msra.mxu0 %vm13258_vm8, %v11513_v39 }
0x2e85   : > { %11521 = vmatprep.subr.msk.bf16.mxu0 %vm13258_vm8, %v11519_v44 }
0x2e8c   : > { %11524 = vmatpush3.bf16.xpose.msk.msra.mxu0 %vm13258_vm8, %v11519_v44 }
0x2ea6   : > { %v7698_v7 = vpop.xlane.xlu0 %7697 }
0x2ea7   : > { %12413 = vrcp.f32 %v7698_v7  ;;  %v7695_v14 = vpop.xlane.xlu1 %7694 }
0x2ea8   : > { %12415 = vrcp.f32 %v7695_v14 }
0x2eaa   : > { %v7818_v33 = vpop.permute.xlu0 %7817 }
0x2eab   : > { %v7820_v39 = vpop.permute.xlu1 %7819 }
0x2eae   : > { %v7822_v28 = vpop.permute.xlu0 %7821 }
0x2eaf   : > { %v7824_v40 = vpop.permute.xlu1 %7823 }
0x2eb1   : > { %v12414_v55 = vpop.eup %12413 }
0x2eb2   : > { %v12416_v1 = vpop.eup %12415  ;;  %v7706_v62 = vmul.f32 %v12414_v55, %v12406_v27 }
0x2eb3   : > { %v7705_v35 = vmul.f32 %v12416_v1, %v12408_v32 }
0x2eb5   : > { %10717 = vmatprep.mubr.msk.f32.mxu0 %vm1810_vm9, %v7705_v35 }
0x2eb6   : > { %10718 = vmatmul.mubr.msk.f32.gmra.mrb[120].mxu0 %vm1810_vm9, %v7706_v62 }
0x2eb7   : > { %10728 = vmatprep.mubr.msk.f32.mxu0 %vm1704_vm6, %v7818_v33 }
0x2eba   : > { %10729 = vmatmul.mubr.msk.f32.vlgmr.msra.gmra.mrb[122].mxu0 %vm1704_vm6, %v7820_v39 }
0x2ebb   : > { %10731 = vmatprep.mubr.msk.f32.mxu0 %vm1704_vm6, %v7822_v28 }
0x2ebe   : > { %10732 = vmatmul.mubr.msk.f32.gmra.mrb[124].mxu0 %vm1704_vm6, %v7824_v40 }
0x2f54   : > { %v14977_v21 = vpop.f32.mrb[118].mxu0 }
0x2f55   : > { %v14979_v32 = vpop.f32.mrb[119].mxu0 }
0x2f89   : > { %v14981_v27 = vpop.f32.mrb[120].mxu0 }
0x2f8a   : > { %v14983_v43 = vpop.f32.mrb[121].mxu0 }
0x2f8d   : > { %v10730_v23 = vpop.f32.mrb[122].mxu0 }
0x2f8e   : > { %v7935_v3 = vmul.f32 0.35355338, %v10730_v23  ;;  %v7915_v5 = vpop.f32.mrb[123].mxu0 }
0x2f8f   : > { %v7934_v44 = vmul.f32 0.35355338, %v7915_v5 }
0x2f90   : > { %v7941_v7 = vsel %vm1810_vm9, %v7935_v3, -inf }
0x2f91   : > { %7942 = vmax.xlane.f32.xlu1 %v7941_v7  ;;  %v10733_v14 = vpop.f32.mrb[124].mxu0  ;;  %v7938_v55 = vsel %vm1810_vm9, %v7934_v44, -inf }
0x2f92   : > { %7939 = vmax.xlane.f32.xlu0 %v7938_v55  ;;  %v7925_v1 = vpop.f32.mrb[125].mxu0  ;;  %v7937_v33 = vmul.f32 0.35355338, %v10733_v14 }
0x2f93   : > { %v7936_v35 = vmul.f32 0.35355338, %v7925_v1 }
0x2f94   : > { %v7947_v39 = vsel %vm1820_vm10, %v7937_v33, -inf }
0x2f95   : > { %v7944_v62 = vsel %vm1810_vm9, %v7936_v35, -inf }
0x2f96   : > { %7945 = vmax.xlane.f32.xlu0 %v7944_v62 }
0x2f9a   : > { %7948 = vmax.xlane.f32.xlu0 %v7947_v39 }
0x2fa2   : > { %12044 = vrot.lane.b32.xlu1 %v14774_v25, %s12531_s29 }
0x2fa6   : > { %12054 = vrot.lane.b32.xlu1 %v14774_v25, %s15659_s13 }
0x301e   : > { %v7943_v28 = vpop.xlane.xlu1 %7942 }
0x301f   : > { %v7951_v40 = vsub.f32 %v7935_v3, %v7943_v28  ;;  %v7940_v23 = vpop.xlane.xlu0 %7939 }
0x3020   : > { %v7950_v5 = vsub.f32 %v7934_v44, %v7940_v23 }
0x3021   : > { %v7956_v7 = vmul.f32 1.442695, %v7951_v40 }
0x3022   : > { %v7954_v55 = vmul.f32 1.442695, %v7950_v5  ;;  %v12045_v1 = vpop.permute.xlu1 %12044 }
0x3023   : > { %12417 = vpow2.f32 %v7956_v7  ;;  %v12047_v14 = vunpack.i.h.bf16 %v12045_v1  ;;  %v12046_v46 = vunpack.i.l.bf16 %v12045_v1  ;;  %v7946_v3 = vpop.xlane.xlu0 %7945 }
0x3024   : > { %12419 = vpow2.f32 %v7954_v55 }
0x3025   : > { %v11525_v62 = vpack.c.bf16 %v12047_v14, %v12046_v46  ;;  %v7952_v46 = vsub.f32 %v7936_v35, %v7946_v3 }
0x3026   : > { %v12055_v35 = vpop.permute.xlu1 %12054 }
0x3027   : > { %11526 = vmatprep.subr.bf16.mxu1 %v11525_v62  ;;  %v7949_v44 = vpop.xlane.xlu0 %7948  ;;  %v7958_v23 = vmul.f32 1.442695, %v7952_v46  ;;  %v12057_v14 = vunpack.i.h.bf16 %v12055_v35 }
0x3028   : > { %11528 = vmatpush3.bf16.msra.mxu1 %v11525_v62  ;;  %v7953_v28 = vsub.f32 %v7937_v33, %v7949_v44  ;;  %v12056_v62 = vunpack.i.l.bf16 %v12055_v35 }
0x302a   : > { %v7960_v40 = vmul.f32 1.442695, %v7953_v28  ;;  %v11535_v28 = vpack.c.bf16 %v12057_v14, %v12056_v62 }
0x302c   : > { %12421 = vpow2.f32 %v7960_v40 }
0x302d   : > { %v12418_v39 = vpop.eup %12417  ;;  %12423 = vpow2.f32 %v7958_v23 }
0x302e   : > { %v12420_v10 = vpop.eup %12419  ;;  %v7965_v29 = vsel %vm1810_vm9, %v12418_v39, 0.0 }
0x302f   : > { %7966 = vadd.xlane.f32.xlu0 %v7965_v29  ;;  %v7962_v22 = vsel %vm1810_vm9, %v12420_v10, 0.0 }
0x3030   : > { %7963 = vadd.xlane.f32.xlu1 %v7962_v22 }
0x3036   : > { %v12422_v5 = vpop.eup %12421 }
0x3037   : > { %v12424_v7 = vpop.eup %12423  ;;  %v7971_v29 = vsel %vm1820_vm10, %v12422_v5, 0.0 }
0x3038   : > { %v7968_v22 = vsel %vm1810_vm9, %v12424_v7, 0.0 }
0x3041   : > { %12059 = vrot.lane.b32.xlu1 %v14793_v57, %s15659_s13 }
0x3045   : > { %12049 = vrot.lane.b32.xlu0 %v14793_v57, %s12531_s29 }
0x3064   : > { %7972 = vadd.xlane.f32.xlu0 %v7971_v29 }
0x3065   : > { %7969 = vadd.xlane.f32.xlu1 %v7968_v22 }
0x3076   : > { %8094 = vrot.lane.b32.xlu1 %v14523_v54, %s15660_s14 }
0x307a   : > { %8098 = vrot.lane.b32.xlu1 %v14783_v9, %s15660_s14  ;;  %8092 = vrot.lane.b32.xlu0 %v14770_v63, %s15660_s14 }
0x307e   : > { %8096 = vrot.lane.b32.xlu0 %v14789_v2, %s15660_s14 }
0x30bc   : > { %v7967_v33 = vpop.xlane.xlu0 %7966 }
0x30bd   : > { %12425 = vrcp.f32 %v7967_v33  ;;  %v7964_v55 = vpop.xlane.xlu1 %7963 }
0x30be   : > { %12427 = vrcp.f32 %v7964_v55 }
0x30c0   : > { %v12050_v1 = vpop.permute.xlu0 %12049 }
0x30c1   : > { %v12052_v3 = vunpack.i.h.bf16 %v12050_v1  ;;  %v12051_v44 = vunpack.i.l.bf16 %v12050_v1  ;;  %v12060_v9 = vpop.permute.xlu1 %12059 }
0x30c2   : > { %v12062_v23 = vunpack.i.h.bf16 %v12060_v9  ;;  %v12061_v29 = vunpack.i.l.bf16 %v12060_v9 }
0x30c3   : > { %v11529_v54 = vpack.c.bf16 %v12052_v3, %v12051_v44 }
0x30c4   : > { %v11541_v22 = vpack.c.bf16 %v12062_v23, %v12061_v29 }
0x30c5   : > { %11531 = vmatprep.subr.msk.bf16.mxu1 %vm13294_vm11, %v11529_v54 }
0x30c6   : > { %11534 = vmatpush3.bf16.msk.msra.mxu1 %vm13294_vm11, %v11529_v54 }
0x30c7   : > { %v12426_v63 = vpop.eup %12425  ;;  %11537 = vmatprep.subr.msk.bf16.mxu1 %vm13258_vm8, %v11535_v28 }
0x30c8   : > { %v12428_v2 = vpop.eup %12427  ;;  %v7979_v40 = vmul.f32 %v12426_v63, %v12418_v39 }
0x30c9   : > { %v7978_v46 = vmul.f32 %v12428_v2, %v12420_v10 }
0x30cb   : > { %10742 = vmatprep.mubr.msk.f32.mxu1 %vm1810_vm9, %v7978_v46 }
0x30cc   : > { %10743 = vmatmul.mubr.msk.f32.vlgmr.msra.gmra.mrb[170].mxu1 %vm1810_vm9, %v7979_v40 }
0x30cf   : > { %11540 = vmatpush3.bf16.xpose.msk.msra.mxu1 %vm13258_vm8, %v11535_v28 }
0x30d0   : > { %11543 = vmatprep.subr.msk.bf16.mxu1 %vm13258_vm8, %v11541_v22 }
0x30d7   : > { %11546 = vmatpush3.bf16.xpose.msk.msra.mxu1 %vm13258_vm8, %v11541_v22 }
0x30f1   : > { %v7973_v35 = vpop.xlane.xlu0 %7972 }
0x30f2   : > { %12429 = vrcp.f32 %v7973_v35  ;;  %v7970_v10 = vpop.xlane.xlu1 %7969 }
0x30f3   : > { %12431 = vrcp.f32 %v7970_v10 }
0x30f5   : > { %v8093_v1 = vpop.permute.xlu0 %8092 }
0x30f6   : > { %v8095_v62 = vpop.permute.xlu1 %8094 }
0x30f9   : > { %v8097_v3 = vpop.permute.xlu0 %8096 }
0x30fa   : > { %v8099_v41 = vpop.permute.xlu1 %8098 }
0x30fc   : > { %v12430_v39 = vpop.eup %12429 }
0x30fd   : > { %v12432_v33 = vpop.eup %12431  ;;  %v7981_v14 = vmul.f32 %v12430_v39, %v12422_v5 }
0x30fe   : > { %v7980_v55 = vmul.f32 %v12432_v33, %v12424_v7 }
0x3100   : > { %10745 = vmatprep.mubr.msk.f32.mxu1 %vm1810_vm9, %v7980_v55 }
0x3101   : > { %10746 = vmatmul.mubr.msk.f32.gmra.mrb[172].mxu1 %vm1810_vm9, %v7981_v14 }
0x3102   : > { %10756 = vmatprep.mubr.msk.f32.mxu1 %vm1704_vm6, %v8093_v1 }
0x3105   : > { %10757 = vmatmul.mubr.msk.f32.vlgmr.msra.gmra.mrb[174].mxu1 %vm1704_vm6, %v8095_v62 }
0x3106   : > { %10759 = vmatprep.mubr.msk.f32.mxu1 %vm1704_vm6, %v8097_v3 }
0x3109   : > { %10760 = vmatmul.mubr.msk.f32.gmra.mrb[176].mxu1 %vm1704_vm6, %v8099_v41 }
0x310a   : > { %8812 = vmatprep.mubr.f32.mxu1 %v15647_v34 }
0x319f   : > { %v15030_v7 = vpop.f32.mrb[170].mxu1 }
0x31a0   : > { %v8073_v5 = vpop.f32.mrb[171].mxu1 }
0x31d4   : > { %v15032_v44 = vpop.f32.mrb[172].mxu1 }
0x31d5   : > { %v15034_v54 = vpop.f32.mrb[173].mxu1 }
0x31d8   : > { %v10758_v28 = vpop.f32.mrb[174].mxu1 }
0x31d9   : > { %v8210_v63 = vmul.f32 0.35355338, %v10758_v28  ;;  %v8190_v9 = vpop.f32.mrb[175].mxu1 }
0x31da   : > { %v8209_v2 = vmul.f32 0.35355338, %v8190_v9 }
0x31db   : > { %v8216_v46 = vsel %vm1810_vm9, %v8210_v63, -inf }
0x31dc   : > { %8217 = vmax.xlane.f32.xlu1 %v8216_v46  ;;  %v10761_v40 = vpop.f32.mrb[176].mxu1  ;;  %v8213_v23 = vsel %vm1810_vm9, %v8209_v2, -inf }
0x31dd   : > { %8214 = vmax.xlane.f32.xlu0 %v8213_v23  ;;  %v8200_v29 = vpop.f32.mrb[177].mxu1  ;;  %v8212_v35 = vmul.f32 0.35355338, %v10761_v40 }
0x31de   : > { %v8211_v22 = vmul.f32 0.35355338, %v8200_v29 }
0x31df   : > { %v8222_v39 = vsel %vm1820_vm10, %v8212_v35, -inf }
0x31e0   : > { %v8219_v10 = vsel %vm1810_vm9, %v8211_v22, -inf }
0x31e1   : > { %8220 = vmax.xlane.f32.xlu0 %v8219_v10 }
0x31e5   : > { %8223 = vmax.xlane.f32.xlu0 %v8222_v39 }
0x3269   : > { %v8218_v33 = vpop.xlane.xlu1 %8217 }
0x326a   : > { %v8226_v55 = vsub.f32 %v8210_v63, %v8218_v33  ;;  %v8215_v1 = vpop.xlane.xlu0 %8214 }
0x326b   : > { %v8225_v14 = vsub.f32 %v8209_v2, %v8215_v1 }
0x326c   : > { %v8231_v62 = vmul.f32 1.442695, %v8226_v55 }
0x326d   : > { %v8229_v3 = vmul.f32 1.442695, %v8225_v14 }
0x326e   : > { %12433 = vpow2.f32 %v8231_v62  ;;  %v8221_v41 = vpop.xlane.xlu0 %8220 }
0x326f   : > { %12435 = vpow2.f32 %v8229_v3  ;;  %v8227_v28 = vsub.f32 %v8211_v22, %v8221_v41  ;;  %v9658_v41 = vld [vmem:[%s15603_s5 + $0x48] sm:$0xff] }
0x3271   : > { %v8233_v9 = vmul.f32 1.442695, %v8227_v28 }
0x3272   : > { %v8224_v46 = vpop.xlane.xlu0 %8223 }
0x3273   : > { %12437 = vpow2.f32 %v8233_v9  ;;  %v8228_v40 = vsub.f32 %v8212_v35, %v8224_v46 }
0x3275   : > { %v8235_v23 = vmul.f32 1.442695, %v8228_v40 }
0x3277   : > { %12439 = vpow2.f32 %v8235_v23 }
0x3278   : > { %v15040_v29 = vpop.eup %12433 }
0x3279   : > { %v12436_v10 = vpop.eup %12435  ;;  %v8240_v63 = vsel %vm1810_vm9, %v15040_v29, 0.0 }
0x327a   : > { %8241 = vadd.xlane.f32.xlu0 %v8240_v63  ;;  %v8237_v2 = vsel %vm1810_vm9, %v12436_v10, 0.0 }
0x327b   : > { %8238 = vadd.xlane.f32.xlu1 %v8237_v2 }
0x327d   : > { %v15045_v39 = vpop.eup %12437 }
0x327e   : > { %v8243_v22 = vsel %vm1810_vm9, %v15045_v39, 0.0 }
0x327f   : > { %8244 = vadd.xlane.f32.xlu1 %v8243_v22 }
0x3281   : > { %v15049_v33 = vpop.eup %12439 }
0x3282   : > { %v8246_v35 = vsel %vm1820_vm10, %v15049_v33, 0.0 }
0x3283   : > { %8247 = vadd.xlane.f32.xlu0 %v8246_v35 }
0x3290   : > { %12064 = vrot.lane.b32.xlu1 %v14774_v25, %s15661_s11 }
0x3294   : > { %6914 = vrot.lane.b32.xlu1 %v14691_v45, %s15662_s19 }
0x3298   : > { %6930 = vrot.lane.b32.xlu1 %v14699_v15, %s15661_s11 }
0x3299   : > { %12069 = vrot.lane.b32.xlu0 %v14793_v57, %s15661_s11 }
0x329c   : > { %6962 = vrot.lane.b32.xlu1 %v14823_v61, %s12530_s28  ;;  %v9654_v61 = vld [vmem:[%s15603_s5 + $0x28] sm:$0xff] }
0x329d   : > { %6946 = vrot.lane.b32.xlu0 %v14751_v47, %s12531_s29 }
0x32a0   : > { %6932 = vrot.lane.b32.xlu1 %v14697_v42, %s15661_s11 }
0x32a1   : > { %6916 = vrot.lane.b32.xlu0 %v14689_v31, %s15662_s19 }
0x32a4   : > { %6964 = vrot.lane.b32.xlu1 %v14821_v19, %s12530_s28 }
0x32a5   : > { %6948 = vrot.lane.b32.xlu0 %v14749_v58, %s12531_s29 }
0x32a8   : > { %6934 = vrot.lane.b32.xlu1 %v14703_v49, %s15661_s11 }
0x32a9   : > { %6918 = vrot.lane.b32.xlu0 %v14695_v16, %s15662_s19 }
0x32ac   : > { %6950 = vrot.lane.b32.xlu1 %v14755_v26, %s12531_s29 }
0x32ad   : > { %8371 = vrot.lane.b32.xlu0 %v14927_v60, %s15662_s19 }
0x32b0   : > { %6920 = vrot.lane.b32.xlu1 %v14693_v4, %s15662_s19 }
0x32b1   : > { %8387 = vrot.lane.b32.xlu0 %v14979_v32, %s15661_s11  ;;  %v9656_v32 = vld [vmem:[%s15603_s5 + $0x38] sm:$0xff] }
0x32b4   : > { %8403 = vrot.lane.b32.xlu1 %v8073_v5, %s12531_s29 }
0x32b5   : > { %6966 = vrot.lane.b32.xlu0 %v14827_v18, %s12530_s28 }
0x32b8   : > { %8373 = vrot.lane.b32.xlu1 %v14925_v50, %s15662_s19 }
0x32b9   : > { %6936 = vrot.lane.b32.xlu0 %v14701_v37, %s15661_s11 }
0x32bc   : > { %8389 = vrot.lane.b32.xlu1 %v14977_v21, %s15661_s11 }
0x32bd   : > { %6952 = vrot.lane.b32.xlu0 %v14753_v17, %s12531_s29 }
0x32c0   : > { %8391 = vrot.lane.b32.xlu1 %v14983_v43, %s15661_s11  ;;  %v9657_v43 = vld [vmem:[%s15603_s5 + $0x40] sm:$0xff] }
0x32c1   : > { %6968 = vrot.lane.b32.xlu0 %v14825_v11, %s12530_s28  ;;  %v9655_v11 = vld [vmem:[%s15603_s5 + $0x30] sm:$0xff]  ;;  %v11561_v36 = vpack.c.bf16 %v9657_v43, %v9656_v32 }
0x32c5   : > { %8405 = vrot.lane.b32.xlu0 %v15030_v7, %s12531_s29 }
0x32c9   : > { %8375 = vrot.lane.b32.xlu0 %v14931_v6, %s15662_s19  ;;  %v11558_v6 = vpack.c.bf16 %v9655_v11, %v9654_v61 }
0x32cd   : > { %8407 = vrot.lane.b32.xlu0 %v15034_v54, %s12531_s29 }
0x32d1   : > { %8377 = vrot.lane.b32.xlu0 %v14929_v0, %s15662_s19 }
0x32d5   : > { %8409 = vrot.lane.b32.xlu0 %v15032_v44, %s12531_s29 }
0x3307   : > { %v8242_v45 = vpop.xlane.xlu0 %8241 }
0x3308   : > { %v8239_v31 = vpop.xlane.xlu1 %8238 }
0x3309   : > { %12441 = vrcp.f32 %v8239_v31 }
0x330a   : > { %12443 = vrcp.f32 %v8242_v45 }
0x330c   : > { %v8245_v4 = vpop.xlane.xlu1 %8244 }
0x330d   : > { %12445 = vrcp.f32 %v8245_v4 }
0x3310   : > { %v12065_v16 = vpop.permute.xlu1 %12064  ;;  %v8248_v42 = vpop.xlane.xlu0 %8247 }
0x3311   : > { %v12067_v15 = vunpack.i.h.bf16 %v12065_v16  ;;  %v12066_v37 = vunpack.i.l.bf16 %v12065_v16  ;;  %12447 = vrcp.f32 %v8248_v42 }
0x3313   : > { %v12442_v49 = vpop.eup %12441  ;;  %v11547_v58 = vpack.c.bf16 %v12067_v15, %v12066_v37  ;;  %v15174_v37 = vld [vmem:[%s15606_s8 + $0x10] sm:$0xff] }
0x3314   : > { %v6915_v47 = vpop.permute.xlu1 %6914  ;;  %v12070_v17 = vpop.permute.xlu0 %12069  ;;  %v8253_v26 = vmul.f32 %v12442_v49, %v12436_v10  ;;  %v15663_v49 = vsub.s32 2, %v13211_v13 }
0x3315   : > { %v12072_v25 = vunpack.i.h.bf16 %v12070_v17  ;;  %v12071_v57 = vunpack.i.l.bf16 %v12070_v17  ;;  %11548 = vmatprep.subr.bf16.mxu0 %v11547_v58  ;;  %v12444_v18 = vpop.eup %12443  ;;  %v6974_v62 = vsel %vm1704_vm6, %v14683_v53, %v6915_v47 }
0x3316   : > { %11550 = vmatpush3.bf16.msra.mxu0 %v11547_v58  ;;  %10770 = vmatprep.mubr.msk.f32.mxu0 %vm1810_vm9, %v8253_v26  ;;  %v8254_v21 = vmul.f32 %v12444_v18, %v15040_v29  ;;  %v15179_v58 = vrot.slane %v15174_v37, %v15663_v49 }
0x3317   : > { %v11551_v19 = vpack.c.bf16 %v12072_v25, %v12071_v57  ;;  %v12446_v0 = vpop.eup %12445 }
0x3318   : > { %v6931_v50 = vpop.permute.xlu1 %6930  ;;  %v6947_v60 = vpop.permute.xlu0 %6946  ;;  %v8255_v54 = vmul.f32 %v12446_v0, %v15045_v39 }
0x3319   : > { %11553 = vmatprep.subr.msk.bf16.mxu0 %vm13294_vm11, %v11551_v19  ;;  %v6978_v3 = vsel %vm3135_vm12, %v6974_v62, %v6931_v50 }
0x331a   : > { %11556 = vmatpush3.bf16.msk.msra.mxu0 %vm13294_vm11, %v11551_v19  ;;  %v6982_v46 = vsel %vm3140_vm13, %v6978_v3, %v6947_v60 }
0x331b   : > { %11557 = vmatprep.subr.bf16.mxu0 %v15648_v38  ;;  %v12448_v7 = vpop.eup %12447 }
0x331c   : > { %v6963_v5 = vpop.permute.xlu1 %6962  ;;  %v6917_v44 = vpop.permute.xlu0 %6916  ;;  %v8256_v55 = vmul.f32 %v12448_v7, %v15049_v33 }
0x331d   : > { %10771 = vmatmul.mubr.msk.f32.vlgmr.msra.gmra.mrb[126].mxu0 %vm1810_vm9, %v8254_v21  ;;  %v6975_v53 = vsel %vm1704_vm6, %v14681_v12, %v6917_v44  ;;  %v6986_v40 = vsel %vm3145_vm14, %v6982_v46, %v6963_v5 }
0x331e   : > { %10773 = vmatprep.mubr.msk.f32.mxu0 %vm1810_vm9, %v8255_v54  ;;  %11559 = vmatpush3.bf16.msra.mxu0 %v11558_v6 }
0x331f   : > { %11560 = vmatprep.subr.bf16.mxu0 %v15648_v38 }
0x3320   : > { %v6933_v1 = vpop.permute.xlu1 %6932  ;;  %v6949_v14 = vpop.permute.xlu0 %6948 }
0x3321   : > { %10774 = vmatmul.mubr.msk.f32.gmra.mrb[128].mxu0 %vm1810_vm9, %v8256_v55  ;;  %v6979_v23 = vsel %vm3135_vm12, %v6975_v53, %v6933_v1 }
0x3322   : > { %11562 = vmatpush3.bf16.msra.mxu0 %v11561_v36  ;;  %10786 = vmatprep.mubr.msk.f32.mxu0 %vm12520_vm4, %v15647_v34  ;;  %v6983_v63 = vsel %vm3140_vm13, %v6979_v23, %v6949_v14 }
0x3323   : > { %10784 = vmatprep.subr.mxu0 %v15647_v34 }
0x3324   : > { %v6965_v28 = vpop.permute.xlu1 %6964  ;;  %v6919_v9 = vpop.permute.xlu0 %6918 }
0x3325   : > { %v6987_v12 = vsel %vm3145_vm14, %v6983_v63, %v6965_v28  ;;  %v6976_v35 = vsel %vm1704_vm6, %v14687_v20, %v6919_v9 }
0x3326   : > { %10785 = vmatpush3.msra.mxu0 %v9658_v41 }
0x3327   : > { %10787 = vmatmul.mubr.msk.f32.vlgmr.msra.gmra.mrb[130].mxu0 %vm1438_vm5, %v6986_v40  ;;  %11571 = vmatprep.subr.bf16.mxu0 %v15648_v38 }
0x3328   : > { %v6935_v29 = vpop.permute.xlu1 %6934  ;;  %v8372_v10 = vpop.permute.xlu0 %8371  ;;  %10789 = vmatprep.mubr.msk.f32.mxu0 %vm12520_vm4, %v15647_v34 }
0x3329   : > { %v8431_v2 = vsel %vm1704_vm6, %v14875_v56, %v8372_v10  ;;  %v6980_v31 = vsel %vm3135_vm12, %v6976_v35, %v6935_v29 }
0x332b   : > { %10790 = vmatmul.mubr.msk.f32.gmra.mrb[132].mxu0 %vm1438_vm5, %v6987_v12 }
0x332c   : > { %v8388_v39 = vpop.permute.xlu0 %8387  ;;  %10792 = vmatprep.mubr.msk.f32.mxu0 %vm12520_vm4, %v15647_v34  ;;  %v6951_v22 = vpop.permute.xlu1 %6950 }
0x332d   : > { %v8435_v33 = vsel %vm3135_vm12, %v8431_v2, %v8388_v39  ;;  %v6984_v45 = vsel %vm3140_vm13, %v6980_v31, %v6951_v22 }
0x3330   : > { %v6967_v4 = vpop.permute.xlu0 %6966  ;;  %v6921_v21 = vpop.permute.xlu1 %6920 }
0x3331   : > { %v6988_v56 = vsel %vm3145_vm14, %v6984_v45, %v6967_v4  ;;  %v6977_v28 = vsel %vm1704_vm6, %v14685_v30, %v6921_v21 }
0x3332   : > { %10793 = vmatmul.mubr.msk.f32.gmra.mrb[134].mxu0 %vm1438_vm5, %v6988_v56 }
0x3333   : > { %10795 = vmatprep.mubr.msk.f32.mxu0 %vm12520_vm4, %v15647_v34 }
0x3334   : > { %v6937_v32 = vpop.permute.xlu0 %6936  ;;  %v8404_v43 = vpop.permute.xlu1 %8403 }
0x3335   : > { %v8439_v9 = vsel %vm3140_vm13, %v8435_v33, %v8404_v43  ;;  %v6981_v53 = vsel %vm3135_vm12, %v6977_v28, %v6937_v32  ;;  %v15665_v32 = vld [vmem:[#allocation4_spill] sm:$0xff] }
0x3338   : > { %v6953_v7 = vpop.permute.xlu0 %6952  ;;  %v8374_v5 = vpop.permute.xlu1 %8373 }
0x3339   : > { %v8432_v1 = vsel %vm1704_vm6, %v14873_v52, %v8374_v5  ;;  %v6985_v52 = vsel %vm3140_vm13, %v6981_v53, %v6953_v7 }
0x333c   : > { %v8390_v44 = vpop.permute.xlu1 %8389 }
0x3340   : > { %v8392_v36 = vpop.permute.xlu1 %8391 }
0x33f0   : > { %v10772_v16 = vpop.f32.mrb[126].mxu0 }
0x33f1   : > { %8421 = vrot.lane.b32.xlu1 %v10772_v16, %s12530_s28  ;;  %v8348_v42 = vpop.f32.mrb[127].mxu0 }
0x33f4   : > { %v10775_v15 = vpop.f32.mrb[128].mxu0 }
0x33f5   : > { %8419 = vrot.lane.b32.xlu1 %v8348_v42, %s12530_s28  ;;  %v8358_v20 = vpop.f32.mrb[129].mxu0 }
0x33f9   : > { %8393 = vrot.lane.b32.xlu1 %v14981_v27, %s15661_s11 }
0x33fa   : > { %v8554_v47 = vpop.f32.mrb[130].mxu0 }
0x33fb   : > { %v8555_v17 = vadd.f32 %v8554_v47, %v15179_v58  ;;  %v10788_v26 = vpop.f32.mrb[131].mxu0 }
0x33fd   : > { %v15185_v25 = vadd.f32 %v8555_v17, %v14348_v8  ;;  %8423 = vrot.lane.b32.xlu1 %v8358_v20, %s12530_s28 }
0x33fe   : > { %v8559_v57 = vpop.f32.mrb[132].mxu0 }
0x33ff   : > { %v10791_v19 = vpop.f32.mrb[133].mxu0  ;;  %v8595_v61 = vsel %vm1438_vm5, %v15185_v25, 0.0  ;;  %v8560_v60 = vadd.f32 %v8559_v57, %v15179_v58 }
0x3400   : > { %8596 = vadd.xlane.f32.xlu0 %v8595_v61  ;;  %v15664_v19 = vld [vmem:[#allocation3_spill] sm:$0xff] }
0x3401   : > { %8425 = vrot.lane.b32.xlu1 %v10775_v15, %s12530_s28  ;;  %v15199_v0 = vadd.f32 %v8560_v60, %v14357_v59  ;;  %v8436_v59 = vsel %vm3135_vm12, %v8432_v1, %v8390_v44  ;;  %v15666_v1 = vld [vmem:[#allocation5_spill] sm:$0xff] }
0x3403   : > { %v8598_v6 = vsel %vm1438_vm5, %v15199_v0, 0.0 }
0x3405   : > { %v8564_v11 = vpop.f32.mrb[134].mxu0 }
0x3406   : > { %v8565_v27 = vadd.f32 %v8564_v11, %v15179_v58  ;;  %v10794_v18 = vpop.f32.mrb[135].mxu0 }
0x3408   : > { %v15193_v50 = vadd.f32 %v8565_v27, %v14365_v51  ;;  %v6969_v51 = vpop.permute.xlu0 %6968 }
0x3409   : > { %v6989_v10 = vsel %vm3145_vm14, %v6985_v52, %v6969_v51 }
0x340a   : > { %v8601_v8 = vsel %vm1438_vm5, %v15193_v50, 0.0 }
0x340b   : > { %8602 = vadd.xlane.f32.xlu0 %v8601_v8 }
0x340c   : > { %v8406_v54 = vpop.permute.xlu0 %8405 }
0x340d   : > { %v8440_v62 = vsel %vm3140_vm13, %v8436_v59, %v8406_v54 }
0x3410   : > { %v8376_v55 = vpop.permute.xlu0 %8375 }
0x3411   : > { %v8433_v63 = vsel %vm1704_vm6, %v14879_v48, %v8376_v55 }
0x3412   : > { %v8437_v22 = vsel %vm3135_vm12, %v8433_v63, %v8392_v36 }
0x3414   : > { %v8408_v3 = vpop.permute.xlu0 %8407 }
0x3415   : > { %v8441_v33 = vsel %vm3140_vm13, %v8437_v22, %v8408_v3  ;;  %v9673_v22 = vld [vmem:[%s15604_s6 + $0x88] sm:$0xff] }
0x3418   : > { %v8378_v39 = vpop.permute.xlu0 %8377 }
0x3419   : > { %v8434_v35 = vsel %vm1704_vm6, %v14877_v24, %v8378_v39  ;;  %v9671_v39 = vld [vmem:[%s15604_s6 + $0x78] sm:$0xff] }
0x341c   : > { %v8410_v56 = vpop.permute.xlu0 %8409 }
0x3425   : > { %8599 = vadd.xlane.f32.xlu1 %v8598_v6 }
0x3463   : > { %v8422_v14 = vpop.permute.xlu1 %8421 }
0x3464   : > { %v8444_v41 = vsel %vm3145_vm14, %v8440_v62, %v8422_v14 }
0x3465   : > { %v8452_v23 = vrot.slane %v8444_v41, 4 }
0x3467   : > { %v8420_v46 = vpop.permute.xlu1 %8419 }
0x3468   : > { %v8443_v40 = vsel %vm3145_vm14, %v8439_v9, %v8420_v46  ;;  %v15667_v46 = vld [vmem:[#allocation6_spill] sm:$0xff] }
0x3469   : > { %v8451_v29 = vrot.slane %v8443_v40, 4 }
0x346b   : > { %v8394_v2 = vpop.permute.xlu1 %8393  ;;  %v8459_v12 = vsel %vm1879_vm7, %v6989_v10, %v8451_v29  ;;  %v8453_v30 = vsel %vm1879_vm7, %v8451_v29, %v8452_v23  ;;  %v9667_v29 = vld [vmem:[%s15604_s6 + $0x58] sm:$0xff]  ;;  %v9669_v10 = vld [vmem:[%s15604_s6 + $0x68] sm:$0xff] }
0x346c   : > { %10796 = vmatmul.mubr.msk.f32.gmra.mrb[136].mxu0 %vm1438_vm5, %v8459_v12  ;;  %v8438_v48 = vsel %vm3135_vm12, %v8434_v35, %v8394_v2  ;;  %v11563_v63 = vpack.c.bf16 %v9669_v10, %v9667_v29  ;;  %v9666_v2 = vld [vmem:[%s15604_s6 + $0x50] sm:$0xff]  ;;  %v9668_v12 = vld [vmem:[%s15604_s6 + $0x60] sm:$0xff]  ;;  %v9684_v29 = vld [vmem:[%s15605_s7 + $0xa8] sm:$0xff] }
0x346d   : > { %10798 = vmatprep.mubr.msk.f32.mxu0 %vm12520_vm4, %v15647_v34  ;;  %v8442_v16 = vsel %vm3140_vm13, %v8438_v48, %v8410_v56  ;;  %v9670_v35 = vld [vmem:[%s15604_s6 + $0x70] sm:$0xff] }
0x346e   : > { %11564 = vmatprep.subr.bf16.mxu1 %v11563_v63  ;;  %v9685_v10 = vld [vmem:[%s15605_s7 + $0xb0] sm:$0xff] }
0x346f   : > { %v8424_v31 = vpop.permute.xlu1 %8423 }
0x3470   : > { %v8445_v45 = vsel %vm3145_vm14, %v8441_v33, %v8424_v31  ;;  %10799 = vmatmul.mubr.msk.f32.gmra.mrb[138].mxu0 %vm1438_vm5, %v8453_v30  ;;  %v11565_v30 = vpack.c.bf16 %v9668_v12, %v9666_v2  ;;  %v11567_v33 = vpack.c.bf16 %v9673_v22, %v9671_v39  ;;  %v9672_v31 = vld [vmem:[%s15604_s6 + $0x80] sm:$0xff]  ;;  %v9686_v2 = vld [vmem:[%s15605_s7 + $0xb8] sm:$0xff]  ;;  %v9688_v39 = vld [vmem:[%s15605_s7 + $0xc8] sm:$0xff] }
0x3471   : > { %v8454_v4 = vrot.slane %v8445_v45, 4  ;;  %10801 = vmatprep.mubr.msk.f32.mxu0 %vm12520_vm4, %v15647_v34  ;;  %v11569_v48 = vpack.c.bf16 %v9672_v31, %v9670_v35  ;;  %v9675_v45 = vld [vmem:[%s15604_s6 + $0x98] sm:$0xff]  ;;  %v11575_v12 = vpack.c.bf16 %v9686_v2, %v9685_v10  ;;  %v15670_v2 = vld [vmem:[#allocation2_spill] sm:$0xff] }
0x3472   : > { %11566 = vmatpush1.bf16.msra.mxu1 %v11565_v30  ;;  %v9687_v30 = vld [vmem:[%s15605_s7 + $0xc0] sm:$0xff]  ;;  %v9690_v35 = vld [vmem:[%s15605_s7 + $0xd8] sm:$0xff] }
0x3473   : > { %v8426_v42 = vpop.permute.xlu1 %8425  ;;  %v8455_v15 = vsel %vm1879_vm7, %v8452_v23, %v8454_v4  ;;  %11568 = vmatprep.subr.bf16.mxu1 %v11567_v33  ;;  %v11578_v22 = vpack.c.bf16 %v9688_v39, %v9687_v30  ;;  %v9689_v33 = vld [vmem:[%s15605_s7 + $0xd0] sm:$0xff] }
0x3474   : > { %v8446_v20 = vsel %vm3145_vm14, %v8442_v16, %v8426_v42  ;;  %10802 = vmatmul.mubr.msk.f32.gmra.mrb[140].mxu0 %vm1438_vm5, %v8455_v15  ;;  %v11581_v31 = vpack.c.bf16 %v9690_v35, %v9689_v33 }
0x3475   : > { %v8456_v24 = vrot.slane %v8446_v20, 4  ;;  %10804 = vmatprep.mubr.msk.f32.mxu0 %vm12520_vm4, %v15647_v34 }
0x3476   : > { %11570 = vmatpush1.bf16.msra.mxu1 %v11569_v48  ;;  %v9691_v48 = vld [vmem:[%s15605_s7 + $0xe0] sm:$0xff] }
0x3477   : > { %v8457_v49 = vsel %vm1879_vm7, %v8454_v4, %v8456_v24  ;;  %v9674_v4 = vld [vmem:[%s15604_s6 + $0x90] sm:$0xff]  ;;  %8756 = vmatprep.subr.mxu1 %v9675_v45  ;;  %v9692_v45 = vld [vmem:[%s15605_s7 + $0xe8] sm:$0xff] }
0x3478   : > { %10805 = vmatmul.mubr.msk.f32.gmra.mrb[142].mxu0 %vm1438_vm5, %v8457_v49 }
0x347a   : > { %8757 = vmatpush1.msra.mxu1 %v9674_v4  ;;  %v11584_v4 = vpack.c.bf16 %v9692_v45, %v9691_v48 }
0x348d   : > { %v8597_v17 = vpop.xlane.xlu0 %8596 }
0x348e   : > { %v8616_v11 = vmul.f32 0.025, %v8597_v17 }
0x3490   : > { %v15245_v7 = vsub.f32 %v15185_v25, %v8616_v11 }
0x3492   : > { %v8630_v62 = vmul.f32 %v15245_v7, %v15245_v7 }
0x3494   : > { %v8637_v40 = vsel %vm1438_vm5, %v8630_v62, 0.0 }
0x3498   : > { %v8603_v6 = vpop.xlane.xlu0 %8602 }
0x3499   : > { %v8618_v51 = vmul.f32 0.025, %v8603_v6 }
0x349b   : > { %v15253_v3 = vsub.f32 %v15193_v50, %v8618_v51 }
0x349d   : > { %v8632_v23 = vmul.f32 %v15253_v3, %v15253_v3 }
0x34b2   : > { %v8600_v21 = vpop.xlane.xlu1 %8599 }
0x34b3   : > { %v8617_v44 = vmul.f32 0.025, %v8600_v21 }
0x34b5   : > { %v15256_v25 = vsub.f32 %v15199_v0, %v8617_v44 }
0x34b7   : > { %v8631_v50 = vmul.f32 %v15256_v25, %v15256_v25 }
0x34b9   : > { %v8640_v0 = vsel %vm1438_vm5, %v8631_v50, 0.0 }
0x353f   : > { %v8569_v47 = vpop.f32.mrb[136].mxu0 }
0x3540   : > { %v8570_v26 = vadd.f32 %v8569_v47, %v15179_v58  ;;  %v10797_v57 = vpop.f32.mrb[137].mxu0 }
0x3542   : > { %v8591_v61 = vadd.f32 %v8570_v26, %v15664_v19 }
0x3543   : > { %v8574_v27 = vpop.f32.mrb[138].mxu0 }
0x3544   : > { %v8575_v18 = vadd.f32 %v8574_v27, %v15179_v58  ;;  %v10800_v8 = vpop.f32.mrb[139].mxu0  ;;  %v8604_v60 = vsel %vm1438_vm5, %v8591_v61, 0.0 }
0x3545   : > { %8605 = vadd.xlane.f32.xlu0 %v8604_v60 }
0x3546   : > { %v8592_v43 = vadd.f32 %v8575_v18, %v15665_v32 }
0x3547   : > { %v8579_v5 = vpop.f32.mrb[140].mxu0 }
0x3548   : > { %v8580_v54 = vadd.f32 %v8579_v5, %v15179_v58  ;;  %v10803_v36 = vpop.f32.mrb[141].mxu0  ;;  %v8607_v55 = vsel %vm1438_vm5, %v8592_v43, 0.0 }
0x3549   : > { %8608 = vadd.xlane.f32.xlu1 %v8607_v55 }
0x354a   : > { %v8593_v14 = vadd.f32 %v8580_v54, %v15666_v1 }
0x354b   : > { %v8584_v59 = vpop.f32.mrb[142].mxu0 }
0x354c   : > { %v8585_v41 = vadd.f32 %v8584_v59, %v15179_v58  ;;  %v10806_v28 = vpop.f32.mrb[143].mxu0  ;;  %v8610_v9 = vsel %vm1438_vm5, %v8593_v14, 0.0  ;;  %v8643_v58 = vsel %vm1438_vm5, %v8632_v23, 0.0 }
0x354d   : > { %8611 = vadd.xlane.f32.xlu0 %v8610_v9 }
0x354e   : > { %v8594_v53 = vadd.f32 %v8585_v41, %v15667_v46  ;;  %v15669_v41 = vsub.s32 4, %v13211_v13 }
0x3550   : > { %v8613_v52 = vsel %vm1438_vm5, %v8594_v53, 0.0  ;;  %v15327_v28 = vrot.slane %v15174_v37, %v15669_v41 }
0x3551   : > { %8638 = vadd.xlane.f32.xlu0 %v8637_v40  ;;  %8614 = vadd.xlane.f32.xlu1 %v8613_v52 }
0x3555   : > { %8644 = vadd.xlane.f32.xlu0 %v8643_v58  ;;  %8641 = vadd.xlane.f32.xlu1 %v8640_v0 }
0x35d2   : > { %v8606_v56 = vpop.xlane.xlu0 %8605 }
0x35d3   : > { %v8619_v16 = vmul.f32 0.025, %v8606_v56  ;;  %v9693_v56 = vld [vmem:[%s15605_s7 + $0xf0] sm:$0xff] }
0x35d5   : > { %v15299_v42 = vsub.f32 %v8591_v61, %v8619_v16  ;;  %v9694_v16 = vld [vmem:[%s15605_s7 + $0xf8] sm:$0xff] }
0x35d6   : > { %v8609_v15 = vpop.xlane.xlu1 %8608 }
0x35d7   : > { %v8620_v20 = vmul.f32 0.025, %v8609_v15  ;;  %v8633_v24 = vmul.f32 %v15299_v42, %v15299_v42  ;;  %v11587_v15 = vpack.c.bf16 %v9694_v16, %v9693_v56 }
0x35d9   : > { %v15303_v49 = vsub.f32 %v8592_v43, %v8620_v20  ;;  %v8646_v47 = vsel %vm1438_vm5, %v8633_v24, 0.0  ;;  %v9695_v20 = vld [vmem:[%s15605_s7 + $0x100] sm:$0xff]  ;;  %v9696_v24 = vld [vmem:[%s15605_s7 + $0x108] sm:$0xff] }
0x35da   : > { %v8612_v17 = vpop.xlane.xlu0 %8611  ;;  %8647 = vadd.xlane.f32.xlu1 %v8646_v47  ;;  %v11590_v47 = vpack.c.bf16 %v9696_v24, %v9695_v20 }
0x35db   : > { %v8621_v26 = vmul.f32 0.025, %v8612_v17  ;;  %v8634_v57 = vmul.f32 %v15303_v49, %v15303_v49  ;;  %v9697_v17 = vld [vmem:[%s15605_s7 + $0x110] sm:$0xff] }
0x35dd   : > { %v15308_v19 = vsub.f32 %v8593_v14, %v8621_v26  ;;  %v8649_v61 = vsel %vm1438_vm5, %v8634_v57, 0.0  ;;  %v15668_v14 = vsub.s32 3, %v13211_v13  ;;  %v9698_v26 = vld [vmem:[%s15605_s7 + $0x118] sm:$0xff] }
0x35de   : > { %8650 = vadd.xlane.f32.xlu0 %v8649_v61  ;;  %v8639_v11 = vpop.xlane.xlu0 %8638  ;;  %v8615_v27 = vpop.xlane.xlu1 %8614  ;;  %v11593_v57 = vpack.c.bf16 %v9698_v26, %v9697_v17  ;;  %v9699_v61 = vld [vmem:[%s15605_s7 + $0x120] sm:$0xff] }
0x35df   : > { %v8658_v18 = vmul.f32 0.025, %v8639_v11  ;;  %v8622_v8 = vmul.f32 0.025, %v8615_v27  ;;  %v8635_v60 = vmul.f32 %v15308_v19, %v15308_v19  ;;  %v15322_v59 = vrot.slane %v15174_v37, %v15668_v14  ;;  %v9700_v11 = vld [vmem:[%s15605_s7 + $0x128] sm:$0xff] }
0x35e0   : > { %v11596_v27 = vpack.c.bf16 %v9700_v11, %v9699_v61 }
0x35e1   : > { %v8665_v6 = vadd.f32 1e-05, %v8658_v18  ;;  %v15313_v21 = vsub.f32 %v8594_v53, %v8622_v8  ;;  %v8652_v32 = vsel %vm1438_vm5, %v8635_v60, 0.0  ;;  %v9701_v18 = vld [vmem:[%s15605_s7 + $0x130] sm:$0xff]  ;;  %v9702_v8 = vld [vmem:[%s15605_s7 + $0x138] sm:$0xff] }
0x35e2   : > { %v8645_v43 = vpop.xlane.xlu0 %8644  ;;  %8653 = vadd.xlane.f32.xlu1 %v8652_v32  ;;  %v8642_v5 = vpop.xlane.xlu1 %8641  ;;  %v11599_v60 = vpack.c.bf16 %v9702_v8, %v9701_v18 }
0x35e3   : > { %12449 = vrsqrt.f32 %v8665_v6  ;;  %v8660_v51 = vmul.f32 0.025, %v8645_v43  ;;  %v8659_v44 = vmul.f32 0.025, %v8642_v5  ;;  %v8636_v54 = vmul.f32 %v15313_v21, %v15313_v21 }
0x35e5   : > { %v8667_v36 = vadd.f32 1e-05, %v8660_v51  ;;  %v8666_v55 = vadd.f32 1e-05, %v8659_v44  ;;  %v8655_v1 = vsel %vm1438_vm5, %v8636_v54, 0.0 }
0x35e6   : > { %8656 = vadd.xlane.f32.xlu0 %v8655_v1 }
0x35e7   : > { %12451 = vrsqrt.f32 %v8667_v36 }
0x35e8   : > { %12453 = vrsqrt.f32 %v8666_v55 }
0x35ed   : > { %v12450_v62 = vpop.eup %12449 }
0x35ee   : > { %v8679_v9 = vmul.f32 %v12450_v62, %v15245_v7 }
0x35f0   : > { %v8690_v46 = vmul.f32 %v15322_v59, %v8679_v9 }
0x35f1   : > { %v12452_v53 = vpop.eup %12451 }
0x35f2   : > { %v12454_v40 = vpop.eup %12453  ;;  %v15332_v52 = vadd.f32 %v15327_v28, %v8690_v46  ;;  %v8681_v50 = vmul.f32 %v12452_v53, %v15253_v3  ;;  %v9683_v3 = vld [vmem:[%s15605_s7 + $0xa0] sm:$0xff] }
0x35f3   : > { %v8680_v23 = vmul.f32 %v12454_v40, %v15256_v25  ;;  %v11572_v63 = vpack.c.bf16 %v9684_v29, %v9683_v3 }
0x35f4   : > { %9676 = vmatmul.mubr.msk.f32.vlgmr.msra.gmra.mrb[178].mxu1 %vm1438_vm5, %v15332_v52  ;;  %v8692_v0 = vmul.f32 %v15322_v59, %v8681_v50 }
0x35f5   : > { %8818 = vmatprep.mubr.f32.mxu1 %v15647_v34  ;;  %v8691_v58 = vmul.f32 %v15322_v59, %v8680_v23  ;;  %11573 = vmatpush1.bf16.msra.mxu0 %v11572_v63  ;;  %v9511_v63 = vld [vmem:[%s15606_s8 + $0x18] sm:$0xff] }
0x35f6   : > { %v15348_v25 = vadd.f32 %v15327_v28, %v8692_v0  ;;  %11574 = vmatprep.subr.bf16.mxu0 %v15648_v38 }
0x35f7   : > { %v15341_v7 = vadd.f32 %v15327_v28, %v8691_v58 }
0x35f9   : > { %9677 = vmatmul.mubr.msk.f32.gmra.mrb[180].mxu1 %vm1438_vm5, %v15341_v7  ;;  %11576 = vmatpush1.bf16.msra.mxu0 %v11575_v12  ;;  %v15461_v12 = vrot.slane %v9511_v63, %v15670_v2 }
0x35fa   : > { %8824 = vmatprep.mubr.f32.mxu1 %v15647_v34  ;;  %11577 = vmatprep.subr.bf16.mxu0 %v15648_v38 }
0x35fd   : > { %9678 = vmatmul.mubr.msk.f32.gmra.mrb[182].mxu1 %vm1438_vm5, %v15348_v25  ;;  %11579 = vmatpush1.bf16.msra.mxu0 %v11578_v22 }
0x35fe   : > { %8830 = vmatprep.mubr.f32.mxu1 %v15647_v34  ;;  %11580 = vmatprep.subr.bf16.mxu0 %v15648_v38 }
0x3601   : > { %11582 = vmatpush1.bf16.msra.mxu0 %v11581_v31 }
0x3602   : > { %11583 = vmatprep.subr.bf16.mxu0 %v15648_v38 }
0x3605   : > { %11585 = vmatpush1.bf16.msra.mxu0 %v11584_v4 }
0x3606   : > { %11586 = vmatprep.subr.bf16.mxu0 %v15648_v38 }
0x3609   : > { %11588 = vmatpush1.bf16.msra.mxu0 %v11587_v15 }
0x360a   : > { %11589 = vmatprep.subr.bf16.mxu0 %v15648_v38 }
0x360d   : > { %11591 = vmatpush1.bf16.msra.mxu0 %v11590_v47 }
0x360e   : > { %11592 = vmatprep.subr.bf16.mxu0 %v15648_v38 }
0x3611   : > { %11594 = vmatpush1.bf16.msra.mxu0 %v11593_v57 }
0x3612   : > { %11595 = vmatprep.subr.bf16.mxu0 %v15648_v38 }
0x3615   : > { %11597 = vmatpush1.bf16.msra.mxu0 %v11596_v27 }
0x3616   : > { %11598 = vmatprep.subr.bf16.mxu0 %v15648_v38 }
0x3619   : > { %11600 = vmatpush1.bf16.msra.mxu0 %v11599_v60 }
0x3667   : > { %v8648_v6 = vpop.xlane.xlu1 %8647 }
0x3668   : > { %v8661_v32 = vmul.f32 0.025, %v8648_v6 }
0x366a   : > { %v8668_v43 = vadd.f32 1e-05, %v8661_v32 }
0x366b   : > { %v8651_v5 = vpop.xlane.xlu0 %8650 }
0x366c   : > { %12455 = vrsqrt.f32 %v8668_v43  ;;  %v8662_v51 = vmul.f32 0.025, %v8651_v5 }
0x366e   : > { %v8669_v44 = vadd.f32 1e-05, %v8662_v51 }
0x366f   : > { %v8654_v54 = vpop.xlane.xlu1 %8653 }
0x3670   : > { %12457 = vrsqrt.f32 %v8669_v44  ;;  %v8663_v38 = vmul.f32 0.025, %v8654_v54 }
0x3672   : > { %v8670_v36 = vadd.f32 1e-05, %v8663_v38 }
0x3673   : > { %v8657_v55 = vpop.xlane.xlu0 %8656 }
0x3674   : > { %12459 = vrsqrt.f32 %v8670_v36  ;;  %v8664_v1 = vmul.f32 0.025, %v8657_v55 }
0x3676   : > { %v12456_v14 = vpop.eup %12455  ;;  %v8671_v62 = vadd.f32 1e-05, %v8664_v1 }
0x3677   : > { %v8682_v41 = vmul.f32 %v12456_v14, %v15299_v42 }
0x3678   : > { %12461 = vrsqrt.f32 %v8671_v62 }
0x3679   : > { %v8693_v9 = vmul.f32 %v15322_v59, %v8682_v41 }
0x367a   : > { %v12458_v46 = vpop.eup %12457 }
0x367b   : > { %v15425_v53 = vadd.f32 %v15327_v28, %v8693_v9  ;;  %v8683_v40 = vmul.f32 %v12458_v46, %v15303_v49 }
0x367d   : > { %9679 = vmatmul.mubr.msk.f32.gmra.mrb[184].mxu1 %vm1438_vm5, %v15425_v53  ;;  %v8694_v23 = vmul.f32 %v15322_v59, %v8683_v40 }
0x367e   : > { %v12460_v50 = vpop.eup %12459  ;;  %8836 = vmatprep.mubr.f32.mxu1 %v15647_v34 }
0x367f   : > { %v15433_v58 = vadd.f32 %v15327_v28, %v8694_v23  ;;  %v8684_v42 = vmul.f32 %v12460_v50, %v15308_v19 }
0x3681   : > { %9680 = vmatmul.mubr.msk.f32.gmra.mrb[186].mxu1 %vm1438_vm5, %v15433_v58  ;;  %v8695_v0 = vmul.f32 %v15322_v59, %v8684_v42 }
0x3682   : > { %v12462_v3 = vpop.eup %12461  ;;  %8842 = vmatprep.mubr.f32.mxu1 %v15647_v34 }
0x3683   : > { %v15441_v49 = vadd.f32 %v15327_v28, %v8695_v0  ;;  %v8685_v29 = vmul.f32 %v12462_v3, %v15313_v21  ;;  %v15458_v21 = vrot.slane %v15174_v37, %v15670_v2 }
0x3685   : > { %9681 = vmatmul.mubr.msk.f32.gmra.mrb[188].mxu1 %vm1438_vm5, %v15441_v49  ;;  %v8696_v10 = vmul.f32 %v15322_v59, %v8685_v29 }
0x3686   : > { %8848 = vmatprep.mubr.f32.mxu1 %v15647_v34 }
0x3687   : > { %v15449_v19 = vadd.f32 %v15327_v28, %v8696_v10 }
0x3689   : > { %9682 = vmatmul.mubr.msk.f32.gmra.mrb[190].mxu1 %vm1438_vm5, %v15449_v19 }
0x36c7   : > { %v8814_v59 = vpop.f32.mrb[178].mxu1 }
0x36c8   : > { %v8815_v34 = vadd.f32 %v8814_v59, %v15458_v21  ;;  %v8816_v30 = vpop.f32.mrb[179].mxu1 }
0x36c9   : > { %v8817_v28 = vadd.f32 %v8816_v30, %v15461_v12 }
0x36ca   : > { %v8869_v39 = vmul.f32 %v8815_v34, %v8815_v34  ;;  %v8855_v0 = vmul.f32 0.5, %v8815_v34 }
0x36cb   : > { %v8870_v22 = vmul.f32 %v8817_v28, %v8817_v28  ;;  %v8856_v50 = vmul.f32 0.5, %v8817_v28 }
0x36cc   : > { %v8883_v33 = vmul.f32 %v8869_v39, %v8815_v34  ;;  %v8820_v35 = vpop.f32.mrb[180].mxu1 }
0x36cd   : > { %v8884_v31 = vmul.f32 %v8870_v22, %v8817_v28  ;;  %v8821_v48 = vadd.f32 %v8820_v35, %v15458_v21  ;;  %v8822_v45 = vpop.f32.mrb[181].mxu1 }
0x36ce   : > { %v8897_v4 = vmul.f32 0.044715, %v8883_v33  ;;  %v8823_v56 = vadd.f32 %v8822_v45, %v15461_v12 }
0x36cf   : > { %v8898_v16 = vmul.f32 0.044715, %v8884_v31  ;;  %v8871_v15 = vmul.f32 %v8821_v48, %v8821_v48  ;;  %v8857_v39 = vmul.f32 0.5, %v8821_v48 }
0x36d0   : > { %v8911_v20 = vadd.f32 %v8897_v4, %v8815_v34  ;;  %v8872_v24 = vmul.f32 %v8823_v56, %v8823_v56  ;;  %v8826_v47 = vpop.f32.mrb[182].mxu1  ;;  %v8858_v59 = vmul.f32 0.5, %v8823_v56 }
0x36d1   : > { %v8912_v17 = vadd.f32 %v8898_v16, %v8817_v28  ;;  %v8885_v26 = vmul.f32 %v8871_v15, %v8821_v48  ;;  %v8827_v57 = vadd.f32 %v8826_v47, %v15458_v21  ;;  %v8828_v61 = vpop.f32.mrb[183].mxu1 }
0x36d2   : > { %v8925_v11 = vmul.f32 0.7978846, %v8911_v20  ;;  %v8886_v27 = vmul.f32 %v8872_v24, %v8823_v56  ;;  %v8829_v18 = vadd.f32 %v8828_v61, %v15461_v12 }
0x36d3   : > { %v8926_v8 = vmul.f32 0.7978846, %v8912_v17  ;;  %v8899_v60 = vmul.f32 0.044715, %v8885_v26  ;;  %v8873_v6 = vmul.f32 %v8827_v57, %v8827_v57  ;;  %v8859_v28 = vmul.f32 0.5, %v8827_v57 }
0x36d4   : > { %12463 = vtanh.f32 %v8925_v11  ;;  %v8900_v32 = vmul.f32 0.044715, %v8886_v27  ;;  %v8874_v43 = vmul.f32 %v8829_v18, %v8829_v18  ;;  %v8860_v4 = vmul.f32 0.5, %v8829_v18 }
0x36d5   : > { %12465 = vtanh.f32 %v8926_v8  ;;  %v8913_v5 = vadd.f32 %v8899_v60, %v8821_v48  ;;  %v8887_v51 = vmul.f32 %v8873_v6, %v8827_v57 }
0x36d6   : > { %v8914_v44 = vadd.f32 %v8900_v32, %v8823_v56  ;;  %v8888_v54 = vmul.f32 %v8874_v43, %v8829_v18 }
0x36d7   : > { %v8927_v38 = vmul.f32 0.7978846, %v8913_v5  ;;  %v8901_v36 = vmul.f32 0.044715, %v8887_v51 }
0x36d8   : > { %v8928_v55 = vmul.f32 0.7978846, %v8914_v44  ;;  %v8902_v1 = vmul.f32 0.044715, %v8888_v54 }
0x36d9   : > { %v8915_v14 = vadd.f32 %v8901_v36, %v8827_v57  ;;  %12467 = vtanh.f32 %v8927_v38 }
0x36da   : > { %12469 = vtanh.f32 %v8928_v55  ;;  %v8916_v62 = vadd.f32 %v8902_v1, %v8829_v18 }
0x36db   : > { %v8929_v41 = vmul.f32 0.7978846, %v8915_v14 }
0x36dc   : > { %v8930_v9 = vmul.f32 0.7978846, %v8916_v62 }
0x36dd   : > { %12471 = vtanh.f32 %v8929_v41 }
0x36de   : > { %v12464_v46 = vpop.eup %12463  ;;  %12473 = vtanh.f32 %v8930_v9 }
0x36df   : > { %v12466_v40 = vpop.eup %12465  ;;  %v8953_v23 = vadd.f32 1.0, %v12464_v46 }
0x36e0   : > { %v8954_v42 = vadd.f32 1.0, %v12466_v40 }
0x36e1   : > { %v8967_v10 = vmul.f32 %v8953_v23, %v8855_v0 }
0x36e2   : > { %v8968_v3 = vmul.f32 %v8954_v42, %v8856_v50 }
0x36e3   : > { %v12468_v29 = vpop.eup %12467 }
0x36e4   : > { %v12470_v63 = vpop.eup %12469  ;;  %9703 = vmatprep.mubr.msk.f32.mxu0 %vm3145_vm14, %v8968_v3  ;;  %v8955_v2 = vadd.f32 1.0, %v12468_v29 }
0x36e5   : > { %9092 = vmatmul.mubr.f32.vlgmr.msra.gmra.mrb[144].mxu0 %v8967_v10  ;;  %v8956_v30 = vadd.f32 1.0, %v12470_v63 }
0x36e6   : > { %v8969_v31 = vmul.f32 %v8955_v2, %v8857_v39 }
0x36e7   : > { %v12472_v22 = vpop.eup %12471  ;;  %v8970_v33 = vmul.f32 %v8956_v30, %v8858_v59 }
0x36e8   : > { %v12474_v35 = vpop.eup %12473  ;;  %v8957_v45 = vadd.f32 1.0, %v12472_v22 }
0x36e9   : > { %9704 = vmatprep.mubr.msk.f32.mxu0 %vm3145_vm14, %v8970_v33  ;;  %v8958_v34 = vadd.f32 1.0, %v12474_v35 }
0x36ea   : > { %9097 = vmatmul.mubr.f32.gmra.mrb[146].mxu0 %v8969_v31  ;;  %v8971_v15 = vmul.f32 %v8957_v45, %v8859_v28 }
0x36eb   : > { %v8972_v16 = vmul.f32 %v8958_v34, %v8860_v4 }
0x36ed   : > { %9705 = vmatprep.mubr.msk.f32.mxu0 %vm3145_vm14, %v8972_v16 }
0x36ee   : > { %9102 = vmatmul.mubr.f32.gmra.mrb[148].mxu0 %v8971_v15 }
0x3750   : > { %v8832_v56 = vpop.f32.mrb[184].mxu1 }
0x3751   : > { %v15473_v20 = vadd.f32 %v8832_v56, %v15458_v21  ;;  %v8834_v48 = vpop.f32.mrb[185].mxu1 }
0x3752   : > { %v8835_v24 = vadd.f32 %v8834_v48, %v15461_v12 }
0x3753   : > { %v8875_v47 = vmul.f32 %v15473_v20, %v15473_v20 }
0x3754   : > { %v8876_v17 = vmul.f32 %v8835_v24, %v8835_v24  ;;  %v8838_v26 = vpop.f32.mrb[186].mxu1 }
0x3755   : > { %v8889_v61 = vmul.f32 %v8875_v47, %v15473_v20  ;;  %v15480_v57 = vadd.f32 %v8838_v26, %v15458_v21  ;;  %v8840_v11 = vpop.f32.mrb[187].mxu1  ;;  %v8862_v26 = vmul.f32 0.5, %v8835_v24 }
0x3756   : > { %v8890_v27 = vmul.f32 %v8876_v17, %v8835_v24  ;;  %v15483_v18 = vadd.f32 %v8840_v11, %v15461_v12  ;;  %v8861_v11 = vmul.f32 0.5, %v15473_v20 }
0x3757   : > { %v8903_v8 = vmul.f32 0.044715, %v8889_v61  ;;  %v8877_v60 = vmul.f32 %v15480_v57, %v15480_v57 }
0x3758   : > { %v8904_v6 = vmul.f32 0.044715, %v8890_v27  ;;  %v8878_v32 = vmul.f32 %v15483_v18, %v15483_v18  ;;  %v8844_v43 = vpop.f32.mrb[188].mxu1 }
0x3759   : > { %v8917_v5 = vadd.f32 %v8903_v8, %v15473_v20  ;;  %v8891_v51 = vmul.f32 %v8877_v60, %v15480_v57  ;;  %v15492_v44 = vadd.f32 %v8844_v43, %v15458_v21  ;;  %v8846_v54 = vpop.f32.mrb[189].mxu1  ;;  %v8864_v43 = vmul.f32 0.5, %v15483_v18 }
0x375a   : > { %v8918_v38 = vadd.f32 %v8904_v6, %v8835_v24  ;;  %v8892_v36 = vmul.f32 %v8878_v32, %v15483_v18  ;;  %v8847_v55 = vadd.f32 %v8846_v54, %v15461_v12 }
0x375b   : > { %v8931_v1 = vmul.f32 0.7978846, %v8917_v5  ;;  %v8905_v14 = vmul.f32 0.044715, %v8891_v51  ;;  %v8879_v62 = vmul.f32 %v15492_v44, %v15492_v44  ;;  %v8863_v51 = vmul.f32 0.5, %v15480_v57 }
0x375c   : > { %v8932_v41 = vmul.f32 0.7978846, %v8918_v38  ;;  %v8906_v9 = vmul.f32 0.044715, %v8892_v36  ;;  %v8880_v46 = vmul.f32 %v8847_v55, %v8847_v55  ;;  %v8850_v40 = vpop.f32.mrb[190].mxu1 }
0x375d   : > { %v8919_v23 = vadd.f32 %v8905_v14, %v15480_v57  ;;  %v8893_v50 = vmul.f32 %v8879_v62, %v15492_v44  ;;  %v15501_v42 = vadd.f32 %v8850_v40, %v15458_v21  ;;  %v8852_v0 = vpop.f32.mrb[191].mxu1  ;;  %12475 = vtanh.f32 %v8931_v1 }
0x375e   : > { %12477 = vtanh.f32 %v8932_v41  ;;  %v8920_v3 = vadd.f32 %v8906_v9, %v15483_v18  ;;  %v8894_v29 = vmul.f32 %v8880_v46, %v8847_v55  ;;  %v8853_v10 = vadd.f32 %v8852_v0, %v15461_v12 }
0x375f   : > { %v8933_v63 = vmul.f32 0.7978846, %v8919_v23  ;;  %v8907_v2 = vmul.f32 0.044715, %v8893_v50  ;;  %v8881_v59 = vmul.f32 %v15501_v42, %v15501_v42  ;;  %v8866_v14 = vmul.f32 0.5, %v8847_v55 }
0x3760   : > { %v8934_v30 = vmul.f32 0.7978846, %v8920_v3  ;;  %v8908_v39 = vmul.f32 0.044715, %v8894_v29  ;;  %v8882_v22 = vmul.f32 %v8853_v10, %v8853_v10  ;;  %v8865_v62 = vmul.f32 0.5, %v15492_v44 }
0x3761   : > { %v8921_v33 = vadd.f32 %v8907_v2, %v15492_v44  ;;  %v8895_v21 = vmul.f32 %v8881_v59, %v15501_v42  ;;  %12479 = vtanh.f32 %v8933_v63  ;;  %v8868_v23 = vmul.f32 0.5, %v8853_v10 }
0x3762   : > { %12481 = vtanh.f32 %v8934_v30  ;;  %v8922_v35 = vadd.f32 %v8908_v39, %v8847_v55  ;;  %v8896_v31 = vmul.f32 %v8882_v22, %v8853_v10  ;;  %v8867_v50 = vmul.f32 0.5, %v15501_v42 }
0x3763   : > { %v8935_v45 = vmul.f32 0.7978846, %v8921_v33  ;;  %v8909_v4 = vmul.f32 0.044715, %v8895_v21  ;;  %v15671_v3 = vsub.s32 5, %v13211_v13 }
0x3764   : > { %v8936_v34 = vmul.f32 0.7978846, %v8922_v35  ;;  %v8910_v12 = vmul.f32 0.044715, %v8896_v31 }
0x3765   : > { %v8923_v28 = vadd.f32 %v8909_v4, %v15501_v42  ;;  %12483 = vtanh.f32 %v8935_v45  ;;  %v9005_v44 = vrot.slane %v15174_v37, %v15671_v3 }
0x3766   : > { %12485 = vtanh.f32 %v8936_v34  ;;  %v8924_v16 = vadd.f32 %v8910_v12, %v8853_v10 }
0x3767   : > { %v12476_v15 = vpop.eup %12475  ;;  %v8937_v56 = vmul.f32 0.7978846, %v8923_v28 }
0x3768   : > { %v12478_v48 = vpop.eup %12477  ;;  %v8938_v47 = vmul.f32 0.7978846, %v8924_v16  ;;  %v8959_v17 = vadd.f32 1.0, %v12476_v15 }
0x3769   : > { %v8960_v61 = vadd.f32 1.0, %v12478_v48  ;;  %12487 = vtanh.f32 %v8937_v56 }
0x376a   : > { %12489 = vtanh.f32 %v8938_v47  ;;  %v8973_v6 = vmul.f32 %v8959_v17, %v8861_v11 }
0x376b   : > { %v12480_v27 = vpop.eup %12479  ;;  %v8974_v8 = vmul.f32 %v8960_v61, %v8862_v26 }
0x376c   : > { %v12482_v60 = vpop.eup %12481  ;;  %v8961_v32 = vadd.f32 1.0, %v12480_v27 }
0x376d   : > { %9706 = vmatprep.mubr.msk.f32.mxu0 %vm3145_vm14, %v8974_v8  ;;  %v8962_v5 = vadd.f32 1.0, %v12482_v60 }
0x376e   : > { %9107 = vmatmul.mubr.f32.gmra.mrb[150].mxu0 %v8973_v6  ;;  %v8975_v36 = vmul.f32 %v8961_v32, %v8863_v51 }
0x376f   : > { %v12484_v54 = vpop.eup %12483  ;;  %v8976_v24 = vmul.f32 %v8962_v5, %v8864_v43 }
0x3770   : > { %v12486_v38 = vpop.eup %12485  ;;  %v8963_v1 = vadd.f32 1.0, %v12484_v54 }
0x3771   : > { %9707 = vmatprep.mubr.msk.f32.mxu0 %vm3145_vm14, %v8976_v24  ;;  %v8964_v20 = vadd.f32 1.0, %v12486_v38 }
0x3772   : > { %9112 = vmatmul.mubr.f32.gmra.mrb[152].mxu0 %v8975_v36  ;;  %v8977_v46 = vmul.f32 %v8963_v1, %v8865_v62 }
0x3773   : > { %v12488_v41 = vpop.eup %12487  ;;  %v8978_v18 = vmul.f32 %v8964_v20, %v8866_v14 }
0x3774   : > { %v12490_v9 = vpop.eup %12489  ;;  %v8965_v40 = vadd.f32 1.0, %v12488_v41 }
0x3775   : > { %9708 = vmatprep.mubr.msk.f32.mxu0 %vm3145_vm14, %v8978_v18  ;;  %v8966_v57 = vadd.f32 1.0, %v12490_v9 }
0x3776   : > { %9117 = vmatmul.mubr.f32.gmra.mrb[154].mxu0 %v8977_v46  ;;  %v8979_v55 = vmul.f32 %v8965_v40, %v8867_v50 }
0x3777   : > { %v8980_v0 = vmul.f32 %v8966_v57, %v8868_v23 }
0x3779   : > { %9709 = vmatprep.mubr.msk.f32.mxu0 %vm3145_vm14, %v8980_v0 }
0x377a   : > { %9122 = vmatmul.mubr.f32.gmra.mrb[156].mxu0 %v8979_v55 }
0x37b8   : > { %v9093_v29 = vpop.f32.mrb[144].mxu0 }
0x37b9   : > { %v9094_v63 = vadd.f32 %v9093_v29, %v9005_v44  ;;  %v9095_v2 = vpop.f32.mrb[145].mxu0 }
0x37bb   : > { %v9127_v10 = vadd.f32 %v9094_v63, %v15332_v52 }
0x37bd   : > { %v9098_v59 = vpop.f32.mrb[146].mxu0  ;;  %v9134_v30 = vsel %vm1438_vm5, %v9127_v10, 0.0 }
0x37be   : > { %v9099_v39 = vadd.f32 %v9098_v59, %v9005_v44  ;;  %v9100_v22 = vpop.f32.mrb[147].mxu0  ;;  %9135 = vadd.xlane.f32.xlu1 %v9134_v30 }
0x37c0   : > { %v9128_v42 = vadd.f32 %v9099_v39, %v15341_v7 }
0x37c1   : > { %v9103_v33 = vpop.f32.mrb[148].mxu0 }
0x37c2   : > { %v9104_v21 = vadd.f32 %v9103_v33, %v9005_v44  ;;  %v9105_v35 = vpop.f32.mrb[149].mxu0  ;;  %v9137_v31 = vsel %vm1438_vm5, %v9128_v42, 0.0 }
0x37c3   : > { %9138 = vadd.xlane.f32.xlu0 %v9137_v31 }
0x37c4   : > { %v9129_v37 = vadd.f32 %v9104_v21, %v15348_v25 }
0x37c6   : > { %v9140_v45 = vsel %vm1438_vm5, %v9129_v37, 0.0 }
0x37c7   : > { %9141 = vadd.xlane.f32.xlu1 %v9140_v45 }
0x3841   : > { %v9108_v52 = vpop.f32.mrb[150].mxu0 }
0x3842   : > { %v9109_v4 = vadd.f32 %v9108_v52, %v9005_v44  ;;  %v9110_v34 = vpop.f32.mrb[151].mxu0 }
0x3843   : > { %v15672_v34 = vsub.s32 6, %v13211_v13 }
0x3844   : > { %v9130_v12 = vadd.f32 %v9109_v4, %v15425_v53  ;;  %v12508_v4 = vld [vmem:[%s15606_s8 + $0x10] sm:$0xff] }
0x3845   : > { %v9113_v28 = vpop.f32.mrb[152].mxu0 }
0x3846   : > { %v9114_v16 = vadd.f32 %v9113_v28, %v9005_v44  ;;  %v9115_v15 = vpop.f32.mrb[153].mxu0  ;;  %v9143_v7 = vsel %vm1438_vm5, %v9130_v12, 0.0 }
0x3847   : > { %9144 = vadd.xlane.f32.xlu0 %v9143_v7 }
0x3848   : > { %v9131_v56 = vadd.f32 %v9114_v16, %v15433_v58  ;;  %v15673_v16 = vsub.s32 7, %v13211_v13 }
0x3849   : > { %v9118_v48 = vpop.f32.mrb[154].mxu0 }
0x384a   : > { %v9119_v47 = vadd.f32 %v9118_v48, %v9005_v44  ;;  %v9120_v17 = vpop.f32.mrb[155].mxu0  ;;  %v9146_v25 = vsel %vm1438_vm5, %v9131_v56, 0.0  ;;  %v9239_v15 = vrot.slane %v12508_v4, %v15673_v16 }
0x384b   : > { %9147 = vadd.xlane.f32.xlu1 %v9146_v25  ;;  %v9136_v26 = vpop.xlane.xlu1 %9135 }
0x384c   : > { %v9132_v61 = vadd.f32 %v9119_v47, %v15441_v49  ;;  %v9155_v11 = vmul.f32 0.025, %v9136_v26 }
0x384d   : > { %v9123_v27 = vpop.f32.mrb[156].mxu0 }
0x384e   : > { %v15533_v53 = vsub.f32 %v9127_v10, %v9155_v11  ;;  %v9124_v8 = vadd.f32 %v9123_v27, %v9005_v44  ;;  %v9125_v60 = vpop.f32.mrb[157].mxu0  ;;  %v9149_v6 = vsel %vm1438_vm5, %v9132_v61, 0.0 }
0x384f   : > { %9150 = vadd.xlane.f32.xlu0 %v9149_v6 }
0x3850   : > { %v9133_v58 = vadd.f32 %v9124_v8, %v15449_v19  ;;  %v9139_v32 = vpop.xlane.xlu0 %9138  ;;  %v9169_v43 = vmul.f32 %v15533_v53, %v15533_v53 }
0x3851   : > { %v9156_v5 = vmul.f32 0.025, %v9139_v32 }
0x3852   : > { %v9152_v51 = vsel %vm1438_vm5, %v9133_v58, 0.0  ;;  %v9176_v49 = vsel %vm1438_vm5, %v9169_v43, 0.0 }
0x3853   : > { %v9163_v54 = vsub.f32 %v9128_v42, %v9156_v5  ;;  %9153 = vadd.xlane.f32.xlu1 %v9152_v51  ;;  %9177 = vadd.xlane.f32.xlu0 %v9176_v49 }
0x3854   : > { %v9142_v24 = vpop.xlane.xlu1 %9141 }
0x3855   : > { %v9157_v38 = vmul.f32 0.025, %v9142_v24  ;;  %v9170_v36 = vmul.f32 %v9163_v54, %v9163_v54 }
0x3857   : > { %v9164_v1 = vsub.f32 %v9129_v37, %v9157_v38  ;;  %v9179_v14 = vsel %vm1438_vm5, %v9170_v36, 0.0 }
0x3858   : > { %9180 = vadd.xlane.f32.xlu1 %v9179_v14 }
0x3859   : > { %v9171_v19 = vmul.f32 %v9164_v1, %v9164_v1 }
0x385b   : > { %v9182_v20 = vsel %vm1438_vm5, %v9171_v19, 0.0 }
0x385c   : > { %9183 = vadd.xlane.f32.xlu0 %v9182_v20 }
0x38d4   : > { %v9145_v62 = vpop.xlane.xlu0 %9144 }
0x38d5   : > { %v9158_v41 = vmul.f32 0.025, %v9145_v62 }
0x38d7   : > { %v15543_v18 = vsub.f32 %v9130_v12, %v9158_v41  ;;  %v9228_v12 = vrot.slane %v12508_v4, %v15672_v34 }
0x38d8   : > { %v9148_v9 = vpop.xlane.xlu1 %9147 }
0x38d9   : > { %v9159_v46 = vmul.f32 0.025, %v9148_v9  ;;  %v9172_v40 = vmul.f32 %v15543_v18, %v15543_v18 }
0x38db   : > { %v15547_v23 = vsub.f32 %v9131_v56, %v9159_v46  ;;  %v9185_v57 = vsel %vm1438_vm5, %v9172_v40, 0.0 }
0x38dc   : > { %v9151_v50 = vpop.xlane.xlu0 %9150  ;;  %9186 = vadd.xlane.f32.xlu1 %v9185_v57 }
0x38dd   : > { %v9160_v0 = vmul.f32 0.025, %v9151_v50  ;;  %v9173_v55 = vmul.f32 %v15547_v23, %v15547_v23 }
0x38df   : > { %v15552_v3 = vsub.f32 %v9132_v61, %v9160_v0  ;;  %v9188_v44 = vsel %vm1438_vm5, %v9173_v55, 0.0 }
0x38e0   : > { %v9178_v29 = vpop.xlane.xlu0 %9177  ;;  %9189 = vadd.xlane.f32.xlu0 %v9188_v44  ;;  %v9154_v63 = vpop.xlane.xlu1 %9153 }
0x38e1   : > { %v9197_v2 = vmul.f32 0.025, %v9178_v29  ;;  %v9161_v10 = vmul.f32 0.025, %v9154_v63  ;;  %v9174_v59 = vmul.f32 %v15552_v3, %v15552_v3 }
0x38e3   : > { %v9204_v30 = vadd.f32 1e-05, %v9197_v2  ;;  %v15557_v39 = vsub.f32 %v9133_v58, %v9161_v10  ;;  %v9191_v22 = vsel %vm1438_vm5, %v9174_v59, 0.0 }
0x38e4   : > { %9192 = vadd.xlane.f32.xlu1 %v9191_v22 }
0x38e5   : > { %12491 = vrsqrt.f32 %v9204_v30  ;;  %v9181_v42 = vpop.xlane.xlu1 %9180  ;;  %v9175_v33 = vmul.f32 %v15557_v39, %v15557_v39 }
0x38e6   : > { %v9198_v21 = vmul.f32 0.025, %v9181_v42 }
0x38e7   : > { %v9194_v35 = vsel %vm1438_vm5, %v9175_v33, 0.0 }
0x38e8   : > { %v9205_v31 = vadd.f32 1e-05, %v9198_v21  ;;  %9195 = vadd.xlane.f32.xlu0 %v9194_v35 }
0x38e9   : > { %v9184_v37 = vpop.xlane.xlu0 %9183 }
0x38ea   : > { %12493 = vrsqrt.f32 %v9205_v31  ;;  %v9199_v45 = vmul.f32 0.025, %v9184_v37 }
0x38ec   : > { %v9206_v52 = vadd.f32 1e-05, %v9199_v45 }
0x38ee   : > { %12495 = vrsqrt.f32 %v9206_v52 }
0x38ef   : > { %v12492_v28 = vpop.eup %12491 }
0x38f0   : > { %v9218_v7 = vmul.f32 %v12492_v28, %v15533_v53 }
0x38f2   : > { %v9229_v56 = vmul.f32 %v9228_v12, %v9218_v7 }
0x38f4   : > { %v12494_v48 = vpop.eup %12493  ;;  %v9240_v47 = vadd.f32 %v9239_v15, %v9229_v56 }
0x38f5   : > { %v9219_v17 = vmul.f32 %v12494_v48, %v9163_v54 }
0x38f6   : > { %9247 = vst.msk [vmem:[%s15575_s23] sm:$0xff] %vm1438_vm5, %v9240_v47 }
0x38f7   : > { %v9230_v25 = vmul.f32 %v9228_v12, %v9219_v17 }
0x38f8   : > { %v12496_v26 = vpop.eup %12495 }
0x38f9   : > { %v9241_v13 = vadd.f32 %v9239_v15, %v9230_v25  ;;  %v9220_v61 = vmul.f32 %v12496_v26, %v9164_v1 }
0x38fb   : > { %9248 = vst.msk [vmem:[%s15575_s23 + $0x8] sm:$0xff] %vm1438_vm5, %v9241_v13  ;;  %v9231_v11 = vmul.f32 %v9228_v12, %v9220_v61 }
0x38fd   : > { %v9242_v27 = vadd.f32 %v9239_v15, %v9231_v11 }
0x38ff   : > { %9249 = vst.msk [vmem:[%s15575_s23 + $0x10] sm:$0xff] %vm1438_vm5, %v9242_v27 }
0x3969   : > { %v9187_v53 = vpop.xlane.xlu1 %9186 }
0x396a   : > { %v9200_v8 = vmul.f32 0.025, %v9187_v53 }
0x396c   : > { %v9207_v60 = vadd.f32 1e-05, %v9200_v8 }
0x396d   : > { %v9190_v6 = vpop.xlane.xlu0 %9189 }
0x396e   : > { %12497 = vrsqrt.f32 %v9207_v60  ;;  %v9201_v58 = vmul.f32 0.025, %v9190_v6 }
0x3970   : > { %v9208_v32 = vadd.f32 1e-05, %v9201_v58 }
0x3971   : > { %v9193_v43 = vpop.xlane.xlu1 %9192 }
0x3972   : > { %12499 = vrsqrt.f32 %v9208_v32  ;;  %v9202_v5 = vmul.f32 0.025, %v9193_v43 }
0x3974   : > { %v9209_v51 = vadd.f32 1e-05, %v9202_v5 }
0x3975   : > { %v9196_v49 = vpop.xlane.xlu0 %9195 }
0x3976   : > { %12501 = vrsqrt.f32 %v9209_v51  ;;  %v9203_v54 = vmul.f32 0.025, %v9196_v49 }
0x3978   : > { %v12498_v24 = vpop.eup %12497  ;;  %v9210_v38 = vadd.f32 1e-05, %v9203_v54 }
0x3979   : > { %v9221_v36 = vmul.f32 %v12498_v24, %v15543_v18 }
0x397a   : > { %12503 = vrsqrt.f32 %v9210_v38 }
0x397b   : > { %v9232_v1 = vmul.f32 %v9228_v12, %v9221_v36 }
0x397c   : > { %v12500_v14 = vpop.eup %12499 }
0x397d   : > { %v9243_v19 = vadd.f32 %v9239_v15, %v9232_v1  ;;  %v9222_v20 = vmul.f32 %v12500_v14, %v15547_v23 }
0x397f   : > { %9250 = vst.msk [vmem:[%s15575_s23 + $0x18] sm:$0xff] %vm1438_vm5, %v9243_v19  ;;  %v9233_v62 = vmul.f32 %v9228_v12, %v9222_v20 }
0x3980   : > { %v12502_v41 = vpop.eup %12501 }
0x3981   : > { %v9244_v9 = vadd.f32 %v9239_v15, %v9233_v62  ;;  %v9223_v46 = vmul.f32 %v12502_v41, %v15552_v3 }
0x3983   : > { %9251 = vst.msk [vmem:[%s15575_s23 + $0x20] sm:$0xff] %vm1438_vm5, %v9244_v9  ;;  %v9234_v40 = vmul.f32 %v9228_v12, %v9223_v46 }
0x3984   : > { %v12504_v57 = vpop.eup %12503 }
0x3985   : > { %v9245_v18 = vadd.f32 %v9239_v15, %v9234_v40  ;;  %v9224_v50 = vmul.f32 %v12504_v57, %v15557_v39 }
0x3987   : > { %9252 = vst.msk [vmem:[%s15575_s23 + $0x28] sm:$0xff] %vm1438_vm5, %v9245_v18  ;;  %v9235_v0 = vmul.f32 %v9228_v12, %v9224_v50 }
0x3989   : > { %v9246_v55 = vadd.f32 %v9239_v15, %v9235_v0 }
0x398b   : > { %9253 = vst.msk [vmem:[%s15575_s23 + $0x30] sm:$0xff] %vm1438_vm5, %v9246_v55 }
0x398c PF: > { %s19_s30 = sadd.s32 1, %s12515_s30  }
0x398d   : > { %p16_p4 = scmp.ge.s32.totalorder %s19_s30, 4  }
0x398f   :  { %18 = sbr.rel (!%p16_p4) target bundleno = 1 (0x1), region = 91 }

</bundles_post_ra>
